<compile_context>
chip_gen: v7x
topology: tpu7x:2x2x1
jax: 0.10.0
libtpu: 0.0.40
codegen_flags: <defaults>
</compile_context>

<pallas_src>
import functools

import jax
import jax.numpy as jnp
from jax.experimental import pallas as pl
from jax.experimental.pallas import tpu as pltpu

# ---- hyperparameters from the reference module ----
N_EMBD = 384
N_HEAD = 6
HEAD_SIZE = N_EMBD // N_HEAD      # 64
BLOCK_SIZE = 256                  # max context (T <= BLOCK_SIZE)
LN_EPS = 1e-5                     # nn.LayerNorm default


def _layernorm(x, g, b):
    mu = jnp.mean(x, axis=-1, keepdims=True)
    var = jnp.mean(jnp.square(x - mu), axis=-1, keepdims=True)
    return (x - mu) * jax.lax.rsqrt(var + LN_EPS) * g + b


# --------------------------- fused Block kernel ------------------------------
def block_kernel(x_ref, ln1g_ref, ln1b_ref,
                 wqkv_ref, wp_ref, bp_ref,
                 ln2g_ref, ln2b_ref, w1_ref, b1_ref, w2_ref, b2_ref,
                 o_ref, heads_ref, *, n_head, head_size):
    """One Transformer Block: x + MHA(LN1(x)); then x + FFN(LN2(x))."""
    x = x_ref[...]                                  # (T, C) f32 (batch squeezed)
    T, C = x.shape
    D = head_size

    # ---- ln1 + multi-head causal self-attention ----
    xn = _layernorm(x, ln1g_ref[...], ln1b_ref[...])
    xn_b = xn.astype(jnp.bfloat16)                  # bf16 MXU operand, f32 acc

    # Single fused QKV projection: (T, C) @ (C, 3C) -> (T, 3C).
    # Column layout: [ Q(h0..h5) | K(h0..h5) | V(h0..h5) ], 1/sqrt(D) folded
    # into the Q columns.
    qkv = jnp.dot(xn_b, wqkv_ref[...], preferred_element_type=jnp.float32)

    row = jax.lax.broadcasted_iota(jnp.int32, (T, T), 0)
    col = jax.lax.broadcasted_iota(jnp.int32, (T, T), 1)
    causal = row >= col                             # tril mask

    # Per-head attention; head output written straight into the (T, H*D)
    # VMEM scratch (one head's (T,T) temporaries live at a time).
    # T=64 here, so the static unroll of 6 heads is register-friendly.
    for h in range(n_head):
        q = qkv[:, h * D:(h + 1) * D]                       # scale already folded
        k = qkv[:, C + h * D: C + (h + 1) * D]
        v = qkv[:, 2 * C + h * D: 2 * C + (h + 1) * D]
        # scores = q @ k.T (contract head dim of both; no explicit transpose)
        s = jax.lax.dot_general(q.astype(jnp.bfloat16), k.astype(jnp.bfloat16),
                                (((1,), (1,)), ((), ())),
                                preferred_element_type=jnp.float32)   # (T, T)
        s = jnp.where(causal, s, -jnp.inf)                  # causal rows never fully masked
        m = jnp.max(s, axis=-1, keepdims=True)
        p = jnp.exp(s - m)                                  # unnormalized, f32 (v5e-safe EUP)
        l = jnp.sum(p, axis=-1, keepdims=True)              # (T, 1), >= 1
        # attention dropout: identity at inference
        oh = jnp.dot(p.astype(jnp.bfloat16), v.astype(jnp.bfloat16),
                     preferred_element_type=jnp.float32)    # (T, D)
        # deferred softmax normalization on the small (T, D) output
        oh = oh * pl.reciprocal(l, approx=True)
        heads_ref[:, h * D:(h + 1) * D] = oh

    # cat(heads) @ Wp as ONE (T,384) x (384,384) matmul (K = 384, full MXU depth)
    sa = jnp.dot(heads_ref[...].astype(jnp.bfloat16), wp_ref[...],
                 preferred_element_type=jnp.float32)        # (T, C)
    x = x + sa + bp_ref[...]                                # proj bias + residual
    # projection dropout: identity at inference

    # ---- ln2 + feedforward (Linear -> ReLU -> Linear) ----
    xn2 = _layernorm(x, ln2g_ref[...], ln2b_ref[...])
    h1 = jnp.dot(xn2.astype(jnp.bfloat16), w1_ref[...],
                 preferred_element_type=jnp.float32) + b1_ref[...]
    h1 = jnp.maximum(h1, 0.0)                               # ReLU in f32
    ff = jnp.dot(h1.astype(jnp.bfloat16), w2_ref[...],
                 preferred_element_type=jnp.float32) + b2_ref[...]
    # TODO(synk): Dropout(p=0.2) layers are train-time only; eval-mode identity here.
    o_ref[...] = x + ff                                     # residual


# --------------------------- wrapper ------------------------------------------
def _weight_spec(shape):
    # Full-array block, constant index_map -> single-buffered (no point holding
    # two copies of never-changing weights in VMEM).
    nd = len(shape)
    return pl.BlockSpec(shape, lambda b, _nd=nd: (0,) * _nd,
                        pipeline_mode=pl.Buffered(1))


def run_block(x, params):
    B, T, C = x.shape
    act_spec = pl.BlockSpec((pl.Squeezed(), T, C), lambda b: (b, 0, 0))
    in_specs = [act_spec] + [_weight_spec(p.shape) for p in params]

    # advisory cost estimate for XLA scheduling around the fused call
    flops = B * (24 * T * C * C + 4 * T * T * C)
    transcendentals = B * N_HEAD * T * T
    bytes_accessed = 2 * B * T * C * 4 + sum(
        int(p.size) * p.dtype.itemsize for p in params)

    return pl.pallas_call(
        functools.partial(block_kernel, n_head=N_HEAD, head_size=HEAD_SIZE),
        out_shape=jax.ShapeDtypeStruct((B, T, C), jnp.float32),
        grid=(B,),
        in_specs=in_specs,
        out_specs=pl.BlockSpec((pl.Squeezed(), T, C), lambda b: (b, 0, 0)),
        scratch_shapes=[pltpu.VMEM((T, C), jnp.float32)],   # concatenated head outputs
        compiler_params=pltpu.CompilerParams(dimension_semantics=("parallel",)),
        cost_estimate=pl.CostEstimate(flops=flops,
                                      transcendentals=transcendentals,
                                      bytes_accessed=bytes_accessed),
    )(x, *params)


# --------------------------- parameters ---------------------------------------
def init_params(key):
    C, H, D = N_EMBD, N_HEAD, HEAD_SIZE
    ks = jax.random.split(key, 6)

    def normal(k, shape):
        return 0.02 * jax.random.normal(k, shape, jnp.float32)

    scale = float(D) ** -0.5       # k.shape[-1]**-0.5, folded into Q cols (exact: 0.125)
    wq = normal(ks[0], (C, H * D)) * scale     # per-head query weights, head-major columns
    wk = normal(ks[1], (C, H * D))
    wv = normal(ks[2], (C, H * D))
    wqkv = jnp.concatenate([wq, wk, wv], axis=-1).astype(jnp.bfloat16)  # (C, 3C)

    wp = normal(ks[3], (C, C)).astype(jnp.bfloat16)       # proj.weight.T
    w1 = normal(ks[4], (C, 4 * C)).astype(jnp.bfloat16)
    w2 = normal(ks[5], (4 * C, C)).astype(jnp.bfloat16)

    return [
        jnp.ones((1, C), jnp.float32),     # ln1 gamma
        jnp.zeros((1, C), jnp.float32),    # ln1 beta
        wqkv,
        wp,
        jnp.zeros((1, C), jnp.float32),    # proj bias
        jnp.ones((1, C), jnp.float32),     # ln2 gamma
        jnp.zeros((1, C), jnp.float32),    # ln2 beta
        w1,
        jnp.zeros((1, 4 * C), jnp.float32),
        w2,
        jnp.zeros((1, C), jnp.float32),
    ]


# --------------------------- main ----------------------------------------------
if __name__ == "__main__":
    key = jax.random.PRNGKey(0)
    pkey, xkey = jax.random.split(key)
    params = init_params(pkey)

    B, T = 2, 64                                   # T <= block_size (256)
    x = jax.random.normal(xkey, (B, T, N_EMBD), jnp.float32)

    y = run_block(x, params)
    y = jax.block_until_ready(y)
    assert y.shape == (B, T, N_EMBD)
    assert bool(jnp.all(jnp.isfinite(y)))
    print("KERNEL_OK")
</pallas_src>

<mosaic_0001>
module attributes {stable_mosaic.version = 11 : i64} {
  func.func @block_kernel(%arg0: i32, %arg1: memref<1x64x384xf32, #tpu.memory_space<vmem>>, %arg2: memref<1x384xf32, #tpu.memory_space<vmem>>, %arg3: memref<1x384xf32, #tpu.memory_space<vmem>>, %arg4: memref<384x1152xbf16, #tpu.memory_space<vmem>>, %arg5: memref<384x384xbf16, #tpu.memory_space<vmem>>, %arg6: memref<1x384xf32, #tpu.memory_space<vmem>>, %arg7: memref<1x384xf32, #tpu.memory_space<vmem>>, %arg8: memref<1x384xf32, #tpu.memory_space<vmem>>, %arg9: memref<384x1536xbf16, #tpu.memory_space<vmem>>, %arg10: memref<1x1536xf32, #tpu.memory_space<vmem>>, %arg11: memref<1536x384xbf16, #tpu.memory_space<vmem>>, %arg12: memref<1x384xf32, #tpu.memory_space<vmem>>, %arg13: memref<1x64x384xf32, #tpu.memory_space<vmem>>, %arg14: memref<64x384xf32, #tpu.memory_space<vmem>>) attributes {dimension_semantics = [#tpu.dimension_semantics<parallel>], iteration_bounds = array<i64: 2>, scalar_prefetch = 0 : i64, scratch_operands = 1 : i64, tpu.core_type = #tpu.core_type<tc>, window_params = [{transform_indices = @transform_0, window_bounds = array<i64: 1, 64, 384>}, {pipeline_mode = #tpu.pipeline_mode<synchronous>, transform_indices = @transform_1, window_bounds = array<i64: 1, 384>}, {pipeline_mode = #tpu.pipeline_mode<synchronous>, transform_indices = @transform_2, window_bounds = array<i64: 1, 384>}, {pipeline_mode = #tpu.pipeline_mode<synchronous>, transform_indices = @transform_3, window_bounds = array<i64: 384, 1152>}, {pipeline_mode = #tpu.pipeline_mode<synchronous>, transform_indices = @transform_4, window_bounds = array<i64: 384, 384>}, {pipeline_mode = #tpu.pipeline_mode<synchronous>, transform_indices = @transform_5, window_bounds = array<i64: 1, 384>}, {pipeline_mode = #tpu.pipeline_mode<synchronous>, transform_indices = @transform_6, window_bounds = array<i64: 1, 384>}, {pipeline_mode = #tpu.pipeline_mode<synchronous>, transform_indices = @transform_7, window_bounds = array<i64: 1, 384>}, {pipeline_mode = #tpu.pipeline_mode<synchronous>, transform_indices = @transform_8, window_bounds = array<i64: 384, 1536>}, {pipeline_mode = #tpu.pipeline_mode<synchronous>, transform_indices = @transform_9, window_bounds = array<i64: 1, 1536>}, {pipeline_mode = #tpu.pipeline_mode<synchronous>, transform_indices = @transform_10, window_bounds = array<i64: 1536, 384>}, {pipeline_mode = #tpu.pipeline_mode<synchronous>, transform_indices = @transform_11, window_bounds = array<i64: 1, 384>}, {transform_indices = @transform_12, window_bounds = array<i64: 1, 64, 384>}]} {
    %c0 = arith.constant 0 : index
    %c0_0 = arith.constant 0 : index
    %c0_1 = arith.constant 0 : index
    %0 = vector.load %arg1[%c0, %c0_0, %c0_1] : memref<1x64x384xf32, #tpu.memory_space<vmem>>, vector<1x64x384xf32>
    %1 = vector.shape_cast %0 : vector<1x64x384xf32> to vector<64x384xf32>
    %c0_2 = arith.constant 0 : index
    %c0_3 = arith.constant 0 : index
    %2 = vector.load %arg2[%c0_2, %c0_3] : memref<1x384xf32, #tpu.memory_space<vmem>>, vector<1x384xf32>
    %c0_4 = arith.constant 0 : index
    %c0_5 = arith.constant 0 : index
    %3 = vector.load %arg3[%c0_4, %c0_5] : memref<1x384xf32, #tpu.memory_space<vmem>>, vector<1x384xf32>
    %cst = arith.constant dense<0.000000e+00> : vector<64xf32>
    %4 = vector.multi_reduction <add>, %1, %cst [1] : vector<64x384xf32> to vector<64xf32>
    %5 = vector.shape_cast %4 : vector<64xf32> to vector<64x1xf32>
    %cst_6 = arith.constant 3.840000e+02 : f32
    %6 = vector.broadcast %cst_6 : f32 to vector<64x1xf32>
    %7 = arith.divf %5, %6 : vector<64x1xf32>
    %8 = vector.broadcast %7 : vector<64x1xf32> to vector<64x384xf32>
    %9 = arith.subf %1, %8 : vector<64x384xf32>
    %10 = arith.mulf %9, %9 : vector<64x384xf32>
    %cst_7 = arith.constant dense<0.000000e+00> : vector<64xf32>
    %11 = vector.multi_reduction <add>, %10, %cst_7 [1] : vector<64x384xf32> to vector<64xf32>
    %12 = vector.shape_cast %11 : vector<64xf32> to vector<64x1xf32>
    %cst_8 = arith.constant 3.840000e+02 : f32
    %13 = vector.broadcast %cst_8 : f32 to vector<64x1xf32>
    %14 = arith.divf %12, %13 : vector<64x1xf32>
    %15 = vector.broadcast %7 : vector<64x1xf32> to vector<64x384xf32>
    %16 = arith.subf %1, %15 : vector<64x384xf32>
    %cst_9 = arith.constant 9.99999974E-6 : f32
    %17 = vector.broadcast %cst_9 : f32 to vector<64x1xf32>
    %18 = arith.addf %14, %17 : vector<64x1xf32>
    %19 = math.rsqrt %18 : vector<64x1xf32>
    %20 = vector.broadcast %19 : vector<64x1xf32> to vector<64x384xf32>
    %21 = arith.mulf %16, %20 : vector<64x384xf32>
    %22 = vector.broadcast %2 : vector<1x384xf32> to vector<64x384xf32>
    %23 = arith.mulf %21, %22 : vector<64x384xf32>
    %24 = vector.broadcast %3 : vector<1x384xf32> to vector<64x384xf32>
    %25 = arith.addf %23, %24 : vector<64x384xf32>
    %26 = arith.truncf %25 : vector<64x384xf32> to vector<64x384xbf16>
    %c0_10 = arith.constant 0 : index
    %c0_11 = arith.constant 0 : index
    %27 = vector.load %arg4[%c0_10, %c0_11] : memref<384x1152xbf16, #tpu.memory_space<vmem>>, vector<384x1152xbf16>
    %cst_12 = arith.constant dense<0.000000e+00> : vector<64x1152xf32>
    %28 = tpu.matmul %26, %27, %cst_12 {dimension_numbers = #tpu.dot_dimension_numbers<[1], [0], [0], [1], [0, 0, 1, 1], [], []>} : vector<64x384xbf16>, vector<384x1152xbf16>, vector<64x1152xf32> -> vector<64x1152xf32>
    %29 = tpu.iota {dimensions = array<i32: 0>} : vector<64x64xi32>
    %30 = tpu.iota {dimensions = array<i32: 1>} : vector<64x64xi32>
    %31 = arith.cmpi sge, %29, %30 : vector<64x64xi32>
    %32 = vector.extract_strided_slice %28 {offsets = [0, 0], sizes = [64, 64], strides = [1, 1]} : vector<64x1152xf32> to vector<64x64xf32>
    %33 = vector.extract_strided_slice %28 {offsets = [0, 384], sizes = [64, 64], strides = [1, 1]} : vector<64x1152xf32> to vector<64x64xf32>
    %34 = vector.extract_strided_slice %28 {offsets = [0, 768], sizes = [64, 64], strides = [1, 1]} : vector<64x1152xf32> to vector<64x64xf32>
    %35 = arith.truncf %32 : vector<64x64xf32> to vector<64x64xbf16>
    %36 = arith.truncf %33 : vector<64x64xf32> to vector<64x64xbf16>
    %cst_13 = arith.constant dense<0.000000e+00> : vector<64x64xf32>
    %37 = tpu.matmul %35, %36, %cst_13 {dimension_numbers = #tpu.dot_dimension_numbers<[1], [1], [0], [0], [0, 0, 1, 0], [], []>} : vector<64x64xbf16>, vector<64x64xbf16>, vector<64x64xf32> -> vector<64x64xf32>
    %cst_14 = arith.constant 0xFF800000 : f32
    %38 = vector.broadcast %cst_14 : f32 to vector<64x64xf32>
    %39 = arith.select %31, %37, %38 : vector<64x64xi1>, vector<64x64xf32>
    %cst_15 = arith.constant dense<0xFF800000> : vector<64xf32>
    %40 = vector.multi_reduction <maximumf>, %39, %cst_15 [1] : vector<64x64xf32> to vector<64xf32>
    %41 = vector.shape_cast %40 : vector<64xf32> to vector<64x1xf32>
    %42 = vector.broadcast %41 : vector<64x1xf32> to vector<64x64xf32>
    %43 = arith.subf %39, %42 : vector<64x64xf32>
    %44 = math.exp %43 : vector<64x64xf32>
    %cst_16 = arith.constant dense<0.000000e+00> : vector<64xf32>
    %45 = vector.multi_reduction <add>, %44, %cst_16 [1] : vector<64x64xf32> to vector<64xf32>
    %46 = vector.shape_cast %45 : vector<64xf32> to vector<64x1xf32>
    %47 = arith.truncf %44 : vector<64x64xf32> to vector<64x64xbf16>
    %48 = arith.truncf %34 : vector<64x64xf32> to vector<64x64xbf16>
    %cst_17 = arith.constant dense<0.000000e+00> : vector<64x64xf32>
    %49 = tpu.matmul %47, %48, %cst_17 {dimension_numbers = #tpu.dot_dimension_numbers<[1], [0], [0], [1], [0, 0, 1, 1], [], []>} : vector<64x64xbf16>, vector<64x64xbf16>, vector<64x64xf32> -> vector<64x64xf32>
    %50 = tpu.reciprocal %46 {approx = true} : vector<64x1xf32> -> vector<64x1xf32>
    %51 = vector.broadcast %50 : vector<64x1xf32> to vector<64x64xf32>
    %52 = arith.mulf %49, %51 : vector<64x64xf32>
    %c0_18 = arith.constant 0 : index
    %c0_19 = arith.constant 0 : index
    %53 = vector.load %arg14[%c0_18, %c0_19] : memref<64x384xf32, #tpu.memory_space<vmem>>, vector<64x64xf32>
    tpu.vector_store %arg14[%c0_18, %c0_19], %52 {strides = array<i32>} : memref<64x384xf32, #tpu.memory_space<vmem>>, vector<64x64xf32>,
    %54 = vector.extract_strided_slice %28 {offsets = [0, 64], sizes = [64, 64], strides = [1, 1]} : vector<64x1152xf32> to vector<64x64xf32>
    %55 = vector.extract_strided_slice %28 {offsets = [0, 448], sizes = [64, 64], strides = [1, 1]} : vector<64x1152xf32> to vector<64x64xf32>
    %56 = vector.extract_strided_slice %28 {offsets = [0, 832], sizes = [64, 64], strides = [1, 1]} : vector<64x1152xf32> to vector<64x64xf32>
    %57 = arith.truncf %54 : vector<64x64xf32> to vector<64x64xbf16>
    %58 = arith.truncf %55 : vector<64x64xf32> to vector<64x64xbf16>
    %cst_20 = arith.constant dense<0.000000e+00> : vector<64x64xf32>
    %59 = tpu.matmul %57, %58, %cst_20 {dimension_numbers = #tpu.dot_dimension_numbers<[1], [1], [0], [0], [0, 0, 1, 0], [], []>} : vector<64x64xbf16>, vector<64x64xbf16>, vector<64x64xf32> -> vector<64x64xf32>
    %cst_21 = arith.constant 0xFF800000 : f32
    %60 = vector.broadcast %cst_21 : f32 to vector<64x64xf32>
    %61 = arith.select %31, %59, %60 : vector<64x64xi1>, vector<64x64xf32>
    %cst_22 = arith.constant dense<0xFF800000> : vector<64xf32>
    %62 = vector.multi_reduction <maximumf>, %61, %cst_22 [1] : vector<64x64xf32> to vector<64xf32>
    %63 = vector.shape_cast %62 : vector<64xf32> to vector<64x1xf32>
    %64 = vector.broadcast %63 : vector<64x1xf32> to vector<64x64xf32>
    %65 = arith.subf %61, %64 : vector<64x64xf32>
    %66 = math.exp %65 : vector<64x64xf32>
    %cst_23 = arith.constant dense<0.000000e+00> : vector<64xf32>
    %67 = vector.multi_reduction <add>, %66, %cst_23 [1] : vector<64x64xf32> to vector<64xf32>
    %68 = vector.shape_cast %67 : vector<64xf32> to vector<64x1xf32>
    %69 = arith.truncf %66 : vector<64x64xf32> to vector<64x64xbf16>
    %70 = arith.truncf %56 : vector<64x64xf32> to vector<64x64xbf16>
    %cst_24 = arith.constant dense<0.000000e+00> : vector<64x64xf32>
    %71 = tpu.matmul %69, %70, %cst_24 {dimension_numbers = #tpu.dot_dimension_numbers<[1], [0], [0], [1], [0, 0, 1, 1], [], []>} : vector<64x64xbf16>, vector<64x64xbf16>, vector<64x64xf32> -> vector<64x64xf32>
    %72 = tpu.reciprocal %68 {approx = true} : vector<64x1xf32> -> vector<64x1xf32>
    %73 = vector.broadcast %72 : vector<64x1xf32> to vector<64x64xf32>
    %74 = arith.mulf %71, %73 : vector<64x64xf32>
    %c0_25 = arith.constant 0 : index
    %c64 = arith.constant 64 : index
    %75 = vector.load %arg14[%c0_25, %c64] : memref<64x384xf32, #tpu.memory_space<vmem>>, vector<64x64xf32>
    tpu.vector_store %arg14[%c0_25, %c64], %74 {strides = array<i32>} : memref<64x384xf32, #tpu.memory_space<vmem>>, vector<64x64xf32>,
    %76 = vector.extract_strided_slice %28 {offsets = [0, 128], sizes = [64, 64], strides = [1, 1]} : vector<64x1152xf32> to vector<64x64xf32>
    %77 = vector.extract_strided_slice %28 {offsets = [0, 512], sizes = [64, 64], strides = [1, 1]} : vector<64x1152xf32> to vector<64x64xf32>
    %78 = vector.extract_strided_slice %28 {offsets = [0, 896], sizes = [64, 64], strides = [1, 1]} : vector<64x1152xf32> to vector<64x64xf32>
    %79 = arith.truncf %76 : vector<64x64xf32> to vector<64x64xbf16>
    %80 = arith.truncf %77 : vector<64x64xf32> to vector<64x64xbf16>
    %cst_26 = arith.constant dense<0.000000e+00> : vector<64x64xf32>
    %81 = tpu.matmul %79, %80, %cst_26 {dimension_numbers = #tpu.dot_dimension_numbers<[1], [1], [0], [0], [0, 0, 1, 0], [], []>} : vector<64x64xbf16>, vector<64x64xbf16>, vector<64x64xf32> -> vector<64x64xf32>
    %cst_27 = arith.constant 0xFF800000 : f32
    %82 = vector.broadcast %cst_27 : f32 to vector<64x64xf32>
    %83 = arith.select %31, %81, %82 : vector<64x64xi1>, vector<64x64xf32>
    %cst_28 = arith.constant dense<0xFF800000> : vector<64xf32>
    %84 = vector.multi_reduction <maximumf>, %83, %cst_28 [1] : vector<64x64xf32> to vector<64xf32>
    %85 = vector.shape_cast %84 : vector<64xf32> to vector<64x1xf32>
    %86 = vector.broadcast %85 : vector<64x1xf32> to vector<64x64xf32>
    %87 = arith.subf %83, %86 : vector<64x64xf32>
    %88 = math.exp %87 : vector<64x64xf32>
    %cst_29 = arith.constant dense<0.000000e+00> : vector<64xf32>
    %89 = vector.multi_reduction <add>, %88, %cst_29 [1] : vector<64x64xf32> to vector<64xf32>
    %90 = vector.shape_cast %89 : vector<64xf32> to vector<64x1xf32>
    %91 = arith.truncf %88 : vector<64x64xf32> to vector<64x64xbf16>
    %92 = arith.truncf %78 : vector<64x64xf32> to vector<64x64xbf16>
    %cst_30 = arith.constant dense<0.000000e+00> : vector<64x64xf32>
    %93 = tpu.matmul %91, %92, %cst_30 {dimension_numbers = #tpu.dot_dimension_numbers<[1], [0], [0], [1], [0, 0, 1, 1], [], []>} : vector<64x64xbf16>, vector<64x64xbf16>, vector<64x64xf32> -> vector<64x64xf32>
    %94 = tpu.reciprocal %90 {approx = true} : vector<64x1xf32> -> vector<64x1xf32>
    %95 = vector.broadcast %94 : vector<64x1xf32> to vector<64x64xf32>
    %96 = arith.mulf %93, %95 : vector<64x64xf32>
    %c0_31 = arith.constant 0 : index
    %c128 = arith.constant 128 : index
    %97 = vector.load %arg14[%c0_31, %c128] : memref<64x384xf32, #tpu.memory_space<vmem>>, vector<64x64xf32>
    tpu.vector_store %arg14[%c0_31, %c128], %96 {strides = array<i32>} : memref<64x384xf32, #tpu.memory_space<vmem>>, vector<64x64xf32>,
    %98 = vector.extract_strided_slice %28 {offsets = [0, 192], sizes = [64, 64], strides = [1, 1]} : vector<64x1152xf32> to vector<64x64xf32>
    %99 = vector.extract_strided_slice %28 {offsets = [0, 576], sizes = [64, 64], strides = [1, 1]} : vector<64x1152xf32> to vector<64x64xf32>
    %100 = vector.extract_strided_slice %28 {offsets = [0, 960], sizes = [64, 64], strides = [1, 1]} : vector<64x1152xf32> to vector<64x64xf32>
    %101 = arith.truncf %98 : vector<64x64xf32> to vector<64x64xbf16>
    %102 = arith.truncf %99 : vector<64x64xf32> to vector<64x64xbf16>
    %cst_32 = arith.constant dense<0.000000e+00> : vector<64x64xf32>
    %103 = tpu.matmul %101, %102, %cst_32 {dimension_numbers = #tpu.dot_dimension_numbers<[1], [1], [0], [0], [0, 0, 1, 0], [], []>} : vector<64x64xbf16>, vector<64x64xbf16>, vector<64x64xf32> -> vector<64x64xf32>
    %cst_33 = arith.constant 0xFF800000 : f32
    %104 = vector.broadcast %cst_33 : f32 to vector<64x64xf32>
    %105 = arith.select %31, %103, %104 : vector<64x64xi1>, vector<64x64xf32>
    %cst_34 = arith.constant dense<0xFF800000> : vector<64xf32>
    %106 = vector.multi_reduction <maximumf>, %105, %cst_34 [1] : vector<64x64xf32> to vector<64xf32>
    %107 = vector.shape_cast %106 : vector<64xf32> to vector<64x1xf32>
    %108 = vector.broadcast %107 : vector<64x1xf32> to vector<64x64xf32>
    %109 = arith.subf %105, %108 : vector<64x64xf32>
    %110 = math.exp %109 : vector<64x64xf32>
    %cst_35 = arith.constant dense<0.000000e+00> : vector<64xf32>
    %111 = vector.multi_reduction <add>, %110, %cst_35 [1] : vector<64x64xf32> to vector<64xf32>
    %112 = vector.shape_cast %111 : vector<64xf32> to vector<64x1xf32>
    %113 = arith.truncf %110 : vector<64x64xf32> to vector<64x64xbf16>
    %114 = arith.truncf %100 : vector<64x64xf32> to vector<64x64xbf16>
    %cst_36 = arith.constant dense<0.000000e+00> : vector<64x64xf32>
    %115 = tpu.matmul %113, %114, %cst_36 {dimension_numbers = #tpu.dot_dimension_numbers<[1], [0], [0], [1], [0, 0, 1, 1], [], []>} : vector<64x64xbf16>, vector<64x64xbf16>, vector<64x64xf32> -> vector<64x64xf32>
    %116 = tpu.reciprocal %112 {approx = true} : vector<64x1xf32> -> vector<64x1xf32>
    %117 = vector.broadcast %116 : vector<64x1xf32> to vector<64x64xf32>
    %118 = arith.mulf %115, %117 : vector<64x64xf32>
    %c0_37 = arith.constant 0 : index
    %c192 = arith.constant 192 : index
    %119 = vector.load %arg14[%c0_37, %c192] : memref<64x384xf32, #tpu.memory_space<vmem>>, vector<64x64xf32>
    tpu.vector_store %arg14[%c0_37, %c192], %118 {strides = array<i32>} : memref<64x384xf32, #tpu.memory_space<vmem>>, vector<64x64xf32>,
    %120 = vector.extract_strided_slice %28 {offsets = [0, 256], sizes = [64, 64], strides = [1, 1]} : vector<64x1152xf32> to vector<64x64xf32>
    %121 = vector.extract_strided_slice %28 {offsets = [0, 640], sizes = [64, 64], strides = [1, 1]} : vector<64x1152xf32> to vector<64x64xf32>
    %122 = vector.extract_strided_slice %28 {offsets = [0, 1024], sizes = [64, 64], strides = [1, 1]} : vector<64x1152xf32> to vector<64x64xf32>
    %123 = arith.truncf %120 : vector<64x64xf32> to vector<64x64xbf16>
    %124 = arith.truncf %121 : vector<64x64xf32> to vector<64x64xbf16>
    %cst_38 = arith.constant dense<0.000000e+00> : vector<64x64xf32>
    %125 = tpu.matmul %123, %124, %cst_38 {dimension_numbers = #tpu.dot_dimension_numbers<[1], [1], [0], [0], [0, 0, 1, 0], [], []>} : vector<64x64xbf16>, vector<64x64xbf16>, vector<64x64xf32> -> vector<64x64xf32>
    %cst_39 = arith.constant 0xFF800000 : f32
    %126 = vector.broadcast %cst_39 : f32 to vector<64x64xf32>
    %127 = arith.select %31, %125, %126 : vector<64x64xi1>, vector<64x64xf32>
    %cst_40 = arith.constant dense<0xFF800000> : vector<64xf32>
    %128 = vector.multi_reduction <maximumf>, %127, %cst_40 [1] : vector<64x64xf32> to vector<64xf32>
    %129 = vector.shape_cast %128 : vector<64xf32> to vector<64x1xf32>
    %130 = vector.broadcast %129 : vector<64x1xf32> to vector<64x64xf32>
    %131 = arith.subf %127, %130 : vector<64x64xf32>
    %132 = math.exp %131 : vector<64x64xf32>
    %cst_41 = arith.constant dense<0.000000e+00> : vector<64xf32>
    %133 = vector.multi_reduction <add>, %132, %cst_41 [1] : vector<64x64xf32> to vector<64xf32>
    %134 = vector.shape_cast %133 : vector<64xf32> to vector<64x1xf32>
    %135 = arith.truncf %132 : vector<64x64xf32> to vector<64x64xbf16>
    %136 = arith.truncf %122 : vector<64x64xf32> to vector<64x64xbf16>
    %cst_42 = arith.constant dense<0.000000e+00> : vector<64x64xf32>
    %137 = tpu.matmul %135, %136, %cst_42 {dimension_numbers = #tpu.dot_dimension_numbers<[1], [0], [0], [1], [0, 0, 1, 1], [], []>} : vector<64x64xbf16>, vector<64x64xbf16>, vector<64x64xf32> -> vector<64x64xf32>
    %138 = tpu.reciprocal %134 {approx = true} : vector<64x1xf32> -> vector<64x1xf32>
    %139 = vector.broadcast %138 : vector<64x1xf32> to vector<64x64xf32>
    %140 = arith.mulf %137, %139 : vector<64x64xf32>
    %c0_43 = arith.constant 0 : index
    %c256 = arith.constant 256 : index
    %141 = vector.load %arg14[%c0_43, %c256] : memref<64x384xf32, #tpu.memory_space<vmem>>, vector<64x64xf32>
    tpu.vector_store %arg14[%c0_43, %c256], %140 {strides = array<i32>} : memref<64x384xf32, #tpu.memory_space<vmem>>, vector<64x64xf32>,
    %142 = vector.extract_strided_slice %28 {offsets = [0, 320], sizes = [64, 64], strides = [1, 1]} : vector<64x1152xf32> to vector<64x64xf32>
    %143 = vector.extract_strided_slice %28 {offsets = [0, 704], sizes = [64, 64], strides = [1, 1]} : vector<64x1152xf32> to vector<64x64xf32>
    %144 = vector.extract_strided_slice %28 {offsets = [0, 1088], sizes = [64, 64], strides = [1, 1]} : vector<64x1152xf32> to vector<64x64xf32>
    %145 = arith.truncf %142 : vector<64x64xf32> to vector<64x64xbf16>
    %146 = arith.truncf %143 : vector<64x64xf32> to vector<64x64xbf16>
    %cst_44 = arith.constant dense<0.000000e+00> : vector<64x64xf32>
    %147 = tpu.matmul %145, %146, %cst_44 {dimension_numbers = #tpu.dot_dimension_numbers<[1], [1], [0], [0], [0, 0, 1, 0], [], []>} : vector<64x64xbf16>, vector<64x64xbf16>, vector<64x64xf32> -> vector<64x64xf32>
    %cst_45 = arith.constant 0xFF800000 : f32
    %148 = vector.broadcast %cst_45 : f32 to vector<64x64xf32>
    %149 = arith.select %31, %147, %148 : vector<64x64xi1>, vector<64x64xf32>
    %cst_46 = arith.constant dense<0xFF800000> : vector<64xf32>
    %150 = vector.multi_reduction <maximumf>, %149, %cst_46 [1] : vector<64x64xf32> to vector<64xf32>
    %151 = vector.shape_cast %150 : vector<64xf32> to vector<64x1xf32>
    %152 = vector.broadcast %151 : vector<64x1xf32> to vector<64x64xf32>
    %153 = arith.subf %149, %152 : vector<64x64xf32>
    %154 = math.exp %153 : vector<64x64xf32>
    %cst_47 = arith.constant dense<0.000000e+00> : vector<64xf32>
    %155 = vector.multi_reduction <add>, %154, %cst_47 [1] : vector<64x64xf32> to vector<64xf32>
    %156 = vector.shape_cast %155 : vector<64xf32> to vector<64x1xf32>
    %157 = arith.truncf %154 : vector<64x64xf32> to vector<64x64xbf16>
    %158 = arith.truncf %144 : vector<64x64xf32> to vector<64x64xbf16>
    %cst_48 = arith.constant dense<0.000000e+00> : vector<64x64xf32>
    %159 = tpu.matmul %157, %158, %cst_48 {dimension_numbers = #tpu.dot_dimension_numbers<[1], [0], [0], [1], [0, 0, 1, 1], [], []>} : vector<64x64xbf16>, vector<64x64xbf16>, vector<64x64xf32> -> vector<64x64xf32>
    %160 = tpu.reciprocal %156 {approx = true} : vector<64x1xf32> -> vector<64x1xf32>
    %161 = vector.broadcast %160 : vector<64x1xf32> to vector<64x64xf32>
    %162 = arith.mulf %159, %161 : vector<64x64xf32>
    %c0_49 = arith.constant 0 : index
    %c320 = arith.constant 320 : index
    %163 = vector.load %arg14[%c0_49, %c320] : memref<64x384xf32, #tpu.memory_space<vmem>>, vector<64x64xf32>
    tpu.vector_store %arg14[%c0_49, %c320], %162 {strides = array<i32>} : memref<64x384xf32, #tpu.memory_space<vmem>>, vector<64x64xf32>,
    %c0_50 = arith.constant 0 : index
    %c0_51 = arith.constant 0 : index
    %164 = vector.load %arg14[%c0_50, %c0_51] : memref<64x384xf32, #tpu.memory_space<vmem>>, vector<64x384xf32>
    %165 = arith.truncf %164 : vector<64x384xf32> to vector<64x384xbf16>
    %c0_52 = arith.constant 0 : index
    %c0_53 = arith.constant 0 : index
    %166 = vector.load %arg5[%c0_52, %c0_53] : memref<384x384xbf16, #tpu.memory_space<vmem>>, vector<384x384xbf16>
    %cst_54 = arith.constant dense<0.000000e+00> : vector<64x384xf32>
    %167 = tpu.matmul %165, %166, %cst_54 {dimension_numbers = #tpu.dot_dimension_numbers<[1], [0], [0], [1], [0, 0, 1, 1], [], []>} : vector<64x384xbf16>, vector<384x384xbf16>, vector<64x384xf32> -> vector<64x384xf32>
    %168 = arith.addf %1, %167 : vector<64x384xf32>
    %c0_55 = arith.constant 0 : index
    %c0_56 = arith.constant 0 : index
    %169 = vector.load %arg6[%c0_55, %c0_56] : memref<1x384xf32, #tpu.memory_space<vmem>>, vector<1x384xf32>
    %170 = vector.broadcast %169 : vector<1x384xf32> to vector<64x384xf32>
    %171 = arith.addf %168, %170 : vector<64x384xf32>
    %c0_57 = arith.constant 0 : index
    %c0_58 = arith.constant 0 : index
    %172 = vector.load %arg7[%c0_57, %c0_58] : memref<1x384xf32, #tpu.memory_space<vmem>>, vector<1x384xf32>
    %c0_59 = arith.constant 0 : index
    %c0_60 = arith.constant 0 : index
    %173 = vector.load %arg8[%c0_59, %c0_60] : memref<1x384xf32, #tpu.memory_space<vmem>>, vector<1x384xf32>
    %cst_61 = arith.constant dense<0.000000e+00> : vector<64xf32>
    %174 = vector.multi_reduction <add>, %171, %cst_61 [1] : vector<64x384xf32> to vector<64xf32>
    %175 = vector.shape_cast %174 : vector<64xf32> to vector<64x1xf32>
    %cst_62 = arith.constant 3.840000e+02 : f32
    %176 = vector.broadcast %cst_62 : f32 to vector<64x1xf32>
    %177 = arith.divf %175, %176 : vector<64x1xf32>
    %178 = vector.broadcast %177 : vector<64x1xf32> to vector<64x384xf32>
    %179 = arith.subf %171, %178 : vector<64x384xf32>
    %180 = arith.mulf %179, %179 : vector<64x384xf32>
    %cst_63 = arith.constant dense<0.000000e+00> : vector<64xf32>
    %181 = vector.multi_reduction <add>, %180, %cst_63 [1] : vector<64x384xf32> to vector<64xf32>
    %182 = vector.shape_cast %181 : vector<64xf32> to vector<64x1xf32>
    %cst_64 = arith.constant 3.840000e+02 : f32
    %183 = vector.broadcast %cst_64 : f32 to vector<64x1xf32>
    %184 = arith.divf %182, %183 : vector<64x1xf32>
    %185 = vector.broadcast %177 : vector<64x1xf32> to vector<64x384xf32>
    %186 = arith.subf %171, %185 : vector<64x384xf32>
    %cst_65 = arith.constant 9.99999974E-6 : f32
    %187 = vector.broadcast %cst_65 : f32 to vector<64x1xf32>
    %188 = arith.addf %184, %187 : vector<64x1xf32>
    %189 = math.rsqrt %188 : vector<64x1xf32>
    %190 = vector.broadcast %189 : vector<64x1xf32> to vector<64x384xf32>
    %191 = arith.mulf %186, %190 : vector<64x384xf32>
    %192 = vector.broadcast %172 : vector<1x384xf32> to vector<64x384xf32>
    %193 = arith.mulf %191, %192 : vector<64x384xf32>
    %194 = vector.broadcast %173 : vector<1x384xf32> to vector<64x384xf32>
    %195 = arith.addf %193, %194 : vector<64x384xf32>
    %196 = arith.truncf %195 : vector<64x384xf32> to vector<64x384xbf16>
    %c0_66 = arith.constant 0 : index
    %c0_67 = arith.constant 0 : index
    %197 = vector.load %arg9[%c0_66, %c0_67] : memref<384x1536xbf16, #tpu.memory_space<vmem>>, vector<384x1536xbf16>
    %cst_68 = arith.constant dense<0.000000e+00> : vector<64x1536xf32>
    %198 = tpu.matmul %196, %197, %cst_68 {dimension_numbers = #tpu.dot_dimension_numbers<[1], [0], [0], [1], [0, 0, 1, 1], [], []>} : vector<64x384xbf16>, vector<384x1536xbf16>, vector<64x1536xf32> -> vector<64x1536xf32>
    %c0_69 = arith.constant 0 : index
    %c0_70 = arith.constant 0 : index
    %199 = vector.load %arg10[%c0_69, %c0_70] : memref<1x1536xf32, #tpu.memory_space<vmem>>, vector<1x1536xf32>
    %200 = vector.broadcast %199 : vector<1x1536xf32> to vector<64x1536xf32>
    %201 = arith.addf %198, %200 : vector<64x1536xf32>
    %cst_71 = arith.constant 0.000000e+00 : f32
    %202 = vector.broadcast %cst_71 : f32 to vector<64x1536xf32>
    %203 = arith.maximumf %201, %202 : vector<64x1536xf32>
    %204 = arith.truncf %203 : vector<64x1536xf32> to vector<64x1536xbf16>
    %c0_72 = arith.constant 0 : index
    %c0_73 = arith.constant 0 : index
    %205 = vector.load %arg11[%c0_72, %c0_73] : memref<1536x384xbf16, #tpu.memory_space<vmem>>, vector<1536x384xbf16>
    %cst_74 = arith.constant dense<0.000000e+00> : vector<64x384xf32>
    %206 = tpu.matmul %204, %205, %cst_74 {dimension_numbers = #tpu.dot_dimension_numbers<[1], [0], [0], [1], [0, 0, 1, 1], [], []>} : vector<64x1536xbf16>, vector<1536x384xbf16>, vector<64x384xf32> -> vector<64x384xf32>
    %c0_75 = arith.constant 0 : index
    %c0_76 = arith.constant 0 : index
    %207 = vector.load %arg12[%c0_75, %c0_76] : memref<1x384xf32, #tpu.memory_space<vmem>>, vector<1x384xf32>
    %208 = vector.broadcast %207 : vector<1x384xf32> to vector<64x384xf32>
    %209 = arith.addf %206, %208 : vector<64x384xf32>
    %210 = arith.addf %171, %209 : vector<64x384xf32>
    %c0_77 = arith.constant 0 : index
    %c0_78 = arith.constant 0 : index
    %c0_79 = arith.constant 0 : index
    %211 = vector.load %arg13[%c0_77, %c0_78, %c0_79] : memref<1x64x384xf32, #tpu.memory_space<vmem>>, vector<1x64x384xf32>
    %212 = vector.shape_cast %211 : vector<1x64x384xf32> to vector<64x384xf32>
    %213 = vector.shape_cast %210 : vector<64x384xf32> to vector<1x64x384xf32>
    tpu.vector_store %arg13[%c0_77, %c0_78, %c0_79], %213 {strides = array<i32>} : memref<1x64x384xf32, #tpu.memory_space<vmem>>, vector<1x64x384xf32>,
    return
  }
  func.func @transform_0(%arg0: i32) -> (i32, i32, i32) {
    %c0_i32 = arith.constant 0 : i32
    %c0_i32_0 = arith.constant 0 : i32
    %c0_i32_1 = arith.constant 0 : i32
    return %arg0, %c0_i32, %c0_i32_0 : i32, i32, i32
  }
  func.func @transform_1(%arg0: i32) -> (i32, i32) {
    %c0_i32 = arith.constant 0 : i32
    %c0_i32_0 = arith.constant 0 : i32
    %c0_i32_1 = arith.constant 0 : i32
    return %c0_i32, %c0_i32_0 : i32, i32
  }
  func.func @transform_2(%arg0: i32) -> (i32, i32) {
    %c0_i32 = arith.constant 0 : i32
    %c0_i32_0 = arith.constant 0 : i32
    %c0_i32_1 = arith.constant 0 : i32
    return %c0_i32, %c0_i32_0 : i32, i32
  }
  func.func @transform_3(%arg0: i32) -> (i32, i32) {
    %c0_i32 = arith.constant 0 : i32
    %c0_i32_0 = arith.constant 0 : i32
    %c0_i32_1 = arith.constant 0 : i32
    return %c0_i32, %c0_i32_0 : i32, i32
  }
  func.func @transform_4(%arg0: i32) -> (i32, i32) {
    %c0_i32 = arith.constant 0 : i32
    %c0_i32_0 = arith.constant 0 : i32
    %c0_i32_1 = arith.constant 0 : i32
    return %c0_i32, %c0_i32_0 : i32, i32
  }
  func.func @transform_5(%arg0: i32) -> (i32, i32) {
    %c0_i32 = arith.constant 0 : i32
    %c0_i32_0 = arith.constant 0 : i32
    %c0_i32_1 = arith.constant 0 : i32
    return %c0_i32, %c0_i32_0 : i32, i32
  }
  func.func @transform_6(%arg0: i32) -> (i32, i32) {
    %c0_i32 = arith.constant 0 : i32
    %c0_i32_0 = arith.constant 0 : i32
    %c0_i32_1 = arith.constant 0 : i32
    return %c0_i32, %c0_i32_0 : i32, i32
  }
  func.func @transform_7(%arg0: i32) -> (i32, i32) {
    %c0_i32 = arith.constant 0 : i32
    %c0_i32_0 = arith.constant 0 : i32
    %c0_i32_1 = arith.constant 0 : i32
    return %c0_i32, %c0_i32_0 : i32, i32
  }
  func.func @transform_8(%arg0: i32) -> (i32, i32) {
    %c0_i32 = arith.constant 0 : i32
    %c0_i32_0 = arith.constant 0 : i32
    %c0_i32_1 = arith.constant 0 : i32
    return %c0_i32, %c0_i32_0 : i32, i32
  }
  func.func @transform_9(%arg0: i32) -> (i32, i32) {
    %c0_i32 = arith.constant 0 : i32
    %c0_i32_0 = arith.constant 0 : i32
    %c0_i32_1 = arith.constant 0 : i32
    return %c0_i32, %c0_i32_0 : i32, i32
  }
  func.func @transform_10(%arg0: i32) -> (i32, i32) {
    %c0_i32 = arith.constant 0 : i32
    %c0_i32_0 = arith.constant 0 : i32
    %c0_i32_1 = arith.constant 0 : i32
    return %c0_i32, %c0_i32_0 : i32, i32
  }
  func.func @transform_11(%arg0: i32) -> (i32, i32) {
    %c0_i32 = arith.constant 0 : i32
    %c0_i32_0 = arith.constant 0 : i32
    %c0_i32_1 = arith.constant 0 : i32
    return %c0_i32, %c0_i32_0 : i32, i32
  }
  func.func @transform_12(%arg0: i32) -> (i32, i32, i32) {
    %c0_i32 = arith.constant 0 : i32
    %c0_i32_0 = arith.constant 0 : i32
    %c0_i32_1 = arith.constant 0 : i32
    return %arg0, %c0_i32, %c0_i32_0 : i32, i32, i32
  }
}

</mosaic_0001>

<bundles_post_ra>
// kernel: tpu_custom_call.1
= control target key start
LH: loop header
LB: loop body
LE: loop exit
PB: predicated region body
PF: predicated region fallthrough
CT: control target
= control target key end

     0   :  { %s18905_s0 = inlined_call_operand.hbm [shape: f32[2,64,384], index: 0, kind: input, shape index: {}]   ;;  %s18906_s1 = inlined_call_operand.hbm [shape: f32[1,384], index: 1, kind: input, shape index: {}]   ;;  %s18907_s2 = inlined_call_operand.hbm [shape: f32[1,384], index: 2, kind: input, shape index: {}]   ;;  %s18908_s3 = inlined_call_operand.hbm [shape: bf16[384,1152], index: 3, kind: input, shape index: {}]   ;;  %s18909_s4 = inlined_call_operand.hbm [shape: bf16[384,384], index: 4, kind: input, shape index: {}]   ;;  %s18910_s5 = inlined_call_operand.hbm [shape: f32[1,384], index: 5, kind: input, shape index: {}]   ;;  %s18911_s6 = inlined_call_operand.hbm [shape: f32[1,384], index: 6, kind: input, shape index: {}]   ;;  %s18912_s7 = inlined_call_operand.hbm [shape: f32[1,384], index: 7, kind: input, shape index: {}]   ;;  %s18913_s8 = inlined_call_operand.hbm [shape: bf16[384,1536], index: 8, kind: input, shape index: {}]   ;;  %s18914_s9 = inlined_call_operand.hbm [shape: f32[1,1536], index: 9, kind: input, shape index: {}]   ;;  %s18915_s10 = inlined_call_operand.hbm [shape: bf16[1536,384], index: 10, kind: input, shape index: {}]   ;;  %s18916_s11 = inlined_call_operand.hbm [shape: f32[1,384], index: 11, kind: input, shape index: {}]   ;;  %s18917_s12 = inlined_call_operand.hbm [shape: f32[2,64,384], index: 12, kind: output, shape index: {}]  }
   0x1   :  { %18951 = sst [smem:[#allocation71_spill]] %s18906_s1 }
   0x2   :  { %18952 = sst [smem:[#allocation72_spill]] %s18907_s2 }
   0x3   :  { %18953 = sst [smem:[#allocation73_spill]] %s18908_s3 }
   0x4   :  { %18954 = sst [smem:[#allocation74_spill]] %s18910_s5 }
   0x5   :  { %18955 = sst [smem:[#allocation75_spill]] %s18917_s12 }
   0x6   :  { %17 = vsyncpa [#allocation4], 0 }
   0x7   :  { %19 = vsyncpa [#allocation4 + $0x1], 0 }
   0x8   :  { %20 = vsyncpa [#allocation7], 0 }
   0x9   :  { %21 = vsyncpa [#allocation10], 0 }
   0xa   :  { %22 = vsyncpa [#allocation13], 0 }
   0xb   :  { %23 = vsyncpa [#allocation16], 0 }
   0xc   :  { %24 = vsyncpa [#allocation19], 0 }
   0xd   :  { %25 = vsyncpa [#allocation22], 0 }
   0xe   :  { %26 = vsyncpa [#allocation5], 0 }
   0xf   :  { %28 = vsyncpa [#allocation5 + $0x1], 0  ;;  %s15974_s21 = smov 0   ;;  %s15976_s22 = smov 0  }
  0x10   :  { %s15978_s23 = smov 0   ;;  %s15980_s24 = smov 0  }
  0x11 LB: > { %s15884_s25 = smov [#allocation6]   ;;  %s15995_s27 = sadd.s32 4294967295, %s15882_s24   ;;  %s15882_s24 = sphi %s15980_s24, %s19109_s24   ;;  %s15878_s23 = sphi %s15978_s23, %s19108_s23   ;;  %s15874_s22 = sphi %s15976_s22, %s19107_s22   ;;  %s15870_s21 = sphi %s15974_s21, %s19106_s21  }
  0x12   : > { %s335_s26 = sshll.u32 %s15884_s25, 4  ;;  %p11778_p0 = scmp.ge.s32.totalorder %s15882_s24, 1  ;;  %s16000_s26 = int_to_ptr.vmem [resolvable:$true] %s335_s26 }
  0x13   : > { %p18920_p1 = scmp.eq.s32.totalorder %s15995_s27, 0  ;;  %p322_p2 = scmp.lt.s32.totalorder %s15882_s24, 3 }
  0x14   : > { %s15885_s29 = smov [#allocation9]   ;;  %s15886_s14 = smov [#allocation12]  }
  0x15   : > { %p16002_p3 = pnand %p11778_p0, %p322_p2  ;;  %s356_s30 = sshll.u32 %s15885_s29, 4  ;;  %s16009_s30 = int_to_ptr.vmem [resolvable:$true] %s356_s30 }
  0x16   : > { %s383_s15 = sshll.u32 %s15886_s14, 4  ;;  %s18959_s1 = sld [smem:[#allocation71_spill]]  ;;  %s16017_s15 = int_to_ptr.vmem [resolvable:$true] %s383_s15 }
  0x17   : > { %s18956_s28 = scalar_select %p16002_p3, 1, 0 }
  0x18   : > { %p13843_p5 = pneg %p16002_p3 }
  0x19   : > { %18957 = sst [smem:[#allocation32_spill]] %s18956_s28 }
  0x1a   : > { %p16013_p6 = pnand %p13843_p5, %p18920_p1 }
  0x1c   : > { %s15454_s18 = scalar_lea.hbm %s18959_s1, 48  ;;  %p16027_p8 = pneg %p16013_p6 }
  0x1d   : > { %p15455_p7 = scmp.ne.s32.totalorder %s18959_s1, %s15454_s18  ;;  %p15461_p11 = scmp.lt.u32.totalorder %s15454_s18, %s18959_s1 }
  0x1f   : > { %p15457_p9 = pnand %p16027_p8, %p15455_p7 }
  0x21   : > { %p15458_p10 = pneg %p15457_p9 }
  0x23   : > { %p15463_p12 = pnand %p15461_p11, %p15458_p10 }
  0x25   : > { %15466 = shalt.err (!%p15463_p12)
}
  0x26   : > { %s15467_s16 = scalar_lea.vmem %s16000_s26, 48  ;;  %s15474_s17 = scalar_lea.vmem %s16000_s26, 64 }
  0x27   : > { %p15468_p13 = scmp.ne.s32.totalorder %s16000_s26, %s15467_s16  ;;  %p15475_p5 = scmp.lt.s32.totalorder %s16000_s26, %s16000_s26 }
  0x28   : > { %p15476_p7 = scmp.lt.s32.totalorder %s15474_s17, %s15467_s16 }
  0x29   : > { %p15470_p0 = pnand %p15468_p13, %p16027_p8 }
  0x2a   : > { %p15477_p9 = por %p15476_p7, %p15475_p5 }
  0x2b   : > { %p15471_p2 = pneg %p15470_p0 }
  0x2d   : > { %p15478_p4 = pnand %p15477_p9, %p15471_p2 }
  0x2f   : > { %15481 = shalt.err (!%p15478_p4)
}
  0x30   : > { %13846 = dma.hbm_to_vmem [thread:$0]  (!%p16013_p6), %s18959_s1, 48, %s16000_s26, [#allocation7]  }
  0x31   : > { %s18961_s3 = sld [smem:[#allocation73_spill]] }
  0x37   : > { %s15482_s14 = scalar_lea.hbm %s18961_s3, 27648 }
  0x38   : > { %p15483_p10 = scmp.ne.s32.totalorder %s18961_s3, %s15482_s14  ;;  %p15489_p4 = scmp.lt.u32.totalorder %s15482_s14, %s18961_s3 }
  0x3a   : > { %p15485_p11 = pnand %p15483_p10, %p16027_p8 }
  0x3c   : > { %p15486_p12 = pneg %p15485_p11 }
  0x3e   : > { %p15491_p13 = pnand %p15489_p4, %p15486_p12 }
  0x40   : > { %15494 = shalt.err (!%p15491_p13)
}
  0x41   : > { %s15495_s26 = scalar_lea.vmem %s16009_s30, 27648  ;;  %p15503_p7 = scmp.lt.s32.totalorder %s16009_s30, %s16009_s30 }
  0x42   : > { %p15496_p0 = scmp.ne.s32.totalorder %s16009_s30, %s15495_s26  ;;  %p15504_p9 = scmp.lt.s32.totalorder %s15495_s26, %s15495_s26 }
  0x44   : > { %p15498_p2 = pnand %p15496_p0, %p16027_p8  ;;  %p15505_p10 = por %p15504_p9, %p15503_p7 }
  0x46   : > { %p15499_p5 = pneg %p15498_p2 }
  0x48   : > { %p15506_p11 = pnand %p15505_p10, %p15499_p5 }
  0x4a   : > { %15509 = shalt.err (!%p15506_p11)
}
  0x4b   : > { %s15887_s12 = smov 576   ;;  %s15888_s28 = smov 36  }
  0x4c   : > { %13852 = dma.hbm_to_vmem [thread:$0]  (!%p16013_p6), %s18961_s3, 27648, %s16009_s30, [#allocation10], %s15887_s12, %s15887_s12, %s15888_s28  }
  0x4d   : > { %s18962_s5 = sld [smem:[#allocation74_spill]] }
  0x53   : > { %s15510_s14 = scalar_lea.hbm %s18962_s5, 48 }
  0x54   : > { %p15511_p12 = scmp.ne.s32.totalorder %s18962_s5, %s15510_s14  ;;  %p15517_p0 = scmp.lt.u32.totalorder %s15510_s14, %s18962_s5 }
  0x56   : > { %p15513_p4 = pnand %p15511_p12, %p16027_p8 }
  0x58   : > { %p15514_p13 = pneg %p15513_p4 }
  0x5a   : > { %p15519_p2 = pnand %p15517_p0, %p15514_p13 }
  0x5c   : > { %15522 = shalt.err (!%p15519_p2)
}
  0x5d   : > { %s15523_s30 = scalar_lea.vmem %s16017_s15, 48  ;;  %s15530_s12 = scalar_lea.vmem %s16017_s15, 64 }
  0x5e   : > { %p15524_p5 = scmp.ne.s32.totalorder %s16017_s15, %s15523_s30  ;;  %p15531_p10 = scmp.lt.s32.totalorder %s16017_s15, %s16017_s15 }
  0x5f   : > { %p15532_p11 = scmp.lt.s32.totalorder %s15530_s12, %s15523_s30 }
  0x60   : > { %p15526_p7 = pnand %p15524_p5, %p16027_p8 }
  0x61   : > { %p15533_p12 = por %p15532_p11, %p15531_p10 }
  0x62   : > { %p15527_p9 = pneg %p15526_p7 }
  0x64   : > { %p15534_p4 = pnand %p15533_p12, %p15527_p9 }
  0x66   : > { %15537 = shalt.err (!%p15534_p4)
}
  0x67   : > { %13858 = dma.hbm_to_vmem [thread:$0]  (!%p16013_p6), %s18962_s5, 48, %s16017_s15, [#allocation13]  }
  0x68   : > { %s15889_s18 = smov [#allocation15]   ;;  %s15890_s20 = smov [#allocation18]  }
  0x69   : > { %s405_s19 = sshll.u32 %s15889_s18, 4  ;;  %s429_s29 = sshll.u32 %s15890_s20, 4  ;;  %s406_s19 = int_to_ptr.vmem [resolvable:$true] %s405_s19  ;;  %s430_s29 = int_to_ptr.vmem [resolvable:$true] %s429_s29 }
  0x6a   : > { %s15538_s17 = scalar_lea.hbm %s18912_s7, 48 }
  0x6b   : > { %p15539_p13 = scmp.ne.s32.totalorder %s18912_s7, %s15538_s17  ;;  %p15545_p5 = scmp.lt.u32.totalorder %s15538_s17, %s18912_s7 }
  0x6d   : > { %p15541_p0 = pnand %p15539_p13, %p16027_p8 }
  0x6f   : > { %p15542_p2 = pneg %p15541_p0 }
  0x71   : > { %p15547_p7 = pnand %p15545_p5, %p15542_p2 }
  0x73   : > { %15550 = shalt.err (!%p15547_p7)
}
  0x74   : > { %s15551_s15 = scalar_lea.vmem %s406_s19, 48  ;;  %s15558_s28 = scalar_lea.vmem %s406_s19, 64 }
  0x75   : > { %p15552_p9 = scmp.ne.s32.totalorder %s406_s19, %s15551_s15  ;;  %p15559_p12 = scmp.lt.s32.totalorder %s406_s19, %s406_s19 }
  0x76   : > { %p15560_p4 = scmp.lt.s32.totalorder %s15558_s28, %s15551_s15 }
  0x77   : > { %p15554_p10 = pnand %p15552_p9, %p16027_p8 }
  0x78   : > { %p15561_p1 = por %p15560_p4, %p15559_p12 }
  0x79   : > { %p15555_p11 = pneg %p15554_p10 }
  0x7b   : > { %p15562_p3 = pnand %p15561_p1, %p15555_p11 }
  0x7d   : > { %15565 = shalt.err (!%p15562_p3)
}
  0x7e   : > { %13864 = dma.hbm_to_vmem [thread:$0]  (!%p16013_p6), %s18912_s7, 48, %s406_s19, [#allocation16]  }
  0x7f   : > { %s15566_s17 = scalar_lea.hbm %s18914_s9, 192 }
  0x80   : > { %p15567_p13 = scmp.ne.s32.totalorder %s18914_s9, %s15566_s17  ;;  %p15573_p3 = scmp.lt.u32.totalorder %s15566_s17, %s18914_s9 }
  0x82   : > { %p15569_p0 = pnand %p15567_p13, %p16027_p8 }
  0x84   : > { %p15570_p1 = pneg %p15569_p0 }
  0x86   : > { %p15575_p2 = pnand %p15573_p3, %p15570_p1 }
  0x88   : > { %15578 = shalt.err (!%p15575_p2)
}
  0x89   : > { %s15579_s15 = scalar_lea.vmem %s430_s29, 192  ;;  %p15587_p10 = scmp.lt.s32.totalorder %s430_s29, %s430_s29 }
  0x8a   : > { %p15580_p5 = scmp.ne.s32.totalorder %s430_s29, %s15579_s15  ;;  %p15588_p11 = scmp.lt.s32.totalorder %s15579_s15, %s15579_s15 }
  0x8c   : > { %p15582_p7 = pnand %p15580_p5, %p16027_p8  ;;  %p15589_p12 = por %p15588_p11, %p15587_p10 }
  0x8e   : > { %p15583_p9 = pneg %p15582_p7 }
  0x90   : > { %p15590_p4 = pnand %p15589_p12, %p15583_p9 }
  0x92   : > { %15593 = shalt.err (!%p15590_p4)
}
  0x93   : > { %13870 = dma.hbm_to_vmem [thread:$0]  (!%p16013_p6), %s18914_s9, 192, %s430_s29, [#allocation19]  }
  0x94   : > { %s15891_s18 = smov [#allocation8]   ;;  %s15892_s14 = smov [#allocation11]  }
  0x95   : > { %s346_s20 = sshll.u32 %s15891_s18, 4  ;;  %s369_s16 = sshll.u32 %s15892_s14, 4  ;;  %s347_s20 = int_to_ptr.vmem [resolvable:$true] %s346_s20  ;;  %s370_s16 = int_to_ptr.vmem [resolvable:$true] %s369_s16 }
  0x96   : > { %s18963_s2 = sld [smem:[#allocation72_spill]] }
  0x9c   : > { %s15594_s30 = scalar_lea.hbm %s18963_s2, 48 }
  0x9d   : > { %p15595_p13 = scmp.ne.s32.totalorder %s18963_s2, %s15594_s30  ;;  %p15601_p3 = scmp.lt.u32.totalorder %s15594_s30, %s18963_s2 }
  0x9f   : > { %p15597_p0 = pnand %p15595_p13, %p16027_p8 }
  0xa1   : > { %p15598_p1 = pneg %p15597_p0 }
  0xa3   : > { %p15603_p2 = pnand %p15601_p3, %p15598_p1 }
  0xa5   : > { %15606 = shalt.err (!%p15603_p2)
}
  0xa6   : > { %s15607_s29 = scalar_lea.vmem %s347_s20, 48  ;;  %s15614_s28 = scalar_lea.vmem %s347_s20, 64 }
  0xa7   : > { %p15608_p5 = scmp.ne.s32.totalorder %s347_s20, %s15607_s29  ;;  %p15615_p10 = scmp.lt.s32.totalorder %s347_s20, %s347_s20 }
  0xa8   : > { %p15616_p11 = scmp.lt.s32.totalorder %s15614_s28, %s15607_s29 }
  0xa9   : > { %p15610_p7 = pnand %p15608_p5, %p16027_p8 }
  0xaa   : > { %p15617_p12 = por %p15616_p11, %p15615_p10 }
  0xab   : > { %p15611_p9 = pneg %p15610_p7 }
  0xad   : > { %p15618_p4 = pnand %p15617_p12, %p15611_p9 }
  0xaf   : > { %15621 = shalt.err (!%p15618_p4)
}
  0xb0   : > { %13849 = dma.hbm_to_vmem [thread:$0]  (!%p16013_p6), %s18963_s2, 48, %s347_s20, [#allocation7]  }
  0xb1   : > { %s15622_s30 = scalar_lea.hbm %s18909_s4, 9216 }
  0xb2   : > { %p15623_p13 = scmp.ne.s32.totalorder %s18909_s4, %s15622_s30  ;;  %p15629_p3 = scmp.lt.u32.totalorder %s15622_s30, %s18909_s4 }
  0xb4   : > { %p15625_p0 = pnand %p15623_p13, %p16027_p8 }
  0xb6   : > { %p15626_p1 = pneg %p15625_p0 }
  0xb8   : > { %p15631_p2 = pnand %p15629_p3, %p15626_p1 }
  0xba   : > { %15634 = shalt.err (!%p15631_p2)
}
  0xbb   : > { %s15635_s29 = scalar_lea.vmem %s370_s16, 9216  ;;  %p15643_p10 = scmp.lt.s32.totalorder %s370_s16, %s370_s16 }
  0xbc   : > { %p15636_p5 = scmp.ne.s32.totalorder %s370_s16, %s15635_s29  ;;  %p15644_p11 = scmp.lt.s32.totalorder %s15635_s29, %s15635_s29 }
  0xbe   : > { %p15638_p7 = pnand %p15636_p5, %p16027_p8  ;;  %p15645_p12 = por %p15644_p11, %p15643_p10 }
  0xc0   : > { %p15639_p9 = pneg %p15638_p7 }
  0xc2   : > { %p15646_p4 = pnand %p15645_p12, %p15639_p9 }
  0xc4   : > { %15649 = shalt.err (!%p15646_p4)
}
  0xc5   : > { %s18922_s20 = smov 192   ;;  %s18923_s28 = smov 12  }
  0xc6   : > { %13855 = dma.hbm_to_vmem [thread:$0]  (!%p16013_p6), %s18909_s4, 9216, %s370_s16, [#allocation10], %s18922_s20, %s18922_s20, %s18923_s28  }
  0xc7   : > { %s15895_s17 = smov [#allocation14]   ;;  %s15896_s30 = smov [#allocation17]  }
  0xc8   : > { %s394_s26 = sshll.u32 %s15895_s17, 4  ;;  %s415_s12 = sshll.u32 %s15896_s30, 4  ;;  %s395_s26 = int_to_ptr.vmem [resolvable:$true] %s394_s26  ;;  %s416_s12 = int_to_ptr.vmem [resolvable:$true] %s415_s12 }
  0xc9   : > { %s15650_s19 = scalar_lea.hbm %s18911_s6, 48 }
  0xca   : > { %p15651_p13 = scmp.ne.s32.totalorder %s18911_s6, %s15650_s19  ;;  %p15657_p3 = scmp.lt.u32.totalorder %s15650_s19, %s18911_s6 }
  0xcc   : > { %p15653_p0 = pnand %p15651_p13, %p16027_p8 }
  0xce   : > { %p15654_p1 = pneg %p15653_p0 }
  0xd0   : > { %p15659_p2 = pnand %p15657_p3, %p15654_p1 }
  0xd2   : > { %15662 = shalt.err (!%p15659_p2)
}
  0xd3   : > { %s15663_s16 = scalar_lea.vmem %s395_s26, 48  ;;  %s15670_s18 = scalar_lea.vmem %s395_s26, 64 }
  0xd4   : > { %p15664_p5 = scmp.ne.s32.totalorder %s395_s26, %s15663_s16  ;;  %p15671_p10 = scmp.lt.s32.totalorder %s395_s26, %s395_s26 }
  0xd5   : > { %p15672_p11 = scmp.lt.s32.totalorder %s15670_s18, %s15663_s16 }
  0xd6   : > { %p15666_p7 = pnand %p15664_p5, %p16027_p8 }
  0xd7   : > { %p15673_p12 = por %p15672_p11, %p15671_p10 }
  0xd8   : > { %p15667_p9 = pneg %p15666_p7 }
  0xda   : > { %p15674_p4 = pnand %p15673_p12, %p15667_p9 }
  0xdc   : > { %15677 = shalt.err (!%p15674_p4)
}
  0xdd   : > { %13861 = dma.hbm_to_vmem [thread:$0]  (!%p16013_p6), %s18911_s6, 48, %s395_s26, [#allocation13]  }
  0xde   : > { %s15678_s17 = scalar_lea.hbm %s18913_s8, 36864 }
  0xdf   : > { %p15679_p13 = scmp.ne.s32.totalorder %s18913_s8, %s15678_s17  ;;  %p15685_p3 = scmp.lt.u32.totalorder %s15678_s17, %s18913_s8 }
  0xe1   : > { %p15681_p0 = pnand %p15679_p13, %p16027_p8 }
  0xe3   : > { %p15682_p1 = pneg %p15681_p0 }
  0xe5   : > { %p15687_p2 = pnand %p15685_p3, %p15682_p1 }
  0xe7   : > { %15690 = shalt.err (!%p15687_p2)
}
  0xe8   : > { %s15691_s29 = scalar_lea.vmem %s416_s12, 36864  ;;  %p15699_p10 = scmp.lt.s32.totalorder %s416_s12, %s416_s12 }
  0xe9   : > { %p15692_p5 = scmp.ne.s32.totalorder %s416_s12, %s15691_s29  ;;  %p15700_p11 = scmp.lt.s32.totalorder %s15691_s29, %s15691_s29 }
  0xeb   : > { %p15694_p7 = pnand %p15692_p5, %p16027_p8  ;;  %p15701_p12 = por %p15700_p11, %p15699_p10 }
  0xed   : > { %p15695_p9 = pneg %p15694_p7 }
  0xef   : > { %p15702_p4 = pnand %p15701_p12, %p15695_p9 }
  0xf1   : > { %15705 = shalt.err (!%p15702_p4)
}
  0xf2   : > { %s15897_s26 = smov 768   ;;  %s15898_s16 = smov 48  }
  0xf3   : > { %13867 = dma.hbm_to_vmem [thread:$0]  (!%p16013_p6), %s18913_s8, 36864, %s416_s12, [#allocation16], %s15897_s26, %s15897_s26, %s15898_s16  }
  0xf4   : > { %s15899_s14 = smov [#allocation20]   ;;  %s15900_s5 = smov [#allocation21]  }
  0xf5   : > { %s439_s3 = sshll.u32 %s15899_s14, 4  ;;  %s453_s17 = sshll.u32 %s15900_s5, 4  ;;  %s440_s3 = int_to_ptr.vmem [resolvable:$true] %s439_s3  ;;  %s454_s17 = int_to_ptr.vmem [resolvable:$true] %s453_s17 }
  0xf6   : > { %s15706_s15 = scalar_lea.hbm %s18915_s10, 36864 }
  0xf7   : > { %p15707_p13 = scmp.ne.s32.totalorder %s18915_s10, %s15706_s15  ;;  %p15713_p3 = scmp.lt.u32.totalorder %s15706_s15, %s18915_s10 }
  0xf9   : > { %p15709_p0 = pnand %p15707_p13, %p16027_p8 }
  0xfb   : > { %p15710_p1 = pneg %p15709_p0 }
  0xfd   : > { %p15715_p2 = pnand %p15713_p3, %p15710_p1 }
  0xff   : > { %15718 = shalt.err (!%p15715_p2)
}
 0x100   : > { %s15719_s12 = scalar_lea.vmem %s440_s3, 36864  ;;  %p15727_p10 = scmp.lt.s32.totalorder %s440_s3, %s440_s3 }
 0x101   : > { %p15720_p5 = scmp.ne.s32.totalorder %s440_s3, %s15719_s12  ;;  %p15728_p11 = scmp.lt.s32.totalorder %s15719_s12, %s15719_s12 }
 0x103   : > { %p15722_p7 = pnand %p15720_p5, %p16027_p8  ;;  %p15729_p12 = por %p15728_p11, %p15727_p10 }
 0x105   : > { %p15723_p9 = pneg %p15722_p7 }
 0x107   : > { %p15730_p4 = pnand %p15729_p12, %p15723_p9 }
 0x109   : > { %15733 = shalt.err (!%p15730_p4)
}
 0x10a   : > { %s18964_s26 = smov 12   ;;  %s18965_s16 = smov 192  }
 0x10b   : > { %13873 = dma.hbm_to_vmem [thread:$0]  (!%p16013_p6), %s18915_s10, 36864, %s440_s3, [#allocation19], %s18965_s16, %s18965_s16, %s18964_s26  }
 0x10c   : > { %s15734_s14 = scalar_lea.hbm %s18916_s11, 48 }
 0x10d   : > { %p15735_p13 = scmp.ne.s32.totalorder %s18916_s11, %s15734_s14  ;;  %p15741_p3 = scmp.lt.u32.totalorder %s15734_s14, %s18916_s11 }
 0x10f   : > { %p15737_p0 = pnand %p15735_p13, %p16027_p8 }
 0x111   : > { %p15738_p1 = pneg %p15737_p0 }
 0x113   : > { %p15743_p2 = pnand %p15741_p3, %p15738_p1 }
 0x115   : > { %15746 = shalt.err (!%p15743_p2)
}
 0x116   : > { %s15747_s19 = scalar_lea.vmem %s454_s17, 48  ;;  %s15754_s3 = scalar_lea.vmem %s454_s17, 64 }
 0x117   : > { %p15748_p5 = scmp.ne.s32.totalorder %s454_s17, %s15747_s19  ;;  %p15755_p10 = scmp.lt.s32.totalorder %s454_s17, %s454_s17 }
 0x118   : > { %p15756_p11 = scmp.lt.s32.totalorder %s15754_s3, %s15747_s19 }
 0x119   : > { %p15750_p7 = pnand %p15748_p5, %p16027_p8 }
 0x11a   : > { %p15757_p12 = por %p15756_p11, %p15755_p10 }
 0x11b   : > { %p15751_p9 = pneg %p15750_p7 }
 0x11d   : > { %p15758_p4 = pnand %p15757_p12, %p15751_p9 }
 0x11f   : > { %15761 = shalt.err (!%p15758_p4)
}
 0x120   : > { %13876 = dma.hbm_to_vmem [thread:$0]  (!%p16013_p6), %s18916_s11, 48, %s454_s17, [#allocation22]  }
 0x121   : > { %s11777_s25 = sadd.s32 4294967294, %s15882_s24   ;;  %s16248_s13 = sadd.s32 1, %s15882_s24  }
 0x122   : > { %s41_s26 = sadd.s32 1, %s15878_s23  ;;  %s38_s16 = ssub.s32 %s15882_s24, %s16248_s13 }
 0x123   : > { %p48_p8 = scmp.ne.s32.totalorder %s15878_s23, %s15874_s22  ;;  %p39_p13 = scmp.eq.s32.totalorder %s38_s16, 0 }
 0x124   : > { %p49_p0 = scmp.eq.s32.totalorder %s15882_s24, 0  ;;  %p54_p1 = scmp.ne.s32.totalorder %s15874_s22, %s15870_s21 }
 0x125   : > { %p309_p3 = scmp.eq.s32.totalorder %s15995_s27, 1  ;;  %p18966_p5 = scmp.eq.s32.totalorder %s15995_s27, 0 }
 0x126   : > { %s16260_s20 = scalar_select %p39_p13, %s15878_s23, %s41_s26  }
 0x127   : > { %p50_p2 = por %p49_p0, %p48_p8  ;;  %p16264_p7 = por %p18966_p5, %p54_p1 }
 0x128   : > { %p16268_p6 = por %p309_p3, %p48_p8  ;;  %p315_p9 = scmp.eq.s32.totalorder %s11777_s25, 1 }
 0x129   : > { %p13896_p10 = scmp.lt.s32.totalorder %s15882_s24, 2  ;;  %s464_s18 = sand.u32 1, %s15878_s23  }
 0x12a   : > { %s18968_s17 = scalar_select %p16268_p6, 1, 0 }
 0x12b   : > { %p16274_p11 = por %p315_p9, %p54_p1  ;;  %s13791_s14 = smul.u32 192, %s464_s18 }
 0x12c   : > { %p16278_p12 = pnand %p13896_p10, %p50_p2  ;;  %s13792_s30 = smul.u32 3072, %s15882_s24 }
 0x12d   : > { %s18969_s2 = scalar_select %p16274_p11, 1, 0 }
 0x12e   : > { %s16286_s19 = scalar_lea.hbm %s18905_s0, %s13792_s30  ;;  %s468_s3 = scalar_lea.vmem [#allocation3], %s13791_s14 }
 0x12f   : > { %s475_s29 = sshll.u32 %s468_s3, 4  ;;  %s16290_s12 = scalar_lea.sflag [#allocation4], %s464_s18  ;;  %s16288_s29 = int_to_ptr.vmem [resolvable:$true] %s475_s29 }
 0x130   : > { %s15762_s25 = scalar_lea.hbm %s16286_s19, 3072  ;;  %p15764_p8 = pneg %p16278_p12 }
 0x131   : > { %p15763_p4 = scmp.ne.s32.totalorder %s16286_s19, %s15762_s25  ;;  %s15767_s30 = scalar_lea.hbm %s18905_s0, 6144 }
 0x132   : > { %p15768_p1 = scmp.lt.u32.totalorder %s16286_s19, %s18905_s0  ;;  %p15769_p3 = scmp.lt.u32.totalorder %s15767_s30, %s15762_s25 }
 0x133   : > { %p15765_p13 = pnand %p15764_p8, %p15763_p4  ;;  %p15771_p5 = scmp.lt.u32.totalorder %s15762_s25, %s16286_s19 }
 0x134   : > { %p15770_p2 = por %p15769_p3, %p15768_p1 }
 0x135   : > { %p15766_p0 = pneg %p15765_p13 }
 0x136   : > { %p15772_p9 = por %p15771_p5, %p15770_p2 }
 0x138   : > { %p15773_p10 = pnand %p15772_p9, %p15766_p0 }
 0x13a   : > { %15776 = shalt.err (!%p15773_p10)
}
 0x13b   : > { %s15777_s18 = scalar_lea.vmem %s16288_s29, 3072  ;;  %s15901_s14 = smov [#allocation3]  }
 0x13c   : > { %p15778_p4 = scmp.ne.s32.totalorder %s16288_s29, %s15777_s18  ;;  %s15782_s3 = sshll.u32 %s15901_s14, 4  ;;  %s15783_s3 = int_to_ptr.vmem [resolvable:$false] %s15782_s3 }
 0x13d   : > { %s15784_s26 = scalar_lea.vmem %s15783_s3, 6144  ;;  %p15785_p6 = scmp.lt.s32.totalorder %s16288_s29, %s15783_s3 }
 0x13e   : > { %p15780_p13 = pnand %p15778_p4, %p15764_p8  ;;  %p15786_p1 = scmp.lt.s32.totalorder %s15784_s26, %s15777_s18 }
 0x140   : > { %p15781_p11 = pneg %p15780_p13  ;;  %p15787_p3 = por %p15786_p1, %p15785_p6 }
 0x142   : > { %p15788_p2 = pnand %p15787_p3, %p15781_p11 }
 0x144   : > { %15791 = shalt.err (!%p15788_p2)
}
 0x145   : > { %s15902_s25 = smov 384   ;;  %s15903_s16 = smov 24  }
 0x146   : > { %13880 = dma.hbm_to_vmem [thread:$0]  (!%p16278_p12), %s16286_s19, 3072, %s16288_s29, %s16290_s12, %s15902_s25, %s15902_s25, %s15903_s16  }
 0x147   : > { %s18971_s30 = sld [smem:[#allocation32_spill]] }
 0x14d   : > { %p18972_p8 = scmp.ne.s32.totalorder %s18971_s30, 0 }
 0x14f   : > { %487 = sbr.rel (%p18972_p8) target bundleno = 5191 (0x1447), region = 68 }
 0x156   : > { %s16321_s1 = sand.u32 1, %s15874_s22  }
 0x157   : > { %s13793_s15 = smul.u32 192, %s16321_s1  ;;  %s490_s18 = scalar_lea.sflag [#allocation4], %s16321_s1 }
 0x159   : > { %s16327_s14 = scalar_lea.vmem [#allocation3], %s13793_s15 }
 0x15a   : > { %15837 = dma.done.wait (%p16264_p7), %s490_s18, 3072  }
 0x15b   : > { %15839 = vsyncadd (%p16264_p7), %s490_s18, 4294964224  ;;  %p18973_p6 = scmp.eq.s32.totalorder %s15995_s27, 0 }
 0x15d   : > { %15841 = dma.done.wait (%p18973_p6), [#allocation7], 96   ;;  %p18974_p11 = pmov %p18973_p6 }
 0x15e   : > { %p18975_p12 = pmov %p18973_p6 }
 0x15f   : > { %15843 = vsyncadd (%p18974_p11), [#allocation7], 4294967200 }
 0x160   : > { %15845 = dma.done.wait (%p18975_p12), [#allocation10], 36864   ;;  %p18976_p0 = pmov %p18973_p6 }
 0x162   : > { %15847 = vsyncadd (%p18976_p0), [#allocation10], 4294930432  ;;  %p18977_p5 = pmov %p18976_p0 }
 0x163   : > { %p18978_p9 = pmov %p18976_p0 }
 0x164   : > { %15849 = dma.done.wait (%p18977_p5), [#allocation13], 96  }
 0x165   : > { %15851 = vsyncadd (%p18978_p9), [#allocation13], 4294967200  ;;  %p18979_p7 = pmov %p18976_p0 }
 0x166   : > { %p18980_p10 = pmov %p18976_p0 }
 0x167   : > { %15853 = dma.done.wait (%p18979_p7), [#allocation16], 36912  }
 0x168   : > { %15855 = vsyncadd (%p18980_p10), [#allocation16], 4294930384  ;;  %p18981_p4 = pmov %p18976_p0 }
 0x169   : > { %p18982_p13 = pmov %p18976_p0 }
 0x16a   : > { %15857 = dma.done.wait (%p18981_p4), [#allocation19], 37056  }
 0x16b   : > { %15859 = vsyncadd (%p18982_p13), [#allocation19], 4294930240  ;;  %p18983_p1 = pmov %p18976_p0 }
 0x16c   : > { %p18984_p3 = pmov %p18976_p0 }
 0x16d   : > { %15861 = dma.done.wait (%p18983_p1), [#allocation22], 48  }
 0x16e   : > { %15863 = vsyncadd (%p18984_p3), [#allocation22], 4294967248  ;;  %v16358_v0 = vld [vmem:[%s16327_s14] sm:$0xff]  ;;  %v16361_v1 = vld [vmem:[%s16327_s14 + $0x8] sm:$0xff]  ;;  %vm2951_vm0 = vcmask 523264   ;;  %s15905_s28 = smov 64  }
 0x16f   : > { %v16364_v2 = vld [vmem:[%s16327_s14 + $0x10] sm:$0xff]  ;;  %v605_v3 = vadd.f32 %v16361_v1, %v16358_v0  ;;  %v16372_v5 = vld [vmem:[%s16327_s14 + $0x38] sm:$0xff]  ;;  %v16375_v6 = vld [vmem:[%s16327_s14 + $0x40] sm:$0xff]  ;;  %vm3568_vm9 = vcmask 1048064   ;;  %s18801_s5 = scalar_lea.vmem [#allocation23], %s13793_s15  ;;  %s13794_s19 = smul.u32 3072, %s15995_s27 }
 0x170   : > { %v16369_v4 = vld [vmem:[%s16327_s14 + $0x30] sm:$0xff]  ;;  %v582_v8 = vld [vmem:[%s16327_s14 + $0x18] sm:$0xff]  ;;  %v583_v9 = vld [vmem:[%s16327_s14 + $0x20] sm:$0xff]  ;;  %s11599_s29 = sshll.u32 %s18801_s5, 4  ;;  %s19101_s26 = sld [smem:[#allocation75_spill]]  ;;  %s18859_s29 = int_to_ptr.vmem [resolvable:$true] %s11599_s29 }
 0x171   : > { %v613_v7 = vadd.f32 %v16372_v5, %v16369_v4  ;;  %v584_v10 = vld [vmem:[%s16327_s14 + $0x28] sm:$0xff]  ;;  %v606_v11 = vadd.f32 %v605_v3, %v16364_v2  ;;  %v609_v12 = vadd.f32 %v583_v9, %v582_v8  ;;  %v589_v14 = vld [vmem:[%s16327_s14 + $0x50] sm:$0xff]  ;;  %v590_v15 = vld [vmem:[%s16327_s14 + $0x58] sm:$0xff]  ;;  %s11586_s25 = scalar_lea.sflag [#allocation5], %s16321_s1  ;;  %s15792_s16 = scalar_lea.vmem %s18859_s29, 3072 }
 0x172   : > { %v588_v13 = vld [vmem:[%s16327_s14 + $0x48] sm:$0xff]  ;;  %v591_v18 = vld [vmem:[%s16327_s14 + $0x60] sm:$0xff]  ;;  %v594_v22 = vld [vmem:[%s16327_s14 + $0x78] sm:$0xff]  ;;  %p15793_p2 = scmp.ne.s32.totalorder %s18859_s29, %s15792_s16  ;;  %p19103_p8 = scmp.ne.s32.totalorder %s18968_s17, 0 }
 0x173   : > { %v614_v16 = vadd.f32 %v613_v7, %v16375_v6  ;;  %v617_v17 = vadd.f32 %v589_v14, %v588_v13  ;;  %v592_v19 = vld [vmem:[%s16327_s14 + $0x68] sm:$0xff]  ;;  %607 = vadd.xlane.f32.xlu0 %v606_v11  ;;  %v610_v20 = vadd.f32 %v609_v12, %v584_v10  ;;  %v595_v23 = vld [vmem:[%s16327_s14 + $0x80] sm:$0xff]  ;;  %v593_v25 = vld [vmem:[%s16327_s14 + $0x70] sm:$0xff]  ;;  %s15906_s30 = smov [#allocation23]  }
 0x174   : > { %v621_v21 = vadd.f32 %v592_v19, %v591_v18  ;;  %v625_v26 = vadd.f32 %v595_v23, %v594_v22  ;;  %v597_v27 = vld [vmem:[%s16327_s14 + $0x90] sm:$0xff]  ;;  %v598_v28 = vld [vmem:[%s16327_s14 + $0x98] sm:$0xff]  ;;  %v596_v29 = vld [vmem:[%s16327_s14 + $0x88] sm:$0xff]  ;;  %p15794_p6 = pnand %p15793_p2, %p19103_p8  ;;  %s15796_s15 = sshll.u32 %s15906_s30, 4  ;;  %s15797_s15 = int_to_ptr.vmem [resolvable:$false] %s15796_s15 }
 0x175   : > { %615 = vadd.xlane.f32.xlu1 %v614_v16  ;;  %v618_v24 = vadd.f32 %v617_v17, %v590_v15  ;;  %v600_v30 = vld [vmem:[%s16327_s14 + $0xa8] sm:$0xff]  ;;  %v601_v31 = vld [vmem:[%s16327_s14 + $0xb0] sm:$0xff]  ;;  %v599_v32 = vld [vmem:[%s16327_s14 + $0xa0] sm:$0xff]  ;;  %v629_v34 = vadd.f32 %v598_v28, %v597_v27  ;;  %s15798_s18 = scalar_lea.vmem %s15797_s15, 6144  ;;  %p15799_p12 = scmp.lt.s32.totalorder %s18859_s29, %s15797_s15 }
 0x176   : > { %v622_v33 = vadd.f32 %v621_v21, %v593_v25  ;;  %v602_v35 = vld [vmem:[%s16327_s14 + $0xb8] sm:$0xff]  ;;  %v626_v36 = vadd.f32 %v625_v26, %v596_v29  ;;  %v633_v37 = vadd.f32 %v601_v31, %v600_v30  ;;  %v13964_v40 = vld [vmem:[#allocation9 + $0x4] ss:$36 sps:$4 sm:$0xff]   ;;  %v13973_v49 = vld [vmem:[#allocation9 + $0xdc] ss:$36 sps:$4 sm:$0xff]   ;;  %s18855_s27 = scalar_lea.hbm %s19101_s26, %s13794_s19  ;;  %p15795_p11 = pneg %p15794_p6 }
 0x177   : > { %611 = vadd.xlane.f32.xlu0 %v610_v20  ;;  %v630_v38 = vadd.f32 %v629_v34, %v599_v32  ;;  %v13966_v41 = vld [vmem:[#allocation9] ss:$36 sps:$4 sm:$0xff]   ;;  %v13967_v42 = vld [vmem:[#allocation9 + $0x4c] ss:$36 sps:$4 sm:$0xff]   ;;  %2210 = vmatprep.subr.bf16.mxu0 %v13964_v40  ;;  %v13970_v44 = vld [vmem:[#allocation9 + $0x94] ss:$36 sps:$4 sm:$0xff]   ;;  %p15800_p0 = scmp.lt.s32.totalorder %s15798_s18, %s15792_s16 }
 0x178   : > { %v634_v39 = vadd.f32 %v633_v37, %v602_v35  ;;  %2211 = vmatpush1.bf16.msra.mxu0 %v13966_v41  ;;  %v13969_v43 = vld [vmem:[#allocation9 + $0x48] ss:$36 sps:$4 sm:$0xff]   ;;  %v13972_v46 = vld [vmem:[#allocation9 + $0x90] ss:$36 sps:$4 sm:$0xff]   ;;  %v13975_v51 = vld [vmem:[#allocation9 + $0xd8] ss:$36 sps:$4 sm:$0xff]  }
 0x179   : > { %619 = vadd.xlane.f32.xlu1 %v618_v24  ;;  %2212 = vmatprep.subr.bf16.mxu0 %v13967_v42  ;;  %v13988_v45 = vld [vmem:[#allocation9 + $0x48c] ss:$36 sps:$4 sm:$0xff]   ;;  %v13994_v48 = vld [vmem:[#allocation9 + $0x4d4] ss:$36 sps:$4 sm:$0xff]   ;;  %v13976_v52 = vld [vmem:[#allocation9 + $0x124] ss:$36 sps:$4 sm:$0xff]   ;;  %p15801_p5 = por %p15800_p0, %p15799_p12 }
 0x17a   : > { %v13992_v47 = vld [vmem:[#allocation9 + $0x488] ss:$36 sps:$4 sm:$0xff]   ;;  %2429 = vmatprep.subr.bf16.mxu1 %v13988_v45  ;;  %v13998_v50 = vld [vmem:[#allocation9 + $0x4d0] ss:$36 sps:$4 sm:$0xff]   ;;  %v13978_v53 = vld [vmem:[#allocation9 + $0x120] ss:$36 sps:$4 sm:$0xff]  }
 0x17b   : > { %623 = vadd.xlane.f32.xlu0 %v622_v33  ;;  %2430 = vmatpush1.bf16.msra.mxu1 %v13992_v47  ;;  %v13979_v54 = vld [vmem:[#allocation9 + $0x16c] ss:$36 sps:$4 sm:$0xff]   ;;  %v13982_v56 = vld [vmem:[#allocation9 + $0x1b4] ss:$36 sps:$4 sm:$0xff]   ;;  %v13985_v58 = vld [vmem:[#allocation9 + $0x1fc] ss:$36 sps:$4 sm:$0xff]   ;;  %p15802_p9 = pnand %p15801_p5, %p15795_p11 }
 0x17c   : > { %2213 = vmatpush1.bf16.msra.mxu0 %v13969_v43  ;;  %2431 = vmatprep.subr.bf16.mxu1 %v13994_v48  ;;  %v13981_v55 = vld [vmem:[#allocation9 + $0x168] ss:$36 sps:$4 sm:$0xff]   ;;  %v13984_v57 = vld [vmem:[#allocation9 + $0x1b0] ss:$36 sps:$4 sm:$0xff]   ;;  %v13987_v59 = vld [vmem:[#allocation9 + $0x1f8] ss:$36 sps:$4 sm:$0xff]  }
 0x17d   : > { %627 = vadd.xlane.f32.xlu1 %v626_v36  ;;  %2214 = vmatprep.subr.bf16.mxu0 %v13970_v44  ;;  %v13990_v60 = vld [vmem:[#allocation9 + $0x244] ss:$36 sps:$4 sm:$0xff]   ;;  %v13996_v62 = vld [vmem:[#allocation9 + $0x28c] ss:$36 sps:$4 sm:$0xff]   ;;  %v15413_v21 = vld [vmem:[%s16327_s14 + $0x20] sm:$0xff] }
 0x17e   : > { %v13993_v61 = vld [vmem:[#allocation9 + $0x240] ss:$36 sps:$4 sm:$0xff]   ;;  %v15412_v19 = vld [vmem:[%s16327_s14 + $0x18] sm:$0xff]  ;;  %v15416_v28 = vld [vmem:[%s16327_s14 + $0x50] sm:$0xff] }
 0x17f   : > { %631 = vadd.xlane.f32.xlu0 %v630_v38  ;;  %2432 = vmatpush1.bf16.msra.mxu1 %v13998_v50  ;;  %v15414_v24 = vld [vmem:[%s16327_s14 + $0x28] sm:$0xff]  ;;  %v15417_v32 = vld [vmem:[%s16327_s14 + $0x58] sm:$0xff]  ;;  %v15418_v43 = vld [vmem:[%s16327_s14 + $0x60] sm:$0xff] }
 0x180   : > { %2215 = vmatpush1.bf16.msra.mxu0 %v13972_v46  ;;  %v15415_v26 = vld [vmem:[%s16327_s14 + $0x48] sm:$0xff] }
 0x181   : > { %635 = vadd.xlane.f32.xlu1 %v634_v39  ;;  %2216 = vmatprep.subr.bf16.mxu0 %v13973_v49  ;;  %v15419_v45 = vld [vmem:[%s16327_s14 + $0x68] sm:$0xff]  ;;  %v15420_v49 = vld [vmem:[%s16327_s14 + $0x78] sm:$0xff] }
 0x184   : > { %2217 = vmatpush1.bf16.msra.mxu0 %v13975_v51  ;;  %v15421_v51 = vld [vmem:[%s16327_s14 + $0x80] sm:$0xff] }
 0x185   : > { %2218 = vmatprep.subr.bf16.mxu0 %v13976_v52 }
 0x188   : > { %2219 = vmatpush1.bf16.msra.mxu0 %v13978_v53 }
 0x189   : > { %2220 = vmatprep.subr.bf16.mxu0 %v13979_v54 }
 0x18c   : > { %2221 = vmatpush1.bf16.msra.mxu0 %v13981_v55  ;;  %v15422_v55 = vld [vmem:[%s16327_s14 + $0x70] sm:$0xff] }
 0x18d   : > { %2222 = vmatprep.subr.bf16.mxu0 %v13982_v56 }
 0x190   : > { %2223 = vmatpush1.bf16.msra.mxu0 %v13984_v57 }
 0x191   : > { %2224 = vmatprep.subr.bf16.mxu0 %v13985_v58 }
 0x194   : > { %2225 = vmatpush1.bf16.msra.mxu0 %v13987_v59 }
 0x195   : > { %2226 = vmatprep.subr.bf16.mxu0 %v13990_v60 }
 0x198   : > { %2227 = vmatpush1.bf16.msra.mxu0 %v13993_v61 }
 0x199   : > { %2228 = vmatprep.subr.bf16.mxu0 %v13996_v62 }
 0x200   : > { %v608_v63 = vpop.xlane.xlu0 %607 }
 0x201   : > { %v638_v3 = vmul.f32 0.0026041667, %v608_v63 }
 0x202   : > { %v616_v7 = vpop.xlane.xlu1 %615 }
 0x203   : > { %v640_v8 = vmul.f32 0.0026041667, %v616_v7  ;;  %v16400_v9 = vsub.f32 %v16358_v0, %v638_v3  ;;  %v16403_v10 = vsub.f32 %v16361_v1, %v638_v3  ;;  %v16406_v11 = vsub.f32 %v16364_v2, %v638_v3  ;;  %v15423_v7 = vld [vmem:[%s16327_s14 + $0x88] sm:$0xff] }
 0x204   : > { %v612_v14 = vpop.xlane.xlu0 %611 }
 0x205   : > { %v16409_v12 = vsub.f32 %v16369_v4, %v640_v8  ;;  %v16412_v13 = vsub.f32 %v16372_v5, %v640_v8  ;;  %v16415_v15 = vsub.f32 %v16375_v6, %v640_v8  ;;  %v639_v0 = vmul.f32 0.0026041667, %v612_v14  ;;  %v15424_v14 = vld [vmem:[%s16327_s14 + $0x90] sm:$0xff] }
 0x206   : > { %v620_v16 = vpop.xlane.xlu1 %619  ;;  %v670_v1 = vmul.f32 %v16400_v9, %v16400_v9  ;;  %v671_v2 = vmul.f32 %v16403_v10, %v16403_v10  ;;  %v672_v4 = vmul.f32 %v16406_v11, %v16406_v11 }
 0x207   : > { %v641_v5 = vmul.f32 0.0026041667, %v620_v16  ;;  %v676_v17 = vmul.f32 %v16409_v12, %v16409_v12  ;;  %v677_v6 = vmul.f32 %v16412_v13, %v16412_v13  ;;  %v678_v18 = vmul.f32 %v16415_v15, %v16415_v15  ;;  %v15425_v16 = vld [vmem:[%s16327_s14 + $0x98] sm:$0xff] }
 0x208   : > { %v16430_v20 = vsub.f32 %v15412_v19, %v639_v0  ;;  %v16433_v22 = vsub.f32 %v15413_v21, %v639_v0  ;;  %v694_v23 = vadd.f32 %v671_v2, %v670_v1  ;;  %v16436_v25 = vsub.f32 %v15414_v24, %v639_v0  ;;  %v624_v30 = vpop.xlane.xlu0 %623  ;;  %v15428_v24 = vld [vmem:[%s16327_s14 + $0xa0] sm:$0xff] }
 0x209   : > { %v16439_v27 = vsub.f32 %v15415_v26, %v641_v5  ;;  %v16442_v29 = vsub.f32 %v15416_v28, %v641_v5  ;;  %v702_v31 = vadd.f32 %v677_v6, %v676_v17  ;;  %v16445_v33 = vsub.f32 %v15417_v32, %v641_v5  ;;  %v15427_v17 = vld [vmem:[%s16327_s14 + $0xb0] sm:$0xff]  ;;  %v15429_v32 = vld [vmem:[%s16327_s14 + $0xb8] sm:$0xff] }
 0x20a   : > { %v642_v34 = vmul.f32 0.0026041667, %v624_v30  ;;  %v695_v35 = vadd.f32 %v694_v23, %v672_v4  ;;  %v628_v36 = vpop.xlane.xlu1 %627  ;;  %v673_v37 = vmul.f32 %v16430_v20, %v16430_v20  ;;  %v674_v38 = vmul.f32 %v16433_v22, %v16433_v22  ;;  %v15426_v4 = vld [vmem:[%s16327_s14 + $0xa8] sm:$0xff] }
 0x20b   : > { %v643_v39 = vmul.f32 0.0026041667, %v628_v36  ;;  %v703_v40 = vadd.f32 %v702_v31, %v678_v18  ;;  %v675_v41 = vmul.f32 %v16436_v25, %v16436_v25  ;;  %v679_v42 = vmul.f32 %v16439_v27, %v16439_v27 }
 0x20c   : > { %v16456_v44 = vsub.f32 %v15418_v43, %v642_v34  ;;  %v16459_v46 = vsub.f32 %v15419_v45, %v642_v34  ;;  %696 = vadd.xlane.f32.xlu0 %v695_v35  ;;  %v698_v47 = vadd.f32 %v674_v38, %v673_v37  ;;  %v680_v48 = vmul.f32 %v16442_v29, %v16442_v29  ;;  %v632_v53 = vpop.xlane.xlu0 %631 }
 0x20d   : > { %v16464_v50 = vsub.f32 %v15420_v49, %v643_v39  ;;  %v16467_v52 = vsub.f32 %v15421_v51, %v643_v39  ;;  %v681_v54 = vmul.f32 %v16445_v33, %v16445_v33  ;;  %v16472_v56 = vsub.f32 %v15422_v55, %v642_v34  ;;  %v14002_v49 = vld [vmem:[#allocation9 + $0x2d4] ss:$36 sps:$4 sm:$0xff]   ;;  %v14008_v55 = vld [vmem:[#allocation9 + $0x31c] ss:$36 sps:$4 sm:$0xff]  }
 0x20e   : > { %v644_v57 = vmul.f32 0.0026041667, %v632_v53  ;;  %v699_v58 = vadd.f32 %v698_v47, %v675_v41  ;;  %v636_v59 = vpop.xlane.xlu1 %635  ;;  %v706_v60 = vadd.f32 %v680_v48, %v679_v42  ;;  %v682_v61 = vmul.f32 %v16456_v44, %v16456_v44  ;;  %v13999_v47 = vld [vmem:[#allocation9 + $0x288] ss:$36 sps:$4 sm:$0xff]   ;;  %v14000_v48 = vld [vmem:[#allocation9 + $0x51c] ss:$36 sps:$4 sm:$0xff]  }
 0x20f   : > { %v645_v62 = vmul.f32 0.0026041667, %v636_v59  ;;  %v683_v63 = vmul.f32 %v16459_v46, %v16459_v46  ;;  %v684_v3 = vmul.f32 %v16472_v56, %v16472_v56  ;;  %v16481_v8 = vsub.f32 %v15423_v7, %v643_v39  ;;  %2229 = vmatpush1.bf16.msra.mxu0 %v13999_v47  ;;  %v14004_v51 = vld [vmem:[#allocation9 + $0x518] ss:$36 sps:$4 sm:$0xff]   ;;  %2433 = vmatprep.subr.bf16.mxu1 %v14000_v48  ;;  %v14005_v53 = vld [vmem:[#allocation9 + $0x2d0] ss:$36 sps:$4 sm:$0xff]  }
 0x210   : > { %v16484_v0 = vsub.f32 %v15424_v14, %v644_v57  ;;  %v16487_v1 = vsub.f32 %v15425_v16, %v644_v57  ;;  %704 = vadd.xlane.f32.xlu0 %v703_v40  ;;  %700 = vadd.xlane.f32.xlu1 %v699_v58  ;;  %v707_v2 = vadd.f32 %v706_v60, %v681_v54  ;;  %v14006_v54 = vld [vmem:[#allocation9 + $0x564] ss:$36 sps:$4 sm:$0xff]   ;;  %v14011_v58 = vld [vmem:[#allocation9 + $0x318] ss:$36 sps:$4 sm:$0xff]   ;;  %v14012_v59 = vld [vmem:[#allocation9 + $0x5ac] ss:$36 sps:$4 sm:$0xff]  }
 0x211   : > { %v16490_v5 = vsub.f32 %v15426_v4, %v645_v62  ;;  %v16493_v6 = vsub.f32 %v15427_v17, %v645_v62  ;;  %v710_v18 = vadd.f32 %v683_v63, %v682_v61  ;;  %v685_v19 = vmul.f32 %v16464_v50, %v16464_v50  ;;  %2230 = vmatprep.subr.bf16.mxu0 %v14002_v49  ;;  %v14014_v60 = vld [vmem:[#allocation9 + $0x364] ss:$36 sps:$4 sm:$0xff]   ;;  %v14018_v63 = vld [vmem:[#allocation9 + $0x5f4] ss:$36 sps:$4 sm:$0xff]   ;;  %v14024_v16 = vld [vmem:[#allocation9 + $0x63c] ss:$36 sps:$4 sm:$0xff]  }
 0x212   : > { %v686_v21 = vmul.f32 %v16467_v52, %v16467_v52  ;;  %v687_v23 = vmul.f32 %v16481_v8, %v16481_v8  ;;  %v16502_v26 = vsub.f32 %v15428_v24, %v644_v57  ;;  %v688_v28 = vmul.f32 %v16484_v0, %v16484_v0  ;;  %2434 = vmatpush1.bf16.msra.mxu1 %v14004_v51  ;;  %v14010_v57 = vld [vmem:[#allocation9 + $0x560] ss:$36 sps:$4 sm:$0xff]   ;;  %v14016_v61 = vld [vmem:[#allocation9 + $0x5a8] ss:$36 sps:$4 sm:$0xff]   ;;  %v14022_v7 = vld [vmem:[#allocation9 + $0x5f0] ss:$36 sps:$4 sm:$0xff]  }
 0x213   : > { %v711_v30 = vadd.f32 %v710_v18, %v684_v3  ;;  %v689_v31 = vmul.f32 %v16487_v1, %v16487_v1  ;;  %v16509_v34 = vsub.f32 %v15429_v32, %v645_v62  ;;  %v691_v35 = vmul.f32 %v16490_v5, %v16490_v5  ;;  %2231 = vmatpush1.bf16.msra.mxu0 %v14005_v53  ;;  %v14017_v62 = vld [vmem:[#allocation9 + $0x360] ss:$36 sps:$4 sm:$0xff]   ;;  %v14020_v3 = vld [vmem:[#allocation9 + $0x3ac] ss:$36 sps:$4 sm:$0xff]   ;;  %v14028_v4 = vld [vmem:[#allocation9 + $0x638] ss:$36 sps:$4 sm:$0xff]  }
 0x214   : > { %708 = vadd.xlane.f32.xlu1 %v707_v2  ;;  %v714_v36 = vadd.f32 %v686_v21, %v685_v19  ;;  %v690_v37 = vmul.f32 %v16502_v26, %v16502_v26  ;;  %v692_v38 = vmul.f32 %v16493_v6, %v16493_v6  ;;  %2435 = vmatprep.subr.bf16.mxu1 %v14006_v54  ;;  %v14023_v14 = vld [vmem:[#allocation9 + $0x3a8] ss:$36 sps:$4 sm:$0xff]   ;;  %v14026_v2 = vld [vmem:[#allocation9 + $0x3f4] ss:$36 sps:$4 sm:$0xff]   ;;  %v14032_v19 = vld [vmem:[#allocation9 + $0x43c] ss:$36 sps:$4 sm:$0xff]   ;;  %v775_v32 = vlaneseq }
 0x215   : > { %712 = vadd.xlane.f32.xlu0 %v711_v30  ;;  %v718_v39 = vadd.f32 %v689_v31, %v688_v28  ;;  %v693_v40 = vmul.f32 %v16509_v34, %v16509_v34  ;;  %2232 = vmatprep.subr.bf16.mxu0 %v14008_v55  ;;  %v14029_v17 = vld [vmem:[#allocation9 + $0x3f0] ss:$36 sps:$4 sm:$0xff]   ;;  %v14030_v18 = vld [vmem:[#allocation9 + $0x684] ss:$36 sps:$4 sm:$0xff]   ;;  %v14038_v24 = vld [vmem:[#allocation9 + $0x1c] ss:$36 sps:$4 sm:$0xff]  }
 0x216   : > { %v715_v41 = vadd.f32 %v714_v36, %v687_v23  ;;  %v722_v42 = vadd.f32 %v692_v38, %v691_v35  ;;  %2436 = vmatpush1.bf16.msra.mxu1 %v14010_v57  ;;  %v14034_v21 = vld [vmem:[#allocation9 + $0x680] ss:$36 sps:$4 sm:$0xff]   ;;  %v14035_v23 = vld [vmem:[#allocation9 + $0x438] ss:$36 sps:$4 sm:$0xff]   ;;  %v18925_v28 = vmov 0  }
 0x217   : > { %v719_v43 = vadd.f32 %v718_v39, %v690_v37  ;;  %2233 = vmatpush1.bf16.msra.mxu0 %v14011_v58  ;;  %2437 = vmatprep.subr.bf16.mxu1 %v14012_v59  ;;  %v14041_v30 = vld [vmem:[#allocation9 + $0x484] ss:$36 sps:$4 sm:$0xff]   ;;  %v16521_v39 = vshrl.u32 %v775_v32, 7  ;;  %v603_v53 = vld [vmem:[#allocation6] sm:$0x7] }
 0x218   : > { %716 = vadd.xlane.f32.xlu1 %v715_v41  ;;  %v723_v45 = vadd.f32 %v722_v42, %v693_v40  ;;  %2234 = vmatprep.subr.bf16.mxu0 %v14014_v60 }
 0x219   : > { %720 = vadd.xlane.f32.xlu0 %v719_v43  ;;  %2461 = vmatprep.mubr.bf16.mxu1 %v18925_v28  ;;  %18985 = vst [vmem:[#allocation33_spill] sm:$0xff] %v16521_v39  ;;  %v16524_v47 = vsub.s32 1, %v16521_v39  ;;  %v16527_v48 = vsub.s32 2, %v16521_v39 }
 0x21a   : > { %2438 = vmatpush1.bf16.msra.mxu1 %v14016_v61  ;;  %v16530_v61 = vsub.s32 0, %v16521_v39 }
 0x21b   : > { %2235 = vmatpush1.bf16.msra.mxu0 %v14017_v62  ;;  %2439 = vmatprep.subr.bf16.mxu1 %v14018_v63  ;;  %18986 = vst [vmem:[#allocation34_spill] sm:$0xff] %v16524_v47  ;;  %18987 = vst [vmem:[#allocation35_spill] sm:$0xff] %v16527_v48  ;;  %v16533_v63 = vrot.slane %v603_v53, %v16524_v47 }
 0x21c   : > { %724 = vadd.xlane.f32.xlu1 %v723_v45  ;;  %2236 = vmatprep.subr.bf16.mxu0 %v14020_v3  ;;  %18988 = vst [vmem:[#allocation36_spill] sm:$0xff] %v16530_v61  ;;  %v16536_v3 = vrot.slane %v603_v53, %v16527_v48 }
 0x21e   : > { %2440 = vmatpush1.bf16.msra.mxu1 %v14022_v7 }
 0x21f   : > { %2237 = vmatpush1.bf16.msra.mxu0 %v14023_v14  ;;  %2441 = vmatprep.subr.bf16.mxu1 %v14024_v16  ;;  %v604_v16 = vld [vmem:[#allocation8] sm:$0x7] }
 0x220   : > { %2238 = vmatprep.subr.bf16.mxu0 %v14026_v2 }
 0x222   : > { %2442 = vmatpush1.bf16.msra.mxu1 %v14028_v4 }
 0x223   : > { %2239 = vmatpush1.bf16.msra.mxu0 %v14029_v17  ;;  %2443 = vmatprep.subr.bf16.mxu1 %v14030_v18 }
 0x224   : > { %2240 = vmatprep.subr.bf16.mxu0 %v14032_v19 }
 0x226   : > { %2444 = vmatpush1.bf16.msra.mxu1 %v14034_v21 }
 0x227   : > { %2241 = vmatpush1.bf16.msra.mxu0 %v14035_v23  ;;  %2648 = vmatprep.subr.bf16.mxu1 %v14038_v24  ;;  %v16542_v23 = vrot.slane %v603_v53, %v16530_v61 }
 0x228   : > { %2283 = vmatprep.subr.bf16.mxu0 %v14041_v30  ;;  %v16546_v30 = vrot.slane %v604_v16, %v16524_v47 }
 0x299   : > { %v697_v31 = vpop.xlane.xlu0 %696 }
 0x29a   : > { %v726_v35 = vmul.f32 0.0026041667, %v697_v31 }
 0x29c   : > { %v734_v36 = vadd.f32 1e-05, %v726_v35  ;;  %v16550_v35 = vrot.slane %v604_v16, %v16527_v48 }
 0x29d   : > { %v701_v37 = vpop.xlane.xlu1 %700  ;;  %v705_v38 = vpop.xlane.xlu0 %704 }
 0x29e   : > { %15188 = vrsqrt.f32 %v734_v36  ;;  %v727_v40 = vmul.f32 0.0026041667, %v701_v37  ;;  %v728_v41 = vmul.f32 0.0026041667, %v705_v38  ;;  %v16555_v38 = vrot.slane %v604_v16, %v16530_v61 }
 0x2a0   : > { %v735_v42 = vadd.f32 1e-05, %v727_v40  ;;  %v736_v43 = vadd.f32 1e-05, %v728_v41 }
 0x2a1   : > { %v709_v45 = vpop.xlane.xlu1 %708 }
 0x2a2   : > { %15190 = vrsqrt.f32 %v735_v42  ;;  %v729_v49 = vmul.f32 0.0026041667, %v709_v45  ;;  %v713_v51 = vpop.xlane.xlu0 %712 }
 0x2a3   : > { %15192 = vrsqrt.f32 %v736_v43  ;;  %v730_v54 = vmul.f32 0.0026041667, %v713_v51 }
 0x2a4   : > { %v737_v55 = vadd.f32 1e-05, %v729_v49 }
 0x2a5   : > { %v738_v57 = vadd.f32 1e-05, %v730_v54  ;;  %v717_v58 = vpop.xlane.xlu1 %716 }
 0x2a6   : > { %15194 = vrsqrt.f32 %v737_v55  ;;  %v731_v59 = vmul.f32 0.0026041667, %v717_v58  ;;  %v721_v60 = vpop.xlane.xlu0 %720 }
 0x2a7   : > { %v732_v62 = vmul.f32 0.0026041667, %v721_v60  ;;  %15196 = vrsqrt.f32 %v738_v57  ;;  %v14039_v57 = vld [vmem:[#allocation9 + $0x480] ss:$36 sps:$4 sm:$0xff]  }
 0x2a8   : > { %v15189_v7 = vpop.eup %15188  ;;  %v739_v14 = vadd.f32 1e-05, %v731_v59  ;;  %v14044_v59 = vld [vmem:[#allocation9 + $0x64] ss:$36 sps:$4 sm:$0xff]  }
 0x2a9   : > { %v740_v2 = vadd.f32 1e-05, %v732_v62  ;;  %v725_v4 = vpop.xlane.xlu1 %724  ;;  %v751_v17 = vmul.f32 %v15189_v7, %v16403_v10  ;;  %v752_v18 = vmul.f32 %v15189_v7, %v16406_v11  ;;  %v750_v21 = vmul.f32 %v15189_v7, %v16400_v9 }
 0x2aa   : > { %15198 = vrsqrt.f32 %v739_v14  ;;  %v733_v19 = vmul.f32 0.0026041667, %v725_v4 }
 0x2ab   : > { %v791_v24 = vmul.f32 %v16533_v63, %v751_v17  ;;  %v792_v31 = vmul.f32 %v16536_v3, %v752_v18  ;;  %15200 = vrsqrt.f32 %v740_v2  ;;  %v790_v41 = vmul.f32 %v16542_v23, %v750_v21  ;;  %v14047_v2 = vld [vmem:[#allocation9 + $0x4cc] ss:$36 sps:$4 sm:$0xff]  }
 0x2ac   : > { %v15191_v10 = vpop.eup %15190  ;;  %v741_v36 = vadd.f32 1e-05, %v733_v19 }
 0x2ad   : > { %v15193_v11 = vpop.eup %15192  ;;  %v754_v37 = vmul.f32 %v15191_v10, %v16433_v22  ;;  %v755_v9 = vmul.f32 %v15191_v10, %v16436_v25  ;;  %v753_v40 = vmul.f32 %v15191_v10, %v16430_v20  ;;  %v831_v45 = vadd.f32 %v16546_v30, %v791_v24  ;;  %v14036_v25 = vld [vmem:[#allocation9 + $0x18] ss:$36 sps:$4 sm:$0xff]   ;;  %v14045_v10 = vld [vmem:[#allocation9 + $0x4c8] ss:$36 sps:$4 sm:$0xff]  }
 0x2ae   : > { %15202 = vrsqrt.f32 %v741_v36  ;;  %v757_v42 = vmul.f32 %v15193_v11, %v16412_v13  ;;  %v832_v22 = vadd.f32 %v16550_v35, %v792_v31  ;;  %v758_v20 = vmul.f32 %v15193_v11, %v16415_v15 }
 0x2af   : > { %v794_v43 = vmul.f32 %v16533_v63, %v754_v37  ;;  %v795_v49 = vmul.f32 %v16536_v3, %v755_v9  ;;  %v793_v53 = vmul.f32 %v16542_v23, %v753_v40  ;;  %v756_v55 = vmul.f32 %v15193_v11, %v16409_v12 }
 0x2b0   : > { %v15195_v51 = vpop.eup %15194  ;;  %v797_v54 = vmul.f32 %v16533_v63, %v757_v42  ;;  %v830_v14 = vadd.f32 %v16555_v38, %v790_v41  ;;  %v798_v21 = vmul.f32 %v16536_v3, %v758_v20  ;;  %v14050_v42 = vld [vmem:[#allocation9 + $0xac] ss:$36 sps:$4 sm:$0xff]  }
 0x2b1   : > { %v834_v13 = vadd.f32 %v16546_v30, %v794_v43  ;;  %v835_v58 = vadd.f32 %v16550_v35, %v795_v49  ;;  %v760_v60 = vmul.f32 %v15195_v51, %v16442_v29  ;;  %v761_v62 = vmul.f32 %v15195_v51, %v16445_v33  ;;  %v15197_v7 = vpop.eup %15196  ;;  %v14053_v43 = vld [vmem:[#allocation9 + $0x514] ss:$36 sps:$4 sm:$0xff]  }
 0x2b2   : > { %v833_v16 = vadd.f32 %v16555_v38, %v793_v53  ;;  %v759_v15 = vmul.f32 %v15195_v51, %v16439_v27  ;;  %v837_v33 = vadd.f32 %v16546_v30, %v797_v54  ;;  %v14042_v27 = vld [vmem:[#allocation9 + $0x60] ss:$36 sps:$4 sm:$0xff]   ;;  %v796_v36 = vmul.f32 %v16542_v23, %v756_v55 }
 0x2b3   : > { %v16575_v4 = vpack.c.bf16 %v834_v13, %v831_v45  ;;  %v16577_v12 = vpack.c.bf16 %v835_v58, %v832_v22  ;;  %v800_v17 = vmul.f32 %v16533_v63, %v760_v60  ;;  %v801_v18 = vmul.f32 %v16536_v3, %v761_v62  ;;  %v14056_v58 = vld [vmem:[#allocation9 + $0xf4] ss:$36 sps:$4 sm:$0xff]  }
 0x2b4   : > { %v15199_v19 = vpop.eup %15198  ;;  %v16581_v29 = vpack.c.bf16 %v833_v16, %v830_v14  ;;  %v799_v24 = vmul.f32 %v16542_v23, %v759_v15  ;;  %v763_v11 = vmul.f32 %v15197_v7, %v16459_v46  ;;  %v14048_v46 = vld [vmem:[#allocation9 + $0xa8] ss:$36 sps:$4 sm:$0xff]   ;;  %v838_v22 = vadd.f32 %v16550_v35, %v798_v21 }
 0x2b5   : > { %2242 = vmatprep.mubr.bf16.mxu0 %v16575_v4  ;;  %2462 = vmatmul.mubr.bf16.vlgmr.msra.gmra.mrb[0].mxu1 %v16577_v12  ;;  %v840_v31 = vadd.f32 %v16546_v30, %v800_v17  ;;  %v841_v37 = vadd.f32 %v16550_v35, %v801_v18  ;;  %v766_v9 = vmul.f32 %v15199_v19, %v16467_v52  ;;  %v16594_v40 = vpop.eup %15200  ;;  %v14062_v17 = vld [vmem:[#allocation9 + $0x13c] ss:$36 sps:$4 sm:$0xff]   ;;  %v14065_v18 = vld [vmem:[#allocation9 + $0x5a4] ss:$36 sps:$4 sm:$0xff]  }
 0x2b6   : > { %2649 = vmatpush1.bf16.msra.mxu1 %v14036_v25  ;;  %2243 = vmatmul.mubr.bf16.vlgmr.msra.gmra.mrb[0].mxu0 %v16581_v29  ;;  %v803_v45 = vmul.f32 %v16533_v63, %v763_v11  ;;  %v839_v51 = vadd.f32 %v16555_v38, %v799_v24  ;;  %v14051_v25 = vld [vmem:[#allocation9 + $0x510] ss:$36 sps:$4 sm:$0xff]   ;;  %v836_v53 = vadd.f32 %v16555_v38, %v796_v36  ;;  %v14060_v24 = vld [vmem:[#allocation9 + $0x138] ss:$36 sps:$4 sm:$0xff]  }
 0x2b7   : > { %2284 = vmatpush1.bf16.msra.mxu0 %v14039_v57  ;;  %2650 = vmatprep.subr.bf16.mxu1 %v14044_v59  ;;  %v16596_v41 = vpack.c.bf16 %v840_v31, %v837_v33  ;;  %v806_v52 = vmul.f32 %v16533_v63, %v766_v9  ;;  %v764_v54 = vmul.f32 %v15197_v7, %v16472_v56  ;;  %v14059_v59 = vld [vmem:[#allocation9 + $0x55c] ss:$36 sps:$4 sm:$0xff]  }
 0x2b8   : > { %v15203_v49 = vpop.eup %15202  ;;  %2285 = vmatprep.subr.bf16.mxu0 %v14047_v2  ;;  %2471 = vmatprep.mubr.bf16.mxu1 %v18925_v28  ;;  %v767_v20 = vmul.f32 %v15199_v19, %v16481_v8  ;;  %v765_v55 = vmul.f32 %v15199_v19, %v16464_v50  ;;  %v16608_v13 = vpack.c.bf16 %v841_v37, %v838_v22  ;;  %v14063_v31 = vld [vmem:[#allocation9 + $0x5a0] ss:$36 sps:$4 sm:$0xff]  }
 0x2b9   : > { %2252 = vmatprep.mubr.bf16.mxu0 %v16596_v41  ;;  %v846_v57 = vadd.f32 %v16546_v30, %v806_v52  ;;  %v762_v60 = vmul.f32 %v15197_v7, %v16456_v44  ;;  %v772_v62 = vmul.f32 %v15203_v49, %v16493_v6  ;;  %v843_v14 = vadd.f32 %v16546_v30, %v803_v45  ;;  %v14054_v44 = vld [vmem:[#allocation9 + $0xf0] ss:$36 sps:$4 sm:$0xff]   ;;  %v14057_v6 = vld [vmem:[#allocation9 + $0x558] ss:$36 sps:$4 sm:$0xff]  }
 0x2ba   : > { %2651 = vmatpush1.bf16.msra.mxu1 %v14042_v27  ;;  %v807_v56 = vmul.f32 %v16536_v3, %v767_v20  ;;  %v769_v50 = vmul.f32 %v16594_v40, %v16487_v1  ;;  %v16617_v8 = vpack.c.bf16 %v839_v51, %v836_v53  ;;  %v805_v16 = vmul.f32 %v16542_v23, %v765_v55  ;;  %v14071_v45 = vld [vmem:[#allocation9 + $0x5ec] ss:$36 sps:$4 sm:$0xff]   ;;  %v14077_v52 = vld [vmem:[#allocation9 + $0x634] ss:$36 sps:$4 sm:$0xff]  }
 0x2bb   : > { %2286 = vmatpush1.bf16.msra.mxu0 %v14045_v10  ;;  %2652 = vmatprep.subr.bf16.mxu1 %v14050_v42  ;;  %v16621_v2 = vpack.c.bf16 %v846_v57, %v843_v14  ;;  %v804_v7 = vmul.f32 %v16536_v3, %v764_v54  ;;  %v812_v15 = vmul.f32 %v16533_v63, %v772_v62  ;;  %v14074_v51 = vld [vmem:[#allocation9 + $0x1cc] ss:$36 sps:$4 sm:$0xff]   ;;  %v14080_v57 = vld [vmem:[#allocation9 + $0x214] ss:$36 sps:$4 sm:$0xff]  }
 0x2bc   : > { %2287 = vmatprep.subr.bf16.mxu0 %v14053_v43  ;;  %v802_v1 = vmul.f32 %v16542_v23, %v762_v60  ;;  %v847_v19 = vadd.f32 %v16550_v35, %v807_v56  ;;  %v809_v33 = vmul.f32 %v16533_v63, %v769_v50  ;;  %v773_v21 = vmul.f32 %v15203_v49, %v16509_v34  ;;  %v14068_v43 = vld [vmem:[#allocation9 + $0x184] ss:$36 sps:$4 sm:$0xff]   ;;  %v14078_v60 = vld [vmem:[#allocation9 + $0x210] ss:$36 sps:$4 sm:$0xff]   ;;  %v14081_v62 = vld [vmem:[#allocation9 + $0x678] ss:$36 sps:$4 sm:$0xff]  }
 0x2bd   : > { %2472 = vmatmul.mubr.bf16.gmra.mrb[4].mxu1 %v16608_v13  ;;  %v845_v27 = vadd.f32 %v16555_v38, %v805_v16  ;;  %v844_v10 = vadd.f32 %v16550_v35, %v804_v7  ;;  %v852_v36 = vadd.f32 %v16546_v30, %v812_v15  ;;  %v770_v11 = vmul.f32 %v16594_v40, %v16502_v26  ;;  %v14072_v53 = vld [vmem:[#allocation9 + $0x1c8] ss:$36 sps:$4 sm:$0xff]   ;;  %v14084_v14 = vld [vmem:[#allocation9 + $0x258] ss:$36 sps:$4 sm:$0xff]  }
 0x2be   : > { %2653 = vmatpush1.bf16.msra.mxu1 %v14048_v46  ;;  %2253 = vmatmul.mubr.bf16.gmra.mrb[4].mxu0 %v16617_v8  ;;  %v771_v37 = vmul.f32 %v15203_v49, %v16490_v5  ;;  %v842_v34 = vadd.f32 %v16555_v38, %v802_v1  ;;  %v768_v63 = vmul.f32 %v16594_v40, %v16484_v0  ;;  %v14066_v5 = vld [vmem:[#allocation9 + $0x180] ss:$36 sps:$4 sm:$0xff]   ;;  %v14069_v0 = vld [vmem:[#allocation9 + $0x5e8] ss:$36 sps:$4 sm:$0xff]   ;;  %v14095_v16 = vld [vmem:[#allocation9 + $0x54] ss:$36 sps:$4 sm:$0xff]  }
 0x2bf   : > { %2288 = vmatpush1.bf16.msra.mxu0 %v14051_v25  ;;  %2262 = vmatprep.mubr.bf16.mxu0 %v16621_v2  ;;  %v16641_v9 = vpack.c.bf16 %v847_v19, %v844_v10  ;;  %v849_v42 = vadd.f32 %v16546_v30, %v809_v33  ;;  %v813_v46 = vmul.f32 %v16536_v3, %v773_v21  ;;  %v14087_v56 = vld [vmem:[#allocation9 + $0x8] ss:$36 sps:$4 sm:$0xff]   ;;  %v14101_v15 = vld [vmem:[#allocation9 + $0x9c] ss:$36 sps:$4 sm:$0xff]   ;;  %v14102_v33 = vld [vmem:[#allocation9 + $0x330] ss:$36 sps:$4 sm:$0xff]  }
 0x2c0   : > { %2654 = vmatprep.subr.bf16.mxu1 %v14056_v58  ;;  %2289 = vmatprep.subr.bf16.mxu0 %v14059_v59  ;;  %v16645_v26 = vpack.c.bf16 %v845_v27, %v842_v34  ;;  %v811_v49 = vmul.f32 %v16542_v23, %v771_v37  ;;  %v810_v40 = vmul.f32 %v16536_v3, %v770_v11  ;;  %v14075_v3 = vld [vmem:[#allocation9 + $0x630] ss:$36 sps:$4 sm:$0xff]   ;;  %v14083_v58 = vld [vmem:[#allocation9 + $0x67c] ss:$36 sps:$4 sm:$0xff]   ;;  %v14092_v50 = vld [vmem:[#allocation9 + $0x2a4] ss:$36 sps:$4 sm:$0xff]  }
 0x2c1   : > { %2481 = vmatprep.mubr.bf16.mxu1 %v18925_v28  ;;  %v16649_v22 = vpack.c.bf16 %v852_v36, %v849_v42  ;;  %v808_v30 = vmul.f32 %v16542_v23, %v768_v63  ;;  %v853_v25 = vadd.f32 %v16550_v35, %v813_v46  ;;  %v14098_v7 = vld [vmem:[#allocation9 + $0x2ec] ss:$36 sps:$4 sm:$0xff]   ;;  %v14107_v19 = vld [vmem:[#allocation9 + $0xe4] ss:$36 sps:$4 sm:$0xff]   ;;  %v14119_v11 = vld [vmem:[#allocation9 + $0x174] ss:$36 sps:$4 sm:$0xff]  }
 0x2c2   : > { %2655 = vmatpush1.bf16.msra.mxu1 %v14054_v44  ;;  %v851_v54 = vadd.f32 %v16555_v38, %v811_v49  ;;  %v850_v20 = vadd.f32 %v16550_v35, %v810_v40  ;;  %v14086_v35 = vld [vmem:[#allocation9 + $0x25c] ss:$36 sps:$4 sm:$0xff]   ;;  %v14096_v1 = vld [vmem:[#allocation9 + $0x2e8] ss:$36 sps:$4 sm:$0xff]   ;;  %v14117_v34 = vld [vmem:[#allocation9 + $0x170] ss:$36 sps:$4 sm:$0xff]  }
 0x2c3   : > { %2290 = vmatpush1.bf16.msra.mxu0 %v14057_v6  ;;  %2656 = vmatprep.subr.bf16.mxu1 %v14062_v17  ;;  %v848_v23 = vadd.f32 %v16555_v38, %v808_v30  ;;  %v14089_v38 = vld [vmem:[#allocation9 + $0xc] ss:$36 sps:$4 sm:$0xff]   ;;  %v14090_v44 = vld [vmem:[#allocation9 + $0x2a0] ss:$36 sps:$4 sm:$0xff]   ;;  %v14099_v17 = vld [vmem:[#allocation9 + $0x98] ss:$36 sps:$4 sm:$0xff]  }
 0x2c4   : > { %2291 = vmatprep.subr.bf16.mxu0 %v14065_v18  ;;  %v16660_v55 = vpack.c.bf16 %v853_v25, %v850_v20  ;;  %v14093_v6 = vld [vmem:[#allocation9 + $0x50] ss:$36 sps:$4 sm:$0xff]   ;;  %v14105_v21 = vld [vmem:[#allocation9 + $0xe0] ss:$36 sps:$4 sm:$0xff]   ;;  %v14111_v10 = vld [vmem:[#allocation9 + $0x128] ss:$36 sps:$4 sm:$0xff]  }
 0x2c5   : > { %2482 = vmatmul.mubr.bf16.gmra.mrb[8].mxu1 %v16641_v9  ;;  %v16662_v59 = vpack.c.bf16 %v851_v54, %v848_v23  ;;  %v14104_v18 = vld [vmem:[#allocation9 + $0x334] ss:$36 sps:$4 sm:$0xff]   ;;  %v14113_v27 = vld [vmem:[#allocation9 + $0x12c] ss:$36 sps:$4 sm:$0xff]   ;;  %v14116_v36 = vld [vmem:[#allocation9 + $0x3c4] ss:$36 sps:$4 sm:$0xff]  }
 0x2c6   : > { %2657 = vmatpush1.bf16.msra.mxu1 %v14060_v24  ;;  %2263 = vmatmul.mubr.bf16.gmra.mrb[8].mxu0 %v16645_v26  ;;  %v14110_v24 = vld [vmem:[#allocation9 + $0x37c] ss:$36 sps:$4 sm:$0xff]   ;;  %v14122_v63 = vld [vmem:[#allocation9 + $0x40c] ss:$36 sps:$4 sm:$0xff]   ;;  %v14128_v46 = vld [vmem:[#allocation9 + $0x454] ss:$36 sps:$4 sm:$0xff]  }
 0x2c7   : > { %2292 = vmatpush1.bf16.msra.mxu0 %v14063_v31  ;;  %2272 = vmatprep.mubr.bf16.mxu0 %v16649_v22  ;;  %v14108_v31 = vld [vmem:[#allocation9 + $0x378] ss:$36 sps:$4 sm:$0xff]   ;;  %v14114_v37 = vld [vmem:[#allocation9 + $0x3c0] ss:$36 sps:$4 sm:$0xff]   ;;  %v14126_v49 = vld [vmem:[#allocation9 + $0x450] ss:$36 sps:$4 sm:$0xff]  }
 0x2c8   : > { %2658 = vmatprep.subr.bf16.mxu1 %v14068_v43  ;;  %2293 = vmatprep.subr.bf16.mxu0 %v14071_v45  ;;  %v14125_v42 = vld [vmem:[#allocation9 + $0x1bc] ss:$36 sps:$4 sm:$0xff]   ;;  %v14120_v43 = vld [vmem:[#allocation9 + $0x408] ss:$36 sps:$4 sm:$0xff]  }
 0x2c9   : > { %2491 = vmatprep.mubr.bf16.mxu1 %v18925_v28  ;;  %v14123_v45 = vld [vmem:[#allocation9 + $0x1b8] ss:$36 sps:$4 sm:$0xff]   ;;  %v14137_v30 = vld [vmem:[#allocation9 + $0x24c] ss:$36 sps:$4 sm:$0xff]   ;;  %v14140_v25 = vld [vmem:[#allocation9 + $0x4e4] ss:$36 sps:$4 sm:$0xff]  }
 0x2ca   : > { %2659 = vmatpush1.bf16.msra.mxu1 %v14066_v5  ;;  %v14131_v5 = vld [vmem:[#allocation9 + $0x204] ss:$36 sps:$4 sm:$0xff]   ;;  %v14134_v40 = vld [vmem:[#allocation9 + $0x49c] ss:$36 sps:$4 sm:$0xff]   ;;  %v14146_v20 = vld [vmem:[#allocation9 + $0x52c] ss:$36 sps:$4 sm:$0xff]  }
 0x2cb   : > { %2294 = vmatpush1.bf16.msra.mxu0 %v14069_v0  ;;  %2660 = vmatprep.subr.bf16.mxu1 %v14074_v51  ;;  %v14129_v0 = vld [vmem:[#allocation9 + $0x200] ss:$36 sps:$4 sm:$0xff]   ;;  %v14132_v51 = vld [vmem:[#allocation9 + $0x498] ss:$36 sps:$4 sm:$0xff]   ;;  %v14144_v23 = vld [vmem:[#allocation9 + $0x528] ss:$36 sps:$4 sm:$0xff]  }
 0x2cc   : > { %2295 = vmatprep.subr.bf16.mxu0 %v14077_v52  ;;  %v14135_v52 = vld [vmem:[#allocation9 + $0x248] ss:$36 sps:$4 sm:$0xff]   ;;  %v14138_v54 = vld [vmem:[#allocation9 + $0x4e0] ss:$36 sps:$4 sm:$0xff]  }
 0x2cd   : > { %2492 = vmatmul.mubr.bf16.gmra.mrb[12].mxu1 %v16660_v55 }
 0x2ce   : > { %2661 = vmatpush1.bf16.msra.mxu1 %v14072_v53  ;;  %2273 = vmatmul.mubr.bf16.gmra.mrb[12].mxu0 %v16662_v59  ;;  %v14143_v53 = vld [vmem:[#allocation9 + $0x294] ss:$36 sps:$4 sm:$0xff]  }
 0x2cf   : > { %2296 = vmatpush1.bf16.msra.mxu0 %v14075_v3  ;;  %2680 = vmatprep.mubr.bf16.mxu1 %v16575_v4  ;;  %v14141_v3 = vld [vmem:[#allocation9 + $0x290] ss:$36 sps:$4 sm:$0xff]  }
 0x2d0   : > { %2662 = vmatprep.subr.bf16.mxu1 %v14080_v57  ;;  %2297 = vmatprep.subr.bf16.mxu0 %v14083_v58  ;;  %v14149_v57 = vld [vmem:[#allocation9 + $0x2dc] ss:$36 sps:$4 sm:$0xff]  }
 0x2d1   : > { %2315 = vmatprep.mubr.bf16.mxu0 %v18925_v28  ;;  %v14147_v58 = vld [vmem:[#allocation9 + $0x2d8] ss:$36 sps:$4 sm:$0xff]  }
 0x2d2   : > { %2663 = vmatpush1.bf16.msra.mxu1 %v14078_v60  ;;  %v14152_v60 = vld [vmem:[#allocation9 + $0x574] ss:$36 sps:$4 sm:$0xff]  }
 0x2d3   : > { %2298 = vmatpush1.bf16.msra.mxu0 %v14081_v62  ;;  %2664 = vmatprep.subr.bf16.mxu1 %v14086_v35  ;;  %v14155_v62 = vld [vmem:[#allocation9 + $0x324] ss:$36 sps:$4 sm:$0xff]   ;;  %v14150_v35 = vld [vmem:[#allocation9 + $0x570] ss:$36 sps:$4 sm:$0xff]  }
 0x2d4   : > { %2356 = vmatprep.subr.bf16.mxu0 %v14089_v38  ;;  %v14153_v38 = vld [vmem:[#allocation9 + $0x320] ss:$36 sps:$4 sm:$0xff]  }
 0x2d6   : > { %2665 = vmatpush1.bf16.msra.mxu1 %v14084_v14  ;;  %2316 = vmatmul.mubr.bf16.vlgmr.msra.gmra.mrb[0].mxu0 %v16577_v12  ;;  %v14158_v14 = vld [vmem:[#allocation9 + $0x5bc] ss:$36 sps:$4 sm:$0xff]  }
 0x2d7   : > { %2357 = vmatpush1.bf16.msra.mxu0 %v14087_v56  ;;  %2666 = vmatprep.subr.bf16.mxu1 %v14092_v50  ;;  %v14156_v56 = vld [vmem:[#allocation9 + $0x5b8] ss:$36 sps:$4 sm:$0xff]   ;;  %v14161_v50 = vld [vmem:[#allocation9 + $0x36c] ss:$36 sps:$4 sm:$0xff]  }
 0x2d8   : > { %2358 = vmatprep.subr.bf16.mxu0 %v14095_v16  ;;  %2325 = vmatprep.mubr.bf16.mxu0 %v18925_v28  ;;  %v14159_v16 = vld [vmem:[#allocation9 + $0x368] ss:$36 sps:$4 sm:$0xff]  }
 0x2da   : > { %2667 = vmatpush1.bf16.msra.mxu1 %v14090_v44  ;;  %v14164_v44 = vld [vmem:[#allocation9 + $0x604] ss:$36 sps:$4 sm:$0xff]  }
 0x2db   : > { %2359 = vmatpush1.bf16.msra.mxu0 %v14093_v6  ;;  %2668 = vmatprep.subr.bf16.mxu1 %v14098_v7  ;;  %v14167_v6 = vld [vmem:[#allocation9 + $0x3b4] ss:$36 sps:$4 sm:$0xff]   ;;  %v14162_v7 = vld [vmem:[#allocation9 + $0x600] ss:$36 sps:$4 sm:$0xff]  }
 0x2dc   : > { %2360 = vmatprep.subr.bf16.mxu0 %v14101_v15  ;;  %v14165_v15 = vld [vmem:[#allocation9 + $0x3b0] ss:$36 sps:$4 sm:$0xff]  }
 0x2de   : > { %2669 = vmatpush1.bf16.msra.mxu1 %v14096_v1  ;;  %2326 = vmatmul.mubr.bf16.gmra.mrb[4].mxu0 %v16608_v13  ;;  %v14170_v1 = vld [vmem:[#allocation9 + $0x64c] ss:$36 sps:$4 sm:$0xff]  }
 0x2df   : > { %2361 = vmatpush1.bf16.msra.mxu0 %v14099_v17  ;;  %2670 = vmatprep.subr.bf16.mxu1 %v14104_v18  ;;  %v14173_v17 = vld [vmem:[#allocation9 + $0x3fc] ss:$36 sps:$4 sm:$0xff]   ;;  %v14168_v18 = vld [vmem:[#allocation9 + $0x648] ss:$36 sps:$4 sm:$0xff]  }
 0x2e0   : > { %2362 = vmatprep.subr.bf16.mxu0 %v14107_v19  ;;  %2335 = vmatprep.mubr.bf16.mxu0 %v18925_v28  ;;  %v14171_v19 = vld [vmem:[#allocation9 + $0x3f8] ss:$36 sps:$4 sm:$0xff]  }
 0x2e2   : > { %2671 = vmatpush1.bf16.msra.mxu1 %v14102_v33  ;;  %v14176_v33 = vld [vmem:[#allocation9 + $0x694] ss:$36 sps:$4 sm:$0xff]  }
 0x2e3   : > { %2363 = vmatpush1.bf16.msra.mxu0 %v14105_v21  ;;  %2672 = vmatprep.subr.bf16.mxu1 %v14110_v24  ;;  %v14179_v21 = vld [vmem:[#allocation9 + $0x444] ss:$36 sps:$4 sm:$0xff]   ;;  %v14174_v24 = vld [vmem:[#allocation9 + $0x690] ss:$36 sps:$4 sm:$0xff]  }
 0x2e4   : > { %2364 = vmatprep.subr.bf16.mxu0 %v14113_v27  ;;  %v14177_v27 = vld [vmem:[#allocation9 + $0x440] ss:$36 sps:$4 sm:$0xff]  }
 0x2e6   : > { %2673 = vmatpush1.bf16.msra.mxu1 %v14108_v31  ;;  %2336 = vmatmul.mubr.bf16.gmra.mrb[8].mxu0 %v16641_v9  ;;  %v14180_v31 = vld [vmem:[#allocation9 + $0x4a0] ss:$36 sps:$4 sm:$0xff]  }
 0x2e7   : > { %2365 = vmatpush1.bf16.msra.mxu0 %v14111_v10  ;;  %2674 = vmatprep.subr.bf16.mxu1 %v14116_v36  ;;  %v14183_v10 = vld [vmem:[#allocation9 + $0x14] ss:$36 sps:$4 sm:$0xff]  }
 0x2e8   : > { %2366 = vmatprep.subr.bf16.mxu0 %v14119_v11  ;;  %2345 = vmatprep.mubr.bf16.mxu0 %v18925_v28  ;;  %v14181_v36 = vld [vmem:[#allocation9 + $0x10] ss:$36 sps:$4 sm:$0xff]   ;;  %v14184_v11 = vld [vmem:[#allocation9 + $0x4e8] ss:$36 sps:$4 sm:$0xff]  }
 0x2ea   : > { %2675 = vmatpush1.bf16.msra.mxu1 %v14114_v37  ;;  %v14187_v37 = vld [vmem:[#allocation9 + $0x5c] ss:$36 sps:$4 sm:$0xff]  }
 0x2eb   : > { %2367 = vmatpush1.bf16.msra.mxu0 %v14117_v34  ;;  %2676 = vmatprep.subr.bf16.mxu1 %v14122_v63  ;;  %v14185_v34 = vld [vmem:[#allocation9 + $0x58] ss:$36 sps:$4 sm:$0xff]   ;;  %v14188_v63 = vld [vmem:[#allocation9 + $0x530] ss:$36 sps:$4 sm:$0xff]  }
 0x2ec   : > { %2368 = vmatprep.subr.bf16.mxu0 %v14125_v42  ;;  %v14191_v42 = vld [vmem:[#allocation9 + $0xa4] ss:$36 sps:$4 sm:$0xff]  }
 0x2ee   : > { %2677 = vmatpush1.bf16.msra.mxu1 %v14120_v43  ;;  %2346 = vmatmul.mubr.bf16.gmra.mrb[12].mxu0 %v16660_v55  ;;  %v14189_v43 = vld [vmem:[#allocation9 + $0xa0] ss:$36 sps:$4 sm:$0xff]  }
 0x2ef   : > { %2369 = vmatpush1.bf16.msra.mxu0 %v14123_v45  ;;  %2388 = vmatprep.mubr.bf16.mxu0 %v16575_v4  ;;  %v14192_v45 = vld [vmem:[#allocation9 + $0x578] ss:$36 sps:$4 sm:$0xff]  }
 0x2f0   : > { %2678 = vmatprep.subr.bf16.mxu1 %v14128_v46  ;;  %2370 = vmatprep.subr.bf16.mxu0 %v14131_v5  ;;  %v14195_v46 = vld [vmem:[#allocation9 + $0xec] ss:$36 sps:$4 sm:$0xff]  }
 0x2f1   : > { %v14193_v5 = vld [vmem:[#allocation9 + $0xe8] ss:$36 sps:$4 sm:$0xff]  }
 0x2f2   : > { %2679 = vmatpush1.bf16.msra.mxu1 %v14126_v49  ;;  %v14196_v49 = vld [vmem:[#allocation9 + $0x5c0] ss:$36 sps:$4 sm:$0xff]  }
 0x2f3   : > { %2371 = vmatpush1.bf16.msra.mxu0 %v14129_v0  ;;  %2721 = vmatprep.subr.bf16.mxu1 %v14134_v40  ;;  %v14199_v0 = vld [vmem:[#allocation9 + $0x134] ss:$36 sps:$4 sm:$0xff]  }
 0x2f4   : > { %2372 = vmatprep.subr.bf16.mxu0 %v14137_v30  ;;  %v14197_v40 = vld [vmem:[#allocation9 + $0x130] ss:$36 sps:$4 sm:$0xff]   ;;  %v14200_v30 = vld [vmem:[#allocation9 + $0x608] ss:$36 sps:$4 sm:$0xff]  }
 0x2f5   : > { %2681 = vmatmul.mubr.bf16.vlgmr.msra.gmra.mrb[16].mxu1 %v16581_v29 }
 0x2f6   : > { %2690 = vmatprep.mubr.bf16.mxu1 %v16596_v41  ;;  %2722 = vmatpush1.bf16.msra.mxu1 %v14132_v51  ;;  %v14203_v51 = vld [vmem:[#allocation9 + $0x17c] ss:$36 sps:$4 sm:$0xff]  }
 0x2f7   : > { %2373 = vmatpush1.bf16.msra.mxu0 %v14135_v52  ;;  %2723 = vmatprep.subr.bf16.mxu1 %v14140_v25  ;;  %v14201_v52 = vld [vmem:[#allocation9 + $0x178] ss:$36 sps:$4 sm:$0xff]   ;;  %v14204_v25 = vld [vmem:[#allocation9 + $0x650] ss:$36 sps:$4 sm:$0xff]  }
 0x2f8   : > { %2374 = vmatprep.subr.bf16.mxu0 %v14143_v53  ;;  %v14207_v53 = vld [vmem:[#allocation9 + $0x1c4] ss:$36 sps:$4 sm:$0xff]  }
 0x2fa   : > { %2724 = vmatpush1.bf16.msra.mxu1 %v14138_v54  ;;  %v14205_v54 = vld [vmem:[#allocation9 + $0x1c0] ss:$36 sps:$4 sm:$0xff]  }
 0x2fb   : > { %2375 = vmatpush1.bf16.msra.mxu0 %v14141_v3  ;;  %2725 = vmatprep.subr.bf16.mxu1 %v14146_v20  ;;  %v14208_v3 = vld [vmem:[#allocation9 + $0x698] ss:$36 sps:$4 sm:$0xff]   ;;  %v14211_v20 = vld [vmem:[#allocation9 + $0x20c] ss:$36 sps:$4 sm:$0xff]  }
 0x2fc   : > { %2376 = vmatprep.subr.bf16.mxu0 %v14149_v57  ;;  %v14214_v57 = vld [vmem:[#allocation9 + $0x254] ss:$36 sps:$4 sm:$0xff]  }
 0x2fd   : > { %2691 = vmatmul.mubr.bf16.gmra.mrb[20].mxu1 %v16617_v8 }
 0x2fe   : > { %2700 = vmatprep.mubr.bf16.mxu1 %v16621_v2  ;;  %2726 = vmatpush1.bf16.msra.mxu1 %v14144_v23  ;;  %v14209_v23 = vld [vmem:[#allocation9 + $0x208] ss:$36 sps:$4 sm:$0xff]  }
 0x2ff   : > { %2377 = vmatpush1.bf16.msra.mxu0 %v14147_v58  ;;  %2727 = vmatprep.subr.bf16.mxu1 %v14152_v60  ;;  %v14212_v58 = vld [vmem:[#allocation9 + $0x250] ss:$36 sps:$4 sm:$0xff]   ;;  %v14217_v60 = vld [vmem:[#allocation9 + $0x29c] ss:$36 sps:$4 sm:$0xff]  }
 0x300   : > { %2378 = vmatprep.subr.bf16.mxu0 %v14155_v62  ;;  %v14215_v62 = vld [vmem:[#allocation9 + $0x298] ss:$36 sps:$4 sm:$0xff]  }
 0x302   : > { %2728 = vmatpush1.bf16.msra.mxu1 %v14150_v35  ;;  %v14220_v35 = vld [vmem:[#allocation9 + $0x2e4] ss:$36 sps:$4 sm:$0xff]  }
 0x303   : > { %2379 = vmatpush1.bf16.msra.mxu0 %v14153_v38  ;;  %2729 = vmatprep.subr.bf16.mxu1 %v14158_v14  ;;  %v14218_v38 = vld [vmem:[#allocation9 + $0x2e0] ss:$36 sps:$4 sm:$0xff]   ;;  %v14223_v14 = vld [vmem:[#allocation9 + $0x32c] ss:$36 sps:$4 sm:$0xff]  }
 0x304   : > { %2380 = vmatprep.subr.bf16.mxu0 %v14161_v50  ;;  %v14226_v50 = vld [vmem:[#allocation9 + $0x374] ss:$36 sps:$4 sm:$0xff]  }
 0x305   : > { %2701 = vmatmul.mubr.bf16.gmra.mrb[24].mxu1 %v16645_v26 }
 0x306   : > { %2710 = vmatprep.mubr.bf16.mxu1 %v16649_v22  ;;  %2730 = vmatpush1.bf16.msra.mxu1 %v14156_v56  ;;  %v14221_v56 = vld [vmem:[#allocation9 + $0x328] ss:$36 sps:$4 sm:$0xff]  }
 0x307   : > { %2381 = vmatpush1.bf16.msra.mxu0 %v14159_v16  ;;  %2731 = vmatprep.subr.bf16.mxu1 %v14164_v44  ;;  %v14224_v16 = vld [vmem:[#allocation9 + $0x370] ss:$36 sps:$4 sm:$0xff]   ;;  %v14229_v44 = vld [vmem:[#allocation9 + $0x3bc] ss:$36 sps:$4 sm:$0xff]  }
 0x308   : > { %2382 = vmatprep.subr.bf16.mxu0 %v14167_v6  ;;  %v14227_v6 = vld [vmem:[#allocation9 + $0x3b8] ss:$36 sps:$4 sm:$0xff]  }
 0x30a   : > { %2732 = vmatpush1.bf16.msra.mxu1 %v14162_v7  ;;  %v14232_v7 = vld [vmem:[#allocation9 + $0x404] ss:$36 sps:$4 sm:$0xff]  }
 0x30b   : > { %2383 = vmatpush1.bf16.msra.mxu0 %v14165_v15  ;;  %2733 = vmatprep.subr.bf16.mxu1 %v14170_v1  ;;  %v14230_v15 = vld [vmem:[#allocation9 + $0x400] ss:$36 sps:$4 sm:$0xff]   ;;  %v14235_v1 = vld [vmem:[#allocation9 + $0x44c] ss:$36 sps:$4 sm:$0xff]  }
 0x30c   : > { %2384 = vmatprep.subr.bf16.mxu0 %v14173_v17  ;;  %v14233_v17 = vld [vmem:[#allocation9 + $0x448] ss:$36 sps:$4 sm:$0xff]  }
 0x30d   : > { %2711 = vmatmul.mubr.bf16.gmra.mrb[28].mxu1 %v16662_v59 }
 0x30e   : > { %2734 = vmatpush1.bf16.msra.mxu1 %v14168_v18  ;;  %2753 = vmatprep.mubr.bf16.mxu1 %v18925_v28  ;;  %v14238_v18 = vld [vmem:[#allocation9 + $0x494] ss:$36 sps:$4 sm:$0xff]  }
 0x30f   : > { %2385 = vmatpush1.bf16.msra.mxu0 %v14171_v19  ;;  %2735 = vmatprep.subr.bf16.mxu1 %v14176_v33  ;;  %v14236_v19 = vld [vmem:[#allocation9 + $0x490] ss:$36 sps:$4 sm:$0xff]   ;;  %v14241_v33 = vld [vmem:[#allocation9 + $0x4dc] ss:$36 sps:$4 sm:$0xff]  }
 0x310   : > { %2386 = vmatprep.subr.bf16.mxu0 %v14179_v21  ;;  %v14239_v21 = vld [vmem:[#allocation9 + $0x4d8] ss:$36 sps:$4 sm:$0xff]  }
 0x312   : > { %2736 = vmatpush1.bf16.msra.mxu1 %v14174_v24  ;;  %v14244_v24 = vld [vmem:[#allocation9 + $0x524] ss:$36 sps:$4 sm:$0xff]  }
 0x313   : > { %2387 = vmatpush1.bf16.msra.mxu0 %v14177_v27  ;;  %13159 = vmatprep.subr.bf16.mxu1 %v14180_v31  ;;  %v14242_v27 = vld [vmem:[#allocation9 + $0x520] ss:$36 sps:$4 sm:$0xff]  }
 0x314   : > { %2502 = vmatprep.subr.bf16.mxu0 %v14183_v10  ;;  %v14245_v10 = vld [vmem:[#allocation9 + $0x568] ss:$36 sps:$4 sm:$0xff]  }
 0x315   : > { %2754 = vmatmul.mubr.bf16.vlgmr.msra.gmra.mrb[16].mxu1 %v16577_v12 }
 0x316   : > { %2389 = vmatmul.mubr.bf16.vlgmr.msra.gmra.mrb[16].mxu0 %v16581_v29  ;;  %13160 = vmatpush3.bf16.msra.mxu1 %v14180_v31  ;;  %v14247_v31 = vld [vmem:[#allocation9 + $0x56c] ss:$36 sps:$4 sm:$0xff]  }
 0x317   : > { %2398 = vmatprep.mubr.bf16.mxu0 %v16596_v41  ;;  %2503 = vmatpush1.bf16.msra.mxu0 %v14181_v36  ;;  %v14250_v36 = vld [vmem:[#allocation9 + $0x5b4] ss:$36 sps:$4 sm:$0xff]  }
 0x318   : > { %13161 = vmatprep.subr.bf16.mxu1 %v14184_v11  ;;  %2504 = vmatprep.subr.bf16.mxu0 %v14187_v37  ;;  %v14253_v37 = vld [vmem:[#allocation9 + $0x5fc] ss:$36 sps:$4 sm:$0xff]  }
 0x319   : > { %2763 = vmatprep.mubr.bf16.mxu1 %v18925_v28 }
 0x31a   : > { %13162 = vmatpush3.bf16.msra.mxu1 %v14184_v11  ;;  %v14248_v11 = vld [vmem:[#allocation9 + $0x5b0] ss:$36 sps:$4 sm:$0xff]  }
 0x31b   : > { %2505 = vmatpush1.bf16.msra.mxu0 %v14185_v34  ;;  %13163 = vmatprep.subr.bf16.mxu1 %v14188_v63  ;;  %v14251_v34 = vld [vmem:[#allocation9 + $0x5f8] ss:$36 sps:$4 sm:$0xff]  }
 0x31c   : > { %2506 = vmatprep.subr.bf16.mxu0 %v14191_v42  ;;  %v14254_v42 = vld [vmem:[#allocation9 + $0x640] ss:$36 sps:$4 sm:$0xff]  }
 0x31d   : > { %2764 = vmatmul.mubr.bf16.gmra.mrb[20].mxu1 %v16608_v13 }
 0x31e   : > { %2399 = vmatmul.mubr.bf16.gmra.mrb[20].mxu0 %v16617_v8  ;;  %13164 = vmatpush3.bf16.msra.mxu1 %v14188_v63  ;;  %v14256_v63 = vld [vmem:[#allocation9 + $0x644] ss:$36 sps:$4 sm:$0xff]  }
 0x31f   : > { %2408 = vmatprep.mubr.bf16.mxu0 %v16621_v2  ;;  %2507 = vmatpush1.bf16.msra.mxu0 %v14189_v43  ;;  %v14259_v43 = vld [vmem:[#allocation9 + $0x68c] ss:$36 sps:$4 sm:$0xff]  }
 0x320   : > { %13165 = vmatprep.subr.bf16.mxu1 %v14192_v45  ;;  %2508 = vmatprep.subr.bf16.mxu0 %v14195_v46  ;;  %v14260_v46 = vld [vmem:[#allocation9 + $0x260] ss:$36 sps:$4 sm:$0xff]  }
 0x321   : > { %2773 = vmatprep.mubr.bf16.mxu1 %v18925_v28 }
 0x322   : > { %13166 = vmatpush3.bf16.msra.mxu1 %v14192_v45  ;;  %v14257_v45 = vld [vmem:[#allocation9 + $0x688] ss:$36 sps:$4 sm:$0xff]  }
 0x323   : > { %2509 = vmatpush1.bf16.msra.mxu0 %v14193_v5  ;;  %13167 = vmatprep.subr.bf16.mxu1 %v14196_v49  ;;  %v14261_v5 = vld [vmem:[#allocation9 + $0x20] ss:$36 sps:$4 sm:$0xff]  }
 0x324   : > { %2510 = vmatprep.subr.bf16.mxu0 %v14199_v0  ;;  %v14263_v0 = vld [vmem:[#allocation9 + $0x68] ss:$36 sps:$4 sm:$0xff]  }
 0x325   : > { %2774 = vmatmul.mubr.bf16.gmra.mrb[24].mxu1 %v16641_v9 }
 0x326   : > { %2409 = vmatmul.mubr.bf16.gmra.mrb[24].mxu0 %v16645_v26  ;;  %13168 = vmatpush3.bf16.msra.mxu1 %v14196_v49  ;;  %v14262_v49 = vld [vmem:[#allocation9 + $0x2a8] ss:$36 sps:$4 sm:$0xff]  }
 0x327   : > { %2418 = vmatprep.mubr.bf16.mxu0 %v16649_v22  ;;  %2511 = vmatpush1.bf16.msra.mxu0 %v14197_v40  ;;  %v14264_v40 = vld [vmem:[#allocation9 + $0x2f0] ss:$36 sps:$4 sm:$0xff]  }
 0x328   : > { %13169 = vmatprep.subr.bf16.mxu1 %v14200_v30  ;;  %2512 = vmatprep.subr.bf16.mxu0 %v14203_v51  ;;  %v14266_v51 = vld [vmem:[#allocation9 + $0x338] ss:$36 sps:$4 sm:$0xff]  }
 0x329   : > { %2783 = vmatprep.mubr.bf16.mxu1 %v18925_v28 }
 0x32a   : > { %13170 = vmatpush3.bf16.msra.mxu1 %v14200_v30  ;;  %v14265_v30 = vld [vmem:[#allocation9 + $0xb0] ss:$36 sps:$4 sm:$0xff]  }
 0x32b   : > { %2513 = vmatpush1.bf16.msra.mxu0 %v14201_v52  ;;  %13171 = vmatprep.subr.bf16.mxu1 %v14204_v25  ;;  %v14267_v52 = vld [vmem:[#allocation9 + $0xf8] ss:$36 sps:$4 sm:$0xff]  }
 0x32c   : > { %2514 = vmatprep.subr.bf16.mxu0 %v14207_v53  ;;  %v14270_v53 = vld [vmem:[#allocation9 + $0x3c8] ss:$36 sps:$4 sm:$0xff]  }
 0x32d   : > { %2784 = vmatmul.mubr.bf16.gmra.mrb[28].mxu1 %v16660_v55 }
 0x32e   : > { %2419 = vmatmul.mubr.bf16.gmra.mrb[28].mxu0 %v16662_v59  ;;  %13172 = vmatpush3.bf16.msra.mxu1 %v14204_v25  ;;  %v14268_v25 = vld [vmem:[#allocation9 + $0x380] ss:$36 sps:$4 sm:$0xff]  }
 0x32f   : > { %13175 = vmatprep.mubr.bf16.mxu1 %v16577_v12  ;;  %2515 = vmatpush1.bf16.msra.mxu0 %v14205_v54  ;;  %v14271_v54 = vld [vmem:[#allocation9 + $0x188] ss:$36 sps:$4 sm:$0xff]  }
 0x330   : > { %2534 = vmatprep.mubr.bf16.mxu0 %v16575_v4  ;;  %13173 = vmatprep.subr.bf16.mxu1 %v14208_v3 }
 0x331   : > { %2516 = vmatprep.subr.bf16.mxu0 %v14211_v20 }
 0x332   : > { %13174 = vmatpush3.bf16.msra.mxu1 %v14208_v3 }
 0x333   : > { %2517 = vmatpush1.bf16.msra.mxu0 %v14209_v23 }
 0x334   : > { %2518 = vmatprep.subr.bf16.mxu0 %v14214_v57 }
 0x335   : > { %13176 = vmatmul.mubr.bf16.vlgmr.msra.gmra.mrb[32].mxu1 %v16608_v13 }
 0x336   : > { %13179 = vmatprep.mubr.bf16.mxu1 %v16641_v9 }
 0x337   : > { %2519 = vmatpush1.bf16.msra.mxu0 %v14212_v58  ;;  %v14273_v58 = vld [vmem:[#allocation9 + $0x1d0] ss:$36 sps:$4 sm:$0xff]  }
 0x338   : > { %2520 = vmatprep.subr.bf16.mxu0 %v14217_v60  ;;  %v14274_v60 = vld [vmem:[#allocation9 + $0x458] ss:$36 sps:$4 sm:$0xff]  }
 0x33b   : > { %2521 = vmatpush1.bf16.msra.mxu0 %v14215_v62 }
 0x33c   : > { %2522 = vmatprep.subr.bf16.mxu0 %v14220_v35 }
 0x33d   : > { %13180 = vmatmul.mubr.bf16.gmra.mrb[36].mxu1 %v16660_v55 }
 0x33f   : > { %2523 = vmatpush1.bf16.msra.mxu0 %v14218_v38 }
 0x340   : > { %2524 = vmatprep.subr.bf16.mxu0 %v14223_v14 }
 0x343   : > { %2525 = vmatpush1.bf16.msra.mxu0 %v14221_v56 }
 0x344   : > { %2526 = vmatprep.subr.bf16.mxu0 %v14226_v50 }
 0x347   : > { %2527 = vmatpush1.bf16.msra.mxu0 %v14224_v16 }
 0x348   : > { %2528 = vmatprep.subr.bf16.mxu0 %v14229_v44 }
 0x34b   : > { %2529 = vmatpush1.bf16.msra.mxu0 %v14227_v6 }
 0x34c   : > { %2530 = vmatprep.subr.bf16.mxu0 %v14232_v7 }
 0x34f   : > { %2531 = vmatpush1.bf16.msra.mxu0 %v14230_v15 }
 0x350   : > { %2532 = vmatprep.subr.bf16.mxu0 %v14235_v1 }
 0x353   : > { %2533 = vmatpush1.bf16.msra.mxu0 %v14233_v17 }
 0x354   : > { %2575 = vmatprep.subr.bf16.mxu0 %v14238_v18 }
 0x356   : > { %2535 = vmatmul.mubr.bf16.vlgmr.msra.gmra.mrb[32].mxu0 %v16581_v29 }
 0x357   : > { %2544 = vmatprep.mubr.bf16.mxu0 %v16596_v41  ;;  %2576 = vmatpush1.bf16.msra.mxu0 %v14236_v19 }
 0x358   : > { %2577 = vmatprep.subr.bf16.mxu0 %v14241_v33 }
 0x35b   : > { %2578 = vmatpush1.bf16.msra.mxu0 %v14239_v21 }
 0x35c   : > { %2579 = vmatprep.subr.bf16.mxu0 %v14244_v24 }
 0x35e   : > { %2545 = vmatmul.mubr.bf16.gmra.mrb[36].mxu0 %v16617_v8 }
 0x35f   : > { %2554 = vmatprep.mubr.bf16.mxu0 %v16621_v2  ;;  %2580 = vmatpush1.bf16.msra.mxu0 %v14242_v27 }
 0x360   : > { %2581 = vmatprep.subr.bf16.mxu0 %v14247_v31 }
 0x363   : > { %2582 = vmatpush1.bf16.msra.mxu0 %v14245_v10 }
 0x364   : > { %2583 = vmatprep.subr.bf16.mxu0 %v14250_v36 }
 0x366   : > { %2555 = vmatmul.mubr.bf16.gmra.mrb[40].mxu0 %v16645_v26 }
 0x367   : > { %2564 = vmatprep.mubr.bf16.mxu0 %v16649_v22  ;;  %2584 = vmatpush1.bf16.msra.mxu0 %v14248_v11 }
 0x368   : > { %2585 = vmatprep.subr.bf16.mxu0 %v14253_v37 }
 0x36b   : > { %2586 = vmatpush1.bf16.msra.mxu0 %v14251_v34 }
 0x36c   : > { %2587 = vmatprep.subr.bf16.mxu0 %v14256_v63 }
 0x36e   : > { %2565 = vmatmul.mubr.bf16.gmra.mrb[44].mxu0 %v16662_v59 }
 0x36f   : > { %2588 = vmatpush1.bf16.msra.mxu0 %v14254_v42  ;;  %2607 = vmatprep.mubr.bf16.mxu0 %v18925_v28 }
 0x370   : > { %2589 = vmatprep.subr.bf16.mxu0 %v14259_v43 }
 0x373   : > { %2590 = vmatpush1.bf16.msra.mxu0 %v14257_v45 }
 0x374   : > { %12719 = vmatprep.subr.bf16.mxu0 %v14260_v46 }
 0x376   : > { %2608 = vmatmul.mubr.bf16.vlgmr.msra.gmra.mrb[32].mxu0 %v16577_v12  ;;  %v14269_v12 = vld [vmem:[#allocation9 + $0x140] ss:$36 sps:$4 sm:$0xff]  }
 0x377   : > { %12720 = vmatpush3.bf16.msra.mxu0 %v14261_v5  ;;  %2617 = vmatprep.mubr.bf16.mxu0 %v18925_v28 }
 0x378   : > { %12721 = vmatprep.subr.bf16.mxu0 %v14262_v49 }
 0x37b   : > { %12722 = vmatpush3.bf16.msra.mxu0 %v14263_v0 }
 0x37c   : > { %12723 = vmatprep.subr.bf16.mxu0 %v14264_v40 }
 0x37e   : > { %2618 = vmatmul.mubr.bf16.gmra.mrb[36].mxu0 %v16608_v13  ;;  %v14272_v13 = vld [vmem:[#allocation9 + $0x410] ss:$36 sps:$4 sm:$0xff]  }
 0x37f   : > { %12724 = vmatpush3.bf16.msra.mxu0 %v14265_v30  ;;  %2627 = vmatprep.mubr.bf16.mxu0 %v18925_v28 }
 0x380   : > { %12725 = vmatprep.subr.bf16.mxu0 %v14266_v51 }
 0x383   : > { %12726 = vmatpush3.bf16.msra.mxu0 %v14267_v52 }
 0x384   : > { %12727 = vmatprep.subr.bf16.mxu0 %v14268_v25 }
 0x386   : > { %2628 = vmatmul.mubr.bf16.gmra.mrb[40].mxu0 %v16641_v9  ;;  %v14275_v9 = vld [vmem:[#allocation9 + $0x218] ss:$36 sps:$4 sm:$0xff]  }
 0x387   : > { %12728 = vmatpush3.bf16.msra.mxu0 %v14269_v12  ;;  %2637 = vmatprep.mubr.bf16.mxu0 %v18925_v28 }
 0x388   : > { %v16717_v3 = vpop.f32.mrb[0].mxu1  ;;  %12729 = vmatprep.subr.bf16.mxu0 %v14270_v53 }
 0x389   : > { %v16719_v20 = vpop.f32.mrb[1].mxu1 }
 0x38a   : > { %v16721_v23 = vpop.f32.mrb[2].mxu1 }
 0x38b   : > { %12730 = vmatpush3.bf16.msra.mxu0 %v14271_v54  ;;  %v16723_v57 = vpop.f32.mrb[3].mxu1 }
 0x38c   : > { %12731 = vmatprep.subr.bf16.mxu0 %v14272_v13 }
 0x38e   : > { %2638 = vmatmul.mubr.bf16.gmra.mrb[44].mxu0 %v16660_v55 }
 0x38f   : > { %12732 = vmatpush3.bf16.msra.mxu0 %v14273_v58  ;;  %2826 = vmatprep.mubr.bf16.mxu0 %v16575_v4 }
 0x390   : > { %v16727_v62 = vpop.f32.mrb[4].mxu1  ;;  %12733 = vmatprep.subr.bf16.mxu0 %v14274_v60 }
 0x391   : > { %v16729_v35 = vpop.f32.mrb[5].mxu1 }
 0x392   : > { %v16731_v38 = vpop.f32.mrb[6].mxu1 }
 0x393   : > { %12734 = vmatpush3.bf16.msra.mxu0 %v14275_v9  ;;  %v16733_v14 = vpop.f32.mrb[7].mxu1 }
 0x396   : > { %2827 = vmatmul.mubr.bf16.vlgmr.msra.gmra.mrb[48].mxu0 %v16581_v29 }
 0x397   : > { %2834 = vmatprep.mubr.bf16.mxu0 %v16596_v41 }
 0x398   : > { %v16737_v56 = vpop.f32.mrb[8].mxu1 }
 0x399   : > { %v16739_v55 = vpop.f32.mrb[9].mxu1 }
 0x39a   : > { %v16741_v4 = vpop.f32.mrb[10].mxu1 }
 0x39b   : > { %v16743_v50 = vpop.f32.mrb[11].mxu1 }
 0x39e   : > { %2835 = vmatmul.mubr.bf16.gmra.mrb[52].mxu0 %v16617_v8 }
 0x39f   : > { %2842 = vmatprep.mubr.bf16.mxu0 %v16621_v2 }
 0x3a0   : > { %v16747_v16 = vpop.f32.mrb[12].mxu1 }
 0x3a1   : > { %v16749_v44 = vpop.f32.mrb[13].mxu1 }
 0x3a2   : > { %v16751_v6 = vpop.f32.mrb[14].mxu1 }
 0x3a3   : > { %v16753_v29 = vpop.f32.mrb[15].mxu1 }
 0x3a6   : > { %2843 = vmatmul.mubr.bf16.gmra.mrb[56].mxu0 %v16645_v26 }
 0x3a7   : > { %2850 = vmatprep.mubr.bf16.mxu0 %v16649_v22 }
 0x3a9   : > { %v2317_v41 = vpop.f32.mrb[0].mxu0 }
 0x3aa   : > { %v2319_v7 = vpop.f32.mrb[1].mxu0 }
 0x3ab   : > { %v2321_v15 = vpop.f32.mrb[2].mxu0 }
 0x3ac   : > { %v2943_v1 = vpack.c.bf16 %v2321_v15, %v2317_v41  ;;  %v2323_v17 = vpop.f32.mrb[3].mxu0 }
 0x3ad   : > { %v16757_v8 = vpack.c.bf16 %v2323_v17, %v2319_v7 }
 0x3ae   : > { %2851 = vmatmul.mubr.bf16.gmra.mrb[60].mxu0 %v16662_v59 }
 0x3af   : > { %13191 = vmatprep.mubr.msk.bf16.mxu0 %vm2951_vm0, %v2943_v1 }
 0x3b1   : > { %v2327_v2 = vpop.f32.mrb[4].mxu0 }
 0x3b2   : > { %v2329_v18 = vpop.f32.mrb[5].mxu0 }
 0x3b3   : > { %v2331_v19 = vpop.f32.mrb[6].mxu0 }
 0x3b4   : > { %v16761_v33 = vpack.c.bf16 %v2331_v19, %v2327_v2  ;;  %v2333_v26 = vpop.f32.mrb[7].mxu0 }
 0x3b5   : > { %v16763_v21 = vpack.c.bf16 %v2333_v26, %v2329_v18 }
 0x3b9   : > { %v2337_v22 = vpop.f32.mrb[8].mxu0 }
 0x3ba   : > { %v2339_v24 = vpop.f32.mrb[9].mxu0 }
 0x3bb   : > { %v2341_v27 = vpop.f32.mrb[10].mxu0 }
 0x3bc   : > { %v16765_v31 = vpack.c.bf16 %v2341_v27, %v2337_v22  ;;  %v2343_v10 = vpop.f32.mrb[11].mxu0 }
 0x3bd   : > { %v16767_v36 = vpack.c.bf16 %v2343_v10, %v2339_v24 }
 0x3c1   : > { %v2347_v11 = vpop.f32.mrb[12].mxu0 }
 0x3c2   : > { %v2349_v59 = vpop.f32.mrb[13].mxu0 }
 0x3c3   : > { %v2351_v37 = vpop.f32.mrb[14].mxu0 }
 0x3c4   : > { %v16769_v34 = vpack.c.bf16 %v2351_v37, %v2347_v11  ;;  %v2353_v63 = vpop.f32.mrb[15].mxu0 }
 0x3c5   : > { %v16771_v42 = vpack.c.bf16 %v2353_v63, %v2349_v59 }
 0x3e8   : > { %v2755_v43 = vpop.f32.mrb[16].mxu1 }
 0x3e9   : > { %v2390_v45 = vpop.f32.mrb[16].mxu0  ;;  %v2757_v46 = vpop.f32.mrb[17].mxu1 }
 0x3ea   : > { %v2464_v5 = vadd.f32 %v16717_v3, %v2390_v45  ;;  %v2392_v49 = vpop.f32.mrb[17].mxu0  ;;  %v2759_v0 = vpop.f32.mrb[18].mxu1 }
 0x3eb   : > { %v2466_v40 = vadd.f32 %v16719_v20, %v2392_v49  ;;  %v16775_v30 = vpack.c.bf16 %v2759_v0, %v2755_v43  ;;  %v2394_v51 = vpop.f32.mrb[18].mxu0  ;;  %v2761_v52 = vpop.f32.mrb[19].mxu1 }
 0x3ec   : > { %v2468_v25 = vadd.f32 %v16721_v23, %v2394_v51  ;;  %v16778_v12 = vpack.c.bf16 %v2761_v52, %v2757_v46  ;;  %v2396_v53 = vpop.f32.mrb[19].mxu0 }
 0x3ed   : > { %v2470_v54 = vadd.f32 %v16723_v57, %v2396_v53 }
 0x3ee   : > { %v16781_v13 = vpack.c.bf16 %v2468_v25, %v2464_v5 }
 0x3ef   : > { %v2947_v58 = vpack.c.bf16 %v2470_v54, %v2466_v40 }
 0x3f0   : > { %v2765_v60 = vpop.f32.mrb[20].mxu1 }
 0x3f1   : > { %v2767_v3 = vpop.f32.mrb[21].mxu1  ;;  %3246 = vrot.lane.b32.xlu0 %v2947_v58, %s15905_s28  ;;  %v2400_v20 = vpop.f32.mrb[20].mxu0  ;;  %13767 = vmatprep.subr.msk.bf16.mxu0 %vm2951_vm0, %v2947_v58  ;;  %v2965_v9 = vsel %vm2951_vm0, %v2947_v58, 0 }
 0x3f2   : > { %v2474_v23 = vadd.f32 %v16727_v62, %v2400_v20  ;;  %v2402_v41 = vpop.f32.mrb[21].mxu0  ;;  %v2769_v7 = vpop.f32.mrb[22].mxu1  ;;  %13184 = vmatpush3.bf16.xpose.msra.mxu0 %v2965_v9 }
 0x3f3   : > { %v2476_v57 = vadd.f32 %v16729_v35, %v2402_v41  ;;  %v16788_v15 = vpack.c.bf16 %v2769_v7, %v2765_v60  ;;  %v2404_v17 = vpop.f32.mrb[22].mxu0  ;;  %v2771_v2 = vpop.f32.mrb[23].mxu1 }
 0x3f4   : > { %v2478_v18 = vadd.f32 %v16731_v38, %v2404_v17  ;;  %v16791_v19 = vpack.c.bf16 %v2771_v2, %v2767_v3  ;;  %v2406_v26 = vpop.f32.mrb[23].mxu0 }
 0x3f5   : > { %v2480_v22 = vadd.f32 %v16733_v14, %v2406_v26  ;;  %3234 = vrot.lane.b32.xlu0 %v2943_v1, %s15905_s28 }
 0x3f6   : > { %v16795_v24 = vpack.c.bf16 %v2478_v18, %v2474_v23 }
 0x3f7   : > { %v2948_v62 = vpack.c.bf16 %v2480_v22, %v2476_v57 }
 0x3f8   : > { %v2775_v27 = vpop.f32.mrb[24].mxu1 }
 0x3f9   : > { %v2777_v10 = vpop.f32.mrb[25].mxu1  ;;  %3238 = vrot.lane.b32.xlu0 %v16765_v31, %s15905_s28  ;;  %3248 = vrot.lane.b32.xlu1 %v2948_v62, %s15905_s28  ;;  %v2410_v35 = vpop.f32.mrb[24].mxu0  ;;  %v2968_v38 = vsel %vm2951_vm0, %v2948_v62, 0 }
 0x3fa   : > { %v2484_v11 = vadd.f32 %v16737_v56, %v2410_v35  ;;  %13768 = vmatprep.subr.msk.bf16.mxu0 %vm2951_vm0, %v2948_v62  ;;  %v2412_v14 = vpop.f32.mrb[25].mxu0  ;;  %v2779_v59 = vpop.f32.mrb[26].mxu1 }
 0x3fb   : > { %v2486_v1 = vadd.f32 %v16739_v55, %v2412_v14  ;;  %v16804_v37 = vpack.c.bf16 %v2779_v59, %v2775_v27  ;;  %13186 = vmatpush3.bf16.xpose.msra.mxu0 %v2968_v38  ;;  %v2414_v63 = vpop.f32.mrb[26].mxu0  ;;  %v2781_v43 = vpop.f32.mrb[27].mxu1 }
 0x3fc   : > { %v2488_v45 = vadd.f32 %v16741_v4, %v2414_v63  ;;  %v16807_v46 = vpack.c.bf16 %v2781_v43, %v2777_v10  ;;  %v2416_v5 = vpop.f32.mrb[27].mxu0 }
 0x3fd   : > { %v2490_v49 = vadd.f32 %v16743_v50, %v2416_v5 }
 0x3fe   : > { %v16810_v0 = vpack.c.bf16 %v2488_v45, %v2484_v11 }
 0x3ff   : > { %v2949_v56 = vpack.c.bf16 %v2490_v49, %v2486_v1 }
 0x400   : > { %v2785_v40 = vpop.f32.mrb[28].mxu1 }
 0x401   : > { %v2787_v51 = vpop.f32.mrb[29].mxu1  ;;  %3250 = vrot.lane.b32.xlu1 %v2949_v56, %s15905_s28  ;;  %v2420_v55 = vpop.f32.mrb[28].mxu0  ;;  %13769 = vmatprep.subr.msk.bf16.mxu0 %vm2951_vm0, %v2949_v56  ;;  %v2971_v52 = vsel %vm2951_vm0, %v2949_v56, 0 }
 0x402   : > { %v2494_v25 = vadd.f32 %v16747_v16, %v2420_v55  ;;  %v2422_v4 = vpop.f32.mrb[29].mxu0  ;;  %v2789_v53 = vpop.f32.mrb[30].mxu1 }
 0x403   : > { %v2496_v54 = vadd.f32 %v16749_v44, %v2422_v4  ;;  %v16817_v58 = vpack.c.bf16 %v2789_v53, %v2785_v40  ;;  %13188 = vmatpush3.bf16.xpose.msra.mxu0 %v2971_v52  ;;  %v2424_v50 = vpop.f32.mrb[30].mxu0  ;;  %v2791_v60 = vpop.f32.mrb[31].mxu1 }
 0x404   : > { %v2498_v3 = vadd.f32 %v16751_v6, %v2424_v50  ;;  %v16820_v20 = vpack.c.bf16 %v2791_v60, %v2787_v51  ;;  %v2426_v9 = vpop.f32.mrb[31].mxu0 }
 0x405   : > { %v2500_v23 = vadd.f32 %v16753_v29, %v2426_v9 }
 0x406   : > { %v16823_v41 = vpack.c.bf16 %v2498_v3, %v2494_v25 }
 0x407   : > { %v2950_v7 = vpack.c.bf16 %v2500_v23, %v2496_v54 }
 0x408   : > { %v16825_v16 = vpop.f32.mrb[32].mxu1 }
 0x409   : > { %v2893_v57 = vpop.f32.mrb[33].mxu1  ;;  %3252 = vrot.lane.b32.xlu1 %v2950_v7, %s15905_s28  ;;  %13770 = vmatprep.subr.msk.bf16.mxu0 %vm2951_vm0, %v2950_v7  ;;  %v2974_v44 = vsel %vm2951_vm0, %v2950_v7, 0 }
 0x40a   : > { %v16830_v17 = vpop.f32.mrb[34].mxu1 }
 0x40b   : > { %13190 = vmatpush3.bf16.xpose.msra.mxu0 %v2974_v44  ;;  %v2896_v6 = vpop.f32.mrb[35].mxu1 }
 0x40c   : > { %13199 = vmatprep.subr.bf16.mxu0 %v16775_v30 }
 0x40d   : > { %3236 = vrot.lane.b32.xlu1 %v16761_v33, %s15905_s28 }
 0x410   : > { %v16835_v29 = vpop.f32.mrb[36].mxu1 }
 0x411   : > { %v16837_v2 = vpop.f32.mrb[37].mxu1  ;;  %3240 = vrot.lane.b32.xlu1 %v16769_v34, %s15905_s28 }
 0x412   : > { %13192 = vmatmul.mubr.msk.bf16.vlgmr.msra.gmra.mrb[64].mxu0 %vm2951_vm0, %v16761_v33  ;;  %v16843_v18 = vpop.f32.mrb[38].mxu1 }
 0x413   : > { %13195 = vmatprep.mubr.msk.bf16.mxu0 %vm2951_vm0, %v16765_v31  ;;  %13200 = vmatpush3.bf16.msra.mxu0 %v16775_v30  ;;  %v16848_v26 = vpop.f32.mrb[39].mxu1 }
 0x414   : > { %13201 = vmatprep.subr.bf16.mxu0 %v16788_v15 }
 0x417   : > { %13202 = vmatpush3.bf16.msra.mxu0 %v16788_v15 }
 0x418   : > { %13203 = vmatprep.subr.bf16.mxu0 %v16804_v37 }
 0x41a   : > { %13196 = vmatmul.mubr.msk.bf16.gmra.mrb[68].mxu0 %vm2951_vm0, %v16769_v34 }
 0x41b   : > { %13204 = vmatpush3.bf16.msra.mxu0 %v16804_v37 }
 0x41c   : > { %13205 = vmatprep.subr.bf16.mxu0 %v16817_v58 }
 0x41f   : > { %13206 = vmatpush3.bf16.msra.mxu0 %v16817_v58 }
 0x449   : > { %v2609_v33 = vpop.f32.mrb[32].mxu0 }
 0x44a   : > { %v2611_v31 = vpop.f32.mrb[33].mxu0 }
 0x44b   : > { %v2613_v22 = vpop.f32.mrb[34].mxu0 }
 0x44c   : > { %v16858_v62 = vpack.c.bf16 %v2613_v22, %v2609_v33  ;;  %v2615_v27 = vpop.f32.mrb[35].mxu0 }
 0x44d   : > { %v16860_v10 = vpack.c.bf16 %v2615_v27, %v2611_v31 }
 0x451   : > { %v2619_v35 = vpop.f32.mrb[36].mxu0 }
 0x452   : > { %v2621_v38 = vpop.f32.mrb[37].mxu0 }
 0x453   : > { %v2623_v11 = vpop.f32.mrb[38].mxu0 }
 0x454   : > { %v16862_v14 = vpack.c.bf16 %v2623_v11, %v2619_v35  ;;  %v2625_v34 = vpop.f32.mrb[39].mxu0 }
 0x455   : > { %v16864_v59 = vpack.c.bf16 %v2625_v34, %v2621_v38 }
 0x459   : > { %v2629_v1 = vpop.f32.mrb[40].mxu0 }
 0x45a   : > { %v2631_v63 = vpop.f32.mrb[41].mxu0 }
 0x45b   : > { %v2633_v43 = vpop.f32.mrb[42].mxu0 }
 0x45c   : > { %v16866_v45 = vpack.c.bf16 %v2633_v43, %v2629_v1  ;;  %v2635_v5 = vpop.f32.mrb[43].mxu0 }
 0x45d   : > { %v16868_v49 = vpack.c.bf16 %v2635_v5, %v2631_v63 }
 0x461   : > { %v2639_v56 = vpop.f32.mrb[44].mxu0 }
 0x462   : > { %v2641_v40 = vpop.f32.mrb[45].mxu0 }
 0x463   : > { %v3247_v51 = vpop.permute.xlu0 %3246  ;;  %v2643_v55 = vpop.f32.mrb[46].mxu0 }
 0x464   : > { %v16870_v52 = vpack.c.bf16 %v2643_v55, %v2639_v56  ;;  %v2645_v25 = vpop.f32.mrb[47].mxu0  ;;  %13771 = vmatprep.subr.msk.bf16.mxu1 %vm2951_vm0, %v3247_v51  ;;  %v3267_v4 = vsel %vm2951_vm0, %v3247_v51, 0 }
 0x465   : > { %v16874_v53 = vpack.c.bf16 %v2645_v25, %v2641_v40  ;;  %13216 = vmatpush3.bf16.xpose.msra.mxu1 %v3267_v4 }
 0x467   : > { %v3235_v54 = vpop.permute.xlu0 %3234 }
 0x468   : > { %13223 = vmatprep.mubr.msk.bf16.mxu1 %vm2951_vm0, %v3235_v54 }
 0x469   : > { %v12735_v50 = vpop.f32.mrb[48].mxu0 }
 0x46a   : > { %v12736_v60 = vpop.f32.mrb[49].mxu0 }
 0x46b   : > { %v12737_v3 = vadd.f32 %v12736_v60, %v12735_v50  ;;  %v3249_v9 = vpop.permute.xlu1 %3248  ;;  %v12738_v23 = vpop.f32.mrb[50].mxu0 }
 0x46c   : > { %13772 = vmatprep.subr.msk.bf16.mxu1 %vm2951_vm0, %v3249_v9  ;;  %v3270_v7 = vsel %vm2951_vm0, %v3249_v9, 0  ;;  %v12739_v33 = vpop.f32.mrb[51].mxu0 }
 0x46d   : > { %v2894_v44 = vadd.f32 %v12737_v3, %v2893_v57  ;;  %13218 = vmatpush3.bf16.xpose.msra.mxu1 %v3270_v7  ;;  %v12740_v31 = vadd.f32 %v12739_v33, %v12738_v23 }
 0x46f   : > { %v2897_v22 = vadd.f32 %v12740_v31, %v2896_v6  ;;  %v3239_v31 = vpop.permute.xlu0 %3238 }
 0x471   : > { %v12741_v27 = vpop.f32.mrb[52].mxu0  ;;  %v16879_v38 = vpack.c.bf16 %v2897_v22, %v2894_v44 }
 0x472   : > { %v12742_v35 = vpop.f32.mrb[53].mxu0 }
 0x473   : > { %v12743_v11 = vadd.f32 %v12742_v35, %v12741_v27  ;;  %v3251_v34 = vpop.permute.xlu1 %3250  ;;  %v12744_v1 = vpop.f32.mrb[54].mxu0 }
 0x474   : > { %v12745_v63 = vpop.f32.mrb[55].mxu0  ;;  %13773 = vmatprep.subr.msk.bf16.mxu1 %vm2951_vm0, %v3251_v34  ;;  %v3273_v43 = vsel %vm2951_vm0, %v3251_v34, 0  ;;  %v2934_v34 = vand.u32 127, %v775_v32 }
 0x475   : > { %v2902_v5 = vadd.f32 %v16825_v16, %v12743_v11  ;;  %v12746_v56 = vadd.f32 %v12745_v63, %v12744_v1  ;;  %13220 = vmatpush3.bf16.xpose.msra.mxu1 %v3273_v43 }
 0x476   : > { %vm16916_vm2 = vcmp.ge.s32.totalorder %v16521_v39, %v2934_v34 }
 0x477   : > { %v2905_v57 = vadd.f32 %v16830_v17, %v12746_v56 }
 0x479   : > { %v12747_v40 = vpop.f32.mrb[56].mxu0  ;;  %v16885_v6 = vpack.c.bf16 %v2905_v57, %v2902_v5  ;;  %v2928_v5 = vadd.s32 24, %v16521_v39 }
 0x47a   : > { %v12748_v51 = vpop.f32.mrb[57].mxu0 }
 0x47b   : > { %v12749_v55 = vadd.f32 %v12748_v51, %v12747_v40  ;;  %v12750_v25 = vpop.f32.mrb[58].mxu0  ;;  %v3253_v4 = vpop.permute.xlu1 %3252  ;;  %vm16935_vm4 = vcmp.ge.s32.totalorder %v2928_v5, %v2934_v34 }
 0x47c   : > { %v12751_v54 = vpop.f32.mrb[59].mxu0  ;;  %13774 = vmatprep.subr.msk.bf16.mxu1 %vm2951_vm0, %v3253_v4  ;;  %v3276_v50 = vsel %vm2951_vm0, %v3253_v4, 0 }
 0x47d   : > { %v2910_v60 = vadd.f32 %v12749_v55, %v16837_v2  ;;  %v12752_v3 = vadd.f32 %v12751_v54, %v12750_v25  ;;  %13222 = vmatpush3.bf16.xpose.msra.mxu1 %v3276_v50  ;;  %v2931_v50 = vadd.s32 48, %v16521_v39 }
 0x47e   : > { %13263 = vmatprep.subr.bf16.mxu1 %v16778_v12 }
 0x47f   : > { %v2913_v16 = vadd.f32 %v12752_v3, %v16848_v26  ;;  %v3237_v7 = vpop.permute.xlu1 %3236  ;;  %vm16951_vm5 = vcmp.ge.s32.totalorder %v2931_v50, %v2934_v34 }
 0x481   : > { %v12753_v17 = vpop.f32.mrb[60].mxu0  ;;  %v16892_v9 = vpack.c.bf16 %v2913_v16, %v2910_v60  ;;  %v2932_v60 = vadd.s32 56, %v16521_v39 }
 0x482   : > { %v12754_v23 = vpop.f32.mrb[61].mxu0 }
 0x483   : > { %v12755_v44 = vadd.f32 %v12754_v23, %v12753_v17  ;;  %v12756_v33 = vpop.f32.mrb[62].mxu0  ;;  %v3241_v11 = vpop.permute.xlu1 %3240  ;;  %v2930_v17 = vadd.s32 40, %v16521_v39  ;;  %vm16956_vm6 = vcmp.ge.s32.totalorder %v2932_v60, %v2934_v34 }
 0x484   : > { %v12757_v22 = vpop.f32.mrb[63].mxu0  ;;  %13224 = vmatmul.mubr.msk.bf16.vlgmr.msra.gmra.mrb[40].mxu1 %vm2951_vm0, %v3237_v7 }
 0x485   : > { %v2918_v27 = vadd.f32 %v16835_v29, %v12755_v44  ;;  %v12758_v2 = vadd.f32 %v12757_v22, %v12756_v33  ;;  %13227 = vmatprep.mubr.msk.bf16.mxu1 %vm2951_vm0, %v3239_v31  ;;  %13264 = vmatpush3.bf16.msra.mxu1 %v16778_v12  ;;  %v2927_v29 = vadd.s32 16, %v16521_v39  ;;  %v2929_v33 = vadd.s32 32, %v16521_v39 }
 0x486   : > { %13265 = vmatprep.subr.bf16.mxu1 %v16791_v19  ;;  %vm16962_vm7 = vcmp.ge.s32.totalorder %v2930_v17, %v2934_v34 }
 0x487   : > { %v2921_v26 = vadd.f32 %v16843_v18, %v12758_v2  ;;  %v2926_v18 = vadd.s32 8, %v16521_v39  ;;  %vm16911_vm1 = vcmp.ge.s32.totalorder %v2927_v29, %v2934_v34  ;;  %vm16972_vm8 = vcmp.ge.s32.totalorder %v2929_v33, %v2934_v34 }
 0x489   : > { %13266 = vmatpush3.bf16.msra.mxu1 %v16791_v19  ;;  %v16901_v35 = vpack.c.bf16 %v2921_v26, %v2918_v27  ;;  %vm16925_vm3 = vcmp.ge.s32.totalorder %v2926_v18, %v2934_v34 }
 0x48a   : > { %13267 = vmatprep.subr.bf16.mxu1 %v16807_v46 }
 0x48c   : > { %13228 = vmatmul.mubr.msk.bf16.gmra.mrb[44].mxu1 %vm2951_vm0, %v3241_v11 }
 0x48d   : > { %13268 = vmatpush3.bf16.msra.mxu1 %v16807_v46 }
 0x48e   : > { %13269 = vmatprep.subr.bf16.mxu1 %v16820_v20 }
 0x491   : > { %13270 = vmatpush3.bf16.msra.mxu1 %v16820_v20 }
 0x4e5   : > { %v13193_v63 = vpop.f32.mrb[64].mxu0 }
 0x4e6   : > { %v16923_v56 = vsel %vm16911_vm1, %v13193_v63, -inf  ;;  %v3010_v57 = vpop.f32.mrb[65].mxu0 }
 0x4e7   : > { %v13194_v40 = vpop.f32.mrb[66].mxu0  ;;  %v3055_v51 = vsel %vm2951_vm0, %v16923_v56, -inf  ;;  %v16933_v55 = vsel %vm16916_vm2, %v3010_v57, -inf }
 0x4e8   : > { %3056 = vmax.xlane.f32.xlu0 %v3055_v51  ;;  %v3013_v25 = vpop.f32.mrb[67].mxu0  ;;  %v3049_v16 = vsel %vm2951_vm0, %v16933_v55, -inf  ;;  %v16949_v23 = vsel %vm16935_vm4, %v13194_v40, -inf }
 0x4e9   : > { %v3042_v54 = vsel %vm16925_vm3, %v3013_v25, -inf  ;;  %v3058_v2 = vsel %vm2951_vm0, %v16949_v23, -inf }
 0x4ea   : > { %v3052_v3 = vsel %vm2951_vm0, %v3042_v54, -inf }
 0x4eb   : > { %3053 = vmax.xlane.f32.xlu1 %v3052_v3 }
 0x4ec   : > { %3050 = vmax.xlane.f32.xlu0 %v3049_v16 }
 0x4ed   : > { %v13197_v44 = vpop.f32.mrb[68].mxu0 }
 0x4ee   : > { %v3026_v22 = vpop.f32.mrb[69].mxu0  ;;  %v3047_v11 = vsel %vm16951_vm5, %v13197_v44, -inf }
 0x4ef   : > { %v13198_v27 = vpop.f32.mrb[70].mxu0  ;;  %v3067_v40 = vsel %vm2951_vm0, %v3047_v11, -inf  ;;  %v3045_v51 = vsel %vm16972_vm8, %v3026_v22, -inf }
 0x4f0   : > { %v16970_v29 = vsel %vm16956_vm6, %v13198_v27, -inf  ;;  %3059 = vmax.xlane.f32.xlu0 %v3058_v2  ;;  %v3029_v18 = vpop.f32.mrb[71].mxu0  ;;  %v3061_v34 = vsel %vm2951_vm0, %v3045_v51, -inf }
 0x4f1   : > { %v3070_v5 = vsel %vm2951_vm0, %v16970_v29, -inf  ;;  %v3046_v57 = vsel %vm16962_vm7, %v3029_v18, -inf }
 0x4f2   : > { %3071 = vmax.xlane.f32.xlu1 %v3070_v5  ;;  %v3064_v25 = vsel %vm2951_vm0, %v3046_v57, -inf }
 0x4f4   : > { %3068 = vmax.xlane.f32.xlu0 %v3067_v40 }
 0x4f6   : > { %3065 = vmax.xlane.f32.xlu1 %v3064_v25 }
 0x4f8   : > { %3062 = vmax.xlane.f32.xlu0 %v3061_v34 }
 0x507   : > { %3433 = vrot.lane.b32.xlu1 %v16788_v15, %s15905_s28 }
 0x50b   : > { %3435 = vrot.lane.b32.xlu1 %v16804_v37, %s15905_s28 }
 0x557   : > { %v13225_v50 = vpop.f32.mrb[40].mxu1 }
 0x558   : > { %v16991_v60 = vsel %vm16911_vm1, %v13225_v50, -inf  ;;  %v3312_v3 = vpop.f32.mrb[41].mxu1 }
 0x559   : > { %v13226_v16 = vpop.f32.mrb[42].mxu1  ;;  %v3357_v17 = vsel %vm2951_vm0, %v16991_v60, -inf  ;;  %v16997_v44 = vsel %vm16916_vm2, %v3312_v3, -inf }
 0x55a   : > { %v17001_v15 = vsel %vm16935_vm4, %v13226_v16, -inf  ;;  %v3315_v33 = vpop.f32.mrb[43].mxu1  ;;  %3358 = vmax.xlane.f32.xlu0 %v3357_v17  ;;  %v3351_v27 = vsel %vm2951_vm0, %v16997_v44, -inf }
 0x55b   : > { %v3360_v37 = vsel %vm2951_vm0, %v17001_v15, -inf  ;;  %v17007_v22 = vsel %vm16925_vm3, %v3315_v33, -inf }
 0x55c   : > { %3361 = vmax.xlane.f32.xlu1 %v3360_v37  ;;  %v3354_v18 = vsel %vm2951_vm0, %v17007_v22, -inf }
 0x55e   : > { %3352 = vmax.xlane.f32.xlu0 %v3351_v27 }
 0x55f   : > { %v13229_v2 = vpop.f32.mrb[44].mxu1 }
 0x560   : > { %v3328_v5 = vpop.f32.mrb[45].mxu1  ;;  %3355 = vmax.xlane.f32.xlu1 %v3354_v18 }
 0x561   : > { %v13230_v40 = vpop.f32.mrb[46].mxu1 }
 0x562   : > { %v3331_v25 = vpop.f32.mrb[47].mxu1 }
 0x571   : > { %3437 = vrot.lane.b32.xlu1 %v16817_v58, %s15905_s28 }
 0x574   : > { %3431 = vrot.lane.b32.xlu0 %v16775_v30, %s15905_s28 }
 0x575   : > { %v3057_v34 = vpop.xlane.xlu0 %3056 }
 0x576   : > { %v3075_v3 = vsub.f32 %v16923_v56, %v3057_v34 }
 0x578   : > { %v3054_v50 = vpop.xlane.xlu1 %3053  ;;  %v3085_v28 = vmul.f32 1.442695, %v3075_v3 }
 0x579   : > { %v3074_v16 = vsub.f32 %v3042_v54, %v3054_v50  ;;  %v3051_v17 = vpop.xlane.xlu0 %3050 }
 0x57a   : > { %v3073_v33 = vsub.f32 %v16933_v55, %v3051_v17 }
 0x57b   : > { %v3083_v37 = vmul.f32 1.442695, %v3074_v16 }
 0x57c   : > { %v3081_v27 = vmul.f32 1.442695, %v3073_v33 }
 0x57d   : > { %15204 = vpow2.f32 %v3083_v37  ;;  %v3060_v18 = vpop.xlane.xlu0 %3059 }
 0x57e   : > { %15206 = vpow2.f32 %v3081_v27  ;;  %v3076_v39 = vsub.f32 %v16949_v23, %v3060_v18  ;;  %v17051_v18 = vsel %vm16951_vm5, %v13229_v2, -inf  ;;  %v17067_v2 = vsel %vm16956_vm6, %v13230_v40, -inf }
 0x57f   : > { %v3072_v58 = vpop.xlane.xlu1 %3071  ;;  %15208 = vpow2.f32 %v3085_v28 }
 0x580   : > { %v3087_v48 = vmul.f32 1.442695, %v3076_v39  ;;  %v3080_v56 = vsub.f32 %v16970_v29, %v3072_v58  ;;  %v17041_v29 = vsel %vm16962_vm7, %v3331_v25, -inf }
 0x581   : > { %v3069_v30 = vpop.xlane.xlu0 %3068  ;;  %v3366_v58 = vsel %vm2951_vm0, %v17041_v29, -inf }
 0x582   : > { %15210 = vpow2.f32 %v3087_v48  ;;  %v3079_v47 = vsub.f32 %v3047_v11, %v3069_v30  ;;  %v3095_v33 = vmul.f32 1.442695, %v3080_v56  ;;  %v17036_v11 = vsel %vm16972_vm8, %v3328_v5, -inf }
 0x583   : > { %v3066_v54 = vpop.xlane.xlu1 %3065  ;;  %v3369_v56 = vsel %vm2951_vm0, %v17051_v18, -inf }
 0x584   : > { %v3093_v34 = vmul.f32 1.442695, %v3079_v47  ;;  %v3078_v50 = vsub.f32 %v3046_v57, %v3066_v54 }
 0x585   : > { %v3063_v55 = vpop.xlane.xlu0 %3062 }
 0x586   : > { %v3091_v16 = vmul.f32 1.442695, %v3078_v50  ;;  %v3077_v17 = vsub.f32 %v3045_v51, %v3063_v55  ;;  %15212 = vpow2.f32 %v3093_v34  ;;  %v3363_v51 = vsel %vm2951_vm0, %v17036_v11, -inf }
 0x587   : > { %v17021_v3 = vpop.eup %15204  ;;  %v3372_v34 = vsel %vm2951_vm0, %v17067_v2, -inf  ;;  %v3434_v50 = vpop.permute.xlu1 %3433 }
 0x588   : > { %v17023_v37 = vpop.eup %15206  ;;  %v3089_v23 = vmul.f32 1.442695, %v3077_v17  ;;  %15214 = vpow2.f32 %v3091_v16 }
 0x589   : > { %v3121_v28 = vpack.c.bf16 %v17021_v3, %v17023_v37  ;;  %v17027_v39 = vpop.eup %15208 }
 0x58a   : > { %15216 = vpow2.f32 %v3089_v23 }
 0x58b   : > { %15218 = vpow2.f32 %v3095_v33  ;;  %13207 = vmatprep.mubr.msk.bf16.mxu0 %vm2951_vm0, %v3121_v28  ;;  %v3436_v55 = vpop.permute.xlu1 %3435 }
 0x58c   : > { %v17030_v47 = vpop.eup %15210 }
 0x58d   : > { %v3122_v48 = vpack.c.bf16 %v17030_v47, %v17027_v39 }
 0x58f   : > { %13208 = vmatmul.mubr.msk.bf16.vlgmr.msra.gmra.mrb[72].mxu0 %vm2951_vm0, %v3122_v48 }
 0x590   : > { %v17043_v57 = vpop.eup %15212 }
 0x591   : > { %19005 = vst [vmem:[#allocation37_spill] sm:$0xff] %v17043_v57 }
 0x592   : > { %v17047_v27 = vpop.eup %15214 }
 0x593   : > { %3364 = vmax.xlane.f32.xlu0 %v3363_v51 }
 0x594   : > { %v17053_v5 = vpop.eup %15216 }
 0x595   : > { %19006 = vst [vmem:[#allocation38_spill] sm:$0xff] %v17053_v5  ;;  %v17057_v30 = vpop.eup %15218  ;;  %3367 = vmax.xlane.f32.xlu1 %v3366_v58  ;;  %v3123_v25 = vpack.c.bf16 %v17047_v27, %v17053_v5 }
 0x596   : > { %v3124_v54 = vpack.c.bf16 %v17057_v30, %v17043_v57 }
 0x597   : > { %13211 = vmatprep.mubr.msk.bf16.mxu0 %vm2951_vm0, %v3123_v25  ;;  %3370 = vmax.xlane.f32.xlu0 %v3369_v56 }
 0x598   : > { %13212 = vmatmul.mubr.msk.bf16.gmra.mrb[76].mxu0 %vm2951_vm0, %v3124_v54 }
 0x59b   : > { %3373 = vmax.xlane.f32.xlu0 %v3372_v34 }
 0x5e7   : > { %v3359_v16 = vpop.xlane.xlu0 %3358 }
 0x5e8   : > { %v3377_v23 = vsub.f32 %v16991_v60, %v3359_v16 }
 0x5e9   : > { %v3362_v17 = vpop.xlane.xlu1 %3361 }
 0x5ea   : > { %v3378_v33 = vsub.f32 %v17001_v15, %v3362_v17  ;;  %v3387_v56 = vmul.f32 1.442695, %v3377_v23  ;;  %v3604_v23 = vsel %vm2951_vm0, %v16866_v45, 0 }
 0x5eb   : > { %v3353_v28 = vpop.xlane.xlu0 %3352 }
 0x5ec   : > { %v3389_v40 = vmul.f32 1.442695, %v3378_v33  ;;  %v3375_v48 = vsub.f32 %v16997_v44, %v3353_v28  ;;  %v3607_v28 = vsel %vm2951_vm0, %v16870_v52, 0 }
 0x5ed   : > { %v3356_v51 = vpop.xlane.xlu1 %3355 }
 0x5ee   : > { %v3383_v58 = vmul.f32 1.442695, %v3375_v48  ;;  %v3376_v25 = vsub.f32 %v17007_v22, %v3356_v51  ;;  %15220 = vpow2.f32 %v3389_v40 }
 0x5ef   : > { %v3432_v54 = vpop.permute.xlu0 %3431 }
 0x5f0   : > { %v3385_v34 = vmul.f32 1.442695, %v3376_v25  ;;  %13231 = vmatprep.subr.bf16.mxu0 %v3432_v54  ;;  %15222 = vpow2.f32 %v3383_v58 }
 0x5f1   : > { %13232 = vmatpush3.bf16.msra.mxu0 %v3432_v54  ;;  %v3438_v60 = vpop.permute.xlu1 %3437 }
 0x5f2   : > { %15224 = vpow2.f32 %v3385_v34  ;;  %13233 = vmatprep.subr.bf16.mxu0 %v3434_v50 }
 0x5f3   : > { %15226 = vpow2.f32 %v3387_v56 }
 0x5f5   : > { %13234 = vmatpush3.bf16.msra.mxu0 %v3434_v50  ;;  %v3598_v50 = vsel %vm2951_vm0, %v16858_v62, 0 }
 0x5f6   : > { %13235 = vmatprep.subr.bf16.mxu0 %v3436_v55 }
 0x5f8   : > { %v17077_v15 = vpop.eup %15220 }
 0x5f9   : > { %13236 = vmatpush3.bf16.msra.mxu0 %v3436_v55  ;;  %v3601_v55 = vsel %vm2951_vm0, %v16862_v14, 0 }
 0x5fa   : > { %13237 = vmatprep.subr.bf16.mxu0 %v3438_v60  ;;  %v17079_v44 = vpop.eup %15222 }
 0x5fb   : > { %v3399_v63 = vsel %vm2951_vm0, %v17079_v44, 0.0 }
 0x5fc   : > { %v17081_v22 = vpop.eup %15224 }
 0x5fd   : > { %v17083_v16 = vpop.eup %15226  ;;  %13238 = vmatpush3.bf16.msra.mxu0 %v3438_v60  ;;  %v3423_v17 = vpack.c.bf16 %v17081_v22, %v17079_v44 }
 0x5fe   : > { %v3424_v33 = vpack.c.bf16 %v17077_v15, %v17083_v16  ;;  %13775 = vmatprep.subr.msk.bf16.mxu0 %vm2951_vm0, %v16858_v62 }
 0x5ff   : > { %13239 = vmatprep.mubr.msk.bf16.mxu0 %vm2951_vm0, %v3423_v17 }
 0x600   : > { %13240 = vmatmul.mubr.msk.bf16.vlgmr.msra.gmra.mrb[80].mxu0 %vm2951_vm0, %v3424_v33 }
 0x606   : > { %13248 = vmatpush3.bf16.xpose.msra.mxu0 %v3598_v50 }
 0x607   : > { %13776 = vmatprep.subr.msk.bf16.mxu0 %vm2951_vm0, %v16862_v14 }
 0x60e   : > { %13250 = vmatpush3.bf16.xpose.msra.mxu0 %v3601_v55 }
 0x60f   : > { %13777 = vmatprep.subr.msk.bf16.mxu0 %vm2951_vm0, %v16866_v45 }
 0x616   : > { %13252 = vmatpush3.bf16.xpose.msra.mxu0 %v3604_v23 }
 0x617   : > { %13778 = vmatprep.subr.msk.bf16.mxu0 %vm2951_vm0, %v16870_v52 }
 0x61e   : > { %13254 = vmatpush3.bf16.xpose.msra.mxu0 %v3607_v28 }
 0x620   : > { %v3365_v40 = vpop.xlane.xlu0 %3364 }
 0x621   : > { %v3379_v48 = vsub.f32 %v17036_v11, %v3365_v40 }
 0x622   : > { %v3368_v51 = vpop.xlane.xlu1 %3367 }
 0x623   : > { %v3391_v58 = vmul.f32 1.442695, %v3379_v48  ;;  %v3380_v25 = vsub.f32 %v17041_v29, %v3368_v51 }
 0x624   : > { %v3371_v56 = vpop.xlane.xlu0 %3370 }
 0x625   : > { %v3393_v54 = vmul.f32 1.442695, %v3380_v25  ;;  %v3381_v34 = vsub.f32 %v17051_v18, %v3371_v56  ;;  %15228 = vpow2.f32 %v3391_v58 }
 0x627   : > { %15230 = vpow2.f32 %v3393_v54  ;;  %v3395_v60 = vmul.f32 1.442695, %v3381_v34 }
 0x628   : > { %v3374_v17 = vpop.xlane.xlu0 %3373 }
 0x629   : > { %v3382_v33 = vsub.f32 %v17067_v2, %v3374_v17  ;;  %15232 = vpow2.f32 %v3395_v60 }
 0x62b   : > { %v3397_v50 = vmul.f32 1.442695, %v3382_v33 }
 0x62d   : > { %15234 = vpow2.f32 %v3397_v50 }
 0x62f   : > { %v17111_v55 = vpop.eup %15228 }
 0x631   : > { %v17113_v11 = vpop.eup %15230 }
 0x632   : > { %v3425_v29 = vpack.c.bf16 %v17113_v11, %v17111_v55  ;;  %v3414_v26 = vsel %vm2951_vm0, %v17113_v11, 0.0  ;;  %v3106_v11 = vsel %vm2951_vm0, %v17030_v47, 0.0 }
 0x633   : > { %v17118_v23 = vpop.eup %15232 }
 0x634   : > { %13243 = vmatprep.mubr.msk.bf16.mxu0 %vm2951_vm0, %v3425_v29 }
 0x637   : > { %v17120_v18 = vpop.eup %15234 }
 0x638   : > { %v3426_v28 = vpack.c.bf16 %v17120_v18, %v17118_v23 }
 0x63a   : > { %13244 = vmatmul.mubr.msk.bf16.gmra.mrb[84].mxu0 %vm2951_vm0, %v3426_v28 }
 0x63b   : > { %13255 = vmatprep.mubr.msk.bf16.mxu0 %vm2951_vm0, %v16757_v8 }
 0x642   : > { %13256 = vmatmul.mubr.msk.bf16.vlgmr.msra.gmra.mrb[88].mxu0 %vm2951_vm0, %v16763_v21 }
 0x643   : > { %13259 = vmatprep.mubr.msk.bf16.mxu0 %vm2951_vm0, %v16767_v36 }
 0x64a   : > { %13260 = vmatmul.mubr.msk.bf16.gmra.mrb[92].mxu0 %vm2951_vm0, %v16771_v42 }
 0x662   : > { %v17133_v2 = vpop.f32.mrb[72].mxu0 }
 0x663   : > { %19007 = vst [vmem:[#allocation39_spill] sm:$0xff] %v17133_v2  ;;  %v17135_v40 = vpop.f32.mrb[73].mxu0 }
 0x664   : > { %19008 = vst [vmem:[#allocation40_spill] sm:$0xff] %v17135_v40  ;;  %v17137_v48 = vpop.f32.mrb[74].mxu0 }
 0x665   : > { %19009 = vst [vmem:[#allocation41_spill] sm:$0xff] %v17137_v48  ;;  %v17139_v51 = vpop.f32.mrb[75].mxu0 }
 0x666   : > { %19010 = vst [vmem:[#allocation42_spill] sm:$0xff] %v17139_v51 }
 0x66b   : > { %v17141_v58 = vpop.f32.mrb[76].mxu0 }
 0x66c   : > { %19011 = vst [vmem:[#allocation43_spill] sm:$0xff] %v17141_v58  ;;  %v17143_v25 = vpop.f32.mrb[77].mxu0 }
 0x66d   : > { %19012 = vst [vmem:[#allocation44_spill] sm:$0xff] %v17143_v25  ;;  %v17145_v56 = vpop.f32.mrb[78].mxu0 }
 0x66e   : > { %19013 = vst [vmem:[#allocation45_spill] sm:$0xff] %v17145_v56  ;;  %v17147_v54 = vpop.f32.mrb[79].mxu0 }
 0x66f   : > { %19014 = vst [vmem:[#allocation46_spill] sm:$0xff] %v17147_v54 }
 0x6d3   : > { %v17149_v34 = vpop.f32.mrb[80].mxu0 }
 0x6d4   : > { %19015 = vst [vmem:[#allocation47_spill] sm:$0xff] %v17149_v34  ;;  %v17151_v60 = vpop.f32.mrb[81].mxu0 }
 0x6d5   : > { %19016 = vst [vmem:[#allocation48_spill] sm:$0xff] %v17151_v60  ;;  %v17153_v17 = vpop.f32.mrb[82].mxu0 }
 0x6d6   : > { %19017 = vst [vmem:[#allocation49_spill] sm:$0xff] %v17153_v17  ;;  %v17155_v33 = vpop.f32.mrb[83].mxu0 }
 0x6d7   : > { %19018 = vst [vmem:[#allocation50_spill] sm:$0xff] %v17155_v33 }
 0x70d   : > { %v17157_v50 = vpop.f32.mrb[84].mxu0 }
 0x70e   : > { %19019 = vst [vmem:[#allocation51_spill] sm:$0xff] %v17157_v50  ;;  %v17159_v29 = vpop.f32.mrb[85].mxu0 }
 0x70f   : > { %19020 = vst [vmem:[#allocation52_spill] sm:$0xff] %v17159_v29  ;;  %v17161_v28 = vpop.f32.mrb[86].mxu0 }
 0x710   : > { %19021 = vst [vmem:[#allocation53_spill] sm:$0xff] %v17161_v28  ;;  %v17163_v61 = vpop.f32.mrb[87].mxu0 }
 0x711   : > { %19022 = vst [vmem:[#allocation54_spill] sm:$0xff] %v17163_v61 }
 0x715   : > { %v13257_v58 = vpop.f32.mrb[88].mxu0 }
 0x716   : > { %v3676_v25 = vsel %vm16911_vm1, %v13257_v58, -inf  ;;  %v3643_v2 = vpop.f32.mrb[89].mxu0 }
 0x717   : > { %v13258_v34 = vpop.f32.mrb[90].mxu0  ;;  %v3688_v40 = vsel %vm2951_vm0, %v3676_v25, -inf  ;;  %v3674_v56 = vsel %vm16916_vm2, %v3643_v2, -inf }
 0x718   : > { %v3677_v50 = vsel %vm16935_vm4, %v13258_v34, -inf  ;;  %3689 = vmax.xlane.f32.xlu0 %v3688_v40  ;;  %v3646_v29 = vpop.f32.mrb[91].mxu0  ;;  %v3682_v58 = vsel %vm2951_vm0, %v3674_v56, -inf }
 0x719   : > { %v3691_v33 = vsel %vm2951_vm0, %v3677_v50, -inf  ;;  %v3675_v60 = vsel %vm16925_vm3, %v3646_v29, -inf }
 0x71a   : > { %3692 = vmax.xlane.f32.xlu1 %v3691_v33  ;;  %v3685_v48 = vsel %vm2951_vm0, %v3675_v60, -inf }
 0x71c   : > { %3683 = vmax.xlane.f32.xlu0 %v3682_v58 }
 0x71d   : > { %v13261_v54 = vpop.f32.mrb[92].mxu0 }
 0x71e   : > { %v17179_v2 = vsel %vm16951_vm5, %v13261_v54, -inf  ;;  %3686 = vmax.xlane.f32.xlu1 %v3685_v48  ;;  %v3659_v34 = vpop.f32.mrb[93].mxu0 }
 0x71f   : > { %v13262_v40 = vpop.f32.mrb[94].mxu0  ;;  %v3700_v51 = vsel %vm2951_vm0, %v17179_v2, -inf  ;;  %v17185_v29 = vsel %vm16972_vm8, %v3659_v34, -inf }
 0x720   : > { %3701 = vmax.xlane.f32.xlu0 %v3700_v51  ;;  %v3662_v33 = vpop.f32.mrb[95].mxu0  ;;  %v3694_v58 = vsel %vm2951_vm0, %v17185_v29, -inf  ;;  %v3681_v48 = vsel %vm16956_vm6, %v13262_v40, -inf }
 0x721   : > { %v3703_v51 = vsel %vm2951_vm0, %v3681_v48, -inf }
 0x724   : > { %3695 = vmax.xlane.f32.xlu0 %v3694_v58 }
 0x72f   : > { %3881 = vrot.lane.b32.xlu1 %v16862_v14, %s15905_s28  ;;  %v3679_v14 = vsel %vm16962_vm7, %v3662_v33, -inf }
 0x733   : > { %3883 = vrot.lane.b32.xlu1 %v16866_v45, %s15905_s28  ;;  %v3697_v45 = vsel %vm2951_vm0, %v3679_v14, -inf }
 0x73a   : > { %3879 = vrot.lane.b32.xlu0 %v16858_v62, %s15905_s28 }
 0x73e   : > { %3867 = vrot.lane.b32.xlu0 %v16757_v8, %s15905_s28 }
 0x742   : > { %3871 = vrot.lane.b32.xlu0 %v16767_v36, %s15905_s28 }
 0x757   : > { %3704 = vmax.xlane.f32.xlu1 %v3703_v51 }
 0x75b   : > { %3698 = vmax.xlane.f32.xlu1 %v3697_v45 }
 0x76c   : > { %3885 = vrot.lane.b32.xlu1 %v16870_v52, %s15905_s28 }
 0x770   : > { %3869 = vrot.lane.b32.xlu1 %v16763_v21, %s15905_s28 }
 0x774   : > { %3873 = vrot.lane.b32.xlu1 %v16771_v42, %s15905_s28 }
 0x778   : > { %4066 = vrot.lane.b32.xlu1 %v16791_v19, %s15905_s28 }
 0x77c   : > { %4068 = vrot.lane.b32.xlu1 %v16807_v46, %s15905_s28 }
 0x7a5   : > { %v3690_v8 = vpop.xlane.xlu0 %3689 }
 0x7a6   : > { %v3708_v54 = vsub.f32 %v3676_v25, %v3690_v8 }
 0x7a7   : > { %v3693_v36 = vpop.xlane.xlu1 %3692 }
 0x7a8   : > { %v3709_v62 = vsub.f32 %v3677_v50, %v3693_v36  ;;  %v3718_v21 = vmul.f32 1.442695, %v3708_v54 }
 0x7a9   : > { %v3684_v34 = vpop.xlane.xlu0 %3683 }
 0x7aa   : > { %v3720_v40 = vmul.f32 1.442695, %v3709_v62  ;;  %v3706_v33 = vsub.f32 %v3674_v56, %v3684_v34 }
 0x7ab   : > { %v3687_v52 = vpop.xlane.xlu1 %3686 }
 0x7ac   : > { %v3714_v58 = vmul.f32 1.442695, %v3706_v33  ;;  %v3707_v51 = vsub.f32 %v3675_v60, %v3687_v52  ;;  %15236 = vpow2.f32 %v3720_v40 }
 0x7ad   : > { %v3702_v45 = vpop.xlane.xlu0 %3701 }
 0x7ae   : > { %v3716_v42 = vmul.f32 1.442695, %v3707_v51  ;;  %15238 = vpow2.f32 %v3714_v58  ;;  %v3712_v51 = vsub.f32 %v17179_v2, %v3702_v45 }
 0x7af   : > { %v3882_v62 = vpop.permute.xlu1 %3881 }
 0x7b0   : > { %15240 = vpow2.f32 %v3716_v42  ;;  %v3903_v54 = vsel %vm2951_vm0, %v3882_v62, 0 }
 0x7b1   : > { %15242 = vpow2.f32 %v3718_v21  ;;  %v3696_v19 = vpop.xlane.xlu0 %3695 }
 0x7b2   : > { %v3710_v33 = vsub.f32 %v17185_v29, %v3696_v19 }
 0x7b3   : > { %v3884_v34 = vpop.permute.xlu1 %3883 }
 0x7b4   : > { %v3906_v40 = vsel %vm2951_vm0, %v3884_v34, 0 }
 0x7b5   : > { %v3880_v28 = vpop.permute.xlu0 %3879 }
 0x7b6   : > { %13779 = vmatprep.subr.msk.bf16.mxu1 %vm2951_vm0, %v3880_v28  ;;  %v17216_v46 = vpop.eup %15236  ;;  %v3900_v36 = vsel %vm2951_vm0, %v3880_v28, 0  ;;  %v3722_v28 = vmul.f32 1.442695, %v3710_v33 }
 0x7b8   : > { %v17218_v25 = vpop.eup %15238  ;;  %15244 = vpow2.f32 %v3722_v28 }
 0x7ba   : > { %v17220_v50 = vpop.eup %15240 }
 0x7bb   : > { %v17222_v56 = vpop.eup %15242  ;;  %v3754_v60 = vpack.c.bf16 %v17220_v50, %v17218_v25 }
 0x7bc   : > { %v3755_v8 = vpack.c.bf16 %v17216_v46, %v17222_v56 }
 0x7bd   : > { %13271 = vmatprep.mubr.msk.bf16.mxu1 %vm2951_vm0, %v3754_v60 }
 0x7be   : > { %13272 = vmatmul.mubr.msk.bf16.vlgmr.msra.gmra.mrb[48].mxu1 %vm2951_vm0, %v3755_v8  ;;  %v3726_v8 = vmul.f32 1.442695, %v3712_v51 }
 0x7bf   : > { %13280 = vmatpush3.bf16.xpose.msra.mxu1 %v3900_v36 }
 0x7c0   : > { %13780 = vmatprep.subr.msk.bf16.mxu1 %vm2951_vm0, %v3882_v62 }
 0x7c2   : > { %v17240_v29 = vpop.eup %15244 }
 0x7c3   : > { %19023 = vst [vmem:[#allocation55_spill] sm:$0xff] %v17240_v29 }
 0x7c7   : > { %13282 = vmatpush3.bf16.xpose.msra.mxu1 %v3903_v54 }
 0x7c8   : > { %13781 = vmatprep.subr.msk.bf16.mxu1 %vm2951_vm0, %v3884_v34  ;;  %v3868_v34 = vpop.permute.xlu0 %3867 }
 0x7cc   : > { %v3872_v33 = vpop.permute.xlu0 %3871 }
 0x7cf   : > { %13284 = vmatpush3.bf16.xpose.msra.mxu1 %v3906_v40 }
 0x7e4   : > { %v3705_v52 = vpop.xlane.xlu1 %3704 }
 0x7e5   : > { %v3713_v58 = vsub.f32 %v3681_v48, %v3705_v52 }
 0x7e7   : > { %v3728_v21 = vmul.f32 1.442695, %v3713_v58 }
 0x7e8   : > { %v3699_v42 = vpop.xlane.xlu1 %3698 }
 0x7e9   : > { %v3711_v60 = vsub.f32 %v3679_v14, %v3699_v42  ;;  %15246 = vpow2.f32 %v3728_v21 }
 0x7eb   : > { %v3724_v36 = vmul.f32 1.442695, %v3711_v60 }
 0x7ec   : > { %v3886_v62 = vpop.permute.xlu1 %3885 }
 0x7ed   : > { %15248 = vpow2.f32 %v3724_v36  ;;  %13782 = vmatprep.subr.msk.bf16.mxu1 %vm2951_vm0, %v3886_v62  ;;  %v3909_v54 = vsel %vm2951_vm0, %v3886_v62, 0 }
 0x7ee   : > { %15250 = vpow2.f32 %v3726_v8  ;;  %13286 = vmatpush3.bf16.xpose.msra.mxu1 %v3909_v54 }
 0x7ef   : > { %13327 = vmatprep.subr.bf16.mxu1 %v16879_v38 }
 0x7f0   : > { %v3870_v40 = vpop.permute.xlu1 %3869 }
 0x7f3   : > { %v17242_v2 = vpop.eup %15246 }
 0x7f4   : > { %v3874_v52 = vpop.permute.xlu1 %3873 }
 0x7f7   : > { %v17244_v48 = vpop.eup %15248 }
 0x7f8   : > { %v17246_v14 = vpop.eup %15250  ;;  %v3756_v45 = vpack.c.bf16 %v17244_v48, %v17240_v29 }
 0x7f9   : > { %19024 = vst [vmem:[#allocation56_spill] sm:$0xff] %v17246_v14  ;;  %v3757_v19 = vpack.c.bf16 %v17242_v2, %v17246_v14 }
 0x7fa   : > { %13275 = vmatprep.mubr.msk.bf16.mxu1 %vm2951_vm0, %v3756_v45 }
 0x7fb   : > { %13276 = vmatmul.mubr.msk.bf16.gmra.mrb[52].mxu1 %vm2951_vm0, %v3757_v19 }
 0x7fc   : > { %13287 = vmatprep.mubr.msk.bf16.mxu1 %vm2951_vm0, %v3868_v34 }
 0x803   : > { %13288 = vmatmul.mubr.msk.bf16.vlgmr.msra.gmra.mrb[56].mxu1 %vm2951_vm0, %v3870_v40 }
 0x804   : > { %13328 = vmatpush3.bf16.msra.mxu1 %v16879_v38  ;;  %13291 = vmatprep.mubr.msk.bf16.mxu1 %vm2951_vm0, %v3872_v33 }
 0x805   : > { %13329 = vmatprep.subr.bf16.mxu1 %v16885_v6 }
 0x808   : > { %13330 = vmatpush3.bf16.msra.mxu1 %v16885_v6 }
 0x809   : > { %13331 = vmatprep.subr.bf16.mxu1 %v16892_v9 }
 0x80b   : > { %13292 = vmatmul.mubr.msk.bf16.gmra.mrb[60].mxu1 %vm2951_vm0, %v3874_v52 }
 0x80c   : > { %13332 = vmatpush3.bf16.msra.mxu1 %v16892_v9 }
 0x80d   : > { %13333 = vmatprep.subr.bf16.mxu1 %v16901_v35 }
 0x810   : > { %13334 = vmatpush3.bf16.msra.mxu1 %v16901_v35 }
 0x891   : > { %v17265_v58 = vpop.f32.mrb[48].mxu1 }
 0x892   : > { %19025 = vst [vmem:[#allocation57_spill] sm:$0xff] %v17265_v58  ;;  %v17267_v51 = vpop.f32.mrb[49].mxu1 }
 0x893   : > { %19026 = vst [vmem:[#allocation58_spill] sm:$0xff] %v17267_v51  ;;  %v17269_v28 = vpop.f32.mrb[50].mxu1 }
 0x894   : > { %19027 = vst [vmem:[#allocation59_spill] sm:$0xff] %v17269_v28  ;;  %v17271_v21 = vpop.f32.mrb[51].mxu1 }
 0x895   : > { %19028 = vst [vmem:[#allocation60_spill] sm:$0xff] %v17271_v21 }
 0x8ce   : > { %v17273_v42 = vpop.f32.mrb[52].mxu1 }
 0x8cf   : > { %19029 = vst [vmem:[#allocation61_spill] sm:$0xff] %v17273_v42  ;;  %v17275_v60 = vpop.f32.mrb[53].mxu1 }
 0x8d0   : > { %19030 = vst [vmem:[#allocation62_spill] sm:$0xff] %v17275_v60  ;;  %v17277_v8 = vpop.f32.mrb[54].mxu1 }
 0x8d1   : > { %19031 = vst [vmem:[#allocation63_spill] sm:$0xff] %v17277_v8  ;;  %v17279_v36 = vpop.f32.mrb[55].mxu1 }
 0x8d2   : > { %19032 = vst [vmem:[#allocation64_spill] sm:$0xff] %v17279_v36 }
 0x8d6   : > { %v13289_v62 = vpop.f32.mrb[56].mxu1 }
 0x8d7   : > { %v3978_v54 = vsel %vm16911_vm1, %v13289_v62, -inf  ;;  %v3945_v45 = vpop.f32.mrb[57].mxu1 }
 0x8d8   : > { %v13290_v19 = vpop.f32.mrb[58].mxu1  ;;  %v3990_v34 = vsel %vm2951_vm0, %v3978_v54, -inf  ;;  %v3976_v40 = vsel %vm16916_vm2, %v3945_v45, -inf }
 0x8d9   : > { %3991 = vmax.xlane.f32.xlu0 %v3990_v34  ;;  %v3948_v33 = vpop.f32.mrb[59].mxu1  ;;  %v3984_v60 = vsel %vm2951_vm0, %v3976_v40, -inf  ;;  %v3979_v62 = vsel %vm16935_vm4, %v13290_v19, -inf }
 0x8da   : > { %v3977_v52 = vsel %vm16925_vm3, %v3948_v33, -inf  ;;  %v3993_v36 = vsel %vm2951_vm0, %v3979_v62, -inf }
 0x8db   : > { %v3987_v42 = vsel %vm2951_vm0, %v3977_v52, -inf }
 0x8dc   : > { %3988 = vmax.xlane.f32.xlu1 %v3987_v42 }
 0x8dd   : > { %3985 = vmax.xlane.f32.xlu0 %v3984_v60 }
 0x8de   : > { %v13293_v58 = vpop.f32.mrb[60].mxu1 }
 0x8df   : > { %v3961_v51 = vpop.f32.mrb[61].mxu1 }
 0x8e0   : > { %v13294_v8 = vpop.f32.mrb[62].mxu1  ;;  %v3980_v60 = vsel %vm16972_vm8, %v3961_v51, -inf  ;;  %v4067_v51 = vpop.permute.xlu1 %4066 }
 0x8e1   : > { %3994 = vmax.xlane.f32.xlu0 %v3993_v36  ;;  %v3964_v45 = vpop.f32.mrb[63].mxu1  ;;  %v3996_v19 = vsel %vm2951_vm0, %v3980_v60, -inf  ;;  %v17305_v36 = vsel %vm16951_vm5, %v13293_v58, -inf }
 0x8e2   : > { %v3981_v42 = vsel %vm16962_vm7, %v3964_v45, -inf }
 0x8e3   : > { %v3999_v34 = vsel %vm2951_vm0, %v3981_v42, -inf }
 0x8e4   : > { %v4069_v45 = vpop.permute.xlu1 %4068 }
 0x8ed   : > { %4070 = vrot.lane.b32.xlu1 %v16820_v20, %s15905_s28  ;;  %v4002_v20 = vsel %vm2951_vm0, %v17305_v36, -inf }
 0x8f7   : > { %4064 = vrot.lane.b32.xlu0 %v16778_v12, %s15905_s28  ;;  %v17311_v12 = vsel %vm16956_vm6, %v13294_v8, -inf }
 0x8f8   : > { %v4005_v33 = vsel %vm2951_vm0, %v17311_v12, -inf }
 0x911   : > { %4000 = vmax.xlane.f32.xlu1 %v3999_v34 }
 0x916   : > { %3997 = vmax.xlane.f32.xlu0 %v3996_v19 }
 0x91a   : > { %4003 = vmax.xlane.f32.xlu0 %v4002_v20 }
 0x91e   : > { %4006 = vmax.xlane.f32.xlu0 %v4005_v33 }
 0x966   : > { %v3992_v34 = vpop.xlane.xlu0 %3991 }
 0x967   : > { %v4010_v57 = vsub.f32 %v3978_v54, %v3992_v34  ;;  %v4236_v54 = vsel %vm2951_vm0, %v16868_v49, 0 }
 0x969   : > { %v3989_v28 = vpop.xlane.xlu1 %3988  ;;  %v4020_v20 = vmul.f32 1.442695, %v4010_v57 }
 0x96a   : > { %v4009_v21 = vsub.f32 %v3977_v52, %v3989_v28  ;;  %v3986_v58 = vpop.xlane.xlu0 %3985 }
 0x96b   : > { %v4008_v61 = vsub.f32 %v3976_v40, %v3986_v58 }
 0x96c   : > { %v4018_v19 = vmul.f32 1.442695, %v4009_v21 }
 0x96d   : > { %v4016_v17 = vmul.f32 1.442695, %v4008_v61  ;;  %v4071_v21 = vpop.permute.xlu1 %4070 }
 0x96e   : > { %15252 = vpow2.f32 %v4018_v19  ;;  %v3995_v14 = vpop.xlane.xlu0 %3994 }
 0x96f   : > { %15254 = vpow2.f32 %v4016_v17  ;;  %v4011_v8 = vsub.f32 %v3979_v62, %v3995_v14  ;;  %v4233_v14 = vsel %vm2951_vm0, %v16864_v59, 0  ;;  %v4239_v62 = vsel %vm2951_vm0, %v16874_v53, 0 }
 0x971   : > { %v4022_v5 = vmul.f32 1.442695, %v4011_v8 }
 0x972   : > { %v4065_v29 = vpop.permute.xlu0 %4064 }
 0x973   : > { %13295 = vmatprep.subr.bf16.mxu0 %v4065_v29  ;;  %15256 = vpow2.f32 %v4022_v5 }
 0x974   : > { %13296 = vmatpush3.bf16.msra.mxu0 %v4065_v29  ;;  %15258 = vpow2.f32 %v4020_v20  ;;  %v4230_v29 = vsel %vm2951_vm0, %v16860_v10, 0 }
 0x975   : > { %13297 = vmatprep.subr.bf16.mxu0 %v4067_v51 }
 0x978   : > { %v17315_v33 = vpop.eup %15252  ;;  %13298 = vmatpush3.bf16.msra.mxu0 %v4067_v51 }
 0x979   : > { %v17317_v28 = vpop.eup %15254  ;;  %13299 = vmatprep.subr.bf16.mxu0 %v4069_v45 }
 0x97a   : > { %v4056_v61 = vpack.c.bf16 %v17315_v33, %v17317_v28 }
 0x97c   : > { %13300 = vmatpush3.bf16.msra.mxu0 %v4069_v45  ;;  %13303 = vmatprep.mubr.msk.bf16.mxu0 %vm2951_vm0, %v4056_v61 }
 0x97d   : > { %13301 = vmatprep.subr.bf16.mxu0 %v4071_v21  ;;  %v17322_v57 = vpop.eup %15256 }
 0x97e   : > { %v17324_v5 = vpop.eup %15258  ;;  %v4041_v4 = vsel %vm2951_vm0, %v17322_v57, 0.0 }
 0x97f   : > { %v4057_v17 = vpack.c.bf16 %v17322_v57, %v17324_v5  ;;  %v3408_v57 = vsel %vm2951_vm0, %v17077_v15, 0.0  ;;  %v3733_v15 = vsel %vm2951_vm0, %v17220_v50, 0.0  ;;  %v4032_v50 = vsel %vm2951_vm0, %v17317_v28, 0.0 }
 0x980   : > { %13302 = vmatpush3.bf16.msra.mxu0 %v4071_v21 }
 0x981   : > { %13783 = vmatprep.subr.msk.bf16.mxu0 %vm2951_vm0, %v16860_v10 }
 0x983   : > { %13304 = vmatmul.mubr.msk.bf16.vlgmr.msra.gmra.mrb[96].mxu0 %vm2951_vm0, %v4057_v17 }
 0x989   : > { %13312 = vmatpush3.bf16.xpose.msra.mxu0 %v4230_v29 }
 0x98a   : > { %13784 = vmatprep.subr.msk.bf16.mxu0 %vm2951_vm0, %v16864_v59 }
 0x991   : > { %13314 = vmatpush3.bf16.xpose.msra.mxu0 %v4233_v14 }
 0x992   : > { %13785 = vmatprep.subr.msk.bf16.mxu0 %vm2951_vm0, %v16868_v49 }
 0x999   : > { %13316 = vmatpush3.bf16.xpose.msra.mxu0 %v4236_v54 }
 0x99a   : > { %13786 = vmatprep.subr.msk.bf16.mxu0 %vm2951_vm0, %v16874_v53 }
 0x99e   : > { %v4001_v40 = vpop.xlane.xlu1 %4000 }
 0x99f   : > { %v4013_v52 = vsub.f32 %v3981_v42, %v4001_v40 }
 0x9a1   : > { %13318 = vmatpush3.bf16.xpose.msra.mxu0 %v4239_v62  ;;  %v4026_v51 = vmul.f32 1.442695, %v4013_v52 }
 0x9a3   : > { %v3998_v45 = vpop.xlane.xlu0 %3997  ;;  %15260 = vpow2.f32 %v4026_v51 }
 0x9a4   : > { %v4012_v34 = vsub.f32 %v3980_v60, %v3998_v45 }
 0x9a6   : > { %v4024_v58 = vmul.f32 1.442695, %v4012_v34 }
 0x9a7   : > { %v4004_v19 = vpop.xlane.xlu0 %4003 }
 0x9a8   : > { %15262 = vpow2.f32 %v4024_v58  ;;  %v4014_v8 = vsub.f32 %v17305_v36, %v4004_v19 }
 0x9aa   : > { %v4028_v20 = vmul.f32 1.442695, %v4014_v8 }
 0x9ab   : > { %v4007_v61 = vpop.xlane.xlu0 %4006 }
 0x9ac   : > { %v4015_v21 = vsub.f32 %v17311_v12, %v4007_v61  ;;  %15264 = vpow2.f32 %v4028_v20 }
 0x9ad   : > { %v17347_v42 = vpop.eup %15260 }
 0x9ae   : > { %v4030_v17 = vmul.f32 1.442695, %v4015_v21  ;;  %v4047_v31 = vsel %vm2951_vm0, %v17347_v42, 0.0 }
 0x9b0   : > { %15266 = vpow2.f32 %v4030_v17 }
 0x9b2   : > { %v17349_v29 = vpop.eup %15262 }
 0x9b3   : > { %v4058_v60 = vpack.c.bf16 %v17347_v42, %v17349_v29  ;;  %v3100_v42 = vsel %vm2951_vm0, %v17021_v3, 0.0  ;;  %v3112_v3 = vsel %vm2951_vm0, %v17047_v27, 0.0  ;;  %v3402_v27 = vsel %vm2951_vm0, %v17081_v22, 0.0 }
 0x9b4   : > { %v3411_v22 = vsel %vm2951_vm0, %v17111_v55, 0.0  ;;  %v3736_v55 = vsel %vm2951_vm0, %v17222_v56, 0.0 }
 0x9b5   : > { %13307 = vmatprep.mubr.msk.bf16.mxu0 %vm2951_vm0, %v4058_v60 }
 0x9b6   : > { %v17354_v14 = vpop.eup %15264 }
 0x9ba   : > { %v17356_v54 = vpop.eup %15266 }
 0x9bb   : > { %v4059_v36 = vpack.c.bf16 %v17356_v54, %v17354_v14 }
 0x9bd   : > { %13308 = vmatmul.mubr.msk.bf16.gmra.mrb[100].mxu0 %vm2951_vm0, %v4059_v36 }
 0x9be   : > { %13319 = vmatprep.mubr.msk.bf16.mxu0 %vm2951_vm0, %v16781_v13 }
 0x9c5   : > { %13320 = vmatmul.mubr.msk.bf16.vlgmr.msra.gmra.mrb[104].mxu0 %vm2951_vm0, %v16795_v24 }
 0x9c6   : > { %13323 = vmatprep.mubr.msk.bf16.mxu0 %vm2951_vm0, %v16810_v0 }
 0x9cd   : > { %13324 = vmatmul.mubr.msk.bf16.gmra.mrb[108].mxu0 %vm2951_vm0, %v16823_v41 }
 0xa56   : > { %v17369_v12 = vpop.f32.mrb[96].mxu0 }
 0xa57   : > { %19033 = vst [vmem:[#allocation65_spill] sm:$0xff] %v17369_v12  ;;  %v17371_v40 = vpop.f32.mrb[97].mxu0 }
 0xa58   : > { %19034 = vst [vmem:[#allocation66_spill] sm:$0xff] %v17371_v40  ;;  %v17373_v52 = vpop.f32.mrb[98].mxu0 }
 0xa59   : > { %v17375_v62 = vpop.f32.mrb[99].mxu0 }
 0xa90   : > { %v17377_v51 = vpop.f32.mrb[100].mxu0 }
 0xa91   : > { %19035 = vst [vmem:[#allocation67_spill] sm:$0xff] %v17377_v51  ;;  %v17379_v45 = vpop.f32.mrb[101].mxu0 }
 0xa92   : > { %19036 = vst [vmem:[#allocation68_spill] sm:$0xff] %v17379_v45  ;;  %v17381_v34 = vpop.f32.mrb[102].mxu0 }
 0xa93   : > { %19037 = vst [vmem:[#allocation69_spill] sm:$0xff] %v17381_v34  ;;  %v17383_v58 = vpop.f32.mrb[103].mxu0 }
 0xa98   : > { %v13321_v19 = vpop.f32.mrb[104].mxu0 }
 0xa99   : > { %v4308_v8 = vsel %vm16911_vm1, %v13321_v19, -inf  ;;  %v4275_v20 = vpop.f32.mrb[105].mxu0 }
 0xa9a   : > { %v13322_v61 = vpop.f32.mrb[106].mxu0  ;;  %v4320_v21 = vsel %vm2951_vm0, %v4308_v8, -inf  ;;  %v4306_v17 = vsel %vm16916_vm2, %v4275_v20, -inf }
 0xa9b   : > { %v4309_v60 = vsel %vm16935_vm4, %v13322_v61, -inf  ;;  %4321 = vmax.xlane.f32.xlu0 %v4320_v21  ;;  %v4278_v36 = vpop.f32.mrb[107].mxu0  ;;  %v4314_v19 = vsel %vm2951_vm0, %v4306_v17, -inf }
 0xa9c   : > { %v4323_v45 = vsel %vm2951_vm0, %v4309_v60, -inf  ;;  %v4307_v12 = vsel %vm16925_vm3, %v4278_v36, -inf }
 0xa9d   : > { %4324 = vmax.xlane.f32.xlu1 %v4323_v45  ;;  %v4317_v40 = vsel %vm2951_vm0, %v4307_v12, -inf }
 0xa9f   : > { %4315 = vmax.xlane.f32.xlu0 %v4314_v19 }
 0xaa0   : > { %v13325_v51 = vpop.f32.mrb[108].mxu0 }
 0xaa1   : > { %v17399_v20 = vsel %vm16951_vm5, %v13325_v51, -inf  ;;  %4318 = vmax.xlane.f32.xlu1 %v4317_v40  ;;  %v4291_v61 = vpop.f32.mrb[109].mxu0 }
 0xaa2   : > { %v13326_v21 = vpop.f32.mrb[110].mxu0  ;;  %v4332_v34 = vsel %vm2951_vm0, %v17399_v20, -inf  ;;  %v17405_v36 = vsel %vm16972_vm8, %v4291_v61, -inf }
 0xaa3   : > { %4333 = vmax.xlane.f32.xlu0 %v4332_v34  ;;  %v4294_v45 = vpop.f32.mrb[111].mxu0  ;;  %v4326_v19 = vsel %vm2951_vm0, %v17405_v36, -inf  ;;  %v4313_v40 = vsel %vm16956_vm6, %v13326_v21, -inf }
 0xaa7   : > { %4327 = vmax.xlane.f32.xlu0 %v4326_v19 }
 0xab2   : > { %4513 = vrot.lane.b32.xlu1 %v16864_v59, %s15905_s28  ;;  %v4335_v59 = vsel %vm2951_vm0, %v4313_v40, -inf }
 0xab6   : > { %4515 = vrot.lane.b32.xlu1 %v16868_v49, %s15905_s28  ;;  %v17426_v49 = vsel %vm16962_vm7, %v4294_v45, -inf }
 0xabd   : > { %4511 = vrot.lane.b32.xlu0 %v16860_v10, %s15905_s28  ;;  %v4329_v10 = vsel %vm2951_vm0, %v17426_v49, -inf }
 0xac1   : > { %4499 = vrot.lane.b32.xlu0 %v16781_v13, %s15905_s28  ;;  %v4035_v13 = vsel %vm2951_vm0, %v17315_v33, 0.0 }
 0xac5   : > { %4503 = vrot.lane.b32.xlu0 %v16810_v0, %s15905_s28 }
 0xac9   : > { %4696 = vrot.lane.b32.xlu0 %v16879_v38, %s15905_s28 }
 0xada   : > { %4336 = vmax.xlane.f32.xlu1 %v4335_v59 }
 0xade   : > { %4330 = vmax.xlane.f32.xlu1 %v4329_v10 }
 0xaef   : > { %4517 = vrot.lane.b32.xlu1 %v16874_v53, %s15905_s28 }
 0xaf3   : > { %4501 = vrot.lane.b32.xlu1 %v16795_v24, %s15905_s28 }
 0xaf7   : > { %4505 = vrot.lane.b32.xlu1 %v16823_v41, %s15905_s28 }
 0xafb   : > { %4698 = vrot.lane.b32.xlu1 %v16885_v6, %s15905_s28 }
 0xaff   : > { %4702 = vrot.lane.b32.xlu1 %v16901_v35, %s15905_s28 }
 0xb23   : > { %4036 = vadd.xlane.f32.xlu1 %v4035_v13 }
 0xb28   : > { %v4322_v0 = vpop.xlane.xlu0 %4321 }
 0xb29   : > { %v4340_v53 = vsub.f32 %v4308_v8, %v4322_v0 }
 0xb2a   : > { %v4325_v38 = vpop.xlane.xlu1 %4324 }
 0xb2b   : > { %v4341_v51 = vsub.f32 %v4309_v60, %v4325_v38  ;;  %v4350_v19 = vmul.f32 1.442695, %v4340_v53 }
 0xb2c   : > { %v4316_v34 = vpop.xlane.xlu0 %4315 }
 0xb2d   : > { %v4352_v61 = vmul.f32 1.442695, %v4341_v51  ;;  %v4338_v24 = vsub.f32 %v4306_v17, %v4316_v34 }
 0xb2e   : > { %v4319_v21 = vpop.xlane.xlu1 %4318 }
 0xb2f   : > { %v4346_v45 = vmul.f32 1.442695, %v4338_v24  ;;  %v4339_v41 = vsub.f32 %v4307_v12, %v4319_v21  ;;  %15268 = vpow2.f32 %v4352_v61 }
 0xb30   : > { %v4334_v59 = vpop.xlane.xlu0 %4333 }
 0xb31   : > { %v4348_v6 = vmul.f32 1.442695, %v4339_v41  ;;  %15270 = vpow2.f32 %v4346_v45 }
 0xb32   : > { %v4514_v53 = vpop.permute.xlu1 %4513 }
 0xb33   : > { %15272 = vpow2.f32 %v4348_v6  ;;  %v4535_v61 = vsel %vm2951_vm0, %v4514_v53, 0  ;;  %v4344_v6 = vsub.f32 %v17399_v20, %v4334_v59 }
 0xb34   : > { %15274 = vpow2.f32 %v4350_v19  ;;  %v4328_v35 = vpop.xlane.xlu0 %4327 }
 0xb35   : > { %v4342_v45 = vsub.f32 %v17405_v36, %v4328_v35 }
 0xb36   : > { %v4516_v24 = vpop.permute.xlu1 %4515 }
 0xb37   : > { %v4538_v21 = vsel %vm2951_vm0, %v4516_v24, 0 }
 0xb38   : > { %v4512_v33 = vpop.permute.xlu0 %4511 }
 0xb39   : > { %13787 = vmatprep.subr.msk.bf16.mxu1 %vm2951_vm0, %v4512_v33  ;;  %v17443_v10 = vpop.eup %15268  ;;  %v4532_v51 = vsel %vm2951_vm0, %v4512_v33, 0  ;;  %v4354_v33 = vmul.f32 1.442695, %v4342_v45 }
 0xb3b   : > { %v17445_v8 = vpop.eup %15270  ;;  %15276 = vpow2.f32 %v4354_v33 }
 0xb3c   : > { %v4500_v60 = vpop.permute.xlu0 %4499 }
 0xb3d   : > { %v17447_v17 = vpop.eup %15272 }
 0xb3e   : > { %v17449_v13 = vpop.eup %15274  ;;  %v4386_v12 = vpack.c.bf16 %v17447_v17, %v17445_v8 }
 0xb3f   : > { %v4387_v0 = vpack.c.bf16 %v17443_v10, %v17449_v13 }
 0xb40   : > { %13335 = vmatprep.mubr.msk.bf16.mxu1 %vm2951_vm0, %v4386_v12  ;;  %v4504_v38 = vpop.permute.xlu0 %4503 }
 0xb41   : > { %13336 = vmatmul.mubr.msk.bf16.vlgmr.msra.gmra.mrb[64].mxu1 %vm2951_vm0, %v4387_v0 }
 0xb42   : > { %13344 = vmatpush3.bf16.xpose.msra.mxu1 %v4532_v51 }
 0xb43   : > { %13788 = vmatprep.subr.msk.bf16.mxu1 %vm2951_vm0, %v4514_v53 }
 0xb44   : > { %v4697_v34 = vpop.permute.xlu0 %4696 }
 0xb45   : > { %13359 = vmatprep.subr.bf16.mxu0 %v4697_v34  ;;  %v17467_v20 = vpop.eup %15276 }
 0xb46   : > { %13360 = vmatpush3.bf16.msra.mxu0 %v4697_v34  ;;  %v4358_v34 = vmul.f32 1.442695, %v4344_v6 }
 0xb4a   : > { %13346 = vmatpush3.bf16.xpose.msra.mxu1 %v4535_v61 }
 0xb4b   : > { %13789 = vmatprep.subr.msk.bf16.mxu1 %vm2951_vm0, %v4516_v24 }
 0xb52   : > { %13348 = vmatpush3.bf16.xpose.msra.mxu1 %v4538_v21 }
 0xb67   : > { %v4337_v41 = vpop.xlane.xlu1 %4336 }
 0xb68   : > { %v4345_v19 = vsub.f32 %v4313_v40, %v4337_v41 }
 0xb6a   : > { %v4360_v12 = vmul.f32 1.442695, %v4345_v19 }
 0xb6b   : > { %v4331_v0 = vpop.xlane.xlu1 %4330 }
 0xb6c   : > { %v4343_v51 = vsub.f32 %v17426_v49, %v4331_v0  ;;  %15278 = vpow2.f32 %v4360_v12 }
 0xb6e   : > { %v4356_v53 = vmul.f32 1.442695, %v4343_v51 }
 0xb6f   : > { %v4518_v61 = vpop.permute.xlu1 %4517 }
 0xb70   : > { %15280 = vpow2.f32 %v4356_v53  ;;  %13790 = vmatprep.subr.msk.bf16.mxu1 %vm2951_vm0, %v4518_v61  ;;  %v4541_v24 = vsel %vm2951_vm0, %v4518_v61, 0 }
 0xb71   : > { %15282 = vpow2.f32 %v4358_v34  ;;  %13350 = vmatpush3.bf16.xpose.msra.mxu1 %v4541_v24 }
 0xb73   : > { %v4502_v36 = vpop.permute.xlu1 %4501 }
 0xb76   : > { %v17469_v59 = vpop.eup %15278 }
 0xb77   : > { %v4506_v40 = vpop.permute.xlu1 %4505 }
 0xb7a   : > { %v17471_v35 = vpop.eup %15280 }
 0xb7b   : > { %v17473_v49 = vpop.eup %15282  ;;  %v4699_v21 = vpop.permute.xlu1 %4698  ;;  %v4388_v45 = vpack.c.bf16 %v17471_v35, %v17467_v20 }
 0xb7c   : > { %13361 = vmatprep.subr.bf16.mxu0 %v4699_v21  ;;  %v4389_v41 = vpack.c.bf16 %v17469_v59, %v17473_v49 }
 0xb7d   : > { %13339 = vmatprep.mubr.msk.bf16.mxu1 %vm2951_vm0, %v4388_v45  ;;  %13362 = vmatpush3.bf16.msra.mxu0 %v4699_v21 }
 0xb7e   : > { %13340 = vmatmul.mubr.msk.bf16.gmra.mrb[68].mxu1 %vm2951_vm0, %v4389_v41 }
 0xb7f   : > { %13351 = vmatprep.mubr.msk.bf16.mxu1 %vm2951_vm0, %v4500_v60  ;;  %v17577_v47 = vpop.permute.xlu1 %4702 }
 0xb86   : > { %13352 = vmatmul.mubr.msk.bf16.vlgmr.msra.gmra.mrb[72].mxu1 %vm2951_vm0, %v4502_v36 }
 0xb87   : > { %13355 = vmatprep.mubr.msk.bf16.mxu1 %vm2951_vm0, %v4504_v38 }
 0xb8e   : > { %13356 = vmatmul.mubr.msk.bf16.gmra.mrb[76].mxu1 %vm2951_vm0, %v4506_v40 }
 0xbb0   : > { %v4037_v28 = vpop.xlane.xlu1 %4036 }
 0xbb1   : > { %15284 = vrcp.f32 %v4037_v28 }
 0xbbb   : > { %v15285_v44 = vpop.eup %15284 }
 0xc14   : > { %v17485_v19 = vpop.f32.mrb[64].mxu1 }
 0xc15   : > { %v17487_v6 = vpop.f32.mrb[65].mxu1 }
 0xc16   : > { %v17489_v33 = vpop.f32.mrb[66].mxu1 }
 0xc17   : > { %v17491_v12 = vpop.f32.mrb[67].mxu1 }
 0xc51   : > { %v17493_v0 = vpop.f32.mrb[68].mxu1 }
 0xc52   : > { %v17495_v51 = vpop.f32.mrb[69].mxu1 }
 0xc53   : > { %v17497_v34 = vpop.f32.mrb[70].mxu1 }
 0xc54   : > { %v17499_v60 = vpop.f32.mrb[71].mxu1 }
 0xc55   : > { %19038 = vst [vmem:[#allocation70_spill] sm:$0xff] %v17499_v60 }
 0xc59   : > { %v13353_v53 = vpop.f32.mrb[72].mxu1 }
 0xc5a   : > { %v17503_v38 = vsel %vm16911_vm1, %v13353_v53, -inf  ;;  %v4577_v61 = vpop.f32.mrb[73].mxu1 }
 0xc5b   : > { %v13354_v24 = vpop.f32.mrb[74].mxu1  ;;  %v4622_v36 = vsel %vm2951_vm0, %v17503_v38, -inf  ;;  %v17509_v40 = vsel %vm16916_vm2, %v4577_v61, -inf }
 0xc5c   : > { %4623 = vmax.xlane.f32.xlu0 %v4622_v36  ;;  %v4580_v21 = vpop.f32.mrb[75].mxu1  ;;  %v4616_v41 = vsel %vm2951_vm0, %v17509_v40, -inf  ;;  %v17521_v53 = vsel %vm16935_vm4, %v13354_v24, -inf }
 0xc5d   : > { %v17513_v45 = vsel %vm16925_vm3, %v4580_v21, -inf }
 0xc5e   : > { %v4619_v1 = vsel %vm2951_vm0, %v17513_v45, -inf }
 0xc5f   : > { %4620 = vmax.xlane.f32.xlu1 %v4619_v1  ;;  %v4625_v1 = vsel %vm2951_vm0, %v17521_v53, -inf }
 0xc60   : > { %4617 = vmax.xlane.f32.xlu0 %v4616_v41 }
 0xc61   : > { %v13357_v43 = vpop.f32.mrb[76].mxu1 }
 0xc62   : > { %v17525_v61 = vsel %vm16951_vm5, %v13357_v43, -inf  ;;  %v4593_v32 = vpop.f32.mrb[77].mxu1 }
 0xc63   : > { %v4634_v36 = vsel %vm2951_vm0, %v17525_v61, -inf  ;;  %v13358_v21 = vpop.f32.mrb[78].mxu1 }
 0xc64   : > { %4626 = vmax.xlane.f32.xlu0 %v4625_v1  ;;  %4635 = vmax.xlane.f32.xlu1 %v4634_v36  ;;  %v4596_v60 = vpop.f32.mrb[79].mxu1  ;;  %v17535_v24 = vsel %vm16956_vm6, %v13358_v21, -inf  ;;  %v3420_v36 = vsel %vm2951_vm0, %v17120_v18, 0.0  ;;  %v3745_v18 = vsel %vm2951_vm0, %v17244_v48, 0.0  ;;  %v3751_v48 = vsel %vm2951_vm0, %v17242_v2, 0.0 }
 0xc65   : > { %v4637_v7 = vsel %vm2951_vm0, %v17535_v24, -inf  ;;  %v17541_v41 = vsel %vm16962_vm7, %v4596_v60, -inf  ;;  %v4053_v60 = vsel %vm2951_vm0, %v17356_v54, 0.0  ;;  %v17571_v54 = vsel %vm16972_vm8, %v4593_v32, -inf }
 0xc66   : > { %v4631_v43 = vsel %vm2951_vm0, %v17541_v41, -inf  ;;  %v3118_v32 = vsel %vm2951_vm0, %v17057_v30, 0.0  ;;  %v4038_v21 = vsel %vm2951_vm0, %v17324_v5, 0.0  ;;  %v3405_v2 = vsel %vm2951_vm0, %v17083_v16, 0.0 }
 0xc67   : > { %v4044_v1 = vsel %vm2951_vm0, %v17349_v29, 0.0  ;;  %v4162_v30 = vmul.f32 %v15285_v44, %v17375_v62  ;;  %v4050_v5 = vsel %vm2951_vm0, %v17354_v14, 0.0  ;;  %v3417_v16 = vsel %vm2951_vm0, %v17118_v23, 0.0 }
 0xc68   : > { %4042 = vadd.xlane.f32.xlu1 %v4041_v4  ;;  %v3730_v29 = vsel %vm2951_vm0, %v17218_v25, 0.0  ;;  %v3097_v62 = vsel %vm2951_vm0, %v17023_v37, 0.0  ;;  %v3103_v14 = vsel %vm2951_vm0, %v17027_v39, 0.0  ;;  %v19039_v4 = vld [vmem:[#allocation55_spill] sm:$0xff] }
 0xc69   : > { %v3742_v23 = vsel %vm2951_vm0, %v19039_v4, 0.0  ;;  %v14285_v4 = vld [vmem:[#allocation11 + $0x48] ss:$12 sps:$4 sm:$0xff]  }
 0xc6c   : > { %4638 = vmax.xlane.f32.xlu1 %v4637_v7  ;;  %v19040_v7 = vld [vmem:[#allocation38_spill] sm:$0xff] }
 0xc6d   : > { %v3109_v25 = vsel %vm2951_vm0, %v19040_v7, 0.0 }
 0xc70   : > { %4632 = vmax.xlane.f32.xlu1 %v4631_v43  ;;  %v19041_v43 = vld [vmem:[#allocation56_spill] sm:$0xff] }
 0xc71   : > { %v3748_v37 = vsel %vm2951_vm0, %v19041_v43, 0.0 }
 0xc74   : > { %3409 = vadd.xlane.f32.xlu1 %v3408_v57  ;;  %v19042_v57 = vld [vmem:[#allocation37_spill] sm:$0xff] }
 0xc75   : > { %v3115_v56 = vsel %vm2951_vm0, %v19042_v57, 0.0  ;;  %v14288_v57 = vld [vmem:[#allocation11 + $0x60] ss:$12 sps:$4 sm:$0xff]  }
 0xc78   : > { %4048 = vadd.xlane.f32.xlu1 %v4047_v31 }
 0xc7a   : > { %4700 = vrot.lane.b32.xlu0 %v16892_v9, %s15905_s28  ;;  %v3739_v9 = vsel %vm2951_vm0, %v17216_v46, 0.0  ;;  %v4628_v46 = vsel %vm2951_vm0, %v17571_v54, -inf }
 0xc7c   : > { %3415 = vadd.xlane.f32.xlu1 %v3414_v26 }
 0xc80   : > { %4054 = vadd.xlane.f32.xlu1 %v4053_v60 }
 0xc84   : > { %3421 = vadd.xlane.f32.xlu1 %v3420_v36 }
 0xc88   : > { %3734 = vadd.xlane.f32.xlu1 %v3733_v15 }
 0xc8c   : > { %3101 = vadd.xlane.f32.xlu1 %v3100_v42 }
 0xc90   : > { %3740 = vadd.xlane.f32.xlu1 %v3739_v9 }
 0xc94   : > { %3107 = vadd.xlane.f32.xlu1 %v3106_v11 }
 0xc98   : > { %3746 = vadd.xlane.f32.xlu1 %v3745_v18 }
 0xc99   : > { %4033 = vadd.xlane.f32.xlu0 %v4032_v50 }
 0xc9c   : > { %3113 = vadd.xlane.f32.xlu1 %v3112_v3 }
 0xc9d   : > { %4629 = vmax.xlane.f32.xlu0 %v4628_v46 }
 0xca0   : > { %3752 = vadd.xlane.f32.xlu1 %v3751_v48 }
 0xca1   : > { %3400 = vadd.xlane.f32.xlu0 %v3399_v63 }
 0xca4   : > { %3119 = vadd.xlane.f32.xlu1 %v3118_v32 }
 0xca5   : > { %3403 = vadd.xlane.f32.xlu0 %v3402_v27 }
 0xca9   : > { %4039 = vadd.xlane.f32.xlu0 %v4038_v21 }
 0xcad   : > { %3406 = vadd.xlane.f32.xlu0 %v3405_v2  ;;  %v14276_v2 = vld [vmem:[#allocation11] ss:$12 sps:$4 sm:$0xff]  }
 0xcb1   : > { %4045 = vadd.xlane.f32.xlu0 %v4044_v1 }
 0xcb5   : > { %3412 = vadd.xlane.f32.xlu0 %v3411_v22  ;;  %4179 = vrot.lane.b32.xlu1 %v4162_v30, %s15905_s28 }
 0xcb9   : > { %4051 = vadd.xlane.f32.xlu0 %v4050_v5  ;;  %v14279_v5 = vld [vmem:[#allocation11 + $0x18] ss:$12 sps:$4 sm:$0xff]  }
 0xcbd   : > { %3418 = vadd.xlane.f32.xlu0 %v3417_v16 }
 0xcc1   : > { %3731 = vadd.xlane.f32.xlu0 %v3730_v29  ;;  %v14284_v29 = vld [vmem:[#allocation11 + $0x34] ss:$12 sps:$4 sm:$0xff]  }
 0xcc5   : > { %3098 = vadd.xlane.f32.xlu0 %v3097_v62  ;;  %v14282_v62 = vld [vmem:[#allocation11 + $0x30] ss:$12 sps:$4 sm:$0xff]  }
 0xcc9   : > { %3737 = vadd.xlane.f32.xlu0 %v3736_v55 }
 0xccd   : > { %3104 = vadd.xlane.f32.xlu0 %v3103_v14  ;;  %v14287_v14 = vld [vmem:[#allocation11 + $0x4c] ss:$12 sps:$4 sm:$0xff]  }
 0xcd1   : > { %3743 = vadd.xlane.f32.xlu0 %v3742_v23 }
 0xcd5   : > { %3110 = vadd.xlane.f32.xlu0 %v3109_v25  ;;  %v14290_v25 = vld [vmem:[#allocation11 + $0x64] ss:$12 sps:$4 sm:$0xff]  }
 0xcd9   : > { %3749 = vadd.xlane.f32.xlu0 %v3748_v37 }
 0xcdd   : > { %3116 = vadd.xlane.f32.xlu0 %v3115_v56 }
 0xce9   : > { %v4624_v31 = vpop.xlane.xlu0 %4623 }
 0xcea   : > { %v4642_v39 = vsub.f32 %v17503_v38, %v4624_v31 }
 0xcec   : > { %v4621_v26 = vpop.xlane.xlu1 %4620  ;;  %v4652_v11 = vmul.f32 1.442695, %v4642_v39 }
 0xced   : > { %v4641_v60 = vsub.f32 %v17513_v45, %v4621_v26  ;;  %v4618_v36 = vpop.xlane.xlu0 %4617  ;;  %v14293_v26 = vld [vmem:[#allocation11 + $0x7c] ss:$12 sps:$4 sm:$0xff]  }
 0xcee   : > { %v4640_v15 = vsub.f32 %v17509_v40, %v4618_v36  ;;  %v14278_v40 = vld [vmem:[#allocation11 + $0x4] ss:$12 sps:$4 sm:$0xff]  }
 0xcef   : > { %v4650_v42 = vmul.f32 1.442695, %v4641_v60  ;;  %v14291_v60 = vld [vmem:[#allocation11 + $0x78] ss:$12 sps:$4 sm:$0xff]  }
 0xcf0   : > { %v4648_v9 = vmul.f32 1.442695, %v4640_v15  ;;  %v14296_v15 = vld [vmem:[#allocation11 + $0x94] ss:$12 sps:$4 sm:$0xff]  }
 0xcf1   : > { %15286 = vpow2.f32 %v4650_v42  ;;  %v4627_v18 = vpop.xlane.xlu0 %4626  ;;  %v17620_v50 = vpop.xlane.xlu1 %4635  ;;  %v19044_v42 = vld [vmem:[#allocation54_spill] sm:$0xff] }
 0xcf2   : > { %15288 = vpow2.f32 %v4648_v9  ;;  %v4643_v3 = vsub.f32 %v17521_v53, %v4627_v18  ;;  %v14294_v18 = vld [vmem:[#allocation11 + $0x90] ss:$12 sps:$4 sm:$0xff]  }
 0xcf3   : > { %15290 = vpow2.f32 %v4652_v11 }
 0xcf4   : > { %v4654_v46 = vmul.f32 1.442695, %v4643_v3 }
 0xcf5   : > { %v4701_v48 = vpop.permute.xlu0 %4700  ;;  %v4043_v63 = vpop.xlane.xlu1 %4042 }
 0xcf6   : > { %15292 = vpow2.f32 %v4654_v46  ;;  %13363 = vmatprep.subr.bf16.mxu0 %v4701_v48  ;;  %v19045_v46 = vld [vmem:[#allocation69_spill] sm:$0xff] }
 0xcf7   : > { %13364 = vmatpush3.bf16.msra.mxu0 %v4701_v48  ;;  %15294 = vrcp.f32 %v4043_v63 }
 0xcf8   : > { %13365 = vmatprep.subr.bf16.mxu0 %v17577_v47 }
 0xcf9   : > { %v17624_v38 = vpop.xlane.xlu1 %4638 }
 0xcfb   : > { %v17626_v45 = vpop.eup %15286  ;;  %13366 = vmatpush3.bf16.msra.mxu0 %v17577_v47  ;;  %v14281_v47 = vld [vmem:[#allocation11 + $0x1c] ss:$12 sps:$4 sm:$0xff]  }
 0xcfc   : > { %v17629_v28 = vpop.eup %15288  ;;  %5357 = vmatprep.subr.bf16.mxu0 %v14278_v40  ;;  %v14297_v40 = vld [vmem:[#allocation11 + $0xa8] ss:$12 sps:$4 sm:$0xff]  }
 0xcfd   : > { %v17631_v53 = vpop.xlane.xlu1 %4632  ;;  %v4688_v32 = vpack.c.bf16 %v17626_v45, %v17629_v28  ;;  %v17635_v27 = vpop.eup %15290 }
 0xcff   : > { %13367 = vmatprep.mubr.msk.bf16.mxu0 %vm2951_vm0, %v4688_v32  ;;  %v14303_v32 = vld [vmem:[#allocation11 + $0xc8] ss:$12 sps:$4 sm:$0xff]  }
 0xd00   : > { %v17638_v21 = vpop.eup %15292  ;;  %12867 = vmatprep.subr.bf16.mxu1 %v14303_v32  ;;  %v14323_v32 = vld [vmem:[#allocation11 + $0x128] ss:$12 sps:$4 sm:$0xff]  }
 0xd01   : > { %v4689_v44 = vpack.c.bf16 %v17638_v21, %v17635_v27  ;;  %v3410_v1 = vpop.xlane.xlu1 %3409  ;;  %v15295_v30 = vpop.eup %15294 }
 0xd02   : > { %15296 = vrcp.f32 %v3410_v1  ;;  %v17644_v22 = vmul.f32 %v15295_v30, %v17373_v52  ;;  %v19043_v52 = vld [vmem:[#allocation49_spill] sm:$0xff]  ;;  %v14304_v1 = vld [vmem:[#allocation11 + $0x8] ss:$12 sps:$4 sm:$0xff]  }
 0xd03   : > { %13368 = vmatmul.mubr.msk.bf16.vlgmr.msra.gmra.mrb[112].mxu0 %vm2951_vm0, %v4689_v44  ;;  %v14302_v44 = vld [vmem:[#allocation11 + $0xc4] ss:$12 sps:$4 sm:$0xff]   ;;  %12868 = vmatpush3.bf16.msra.mxu1 %v14304_v1  ;;  %v19050_v1 = vld [vmem:[#allocation41_spill] sm:$0xff] }
 0xd04   : > { %5358 = vmatpush1.bf16.msra.mxu0 %v14276_v2 }
 0xd05   : > { %v4049_v16 = vpop.xlane.xlu1 %4048  ;;  %5359 = vmatprep.subr.bf16.mxu0 %v14281_v47  ;;  %v19046_v47 = vld [vmem:[#allocation53_spill] sm:$0xff] }
 0xd06   : > { %15298 = vrcp.f32 %v4049_v16  ;;  %v14300_v16 = vld [vmem:[#allocation11 + $0xc0] ss:$12 sps:$4 sm:$0xff]  }
 0xd08   : > { %5360 = vmatpush1.bf16.msra.mxu0 %v14279_v5 }
 0xd09   : > { %v3416_v55 = vpop.xlane.xlu1 %3415  ;;  %5361 = vmatprep.subr.bf16.mxu0 %v14284_v29  ;;  %v14308_v29 = vld [vmem:[#allocation11 + $0xe0] ss:$12 sps:$4 sm:$0xff]  }
 0xd0a   : > { %15300 = vrcp.f32 %v3416_v55  ;;  %12869 = vmatprep.subr.bf16.mxu1 %v14308_v29  ;;  %v14322_v29 = vld [vmem:[#allocation11 + $0x124] ss:$12 sps:$4 sm:$0xff]  }
 0xd0c   : > { %5362 = vmatpush1.bf16.msra.mxu0 %v14282_v62  ;;  %v15297_v23 = vpop.eup %15296  ;;  %v19047_v62 = vld [vmem:[#allocation60_spill] sm:$0xff] }
 0xd0d   : > { %v4055_v7 = vpop.xlane.xlu1 %4054  ;;  %5363 = vmatprep.subr.bf16.mxu0 %v14287_v14  ;;  %v17647_v43 = vmul.f32 %v15297_v23, %v19043_v52  ;;  %v14309_v23 = vld [vmem:[#allocation11 + $0x20] ss:$12 sps:$4 sm:$0xff]  }
 0xd0e   : > { %15302 = vrcp.f32 %v4055_v7  ;;  %v14313_v7 = vld [vmem:[#allocation11 + $0xf8] ss:$12 sps:$4 sm:$0xff]   ;;  %12870 = vmatpush3.bf16.msra.mxu1 %v14309_v23 }
 0xd0f   : > { %12871 = vmatprep.subr.bf16.mxu1 %v14313_v7  ;;  %v19051_v7 = vld [vmem:[#allocation64_spill] sm:$0xff] }
 0xd10   : > { %v15299_v37 = vpop.eup %15298  ;;  %5364 = vmatpush1.bf16.msra.mxu0 %v14285_v4  ;;  %v14307_v4 = vld [vmem:[#allocation11 + $0xdc] ss:$12 sps:$4 sm:$0xff]  }
 0xd11   : > { %v3422_v56 = vpop.xlane.xlu1 %3421  ;;  %v17650_v31 = vmul.f32 %v15299_v37, %v17383_v58  ;;  %5365 = vmatprep.subr.bf16.mxu0 %v14290_v25  ;;  %v14299_v58 = vld [vmem:[#allocation11 + $0xac] ss:$12 sps:$4 sm:$0xff]   ;;  %v4646_v25 = vsub.f32 %v17525_v61, %v17620_v50  ;;  %v4647_v37 = vsub.f32 %v17535_v24, %v17624_v38 }
 0xd12   : > { %15304 = vrcp.f32 %v3422_v56  ;;  %v4645_v56 = vsub.f32 %v17541_v41, %v17631_v53  ;;  %v14314_v50 = vld [vmem:[#allocation11 + $0x38] ss:$12 sps:$4 sm:$0xff]   ;;  %v19049_v41 = vld [vmem:[#allocation59_spill] sm:$0xff] }
 0xd13   : > { %v4662_v38 = vmul.f32 1.442695, %v4647_v37  ;;  %12872 = vmatpush3.bf16.msra.mxu1 %v14314_v50  ;;  %v14327_v37 = vld [vmem:[#allocation11 + $0x13c] ss:$12 sps:$4 sm:$0xff]  }
 0xd14   : > { %v15301_v39 = vpop.eup %15300  ;;  %5366 = vmatpush1.bf16.msra.mxu0 %v14288_v57  ;;  %v14305_v57 = vld [vmem:[#allocation11 + $0xd8] ss:$12 sps:$4 sm:$0xff]  }
 0xd15   : > { %v3735_v36 = vpop.xlane.xlu1 %3734  ;;  %5367 = vmatprep.subr.bf16.mxu0 %v14293_v26  ;;  %v17653_v9 = vmul.f32 %v15301_v39, %v19044_v42  ;;  %v19048_v26 = vld [vmem:[#allocation42_spill] sm:$0xff]  ;;  %v14318_v42 = vld [vmem:[#allocation11 + $0x110] ss:$12 sps:$4 sm:$0xff]  }
 0xd16   : > { %15306 = vrcp.f32 %v3735_v36  ;;  %v14312_v36 = vld [vmem:[#allocation11 + $0xf4] ss:$12 sps:$4 sm:$0xff]   ;;  %12873 = vmatprep.subr.bf16.mxu1 %v14318_v42 }
 0xd18   : > { %v15303_v11 = vpop.eup %15302  ;;  %5368 = vmatpush1.bf16.msra.mxu0 %v14291_v60 }
 0xd19   : > { %v3102_v3 = vpop.xlane.xlu1 %3101  ;;  %5369 = vmatprep.subr.bf16.mxu0 %v14296_v15  ;;  %v17656_v48 = vmul.f32 %v15303_v11, %v19045_v46  ;;  %v4660_v15 = vmul.f32 1.442695, %v4646_v25  ;;  %v14310_v11 = vld [vmem:[#allocation11 + $0xf0] ss:$12 sps:$4 sm:$0xff]  }
 0xd1a   : > { %15308 = vrcp.f32 %v3102_v3 }
 0xd1c   : > { %v15305_v63 = vpop.eup %15304  ;;  %5370 = vmatpush1.bf16.msra.mxu0 %v14294_v18  ;;  %v4658_v18 = vmul.f32 1.442695, %v4645_v56  ;;  %v19052_v56 = vld [vmem:[#allocation66_spill] sm:$0xff] }
 0xd1d   : > { %v3741_v2 = vpop.xlane.xlu1 %3740  ;;  %5371 = vmatprep.subr.bf16.mxu0 %v14299_v58  ;;  %v17659_v30 = vmul.f32 %v15305_v63, %v19046_v47  ;;  %v14317_v58 = vld [vmem:[#allocation11 + $0x10c] ss:$12 sps:$4 sm:$0xff]   ;;  %v14319_v63 = vld [vmem:[#allocation11 + $0x50] ss:$12 sps:$4 sm:$0xff]  }
 0xd1e   : > { %15310 = vrcp.f32 %v3741_v2  ;;  %12874 = vmatpush3.bf16.msra.mxu1 %v14319_v63 }
 0xd1f   : > { %12875 = vmatprep.subr.bf16.mxu1 %v14323_v32 }
 0xd20   : > { %v15307_v5 = vpop.eup %15306  ;;  %5372 = vmatpush1.bf16.msra.mxu0 %v14297_v40 }
 0xd21   : > { %v3848_v55 = vmul.f32 %v15307_v5, %v19047_v62  ;;  %v3108_v14 = vpop.xlane.xlu1 %3107  ;;  %5373 = vmatprep.subr.bf16.mxu0 %v14302_v44  ;;  %v14315_v44 = vld [vmem:[#allocation11 + $0x108] ss:$12 sps:$4 sm:$0xff]  }
 0xd22   : > { %15312 = vrcp.f32 %v3108_v14  ;;  %v14320_v14 = vld [vmem:[#allocation11 + $0x120] ss:$12 sps:$4 sm:$0xff]  }
 0xd23   : > { %3856 = vst.msk [vmem:[#allocation2 + $0x20] sm:$0xff] %vm2951_vm0, %v3848_v55  ;;  %v14324_v55 = vld [vmem:[#allocation11 + $0x68] ss:$12 sps:$4 sm:$0xff]  }
 0xd24   : > { %v15309_v52 = vpop.eup %15308  ;;  %5374 = vmatpush1.bf16.msra.mxu0 %v14300_v16  ;;  %12876 = vmatpush3.bf16.msra.mxu1 %v14324_v55 }
 0xd25   : > { %v3215_v39 = vmul.f32 %v15309_v52, %v19048_v26  ;;  %v3747_v60 = vpop.xlane.xlu1 %3746  ;;  %5375 = vmatprep.subr.bf16.mxu0 %v14307_v4  ;;  %v14328_v4 = vld [vmem:[#allocation11 + $0x140] ss:$12 sps:$4 sm:$0xff]  }
 0xd26   : > { %15314 = vrcp.f32 %v3747_v60  ;;  %v4034_v61 = vpop.xlane.xlu0 %4033  ;;  %12877 = vmatprep.subr.bf16.mxu1 %v14328_v4  ;;  %v19056_v4 = vld [vmem:[#allocation45_spill] sm:$0xff] }
 0xd27   : > { %3223 = vst.msk [vmem:[#allocation2 + $0x18] sm:$0xff] %vm2951_vm0, %v3215_v39  ;;  %15316 = vrcp.f32 %v4034_v61  ;;  %v14329_v39 = vld [vmem:[#allocation11 + $0x80] ss:$12 sps:$4 sm:$0xff]   ;;  %v14333_v61 = vld [vmem:[#allocation11 + $0x158] ss:$12 sps:$4 sm:$0xff]  }
 0xd28   : > { %v15311_v24 = vpop.eup %15310  ;;  %5376 = vmatpush1.bf16.msra.mxu0 %v14305_v57  ;;  %12878 = vmatpush3.bf16.msra.mxu1 %v14329_v39 }
 0xd29   : > { %v3850_v53 = vmul.f32 %v15311_v24, %v19049_v41  ;;  %v3114_v3 = vpop.xlane.xlu1 %3113  ;;  %5377 = vmatprep.subr.bf16.mxu0 %v14312_v36  ;;  %v14325_v36 = vld [vmem:[#allocation11 + $0x138] ss:$12 sps:$4 sm:$0xff]   ;;  %12879 = vmatprep.subr.bf16.mxu1 %v14333_v61 }
 0xd2a   : > { %15318 = vrcp.f32 %v3114_v3  ;;  %v4630_v46 = vpop.xlane.xlu0 %4629 }
 0xd2b   : > { %15320 = vpow2.f32 %v4660_v15  ;;  %3858 = vst.msk [vmem:[#allocation2 + $0x50] sm:$0xff] %vm2951_vm0, %v3850_v53  ;;  %v4644_v40 = vsub.f32 %v17571_v54, %v4630_v46  ;;  %v19053_v15 = vld [vmem:[#allocation46_spill] sm:$0xff]  ;;  %v14338_v53 = vld [vmem:[#allocation11 + $0x170] ss:$12 sps:$4 sm:$0xff]  }
 0xd2c   : > { %v15313_v2 = vpop.eup %15312  ;;  %15322 = vpow2.f32 %v4662_v38  ;;  %5378 = vmatpush1.bf16.msra.mxu0 %v14310_v11  ;;  %v14332_v38 = vld [vmem:[#allocation11 + $0x154] ss:$12 sps:$4 sm:$0xff]   ;;  %v14334_v11 = vld [vmem:[#allocation11 + $0x98] ss:$12 sps:$4 sm:$0xff]   ;;  %v14330_v46 = vld [vmem:[#allocation11 + $0x150] ss:$12 sps:$4 sm:$0xff]  }
 0xd2d   : > { %15324 = vpow2.f32 %v4658_v18  ;;  %v3217_v47 = vmul.f32 %v15313_v2, %v19050_v1  ;;  %v4656_v5 = vmul.f32 1.442695, %v4644_v40  ;;  %v3753_v16 = vpop.xlane.xlu1 %3752  ;;  %5379 = vmatprep.subr.bf16.mxu0 %v14317_v58  ;;  %v19054_v40 = vld [vmem:[#allocation63_spill] sm:$0xff]  ;;  %12880 = vmatpush3.bf16.msra.mxu1 %v14334_v11 }
 0xd2e   : > { %15326 = vrcp.f32 %v3753_v16  ;;  %v3401_v62 = vpop.xlane.xlu0 %3400  ;;  %12881 = vmatprep.subr.bf16.mxu1 %v14338_v53  ;;  %v19055_v16 = vld [vmem:[#allocation48_spill] sm:$0xff] }
 0xd2f   : > { %3225 = vst.msk [vmem:[#allocation2 + $0x48] sm:$0xff] %vm2951_vm0, %v3217_v47  ;;  %15328 = vpow2.f32 %v4656_v5  ;;  %v14337_v47 = vld [vmem:[#allocation11 + $0x16c] ss:$12 sps:$4 sm:$0xff]   ;;  %v14339_v5 = vld [vmem:[#allocation11 + $0xb0] ss:$12 sps:$4 sm:$0xff]  }
 0xd30   : > { %v15315_v54 = vpop.eup %15314  ;;  %15330 = vrcp.f32 %v3401_v62  ;;  %5380 = vmatpush1.bf16.msra.mxu0 %v14315_v44 }
 0xd31   : > { %v15317_v23 = vpop.eup %15316  ;;  %v3852_v25 = vmul.f32 %v15315_v54, %v19051_v7  ;;  %v3120_v52 = vpop.xlane.xlu1 %3119  ;;  %5381 = vmatprep.subr.bf16.mxu0 %v14322_v29  ;;  %v14335_v54 = vld [vmem:[#allocation11 + $0x168] ss:$12 sps:$4 sm:$0xff]   ;;  %12882 = vmatpush3.bf16.msra.mxu1 %v14339_v5 }
 0xd32   : > { %15332 = vrcp.f32 %v3120_v52  ;;  %v3404_v57 = vpop.xlane.xlu0 %3403  ;;  %v4161_v26 = vmul.f32 %v15317_v23, %v19052_v56 }
 0xd33   : > { %3860 = vst.msk [vmem:[#allocation2 + $0x80] sm:$0xff] %vm2951_vm0, %v3852_v25  ;;  %15334 = vrcp.f32 %v3404_v57  ;;  %v19057_v25 = vld [vmem:[#allocation50_spill] sm:$0xff] }
 0xd34   : > { %v15319_v60 = vpop.eup %15318  ;;  %4177 = vrot.lane.b32.xlu0 %v4161_v26, %s15905_s28  ;;  %5382 = vmatpush1.bf16.msra.mxu0 %v14320_v14 }
 0xd35   : > { %v17680_v50 = vpop.eup %15320  ;;  %v3219_v42 = vmul.f32 %v15319_v60, %v19053_v15  ;;  %v4180_v24 = vpop.permute.xlu1 %4179  ;;  %5383 = vmatprep.subr.bf16.mxu0 %v14327_v37  ;;  %v19058_v60 = vld [vmem:[#allocation52_spill] sm:$0xff] }
 0xd36   : > { %v17683_v18 = vpop.eup %15322  ;;  %4202 = vst.msk [vmem:[#allocation2 + $0x20] sm:$0xff] %vm3568_vm9, %v4180_v24  ;;  %v17686_v41 = vpop.xlane.xlu0 %4039  ;;  %v19059_v24 = vld [vmem:[#allocation67_spill] sm:$0xff] }
 0xd37   : > { %v17688_v3 = vpop.eup %15324  ;;  %3227 = vst.msk [vmem:[#allocation2 + $0x78] sm:$0xff] %vm2951_vm0, %v3219_v42  ;;  %v4691_v62 = vpack.c.bf16 %v17683_v18, %v17680_v50  ;;  %v4362_v42 = vsel %vm2951_vm0, %v17445_v8, 0.0  ;;  %v4371_v8 = vsel %vm2951_vm0, %v17443_v10, 0.0  ;;  %v4365_v10 = vsel %vm2951_vm0, %v17447_v17, 0.0 }
 0xd38   : > { %v15327_v58 = vpop.eup %15326  ;;  %5384 = vmatpush1.bf16.msra.mxu0 %v14325_v36 }
 0xd39   : > { %v17691_v63 = vpop.eup %15328  ;;  %v3854_v32 = vmul.f32 %v15327_v58, %v19054_v40  ;;  %5385 = vmatprep.subr.bf16.mxu0 %v14332_v38  ;;  %v4368_v58 = vsel %vm2951_vm0, %v17449_v13, 0.0 }
 0xd3a   : > { %v15331_v2 = vpop.eup %15330  ;;  %v17694_v44 = vpop.xlane.xlu0 %3406  ;;  %v4690_v1 = vpack.c.bf16 %v17688_v3, %v17691_v63 }
 0xd3b   : > { %3862 = vst.msk [vmem:[#allocation2 + $0xb0] sm:$0xff] %vm2951_vm0, %v3854_v32  ;;  %v3528_v29 = vmul.f32 %v15331_v2, %v19055_v16  ;;  %v19061_v2 = vld [vmem:[#allocation58_spill] sm:$0xff]  ;;  %v19062_v16 = vld [vmem:[#allocation40_spill] sm:$0xff] }
 0xd3c   : > { %v15333_v55 = vpop.eup %15332  ;;  %13371 = vmatprep.mubr.msk.bf16.mxu0 %vm2951_vm0, %v4690_v1  ;;  %5386 = vmatpush1.bf16.msra.mxu0 %v14330_v46  ;;  %v19060_v46 = vld [vmem:[#allocation51_spill] sm:$0xff] }
 0xd3d   : > { %v15335_v14 = vpop.eup %15334  ;;  %v3221_v23 = vmul.f32 %v15333_v55, %v19056_v4  ;;  %3544 = vrot.lane.b32.xlu1 %v3528_v29, %s15905_s28  ;;  %13372 = vmatmul.mubr.msk.bf16.gmra.mrb[116].mxu0 %vm2951_vm0, %v4691_v62  ;;  %v19063_v55 = vld [vmem:[#allocation57_spill] sm:$0xff] }
 0xd3e   : > { %v4046_v7 = vpop.xlane.xlu0 %4045  ;;  %v3529_v52 = vmul.f32 %v15335_v14, %v19057_v25  ;;  %5387 = vmatprep.subr.bf16.mxu0 %v14337_v47 }
 0xd3f   : > { %3229 = vst.msk [vmem:[#allocation2 + $0xa8] sm:$0xff] %vm2951_vm0, %v3221_v23  ;;  %v19064_v23 = vld [vmem:[#allocation39_spill] sm:$0xff] }
 0xd40   : > { %5388 = vmatpush1.bf16.msra.mxu0 %v14335_v54 }
 0xd41   : > { %3546 = vrot.lane.b32.xlu1 %v3529_v52, %s15905_s28 }
 0xd42   : > { %v3413_v37 = vpop.xlane.xlu0 %3412 }
 0xd43   : > { %15336 = vrcp.f32 %v3413_v37 }
 0xd46   : > { %v4052_v57 = vpop.xlane.xlu0 %4051 }
 0xd47   : > { %15338 = vrcp.f32 %v4052_v57 }
 0xd4a   : > { %v3419_v56 = vpop.xlane.xlu0 %3418 }
 0xd4b   : > { %15340 = vrcp.f32 %v3419_v56 }
 0xd4d   : > { %v15337_v26 = vpop.eup %15336 }
 0xd4e   : > { %v3732_v39 = vpop.xlane.xlu0 %3731  ;;  %v17710_v36 = vmul.f32 %v15337_v26, %v19058_v60 }
 0xd4f   : > { %15342 = vrcp.f32 %v3732_v39  ;;  %v19066_v39 = vld [vmem:[#allocation44_spill] sm:$0xff] }
 0xd51   : > { %v15339_v61 = vpop.eup %15338 }
 0xd52   : > { %v3099_v15 = vpop.xlane.xlu0 %3098  ;;  %v17715_v38 = vmul.f32 %v15339_v61, %v19059_v24  ;;  %v19068_v24 = vld [vmem:[#allocation61_spill] sm:$0xff] }
 0xd53   : > { %15344 = vrcp.f32 %v3099_v15  ;;  %4363 = vadd.xlane.f32.xlu0 %v4362_v42 }
 0xd55   : > { %v15341_v11 = vpop.eup %15340 }
 0xd56   : > { %v3738_v53 = vpop.xlane.xlu0 %3737  ;;  %v17720_v40 = vmul.f32 %v15341_v11, %v19060_v46  ;;  %v19069_v11 = vld [vmem:[#allocation68_spill] sm:$0xff] }
 0xd57   : > { %15346 = vrcp.f32 %v3738_v53  ;;  %4369 = vadd.xlane.f32.xlu0 %v4368_v58 }
 0xd59   : > { %v15343_v32 = vpop.eup %15342 }
 0xd5a   : > { %v3847_v1 = vmul.f32 %v15343_v32, %v19061_v2  ;;  %v3105_v47 = vpop.xlane.xlu0 %3104  ;;  %v19070_v32 = vld [vmem:[#allocation43_spill] sm:$0xff] }
 0xd5b   : > { %15348 = vrcp.f32 %v3105_v47  ;;  %4372 = vadd.xlane.f32.xlu0 %v4371_v8  ;;  %v4670_v8 = vsel %vm2951_vm0, %v17635_v27, 0.0  ;;  %v4667_v27 = vsel %vm2951_vm0, %v17626_v45, 0.0 }
 0xd5c   : > { %3855 = vst.msk [vmem:[#allocation2 + $0x8] sm:$0xff] %vm2951_vm0, %v3847_v1  ;;  %v19071_v1 = vld [vmem:[#allocation47_spill] sm:$0xff] }
 0xd5d   : > { %v15345_v5 = vpop.eup %15344 }
 0xd5e   : > { %v3214_v29 = vmul.f32 %v15345_v5, %v19062_v16  ;;  %v3744_v13 = vpop.xlane.xlu0 %3743  ;;  %v4664_v5 = vsel %vm2951_vm0, %v17629_v28, 0.0  ;;  %v4676_v16 = vsel %vm2951_vm0, %v17691_v63, 0.0  ;;  %v4685_v28 = vsel %vm2951_vm0, %v17683_v18, 0.0 }
 0xd5f   : > { %15350 = vrcp.f32 %v3744_v13 }
 0xd60   : > { %3222 = vst.msk [vmem:[#allocation2] sm:$0xff] %vm2951_vm0, %v3214_v29  ;;  %15352 = vrcp.f32 %v17686_v41  ;;  %v19065_v41 = vld [vmem:[#allocation62_spill] sm:$0xff]  ;;  %v4845_v29 = vld [vmem:[#allocation2 + $0x20] sm:$0xff] }
 0xd61   : > { %v15347_v62 = vpop.eup %15346 }
 0xd62   : > { %v3849_v54 = vmul.f32 %v15347_v62, %v19063_v55  ;;  %v3111_v14 = vpop.xlane.xlu0 %3110 }
 0xd63   : > { %15354 = vrcp.f32 %v3111_v14 }
 0xd64   : > { %3857 = vst.msk [vmem:[#allocation2 + $0x38] sm:$0xff] %vm2951_vm0, %v3849_v54  ;;  %15356 = vrcp.f32 %v4046_v7  ;;  %v19067_v7 = vld [vmem:[#allocation65_spill] sm:$0xff] }
 0xd65   : > { %v15349_v4 = vpop.eup %15348  ;;  %4366 = vadd.xlane.f32.xlu1 %v4365_v10 }
 0xd66   : > { %v3216_v25 = vmul.f32 %v15349_v4, %v19064_v23  ;;  %v3750_v52 = vpop.xlane.xlu0 %3749  ;;  %v4383_v23 = vsel %vm2951_vm0, %v17469_v59, 0.0 }
 0xd67   : > { %15358 = vrcp.f32 %v3750_v52 }
 0xd68   : > { %3224 = vst.msk [vmem:[#allocation2 + $0x30] sm:$0xff] %vm2951_vm0, %v3216_v25  ;;  %15360 = vrcp.f32 %v17694_v44  ;;  %v4377_v25 = vsel %vm2951_vm0, %v17471_v35, 0.0 }
 0xd69   : > { %v15351_v37 = vpop.eup %15350 }
 0xd6a   : > { %v3851_v57 = vmul.f32 %v15351_v37, %v19065_v41  ;;  %v3117_v56 = vpop.xlane.xlu0 %3116  ;;  %v15353_v26 = vpop.eup %15352 }
 0xd6b   : > { %15362 = vrcp.f32 %v3117_v56  ;;  %v4163_v61 = vmul.f32 %v15353_v26, %v19067_v7 }
 0xd6c   : > { %3859 = vst.msk [vmem:[#allocation2 + $0x68] sm:$0xff] %vm2951_vm0, %v3851_v57 }
 0xd6d   : > { %v15355_v17 = vpop.eup %15354 }
 0xd6e   : > { %v3218_v60 = vmul.f32 %v15355_v17, %v19066_v39  ;;  %v15357_v15 = vpop.eup %15356 }
 0xd6f   : > { %v4165_v53 = vmul.f32 %v15357_v15, %v19069_v11 }
 0xd70   : > { %3226 = vst.msk [vmem:[#allocation2 + $0x60] sm:$0xff] %vm2951_vm0, %v3218_v60 }
 0xd71   : > { %v15359_v42 = vpop.eup %15358  ;;  %4181 = vrot.lane.b32.xlu0 %v4163_v61, %s15905_s28 }
 0xd72   : > { %v3853_v44 = vmul.f32 %v15359_v42, %v19068_v24  ;;  %v15361_v58 = vpop.eup %15360 }
 0xd73   : > { %v3530_v47 = vmul.f32 %v15361_v58, %v19071_v1 }
 0xd74   : > { %3861 = vst.msk [vmem:[#allocation2 + $0x98] sm:$0xff] %vm2951_vm0, %v3853_v44 }
 0xd75   : > { %v15363_v46 = vpop.eup %15362  ;;  %4185 = vrot.lane.b32.xlu0 %v4165_v53, %s15905_s28 }
 0xd76   : > { %v3220_v2 = vmul.f32 %v15363_v46, %v19070_v32  ;;  %4183 = vrot.lane.b32.xlu1 %v17644_v22, %s15905_s28  ;;  %v4682_v22 = vsel %vm2951_vm0, %v17680_v50, 0.0  ;;  %v14340_v46 = vld [vmem:[#allocation11 + $0x180] ss:$12 sps:$4 sm:$0xff]   ;;  %v14342_v32 = vld [vmem:[#allocation11 + $0x184] ss:$12 sps:$4 sm:$0xff]  }
 0xd77   : > { %5430 = vmatprep.subr.bf16.mxu0 %v14342_v32 }
 0xd78   : > { %3228 = vst.msk [vmem:[#allocation2 + $0x90] sm:$0xff] %vm2951_vm0, %v3220_v2  ;;  %v14343_v2 = vld [vmem:[#allocation11 + $0x188] ss:$12 sps:$4 sm:$0xff]  }
 0xd79   : > { %13375 = vmatprep.subr.bf16.mxu1 %v14343_v2 }
 0xd7a   : > { %3548 = vrot.lane.b32.xlu1 %v3530_v47, %s15905_s28 }
 0xd7e   : > { %3550 = vrot.lane.b32.xlu1 %v17647_v43, %s15905_s28  ;;  %v4673_v43 = vsel %vm2951_vm0, %v17638_v21, 0.0  ;;  %v4679_v21 = vsel %vm2951_vm0, %v17688_v3, 0.0  ;;  %v4374_v3 = vsel %vm2951_vm0, %v17467_v20, 0.0 }
 0xd82   : > { %4187 = vrot.lane.b32.xlu1 %v17650_v31, %s15905_s28 }
 0xd94   : > { %4671 = vadd.xlane.f32.xlu0 %v4670_v8  ;;  %v14344_v8 = vld [vmem:[#allocation11 + $0x198] ss:$12 sps:$4 sm:$0xff]  }
 0xd98   : > { %4665 = vadd.xlane.f32.xlu0 %v4664_v5  ;;  %v14346_v5 = vld [vmem:[#allocation11 + $0x19c] ss:$12 sps:$4 sm:$0xff]  }
 0xd9c   : > { %4683 = vadd.xlane.f32.xlu0 %v4682_v22  ;;  %v14347_v22 = vld [vmem:[#allocation11 + $0x1a0] ss:$12 sps:$4 sm:$0xff]  }
 0xda0   : > { %4677 = vadd.xlane.f32.xlu0 %v4676_v16 }
 0xda6   : > { %4674 = vadd.xlane.f32.xlu1 %v4673_v43  ;;  %v4178_v31 = vpop.permute.xlu0 %4177  ;;  %v14348_v43 = vld [vmem:[#allocation11 + $0x1b0] ss:$12 sps:$4 sm:$0xff]  }
 0xda7   : > { %4201 = vst.msk [vmem:[#allocation2 + $0x8] sm:$0xff] %vm3568_vm9, %v4178_v31  ;;  %v14350_v31 = vld [vmem:[#allocation11 + $0x1b4] ss:$12 sps:$4 sm:$0xff]  }
 0xdaa   : > { %4668 = vadd.xlane.f32.xlu1 %v4667_v27  ;;  %v14351_v27 = vld [vmem:[#allocation11 + $0x1b8] ss:$12 sps:$4 sm:$0xff]  }
 0xdae   : > { %4686 = vadd.xlane.f32.xlu1 %v4685_v28  ;;  %v4842_v50 = vld [vmem:[#allocation2 + $0x8] sm:$0xff] }
 0xdaf   : > { %v3545_v13 = vpop.permute.xlu1 %3544  ;;  %v4866_v63 = vpack.c.bf16 %v4845_v29, %v4842_v50  ;;  %v14352_v50 = vld [vmem:[#allocation11 + $0x1c8] ss:$12 sps:$4 sm:$0xff]   ;;  %v14354_v29 = vld [vmem:[#allocation11 + $0x1cc] ss:$12 sps:$4 sm:$0xff]  }
 0xdb0   : > { %3569 = vst.msk [vmem:[#allocation2] sm:$0xff] %vm3568_vm9, %v3545_v13  ;;  %v14355_v13 = vld [vmem:[#allocation11 + $0x1d0] ss:$12 sps:$4 sm:$0xff]  }
 0xdb1   : > { %5389 = vmatprep.mubr.bf16.mxu0 %v4866_v63  ;;  %5535 = vmatprep.mubr.bf16.mxu1 %v4866_v63 }
 0xdb2   : > { %4680 = vadd.xlane.f32.xlu1 %v4679_v21 }
 0xdb3   : > { %v3547_v62 = vpop.permute.xlu1 %3546 }
 0xdb4   : > { %3570 = vst.msk [vmem:[#allocation2 + $0x18] sm:$0xff] %vm3568_vm9, %v3547_v62 }
 0xdb6   : > { %3552 = vrot.lane.b32.xlu0 %v17710_v36, %s15905_s28  ;;  %v4380_v36 = vsel %vm2951_vm0, %v17473_v49, 0.0 }
 0xdb7   : > { %v4841_v45 = vld [vmem:[#allocation2] sm:$0xff] }
 0xdbb   : > { %v4844_v18 = vld [vmem:[#allocation2 + $0x18] sm:$0xff] }
 0xdbc   : > { %v4865_v55 = vpack.c.bf16 %v4844_v18, %v4841_v45  ;;  %v14356_v18 = vld [vmem:[#allocation11 + $0x1e0] ss:$12 sps:$4 sm:$0xff]  }
 0xdbe   : > { %5390 = vmatmul.mubr.bf16.vlgmr.msra.gmra.mrb[120].mxu0 %v4865_v55  ;;  %5536 = vmatmul.mubr.bf16.vlgmr.msra.gmra.mrb[80].mxu1 %v4865_v55  ;;  %v14358_v55 = vld [vmem:[#allocation11 + $0x1e4] ss:$12 sps:$4 sm:$0xff]  }
 0xdbf   : > { %5431 = vmatpush1.bf16.msra.mxu0 %v14340_v46  ;;  %13376 = vmatpush3.bf16.msra.mxu1 %v14343_v2 }
 0xdc0   : > { %5432 = vmatprep.subr.bf16.mxu0 %v14346_v5  ;;  %13377 = vmatprep.subr.bf16.mxu1 %v14347_v22 }
 0xdc3   : > { %3554 = vrot.lane.b32.xlu1 %v17653_v9, %s15905_s28  ;;  %5433 = vmatpush1.bf16.msra.mxu0 %v14344_v8  ;;  %v19072_v8 = vld [vmem:[#allocation70_spill] sm:$0xff] }
 0xdc4   : > { %13378 = vmatpush3.bf16.msra.mxu1 %v14347_v22  ;;  %5434 = vmatprep.subr.bf16.mxu0 %v14350_v31 }
 0xdc5   : > { %13379 = vmatprep.subr.bf16.mxu1 %v14351_v27 }
 0xdc7   : > { %5435 = vmatpush1.bf16.msra.mxu0 %v14348_v43 }
 0xdc8   : > { %13380 = vmatpush3.bf16.msra.mxu1 %v14351_v27  ;;  %5436 = vmatprep.subr.bf16.mxu0 %v14354_v29 }
 0xdc9   : > { %13381 = vmatprep.subr.bf16.mxu1 %v14355_v13 }
 0xdcb   : > { %5437 = vmatpush1.bf16.msra.mxu0 %v14352_v50 }
 0xdcc   : > { %13382 = vmatpush3.bf16.msra.mxu1 %v14355_v13  ;;  %5438 = vmatprep.subr.bf16.mxu0 %v14358_v55 }
 0xdcf   : > { %5439 = vmatpush1.bf16.msra.mxu0 %v14356_v18 }
 0xdd5   : > { %4375 = vadd.xlane.f32.xlu0 %v4374_v3  ;;  %v14359_v3 = vld [vmem:[#allocation11 + $0x1e8] ss:$12 sps:$4 sm:$0xff]  }
 0xdd6   : > { %v17781_v54 = vpop.f32.mrb[112].mxu0  ;;  %13383 = vmatprep.subr.bf16.mxu1 %v14359_v3 }
 0xdd7   : > { %v17783_v14 = vpop.f32.mrb[113].mxu0  ;;  %13384 = vmatpush3.bf16.msra.mxu1 %v14359_v3 }
 0xdd8   : > { %v17785_v10 = vpop.f32.mrb[114].mxu0 }
 0xdd9   : > { %v17789_v4 = vpop.f32.mrb[115].mxu0  ;;  %4381 = vadd.xlane.f32.xlu0 %v4380_v36 }
 0xddd   : > { %4384 = vadd.xlane.f32.xlu0 %v4383_v23  ;;  %v14362_v23 = vld [vmem:[#allocation11 + $0x1fc] ss:$12 sps:$4 sm:$0xff]  }
 0xdde   : > { %5440 = vmatprep.subr.bf16.mxu0 %v14362_v23 }
 0xde0   : > { %v4364_v9 = vpop.xlane.xlu0 %4363 }
 0xde1   : > { %15364 = vrcp.f32 %v4364_v9 }
 0xde4   : > { %v4370_v20 = vpop.xlane.xlu0 %4369 }
 0xde5   : > { %15366 = vrcp.f32 %v4370_v20  ;;  %v14360_v20 = vld [vmem:[#allocation11 + $0x1f8] ss:$12 sps:$4 sm:$0xff]  }
 0xde6   : > { %5441 = vmatpush1.bf16.msra.mxu0 %v14360_v20 }
 0xde7   : > { %4378 = vadd.xlane.f32.xlu1 %v4377_v25 }
 0xde8   : > { %v4373_v52 = vpop.xlane.xlu0 %4372 }
 0xde9   : > { %15368 = vrcp.f32 %v4373_v52  ;;  %v14363_v52 = vld [vmem:[#allocation11 + $0x200] ss:$12 sps:$4 sm:$0xff]  }
 0xdea   : > { %13385 = vmatprep.subr.bf16.mxu1 %v14363_v52 }
 0xdeb   : > { %v15365_v37 = vpop.eup %15364  ;;  %13386 = vmatpush3.bf16.msra.mxu1 %v14363_v52 }
 0xdec   : > { %v4479_v49 = vmul.f32 %v15365_v37, %v17487_v6  ;;  %v4182_v41 = vpop.permute.xlu0 %4181  ;;  %v14366_v37 = vld [vmem:[#allocation11 + $0x214] ss:$12 sps:$4 sm:$0xff]  }
 0xded   : > { %4203 = vst.msk [vmem:[#allocation2 + $0x38] sm:$0xff] %vm3568_vm9, %v4182_v41  ;;  %v14364_v41 = vld [vmem:[#allocation11 + $0x210] ss:$12 sps:$4 sm:$0xff]   ;;  %5442 = vmatprep.subr.bf16.mxu0 %v14366_v37 }
 0xdee   : > { %4487 = vst.msk [vmem:[#allocation2 + $0x10] sm:$0xff] %vm2951_vm0, %v4479_v49  ;;  %5443 = vmatpush1.bf16.msra.mxu0 %v14364_v41 }
 0xdef   : > { %v15367_v59 = vpop.eup %15366 }
 0xdf0   : > { %v4481_v57 = vmul.f32 %v15367_v59, %v17485_v19  ;;  %v4186_v56 = vpop.permute.xlu0 %4185 }
 0xdf1   : > { %4205 = vst.msk [vmem:[#allocation2 + $0x68] sm:$0xff] %vm3568_vm9, %v4186_v56  ;;  %v14370_v56 = vld [vmem:[#allocation11 + $0x22c] ss:$12 sps:$4 sm:$0xff]  }
 0xdf2   : > { %4489 = vst.msk [vmem:[#allocation2 + $0x40] sm:$0xff] %vm2951_vm0, %v4481_v57  ;;  %v4367_v35 = vpop.xlane.xlu1 %4366  ;;  %v14367_v57 = vld [vmem:[#allocation11 + $0x218] ss:$12 sps:$4 sm:$0xff]   ;;  %5444 = vmatprep.subr.bf16.mxu0 %v14370_v56 }
 0xdf3   : > { %v15369_v26 = vpop.eup %15368  ;;  %15370 = vrcp.f32 %v4367_v35  ;;  %4189 = vrot.lane.b32.xlu0 %v17715_v38, %s15905_s28  ;;  %13387 = vmatprep.subr.bf16.mxu1 %v14367_v57 }
 0xdf4   : > { %v4482_v6 = vmul.f32 %v15369_v26, %v17489_v33  ;;  %v4848_v7 = vld [vmem:[#allocation2 + $0x38] sm:$0xff]  ;;  %13388 = vmatpush3.bf16.msra.mxu1 %v14367_v57 }
 0xdf5   : > { %v14368_v26 = vld [vmem:[#allocation11 + $0x228] ss:$12 sps:$4 sm:$0xff]  }
 0xdf6   : > { %4490 = vst.msk [vmem:[#allocation2 + $0x58] sm:$0xff] %vm2951_vm0, %v4482_v6  ;;  %v4184_v17 = vpop.permute.xlu1 %4183  ;;  %5445 = vmatpush1.bf16.msra.mxu0 %v14368_v26 }
 0xdf7   : > { %4204 = vst.msk [vmem:[#allocation2 + $0x50] sm:$0xff] %vm3568_vm9, %v4184_v17  ;;  %v14371_v17 = vld [vmem:[#allocation11 + $0x230] ss:$12 sps:$4 sm:$0xff]  }
 0xdf8   : > { %4191 = vrot.lane.b32.xlu1 %v17656_v48, %s15905_s28  ;;  %13389 = vmatprep.subr.bf16.mxu1 %v14371_v17 }
 0xdf9   : > { %13390 = vmatpush3.bf16.msra.mxu1 %v14371_v17 }
 0xdfa   : > { %v3549_v19 = vpop.permute.xlu1 %3548 }
 0xdfb   : > { %3571 = vst.msk [vmem:[#allocation2 + $0x30] sm:$0xff] %vm3568_vm9, %v3549_v19 }
 0xdfc   : > { %3556 = vrot.lane.b32.xlu1 %v17720_v40, %s15905_s28 }
 0xdfd   : > { %v15371_v39 = vpop.eup %15370 }
 0xdfe   : > { %v4480_v60 = vmul.f32 %v15371_v39, %v17491_v12  ;;  %v3551_v38 = vpop.permute.xlu1 %3550  ;;  %v4851_v33 = vld [vmem:[#allocation2 + $0x50] sm:$0xff]  ;;  %v4854_v12 = vld [vmem:[#allocation2 + $0x68] sm:$0xff] }
 0xdff   : > { %3572 = vst.msk [vmem:[#allocation2 + $0x48] sm:$0xff] %vm3568_vm9, %v3551_v38  ;;  %v4869_v61 = vpack.c.bf16 %v4851_v33, %v4848_v7 }
 0xe00   : > { %4488 = vst.msk [vmem:[#allocation2 + $0x28] sm:$0xff] %vm2951_vm0, %v4480_v60  ;;  %3558 = vrot.lane.b32.xlu1 %v17659_v30, %s15905_s28 }
 0xe01   : > { %5399 = vmatprep.mubr.bf16.mxu0 %v4869_v61  ;;  %5543 = vmatprep.mubr.bf16.mxu1 %v4869_v61 }
 0xe02   : > { %v4188_v48 = vpop.permute.xlu1 %4187  ;;  %v4847_v40 = vld [vmem:[#allocation2 + $0x30] sm:$0xff] }
 0xe03   : > { %4206 = vst.msk [vmem:[#allocation2 + $0x80] sm:$0xff] %vm3568_vm9, %v4188_v48 }
 0xe06   : > { %v4850_v15 = vld [vmem:[#allocation2 + $0x48] sm:$0xff] }
 0xe07   : > { %v4868_v42 = vpack.c.bf16 %v4850_v15, %v4847_v40 }
 0xe09   : > { %5400 = vmatmul.mubr.bf16.gmra.mrb[124].mxu0 %v4868_v42  ;;  %5544 = vmatmul.mubr.bf16.gmra.mrb[84].mxu1 %v4868_v42 }
 0xe0a   : > { %v4857_v24 = vld [vmem:[#allocation2 + $0x80] sm:$0xff] }
 0xe0b   : > { %v4872_v44 = vpack.c.bf16 %v4857_v24, %v4854_v12 }
 0xe0d   : > { %5409 = vmatprep.mubr.bf16.mxu0 %v4872_v44  ;;  %5551 = vmatprep.mubr.bf16.mxu1 %v4872_v44 }
 0xe10   : > { %v17817_v11 = vpop.f32.mrb[116].mxu0 }
 0xe11   : > { %v17819_v53 = vpop.f32.mrb[117].mxu0 }
 0xe12   : > { %v17821_v30 = vpop.f32.mrb[118].mxu0 }
 0xe13   : > { %v17823_v58 = vpop.f32.mrb[119].mxu0 }
 0xe21   : > { %v4672_v1 = vpop.xlane.xlu0 %4671 }
 0xe25   : > { %v4666_v47 = vpop.xlane.xlu0 %4665 }
 0xe26   : > { %15372 = vrcp.f32 %v4666_v47 }
 0xe27   : > { %15374 = vrcp.f32 %v4672_v1 }
 0xe29   : > { %v4684_v16 = vpop.xlane.xlu0 %4683 }
 0xe2d   : > { %v4678_v28 = vpop.xlane.xlu0 %4677 }
 0xe2e   : > { %15376 = vrcp.f32 %v4678_v28  ;;  %v19073_v28 = vmov 0  }
 0xe2f   : > { %15378 = vrcp.f32 %v4684_v16 }
 0xe30   : > { %v15373_v63 = vpop.eup %15372 }
 0xe31   : > { %v3553_v21 = vpop.permute.xlu0 %3552  ;;  %v4793_v62 = vmul.f32 %v15373_v63, %v17783_v14  ;;  %v15375_v45 = vpop.eup %15374 }
 0xe32   : > { %3573 = vst.msk [vmem:[#allocation2 + $0x60] sm:$0xff] %vm3568_vm9, %v3553_v21  ;;  %v4795_v9 = vmul.f32 %v15375_v45, %v17781_v54 }
 0xe33   : > { %v4675_v36 = vpop.xlane.xlu1 %4674  ;;  %4809 = vrot.lane.b32.xlu0 %v4793_v62, %s15905_s28 }
 0xe37   : > { %v4669_v14 = vpop.xlane.xlu1 %4668  ;;  %4813 = vrot.lane.b32.xlu0 %v4795_v9, %s15905_s28 }
 0xe38   : > { %v15377_v25 = vpop.eup %15376  ;;  %15380 = vrcp.f32 %v4669_v14 }
 0xe39   : > { %v4797_v49 = vmul.f32 %v15377_v25, %v17819_v53  ;;  %v15379_v59 = vpop.eup %15378  ;;  %15382 = vrcp.f32 %v4675_v36  ;;  %v4853_v48 = vld [vmem:[#allocation2 + $0x60] sm:$0xff] }
 0xe3a   : > { %v4799_v35 = vmul.f32 %v15379_v59, %v17817_v11 }
 0xe3b   : > { %v4687_v54 = vpop.xlane.xlu1 %4686  ;;  %4817 = vrot.lane.b32.xlu0 %v4797_v49, %s15905_s28 }
 0xe3f   : > { %v4681_v6 = vpop.xlane.xlu1 %4680  ;;  %4821 = vrot.lane.b32.xlu0 %v4799_v35, %s15905_s28 }
 0xe40   : > { %15384 = vrcp.f32 %v4681_v6 }
 0xe41   : > { %15386 = vrcp.f32 %v4687_v54 }
 0xe42   : > { %v15381_v19 = vpop.eup %15380 }
 0xe43   : > { %v3555_v39 = vpop.permute.xlu1 %3554  ;;  %v4794_v60 = vmul.f32 %v15381_v19, %v17789_v4  ;;  %v15383_v38 = vpop.eup %15382 }
 0xe44   : > { %3574 = vst.msk [vmem:[#allocation2 + $0x78] sm:$0xff] %vm3568_vm9, %v3555_v39  ;;  %v4796_v7 = vmul.f32 %v15383_v38, %v17785_v10 }
 0xe45   : > { %4811 = vrot.lane.b32.xlu1 %v4794_v60, %s15905_s28 }
 0xe49   : > { %4815 = vrot.lane.b32.xlu1 %v4796_v7, %s15905_s28 }
 0xe4a   : > { %v15385_v33 = vpop.eup %15384 }
 0xe4b   : > { %v4798_v61 = vmul.f32 %v15385_v33, %v17823_v58  ;;  %v4856_v40 = vld [vmem:[#allocation2 + $0x78] sm:$0xff]  ;;  %v15387_v15 = vpop.eup %15386 }
 0xe4c   : > { %v4871_v42 = vpack.c.bf16 %v4856_v40, %v4853_v48  ;;  %v4800_v4 = vmul.f32 %v15387_v15, %v17821_v30 }
 0xe4d   : > { %4819 = vrot.lane.b32.xlu1 %v4798_v61, %s15905_s28 }
 0xe4e   : > { %5410 = vmatmul.mubr.bf16.gmra.mrb[128].mxu0 %v4871_v42  ;;  %5552 = vmatmul.mubr.bf16.gmra.mrb[88].mxu1 %v4871_v42 }
 0xe51   : > { %4823 = vrot.lane.b32.xlu1 %v4800_v4, %s15905_s28 }
 0xe62   : > { %v4376_v12 = vpop.xlane.xlu0 %4375 }
 0xe63   : > { %15388 = vrcp.f32 %v4376_v12 }
 0xe66   : > { %v4382_v10 = vpop.xlane.xlu0 %4381 }
 0xe67   : > { %15390 = vrcp.f32 %v4382_v10 }
 0xe6a   : > { %v4385_v24 = vpop.xlane.xlu0 %4384 }
 0xe6b   : > { %15392 = vrcp.f32 %v4385_v24 }
 0xe6d   : > { %v15389_v44 = vpop.eup %15388 }
 0xe6e   : > { %v4483_v11 = vmul.f32 %v15389_v44, %v17495_v51  ;;  %v4190_v53 = vpop.permute.xlu0 %4189 }
 0xe6f   : > { %4207 = vst.msk [vmem:[#allocation2 + $0x98] sm:$0xff] %vm3568_vm9, %v4190_v53 }
 0xe70   : > { %4491 = vst.msk [vmem:[#allocation2 + $0x70] sm:$0xff] %vm2951_vm0, %v4483_v11  ;;  %v5657_v11 = vld [vmem:[#allocation12] sm:$0x7] }
 0xe71   : > { %v15391_v58 = vpop.eup %15390 }
 0xe72   : > { %v4485_v46 = vmul.f32 %v15391_v58, %v17493_v0 }
 0xe74   : > { %4493 = vst.msk [vmem:[#allocation2 + $0xa0] sm:$0xff] %vm2951_vm0, %v4485_v46  ;;  %v4379_v30 = vpop.xlane.xlu1 %4378  ;;  %v15430_v46 = vld [vmem:[%s16327_s14] sm:$0xff] }
 0xe75   : > { %v15393_v32 = vpop.eup %15392  ;;  %15394 = vrcp.f32 %v4379_v30 }
 0xe76   : > { %v4486_v2 = vmul.f32 %v15393_v32, %v17497_v34  ;;  %v4860_v0 = vld [vmem:[#allocation2 + $0x98] sm:$0xff] }
 0xe77   : > { %v19074_v32 = vld [vmem:[#allocation36_spill] sm:$0xff] }
 0xe78   : > { %4494 = vst.msk [vmem:[#allocation2 + $0xb8] sm:$0xff] %vm2951_vm0, %v4486_v2  ;;  %v4192_v1 = vpop.permute.xlu1 %4191  ;;  %v17879_v2 = vrot.slane %v5657_v11, %v19074_v32 }
 0xe79   : > { %4208 = vst.msk [vmem:[#allocation2 + $0xb0] sm:$0xff] %vm3568_vm9, %v4192_v1  ;;  %v15431_v1 = vld [vmem:[%s16327_s14 + $0x8] sm:$0xff] }
 0xe7c   : > { %v3557_v51 = vpop.permute.xlu1 %3556 }
 0xe7d   : > { %3575 = vst.msk [vmem:[#allocation2 + $0x90] sm:$0xff] %vm3568_vm9, %v3557_v51 }
 0xe7f   : > { %v15395_v47 = vpop.eup %15394 }
 0xe80   : > { %v4484_v5 = vmul.f32 %v15395_v47, %v19072_v8  ;;  %v3559_v22 = vpop.permute.xlu1 %3558  ;;  %v4863_v16 = vld [vmem:[#allocation2 + $0xb0] sm:$0xff] }
 0xe81   : > { %3576 = vst.msk [vmem:[#allocation2 + $0xa8] sm:$0xff] %vm3568_vm9, %v3559_v22  ;;  %v4875_v43 = vpack.c.bf16 %v4863_v16, %v4860_v0  ;;  %v19075_v47 = vld [vmem:[#allocation34_spill] sm:$0xff]  ;;  %v15432_v22 = vld [vmem:[%s16327_s14 + $0x18] sm:$0xff] }
 0xe82   : > { %4492 = vst.msk [vmem:[#allocation2 + $0x88] sm:$0xff] %vm2951_vm0, %v4484_v5  ;;  %v17883_v8 = vrot.slane %v5657_v11, %v19075_v47 }
 0xe83   : > { %5419 = vmatprep.mubr.bf16.mxu0 %v4875_v43  ;;  %5559 = vmatprep.mubr.bf16.mxu1 %v4875_v43  ;;  %v15433_v43 = vld [vmem:[%s16327_s14 + $0x20] sm:$0xff] }
 0xe84   : > { %v4859_v34 = vld [vmem:[#allocation2 + $0x90] sm:$0xff] }
 0xe88   : > { %v4862_v31 = vld [vmem:[#allocation2 + $0xa8] sm:$0xff] }
 0xe89   : > { %v4874_v27 = vpack.c.bf16 %v4862_v31, %v4859_v34 }
 0xe8b   : > { %5420 = vmatmul.mubr.bf16.gmra.mrb[132].mxu0 %v4874_v27  ;;  %5560 = vmatmul.mubr.bf16.gmra.mrb[92].mxu1 %v4874_v27 }
 0xe8c   : > { %5462 = vmatprep.mubr.bf16.mxu0 %v19073_v28 }
 0xe91   : > { %v12883_v50 = vpop.f32.mrb[80].mxu1 }
 0xe92   : > { %v12884_v29 = vpop.f32.mrb[81].mxu1 }
 0xe93   : > { %v17856_v13 = vadd.f32 %v12884_v29, %v12883_v50  ;;  %v12886_v63 = vpop.f32.mrb[82].mxu1 }
 0xe94   : > { %v12887_v21 = vpop.f32.mrb[83].mxu1 }
 0xe95   : > { %v17858_v62 = vadd.f32 %v12887_v21, %v12886_v63  ;;  %v19076_v21 = vld [vmem:[#allocation35_spill] sm:$0xff] }
 0xea5   : > { %v4810_v45 = vpop.permute.xlu0 %4809 }
 0xea6   : > { %4833 = vst.msk [vmem:[#allocation2 + $0x10] sm:$0xff] %vm3568_vm9, %v4810_v45  ;;  %v17894_v45 = vrot.slane %v5657_v11, %v19076_v21 }
 0xea9   : > { %v4814_v18 = vpop.permute.xlu0 %4813 }
 0xeaa   : > { %4835 = vst.msk [vmem:[#allocation2 + $0x40] sm:$0xff] %vm3568_vm9, %v4814_v18 }
 0xead   : > { %v4818_v55 = vpop.permute.xlu0 %4817  ;;  %v4843_v20 = vld [vmem:[#allocation2 + $0x10] sm:$0xff] }
 0xeae   : > { %4837 = vst.msk [vmem:[#allocation2 + $0x70] sm:$0xff] %vm3568_vm9, %v4818_v55 }
 0xeb1   : > { %v4822_v3 = vpop.permute.xlu0 %4821  ;;  %v4849_v37 = vld [vmem:[#allocation2 + $0x40] sm:$0xff] }
 0xeb2   : > { %4839 = vst.msk [vmem:[#allocation2 + $0xa0] sm:$0xff] %vm3568_vm9, %v4822_v3 }
 0xeb5   : > { %v4855_v59 = vld [vmem:[#allocation2 + $0x70] sm:$0xff] }
 0xeb7   : > { %v4812_v36 = vpop.permute.xlu1 %4811 }
 0xeb8   : > { %4834 = vst.msk [vmem:[#allocation2 + $0x28] sm:$0xff] %vm3568_vm9, %v4812_v36 }
 0xeb9   : > { %v4861_v56 = vld [vmem:[#allocation2 + $0xa0] sm:$0xff] }
 0xebb   : > { %v4816_v23 = vpop.permute.xlu1 %4815 }
 0xebc   : > { %4836 = vst.msk [vmem:[#allocation2 + $0x58] sm:$0xff] %vm3568_vm9, %v4816_v23 }
 0xebf   : > { %v4820_v9 = vpop.permute.xlu1 %4819  ;;  %v4846_v14 = vld [vmem:[#allocation2 + $0x28] sm:$0xff] }
 0xec0   : > { %4838 = vst.msk [vmem:[#allocation2 + $0x88] sm:$0xff] %vm3568_vm9, %v4820_v9  ;;  %v4867_v25 = vpack.c.bf16 %v4846_v14, %v4843_v20  ;;  %v15434_v20 = vld [vmem:[%s16327_s14 + $0x10] sm:$0xff] }
 0xec2   : > { %5463 = vmatmul.mubr.bf16.vlgmr.msra.gmra.mrb[120].mxu0 %v4867_v25  ;;  %13391 = vmatprep.mubr.bf16.mxu1 %v4867_v25 }
 0xec3   : > { %v4824_v52 = vpop.permute.xlu1 %4823  ;;  %v4852_v49 = vld [vmem:[#allocation2 + $0x58] sm:$0xff]  ;;  %5472 = vmatprep.mubr.bf16.mxu0 %v19073_v28 }
 0xec4   : > { %4840 = vst.msk [vmem:[#allocation2 + $0xb8] sm:$0xff] %vm3568_vm9, %v4824_v52  ;;  %v4870_v41 = vpack.c.bf16 %v4852_v49, %v4849_v37  ;;  %v15435_v37 = vld [vmem:[%s16327_s14 + $0x40] sm:$0xff] }
 0xec6   : > { %13392 = vmatmul.mubr.bf16.vlgmr.msra.gmra.mrb[96].mxu1 %v4870_v41 }
 0xec7   : > { %v4858_v54 = vld [vmem:[#allocation2 + $0x88] sm:$0xff] }
 0xec8   : > { %v4873_v57 = vpack.c.bf16 %v4858_v54, %v4855_v59 }
 0xeca   : > { %5473 = vmatmul.mubr.bf16.gmra.mrb[124].mxu0 %v4870_v41  ;;  %13395 = vmatprep.mubr.bf16.mxu1 %v4873_v57 }
 0xecb   : > { %v4864_v35 = vld [vmem:[#allocation2 + $0xb8] sm:$0xff]  ;;  %5482 = vmatprep.mubr.bf16.mxu0 %v19073_v28 }
 0xecc   : > { %v4876_v26 = vpack.c.bf16 %v4864_v35, %v4861_v56  ;;  %v15438_v35 = vld [vmem:[%s16327_s14 + $0x38] sm:$0xff] }
 0xece   : > { %13396 = vmatmul.mubr.bf16.gmra.mrb[100].mxu1 %v4876_v26 }
 0xed2   : > { %5483 = vmatmul.mubr.bf16.gmra.mrb[128].mxu0 %v4873_v57  ;;  %v15437_v57 = vld [vmem:[%s16327_s14 + $0x28] sm:$0xff] }
 0xed3   : > { %5492 = vmatprep.mubr.bf16.mxu0 %v19073_v28 }
 0xeda   : > { %5493 = vmatmul.mubr.bf16.gmra.mrb[132].mxu0 %v4876_v26 }
 0xedc   : > { %v12889_v6 = vpop.f32.mrb[84].mxu1 }
 0xedd   : > { %v12890_v17 = vpop.f32.mrb[85].mxu1 }
 0xede   : > { %v12891_v19 = vadd.f32 %v12890_v17, %v12889_v6  ;;  %v12892_v39 = vpop.f32.mrb[86].mxu1 }
 0xedf   : > { %v12893_v60 = vpop.f32.mrb[87].mxu1 }
 0xee0   : > { %v12894_v38 = vadd.f32 %v12893_v60, %v12892_v39 }
 0xf21   : > { %v12895_v7 = vpop.f32.mrb[88].mxu1 }
 0xf22   : > { %v12896_v33 = vpop.f32.mrb[89].mxu1 }
 0xf23   : > { %v17871_v61 = vadd.f32 %v12896_v33, %v12895_v7  ;;  %v12898_v48 = vpop.f32.mrb[90].mxu1 }
 0xf24   : > { %v12899_v40 = vpop.f32.mrb[91].mxu1 }
 0xf25   : > { %v17873_v15 = vadd.f32 %v12899_v40, %v12898_v48  ;;  %v15440_v48 = vld [vmem:[%s16327_s14 + $0x50] sm:$0xff] }
 0xf5e   : > { %v12901_v42 = vpop.f32.mrb[92].mxu1 }
 0xf5f   : > { %v12902_v4 = vpop.f32.mrb[93].mxu1 }
 0xf60   : > { %v12903_v12 = vadd.f32 %v12902_v4, %v12901_v42  ;;  %v12904_v10 = vpop.f32.mrb[94].mxu1 }
 0xf61   : > { %v12905_v24 = vpop.f32.mrb[95].mxu1 }
 0xf62   : > { %v17875_v44 = vadd.f32 %v12905_v24, %v12904_v10  ;;  %v15441_v24 = vld [vmem:[%s16327_s14 + $0x58] sm:$0xff] }
 0xf95   : > { %v5464_v53 = vpop.f32.mrb[120].mxu0 }
 0xf96   : > { %v5466_v58 = vpop.f32.mrb[121].mxu0  ;;  %v5633_v30 = vadd.f32 %v15430_v46, %v5464_v53 }
 0xf97   : > { %v5634_v51 = vadd.f32 %v15431_v1, %v5466_v58  ;;  %v5468_v5 = vpop.f32.mrb[122].mxu0 }
 0xf98   : > { %v5636_v0 = vadd.f32 %v15432_v22, %v5468_v5  ;;  %v5470_v16 = vpop.f32.mrb[123].mxu0  ;;  %v17888_v29 = vadd.f32 %v17879_v2, %v5633_v30 }
 0xf99   : > { %v5637_v34 = vadd.f32 %v15433_v43, %v5470_v16  ;;  %v13393_v31 = vpop.f32.mrb[96].mxu1  ;;  %v17891_v63 = vadd.f32 %v17883_v8, %v5634_v51 }
 0xf9a   : > { %v5611_v27 = vadd.f32 %v13393_v31, %v12891_v19  ;;  %v5602_v50 = vpop.f32.mrb[97].mxu1  ;;  %v17898_v3 = vadd.f32 %v17879_v2, %v5636_v0  ;;  %v15439_v19 = vld [vmem:[%s16327_s14 + $0x48] sm:$0xff]  ;;  %v15442_v31 = vld [vmem:[%s16327_s14 + $0x60] sm:$0xff] }
 0xf9b   : > { %v5603_v18 = vadd.f32 %v17856_v13, %v5602_v50  ;;  %v13394_v55 = vpop.f32.mrb[98].mxu1  ;;  %v17901_v36 = vadd.f32 %v17883_v8, %v5637_v34  ;;  %v15436_v13 = vld [vmem:[%s16327_s14 + $0x30] sm:$0xff]  ;;  %v5700_v17 = vadd.f32 %v17891_v63, %v17888_v29 }
 0xf9c   : > { %v5614_v23 = vadd.f32 %v13394_v55, %v12894_v38  ;;  %v5605_v9 = vpop.f32.mrb[99].mxu1  ;;  %v5641_v49 = vadd.f32 %v15435_v37, %v5611_v27  ;;  %v15446_v37 = vld [vmem:[%s16327_s14 + $0x88] sm:$0xff] }
 0xf9d   : > { %v5635_v14 = vadd.f32 %v15434_v20, %v5603_v18  ;;  %v5606_v25 = vadd.f32 %v17858_v62, %v5605_v9  ;;  %v5474_v52 = vpop.f32.mrb[124].mxu0  ;;  %v5704_v38 = vadd.f32 %v17901_v36, %v17898_v3 }
 0xf9e   : > { %v5639_v41 = vadd.f32 %v15436_v13, %v5474_v52  ;;  %v5476_v59 = vpop.f32.mrb[125].mxu0  ;;  %v17929_v10 = vadd.f32 %v17894_v45, %v5641_v49  ;;  %v5644_v11 = vadd.f32 %v15441_v24, %v5614_v23  ;;  %v15444_v23 = vld [vmem:[%s16327_s14 + $0x68] sm:$0xff]  ;;  %v15450_v24 = vld [vmem:[%s16327_s14 + $0x98] sm:$0xff] }
 0xf9f   : > { %v17908_v54 = vadd.f32 %v17894_v45, %v5635_v14  ;;  %v5638_v56 = vadd.f32 %v15437_v57, %v5606_v25  ;;  %v5640_v26 = vadd.f32 %v15438_v35, %v5476_v59  ;;  %v5478_v6 = vpop.f32.mrb[126].mxu0  ;;  %v15445_v14 = vld [vmem:[%s16327_s14 + $0x78] sm:$0xff] }
 0xfa0   : > { %v17915_v62 = vadd.f32 %v17879_v2, %v5639_v41  ;;  %v5642_v39 = vadd.f32 %v15439_v19, %v5478_v6  ;;  %v5480_v60 = vpop.f32.mrb[127].mxu0  ;;  %v17949_v18 = vadd.f32 %v17894_v45, %v5644_v11  ;;  %v15447_v41 = vld [vmem:[%s16327_s14 + $0x80] sm:$0xff] }
 0xfa1   : > { %v17921_v7 = vadd.f32 %v17894_v45, %v5638_v56  ;;  %v17924_v33 = vadd.f32 %v17883_v8, %v5640_v26  ;;  %v5643_v40 = vadd.f32 %v15440_v48, %v5480_v60  ;;  %v13397_v42 = vpop.f32.mrb[100].mxu1  ;;  %v5701_v4 = vadd.f32 %v5700_v17, %v17908_v54 }
 0xfa2   : > { %19077 = vst [vmem:[#allocation55_spill] sm:$0xff] %v17915_v62  ;;  %v17933_v53 = vadd.f32 %v17879_v2, %v5642_v39  ;;  %v5627_v58 = vadd.f32 %v13397_v42, %v12903_v12  ;;  %v5618_v46 = vpop.f32.mrb[101].mxu1  ;;  %v15449_v42 = vld [vmem:[%s16327_s14 + $0xa0] sm:$0xff] }
 0xfa3   : > { %19078 = vst [vmem:[#allocation38_spill] sm:$0xff] %v17924_v33  ;;  %v17936_v30 = vadd.f32 %v17883_v8, %v5643_v40  ;;  %v5619_v1 = vadd.f32 %v17871_v61, %v5618_v46  ;;  %5702 = vadd.xlane.f32.xlu0 %v5701_v4  ;;  %v13398_v51 = vpop.f32.mrb[102].mxu1  ;;  %v5705_v5 = vadd.f32 %v5704_v38, %v17921_v7  ;;  %v15448_v38 = vld [vmem:[%s16327_s14 + $0x90] sm:$0xff] }
 0xfa4   : > { %19079 = vst [vmem:[#allocation56_spill] sm:$0xff] %v17933_v53  ;;  %v5708_v22 = vadd.f32 %v17924_v33, %v17915_v62  ;;  %v5630_v0 = vadd.f32 %v13398_v51, %v17875_v44  ;;  %v5621_v16 = vpop.f32.mrb[103].mxu1  ;;  %v15443_v44 = vld [vmem:[%s16327_s14 + $0x70] sm:$0xff]  ;;  %v5653_v4 = vadd.f32 %v15449_v42, %v5627_v58  ;;  %v14399_v42 = vld [vmem:[#allocation17 + $0x188] ss:$48 sps:$4 sm:$0xff]  }
 0xfa5   : > { %19080 = vst [vmem:[#allocation37_spill] sm:$0xff] %v17936_v30  ;;  %v5622_v12 = vadd.f32 %v17873_v15, %v5621_v16  ;;  %5706 = vadd.xlane.f32.xlu1 %v5705_v5  ;;  %v5484_v43 = vpop.f32.mrb[128].mxu0  ;;  %v5712_v61 = vadd.f32 %v17936_v30, %v17933_v53  ;;  %v5647_v55 = vadd.f32 %v15443_v44, %v5619_v1  ;;  %v15451_v5 = vld [vmem:[%s16327_s14 + $0xa8] sm:$0xff] }
 0xfa6   : > { %v5709_v34 = vadd.f32 %v5708_v22, %v17929_v10  ;;  %v5645_v27 = vadd.f32 %v15442_v31, %v5484_v43  ;;  %v5486_v50 = vpop.f32.mrb[129].mxu0 }
 0xfa7   : > { %v5646_v15 = vadd.f32 %v15444_v23, %v5486_v50  ;;  %v5488_v9 = vpop.f32.mrb[130].mxu0  ;;  %v5650_v49 = vadd.f32 %v15446_v37, %v5622_v12  ;;  %v5713_v57 = vadd.f32 %v5712_v61, %v17949_v18  ;;  %v17967_v35 = vadd.f32 %v17894_v45, %v5647_v55  ;;  %v15452_v12 = vld [vmem:[%s16327_s14 + $0xb8] sm:$0xff]  ;;  %v15453_v61 = vld [vmem:[%s16327_s14 + $0xb0] sm:$0xff] }
 0xfa8   : > { %5710 = vadd.xlane.f32.xlu0 %v5709_v34  ;;  %v17954_v20 = vadd.f32 %v17879_v2, %v5645_v27  ;;  %v5648_v25 = vadd.f32 %v15445_v14, %v5488_v9  ;;  %v5490_v52 = vpop.f32.mrb[131].mxu0  ;;  %v5656_v43 = vadd.f32 %v15452_v12, %v5630_v0  ;;  %v17997_v27 = vadd.f32 %v17894_v45, %v5653_v4  ;;  %v14374_v9 = vld [vmem:[#allocation17 + $0x4] ss:$48 sps:$4 sm:$0xff]   ;;  %v14375_v14 = vld [vmem:[#allocation17 + $0x8] ss:$48 sps:$4 sm:$0xff]  }
 0xfa9   : > { %v17959_v13 = vadd.f32 %v17883_v8, %v5646_v15  ;;  %v5649_v59 = vadd.f32 %v15447_v41, %v5490_v52  ;;  %v17975_v17 = vadd.f32 %v17894_v45, %v5650_v49  ;;  %v14372_v15 = vld [vmem:[#allocation17] ss:$48 sps:$4 sm:$0xff]   ;;  %7752 = vmatprep.subr.bf16.mxu1 %v14374_v9  ;;  %v14383_v52 = vld [vmem:[#allocation17 + $0x6c] ss:$48 sps:$4 sm:$0xff]   ;;  %v14381_v37 = vld [vmem:[#allocation17 + $0x68] ss:$48 sps:$4 sm:$0xff]  }
 0xfaa   : > { %19081 = vst [vmem:[#allocation49_spill] sm:$0xff] %v17954_v20  ;;  %v17964_v56 = vadd.f32 %v17879_v2, %v5648_v25  ;;  %v18005_v0 = vadd.f32 %v17894_v45, %v5656_v43  ;;  %v14380_v25 = vld [vmem:[#allocation17 + $0x64] ss:$48 sps:$4 sm:$0xff]   ;;  %7753 = vmatpush1.bf16.msra.mxu1 %v14372_v15  ;;  %v14378_v45 = vld [vmem:[#allocation17 + $0x60] ss:$48 sps:$4 sm:$0xff]  }
 0xfab   : > { %19082 = vst [vmem:[#allocation54_spill] sm:$0xff] %v17959_v13  ;;  %v17970_v26 = vadd.f32 %v17883_v8, %v5649_v59  ;;  %v5716_v6 = vadd.f32 %v17959_v13, %v17954_v20  ;;  %7754 = vmatprep.subr.bf16.mxu1 %v14380_v25  ;;  %v14386_v49 = vld [vmem:[#allocation17 + $0xc4] ss:$48 sps:$4 sm:$0xff]   ;;  %v14389_v41 = vld [vmem:[#allocation17 + $0xcc] ss:$48 sps:$4 sm:$0xff]  }
 0xfac   : > { %19083 = vst [vmem:[#allocation69_spill] sm:$0xff] %v17964_v56  ;;  %5714 = vadd.xlane.f32.xlu0 %v5713_v57  ;;  %v14384_v59 = vld [vmem:[#allocation17 + $0xc0] ss:$48 sps:$4 sm:$0xff]   ;;  %v14387_v57 = vld [vmem:[#allocation17 + $0xc8] ss:$48 sps:$4 sm:$0xff]  }
 0xfad   : > { %19084 = vst [vmem:[#allocation53_spill] sm:$0xff] %v17970_v26  ;;  %v5494_v19 = vpop.f32.mrb[132].mxu0  ;;  %v5717_v39 = vadd.f32 %v5716_v6, %v17967_v35  ;;  %v5720_v60 = vadd.f32 %v17970_v26, %v17964_v56  ;;  %v14392_v6 = vld [vmem:[#allocation17 + $0x124] ss:$48 sps:$4 sm:$0xff]   ;;  %v14419_v43 = vld [vmem:[#allocation17 + $0x2ac] ss:$48 sps:$4 sm:$0xff]  }
 0xfae   : > { %v5651_v48 = vadd.f32 %v15448_v38, %v5494_v19  ;;  %v5496_v40 = vpop.f32.mrb[133].mxu0  ;;  %7755 = vmatpush1.bf16.msra.mxu1 %v14378_v45  ;;  %v14395_v19 = vld [vmem:[#allocation17 + $0x12c] ss:$48 sps:$4 sm:$0xff]   ;;  %v14398_v38 = vld [vmem:[#allocation17 + $0x184] ss:$48 sps:$4 sm:$0xff]  }
 0xfaf   : > { %v5652_v11 = vadd.f32 %v15450_v24, %v5496_v40  ;;  %v5498_v46 = vpop.f32.mrb[134].mxu0  ;;  %v5721_v1 = vadd.f32 %v5720_v60, %v17975_v17  ;;  %7756 = vmatprep.subr.bf16.mxu1 %v14386_v49  ;;  %v14393_v60 = vld [vmem:[#allocation17 + $0x128] ss:$48 sps:$4 sm:$0xff]   ;;  %v14396_v40 = vld [vmem:[#allocation17 + $0x180] ss:$48 sps:$4 sm:$0xff]  }
 0xfb0   : > { %5718 = vadd.xlane.f32.xlu0 %v5717_v39  ;;  %v17985_v51 = vadd.f32 %v17879_v2, %v5651_v48  ;;  %v5654_v22 = vadd.f32 %v15451_v5, %v5498_v46  ;;  %v5500_v16 = vpop.f32.mrb[135].mxu0  ;;  %v14390_v39 = vld [vmem:[#allocation17 + $0x120] ss:$48 sps:$4 sm:$0xff]   ;;  %v14401_v48 = vld [vmem:[#allocation17 + $0x18c] ss:$48 sps:$4 sm:$0xff]  }
 0xfb1   : > { %v17990_v34 = vadd.f32 %v17883_v8, %v5652_v11  ;;  %v5655_v31 = vadd.f32 %v15453_v61, %v5500_v16  ;;  %5722 = vadd.xlane.f32.xlu1 %v5721_v1  ;;  %v14404_v4 = vld [vmem:[#allocation17 + $0x1e4] ss:$48 sps:$4 sm:$0xff]   ;;  %v14407_v24 = vld [vmem:[#allocation17 + $0x1ec] ss:$48 sps:$4 sm:$0xff]   ;;  %v14402_v11 = vld [vmem:[#allocation17 + $0x1e0] ss:$48 sps:$4 sm:$0xff]  }
 0xfb2   : > { %19085 = vst [vmem:[#allocation60_spill] sm:$0xff] %v17985_v51  ;;  %v17994_v58 = vadd.f32 %v17879_v2, %v5654_v22  ;;  %7757 = vmatpush1.bf16.msra.mxu1 %v14384_v59  ;;  %v14405_v46 = vld [vmem:[#allocation17 + $0x1e8] ss:$48 sps:$4 sm:$0xff]   ;;  %v14410_v1 = vld [vmem:[#allocation17 + $0x244] ss:$48 sps:$4 sm:$0xff]  }
 0xfb3   : > { %19086 = vst [vmem:[#allocation42_spill] sm:$0xff] %v17990_v34  ;;  %v18000_v50 = vadd.f32 %v17883_v8, %v5655_v31  ;;  %v5724_v44 = vadd.f32 %v17990_v34, %v17985_v51  ;;  %v14377_v8 = vld [vmem:[#allocation17 + $0xc] ss:$48 sps:$4 sm:$0xff]   ;;  %7758 = vmatprep.subr.bf16.mxu1 %v14392_v6  ;;  %v14408_v22 = vld [vmem:[#allocation17 + $0x240] ss:$48 sps:$4 sm:$0xff]  }
 0xfb4   : > { %19087 = vst [vmem:[#allocation59_spill] sm:$0xff] %v17994_v58  ;;  %7898 = vmatprep.subr.bf16.mxu0 %v14377_v8  ;;  %v14413_v5 = vld [vmem:[#allocation17 + $0x24c] ss:$48 sps:$4 sm:$0xff]   ;;  %v14411_v16 = vld [vmem:[#allocation17 + $0x248] ss:$48 sps:$4 sm:$0xff]  }
 0xfb5   : > { %19088 = vst [vmem:[#allocation41_spill] sm:$0xff] %v18000_v50  ;;  %v5725_v55 = vadd.f32 %v5724_v44, %v17997_v27  ;;  %v5728_v23 = vadd.f32 %v18000_v50, %v17994_v58  ;;  %7899 = vmatpush1.bf16.msra.mxu0 %v14375_v14  ;;  %v14416_v12 = vld [vmem:[#allocation17 + $0x2a4] ss:$48 sps:$4 sm:$0xff]   ;;  %v14414_v61 = vld [vmem:[#allocation17 + $0x2a0] ss:$48 sps:$4 sm:$0xff]  }
 0xfb6   : > { %7900 = vmatprep.subr.bf16.mxu0 %v14383_v52  ;;  %7759 = vmatpush1.bf16.msra.mxu1 %v14390_v39  ;;  %v14417_v31 = vld [vmem:[#allocation17 + $0x2a8] ss:$48 sps:$4 sm:$0xff]   ;;  %v14422_v44 = vld [vmem:[#allocation17 + $0x304] ss:$48 sps:$4 sm:$0xff]   ;;  %v14431_v9 = vld [vmem:[#allocation17 + $0x36c] ss:$48 sps:$4 sm:$0xff]  }
 0xfb7   : > { %5726 = vadd.xlane.f32.xlu0 %v5725_v55  ;;  %v5729_v2 = vadd.f32 %v5728_v23, %v18005_v0  ;;  %7760 = vmatprep.subr.bf16.mxu1 %v14398_v38  ;;  %v14425_v55 = vld [vmem:[#allocation17 + $0x30c] ss:$48 sps:$4 sm:$0xff]   ;;  %v14420_v23 = vld [vmem:[#allocation17 + $0x300] ss:$48 sps:$4 sm:$0xff]   ;;  %v14428_v15 = vld [vmem:[#allocation17 + $0x364] ss:$48 sps:$4 sm:$0xff]  }
 0xfb8   : > { %v14426_v14 = vld [vmem:[#allocation17 + $0x360] ss:$48 sps:$4 sm:$0xff]   ;;  %v14429_v8 = vld [vmem:[#allocation17 + $0x368] ss:$48 sps:$4 sm:$0xff]  }
 0xfb9   : > { %5730 = vadd.xlane.f32.xlu1 %v5729_v2  ;;  %7901 = vmatpush1.bf16.msra.mxu0 %v14381_v37  ;;  %v14423_v2 = vld [vmem:[#allocation17 + $0x308] ss:$48 sps:$4 sm:$0xff]  }
 0xfba   : > { %7902 = vmatprep.subr.bf16.mxu0 %v14389_v41  ;;  %7761 = vmatpush1.bf16.msra.mxu1 %v14396_v40 }
 0xfbb   : > { %7762 = vmatprep.subr.bf16.mxu1 %v14404_v4 }
 0xfbd   : > { %7903 = vmatpush1.bf16.msra.mxu0 %v14387_v57 }
 0xfbe   : > { %7904 = vmatprep.subr.bf16.mxu0 %v14395_v19  ;;  %7763 = vmatpush1.bf16.msra.mxu1 %v14402_v11 }
 0xfbf   : > { %7764 = vmatprep.subr.bf16.mxu1 %v14410_v1 }
 0xfc1   : > { %7905 = vmatpush1.bf16.msra.mxu0 %v14393_v60 }
 0xfc2   : > { %7906 = vmatprep.subr.bf16.mxu0 %v14401_v48  ;;  %7765 = vmatpush1.bf16.msra.mxu1 %v14408_v22 }
 0xfc3   : > { %7766 = vmatprep.subr.bf16.mxu1 %v14416_v12 }
 0xfc5   : > { %7907 = vmatpush1.bf16.msra.mxu0 %v14399_v42 }
 0xfc6   : > { %7908 = vmatprep.subr.bf16.mxu0 %v14407_v24  ;;  %7767 = vmatpush1.bf16.msra.mxu1 %v14414_v61 }
 0xfc7   : > { %7768 = vmatprep.subr.bf16.mxu1 %v14422_v44 }
 0xfc9   : > { %7909 = vmatpush1.bf16.msra.mxu0 %v14405_v46 }
 0xfca   : > { %7910 = vmatprep.subr.bf16.mxu0 %v14413_v5  ;;  %7769 = vmatpush1.bf16.msra.mxu1 %v14420_v23 }
 0xfcb   : > { %7770 = vmatprep.subr.bf16.mxu1 %v14428_v15 }
 0xfcd   : > { %7911 = vmatpush1.bf16.msra.mxu0 %v14411_v16 }
 0xfce   : > { %7912 = vmatprep.subr.bf16.mxu0 %v14419_v43  ;;  %7771 = vmatpush1.bf16.msra.mxu1 %v14426_v14 }
 0xfd1   : > { %7913 = vmatpush1.bf16.msra.mxu0 %v14417_v31 }
 0xfd2   : > { %7914 = vmatprep.subr.bf16.mxu0 %v14425_v55 }
 0xfd5   : > { %7915 = vmatpush1.bf16.msra.mxu0 %v14423_v2 }
 0xfd6   : > { %7916 = vmatprep.subr.bf16.mxu0 %v14431_v9 }
 0xfd9   : > { %7917 = vmatpush1.bf16.msra.mxu0 %v14429_v8 }
0x1030   : > { %v5703_v25 = vpop.xlane.xlu0 %5702 }
0x1031   : > { %v5732_v52 = vmul.f32 0.0026041667, %v5703_v25 }
0x1032   : > { %v5707_v45 = vpop.xlane.xlu1 %5706 }
0x1033   : > { %v18012_v37 = vsub.f32 %v17888_v29, %v5732_v52  ;;  %v18015_v49 = vsub.f32 %v17891_v63, %v5732_v52  ;;  %v18018_v41 = vsub.f32 %v17908_v54, %v5732_v52  ;;  %v5733_v59 = vmul.f32 0.0026041667, %v5707_v45 }
0x1035   : > { %v5711_v57 = vpop.xlane.xlu0 %5710  ;;  %v5764_v6 = vmul.f32 %v18012_v37, %v18012_v37  ;;  %v5765_v19 = vmul.f32 %v18015_v49, %v18015_v49  ;;  %v18025_v39 = vsub.f32 %v17898_v3, %v5733_v59  ;;  %v18028_v60 = vsub.f32 %v17901_v36, %v5733_v59 }
0x1036   : > { %v18031_v38 = vsub.f32 %v17921_v7, %v5733_v59  ;;  %v5734_v48 = vmul.f32 0.0026041667, %v5711_v57  ;;  %v5766_v4 = vmul.f32 %v18018_v41, %v18018_v41 }
0x1037   : > { %v5767_v40 = vmul.f32 %v18025_v39, %v18025_v39  ;;  %v5768_v42 = vmul.f32 %v18028_v60, %v18028_v60  ;;  %v5788_v24 = vadd.f32 %v5765_v19, %v5764_v6 }
0x1038   : > { %v18040_v11 = vsub.f32 %v17915_v62, %v5734_v48  ;;  %v18043_v46 = vsub.f32 %v17924_v33, %v5734_v48  ;;  %v18046_v1 = vsub.f32 %v17929_v10, %v5734_v48  ;;  %v5769_v12 = vmul.f32 %v18031_v38, %v18031_v38  ;;  %v14479_v62 = vld [vmem:[#allocation17 + $0x66c] ss:$48 sps:$4 sm:$0xff]  }
0x1039   : > { %v5715_v5 = vpop.xlane.xlu0 %5714  ;;  %v5789_v16 = vadd.f32 %v5788_v24, %v5766_v4  ;;  %v5792_v43 = vadd.f32 %v5768_v42, %v5767_v40 }
0x103a   : > { %v5735_v22 = vmul.f32 0.0026041667, %v5715_v5  ;;  %v5770_v61 = vmul.f32 %v18040_v11, %v18040_v11  ;;  %v5771_v31 = vmul.f32 %v18043_v46, %v18043_v46  ;;  %v5772_v9 = vmul.f32 %v18046_v1, %v18046_v1 }
0x103b   : > { %5790 = vadd.xlane.f32.xlu0 %v5789_v16  ;;  %v5793_v23 = vadd.f32 %v5792_v43, %v5769_v12 }
0x103c   : > { %v18055_v44 = vsub.f32 %v17933_v53, %v5735_v22  ;;  %v18058_v55 = vsub.f32 %v17936_v30, %v5735_v22  ;;  %v18061_v2 = vsub.f32 %v17949_v18, %v5735_v22  ;;  %v5796_v14 = vadd.f32 %v5771_v31, %v5770_v61 }
0x103d   : > { %v5719_v15 = vpop.xlane.xlu0 %5718  ;;  %5794 = vadd.xlane.f32.xlu1 %v5793_v23 }
0x103e   : > { %v5773_v8 = vmul.f32 %v18055_v44, %v18055_v44  ;;  %v5774_v25 = vmul.f32 %v18058_v55, %v18058_v55  ;;  %v5736_v52 = vmul.f32 0.0026041667, %v5719_v15  ;;  %v5723_v45 = vpop.xlane.xlu1 %5722  ;;  %v5797_v59 = vadd.f32 %v5796_v14, %v5772_v9 }
0x103f   : > { %v5737_v48 = vmul.f32 0.0026041667, %v5723_v45  ;;  %v5775_v40 = vmul.f32 %v18061_v2, %v18061_v2 }
0x1040   : > { %v18070_v57 = vsub.f32 %v17954_v20, %v5736_v52  ;;  %v18073_v6 = vsub.f32 %v17959_v13, %v5736_v52  ;;  %v18076_v19 = vsub.f32 %v17967_v35, %v5736_v52  ;;  %5798 = vadd.xlane.f32.xlu0 %v5797_v59  ;;  %v5800_v42 = vadd.f32 %v5774_v25, %v5773_v8 }
0x1041   : > { %v18085_v5 = vsub.f32 %v17964_v56, %v5737_v48  ;;  %v18088_v22 = vsub.f32 %v17970_v26, %v5737_v48  ;;  %v18091_v16 = vsub.f32 %v17975_v17, %v5737_v48  ;;  %v14441_v26 = vld [vmem:[#allocation17 + $0x428] ss:$48 sps:$4 sm:$0xff]  }
0x1042   : > { %v5776_v4 = vmul.f32 %v18070_v57, %v18070_v57  ;;  %v5777_v24 = vmul.f32 %v18073_v6, %v18073_v6  ;;  %v5801_v12 = vadd.f32 %v5800_v42, %v5775_v40  ;;  %v5778_v31 = vmul.f32 %v18076_v19, %v18076_v19 }
0x1043   : > { %v5779_v43 = vmul.f32 %v18085_v5, %v18085_v5  ;;  %v5780_v61 = vmul.f32 %v18088_v22, %v18088_v22  ;;  %v5781_v52 = vmul.f32 %v18091_v16, %v18091_v16 }
0x1044   : > { %v5804_v23 = vadd.f32 %v5777_v24, %v5776_v4  ;;  %5802 = vadd.xlane.f32.xlu1 %v5801_v12  ;;  %v5727_v15 = vpop.xlane.xlu0 %5726 }
0x1045   : > { %v5738_v9 = vmul.f32 0.0026041667, %v5727_v15  ;;  %v5808_v8 = vadd.f32 %v5780_v61, %v5779_v43 }
0x1046   : > { %v5805_v14 = vadd.f32 %v5804_v23, %v5778_v31  ;;  %v5731_v25 = vpop.xlane.xlu1 %5730 }
0x1047   : > { %v18102_v45 = vsub.f32 %v17985_v51, %v5738_v9  ;;  %v18105_v59 = vsub.f32 %v17990_v34, %v5738_v9  ;;  %v18108_v48 = vsub.f32 %v17997_v27, %v5738_v9  ;;  %v5739_v40 = vmul.f32 0.0026041667, %v5731_v25  ;;  %v14438_v34 = vld [vmem:[#allocation17 + $0x420] ss:$48 sps:$4 sm:$0xff]   ;;  %v14440_v51 = vld [vmem:[#allocation17 + $0x424] ss:$48 sps:$4 sm:$0xff]  }
0x1048   : > { %5806 = vadd.xlane.f32.xlu0 %v5805_v14  ;;  %v5809_v42 = vadd.f32 %v5808_v8, %v5781_v52  ;;  %v14432_v52 = vld [vmem:[#allocation17 + $0x3c0] ss:$48 sps:$4 sm:$0xff]  }
0x1049   : > { %v5782_v4 = vmul.f32 %v18102_v45, %v18102_v45  ;;  %v5783_v24 = vmul.f32 %v18105_v59, %v18105_v59  ;;  %v18115_v12 = vsub.f32 %v17994_v58, %v5739_v40  ;;  %v18118_v43 = vsub.f32 %v18000_v50, %v5739_v40  ;;  %v14434_v50 = vld [vmem:[#allocation17 + $0x3c4] ss:$48 sps:$4 sm:$0xff]   ;;  %v14437_v58 = vld [vmem:[#allocation17 + $0x3cc] ss:$48 sps:$4 sm:$0xff]  }
0x104a   : > { %v18121_v61 = vsub.f32 %v18005_v0, %v5739_v40  ;;  %5810 = vadd.xlane.f32.xlu1 %v5809_v42  ;;  %v5784_v15 = vmul.f32 %v18108_v48, %v18108_v48  ;;  %v14435_v40 = vld [vmem:[#allocation17 + $0x3c8] ss:$48 sps:$4 sm:$0xff]   ;;  %7772 = vmatprep.subr.bf16.mxu1 %v14434_v50  ;;  %v14450_v50 = vld [vmem:[#allocation17 + $0x4e0] ss:$48 sps:$4 sm:$0xff]  }
0x104b   : > { %v5785_v31 = vmul.f32 %v18115_v12, %v18115_v12  ;;  %v5786_v23 = vmul.f32 %v18118_v43, %v18118_v43  ;;  %v5812_v9 = vadd.f32 %v5783_v24, %v5782_v4  ;;  %7918 = vmatprep.subr.bf16.mxu0 %v14437_v58  ;;  %7773 = vmatpush1.bf16.msra.mxu1 %v14432_v52  ;;  %v14443_v4 = vld [vmem:[#allocation17 + $0x42c] ss:$48 sps:$4 sm:$0xff]   ;;  %v14444_v24 = vld [vmem:[#allocation17 + $0x480] ss:$48 sps:$4 sm:$0xff]   ;;  %v14452_v58 = vld [vmem:[#allocation17 + $0x4e4] ss:$48 sps:$4 sm:$0xff]  }
0x104c   : > { %v5787_v8 = vmul.f32 %v18121_v61, %v18121_v61  ;;  %7919 = vmatpush1.bf16.msra.mxu0 %v14435_v40  ;;  %7774 = vmatprep.subr.bf16.mxu1 %v14440_v51  ;;  %v14456_v51 = vld [vmem:[#allocation17 + $0x540] ss:$48 sps:$4 sm:$0xff]   ;;  %v14464_v52 = vld [vmem:[#allocation17 + $0x5a4] ss:$48 sps:$4 sm:$0xff]   ;;  %v14465_v40 = vld [vmem:[#allocation17 + $0x5a8] ss:$48 sps:$4 sm:$0xff]  }
0x104d   : > { %v5813_v14 = vadd.f32 %v5812_v9, %v5784_v15  ;;  %v5816_v25 = vadd.f32 %v5786_v23, %v5785_v31  ;;  %7920 = vmatprep.subr.bf16.mxu0 %v14443_v4  ;;  %v14446_v31 = vld [vmem:[#allocation17 + $0x484] ss:$48 sps:$4 sm:$0xff]   ;;  %v14447_v23 = vld [vmem:[#allocation17 + $0x488] ss:$48 sps:$4 sm:$0xff]   ;;  %v14449_v15 = vld [vmem:[#allocation17 + $0x48c] ss:$48 sps:$4 sm:$0xff]  }
0x104e   : > { %v14453_v9 = vld [vmem:[#allocation17 + $0x4e8] ss:$48 sps:$4 sm:$0xff]   ;;  %v14470_v4 = vld [vmem:[#allocation17 + $0x604] ss:$48 sps:$4 sm:$0xff]  }
0x104f   : > { %5814 = vadd.xlane.f32.xlu0 %v5813_v14  ;;  %v5817_v42 = vadd.f32 %v5816_v25, %v5787_v8  ;;  %7775 = vmatpush1.bf16.msra.mxu1 %v14438_v34  ;;  %v14455_v14 = vld [vmem:[#allocation17 + $0x4ec] ss:$48 sps:$4 sm:$0xff]   ;;  %v14458_v8 = vld [vmem:[#allocation17 + $0x544] ss:$48 sps:$4 sm:$0xff]   ;;  %v14462_v34 = vld [vmem:[#allocation17 + $0x5a0] ss:$48 sps:$4 sm:$0xff]  }
0x1050   : > { %7921 = vmatpush1.bf16.msra.mxu0 %v14441_v26  ;;  %7776 = vmatprep.subr.bf16.mxu1 %v14446_v31  ;;  %v14461_v25 = vld [vmem:[#allocation17 + $0x54c] ss:$48 sps:$4 sm:$0xff]   ;;  %v14459_v26 = vld [vmem:[#allocation17 + $0x548] ss:$48 sps:$4 sm:$0xff]  }
0x1051   : > { %5818 = vadd.xlane.f32.xlu1 %v5817_v42  ;;  %7922 = vmatprep.subr.bf16.mxu0 %v14449_v15  ;;  %v14467_v42 = vld [vmem:[#allocation17 + $0x5ac] ss:$48 sps:$4 sm:$0xff]  }
0x1053   : > { %7777 = vmatpush1.bf16.msra.mxu1 %v14444_v24  ;;  %v14473_v24 = vld [vmem:[#allocation17 + $0x60c] ss:$48 sps:$4 sm:$0xff]  }
0x1054   : > { %7923 = vmatpush1.bf16.msra.mxu0 %v14447_v23  ;;  %7778 = vmatprep.subr.bf16.mxu1 %v14452_v58 }
0x1055   : > { %7924 = vmatprep.subr.bf16.mxu0 %v14455_v14 }
0x1057   : > { %7779 = vmatpush1.bf16.msra.mxu1 %v14450_v50 }
0x1058   : > { %7925 = vmatpush1.bf16.msra.mxu0 %v14453_v9  ;;  %7780 = vmatprep.subr.bf16.mxu1 %v14458_v8 }
0x1059   : > { %7926 = vmatprep.subr.bf16.mxu0 %v14461_v25 }
0x105b   : > { %7781 = vmatpush1.bf16.msra.mxu1 %v14456_v51 }
0x105c   : > { %7927 = vmatpush1.bf16.msra.mxu0 %v14459_v26  ;;  %7782 = vmatprep.subr.bf16.mxu1 %v14464_v52  ;;  %v18131_v52 = vld [vmem:[#allocation14] sm:$0x7] }
0x105d   : > { %7928 = vmatprep.subr.bf16.mxu0 %v14467_v42 }
0x105f   : > { %7783 = vmatpush1.bf16.msra.mxu1 %v14462_v34 }
0x1060   : > { %7929 = vmatpush1.bf16.msra.mxu0 %v14465_v40  ;;  %7825 = vmatprep.subr.bf16.mxu1 %v14470_v4  ;;  %v18133_v4 = vld [vmem:[#allocation15] sm:$0x7] }
0x1061   : > { %7971 = vmatprep.subr.bf16.mxu0 %v14473_v24  ;;  %v18137_v24 = vrot.slane %v18131_v52, %v19075_v47 }
0x10c8   : > { %v5791_v31 = vpop.xlane.xlu0 %5790 }
0x10c9   : > { %v5820_v23 = vmul.f32 0.0026041667, %v5791_v31 }
0x10ca   : > { %v5795_v15 = vpop.xlane.xlu1 %5794 }
0x10cb   : > { %v5828_v50 = vadd.f32 1e-05, %v5820_v23  ;;  %v5821_v58 = vmul.f32 0.0026041667, %v5795_v15 }
0x10cd   : > { %15396 = vrsqrt.f32 %v5828_v50  ;;  %v5829_v9 = vadd.f32 1e-05, %v5821_v58  ;;  %v5799_v14 = vpop.xlane.xlu0 %5798  ;;  %v18143_v50 = vrot.slane %v18131_v52, %v19074_v32 }
0x10ce   : > { %v5822_v8 = vmul.f32 0.0026041667, %v5799_v14 }
0x10cf   : > { %15398 = vrsqrt.f32 %v5829_v9 }
0x10d0   : > { %v5830_v51 = vadd.f32 1e-05, %v5822_v8 }
0x10d1   : > { %v5803_v25 = vpop.xlane.xlu1 %5802 }
0x10d2   : > { %15400 = vrsqrt.f32 %v5830_v51  ;;  %v5823_v26 = vmul.f32 0.0026041667, %v5803_v25  ;;  %v18153_v51 = vrot.slane %v18133_v4, %v19075_v47  ;;  %v18157_v25 = vrot.slane %v18133_v4, %v19074_v32 }
0x10d4   : > { %v5831_v34 = vadd.f32 1e-05, %v5823_v26 }
0x10d5   : > { %v5807_v40 = vpop.xlane.xlu0 %5806 }
0x10d6   : > { %v5824_v42 = vmul.f32 0.0026041667, %v5807_v40  ;;  %15402 = vrsqrt.f32 %v5831_v34 }
0x10d7   : > { %v18139_v31 = vpop.eup %15396  ;;  %v5811_v15 = vpop.xlane.xlu1 %5810 }
0x10d8   : > { %v5832_v23 = vadd.f32 1e-05, %v5824_v42  ;;  %v5825_v58 = vmul.f32 0.0026041667, %v5811_v15  ;;  %v5845_v9 = vmul.f32 %v18139_v31, %v18015_v49  ;;  %v5844_v14 = vmul.f32 %v18139_v31, %v18012_v37 }
0x10d9   : > { %v18149_v8 = vpop.eup %15398 }
0x10da   : > { %15404 = vrsqrt.f32 %v5832_v23  ;;  %v5833_v26 = vadd.f32 1e-05, %v5825_v58  ;;  %v5848_v34 = vmul.f32 %v18149_v8, %v18028_v60  ;;  %v5885_v49 = vmul.f32 %v18137_v24, %v5845_v9 }
0x10db   : > { %v5847_v37 = vmul.f32 %v18149_v8, %v18025_v39  ;;  %v5884_v40 = vmul.f32 %v18143_v50, %v5844_v14 }
0x10dc   : > { %v18165_v42 = vpop.eup %15400  ;;  %15406 = vrsqrt.f32 %v5833_v26  ;;  %v5815_v23 = vpop.xlane.xlu0 %5814  ;;  %v5888_v15 = vmul.f32 %v18137_v24, %v5848_v34  ;;  %v5925_v58 = vadd.f32 %v18153_v51, %v5885_v49  ;;  %v14468_v49 = vld [vmem:[#allocation17 + $0x600] ss:$48 sps:$4 sm:$0xff]  }
0x10dd   : > { %v5887_v56 = vmul.f32 %v18143_v50, %v5847_v37  ;;  %v5826_v13 = vmul.f32 0.0026041667, %v5815_v23  ;;  %v5851_v60 = vmul.f32 %v18165_v42, %v18043_v46  ;;  %v5924_v39 = vadd.f32 %v18157_v25, %v5884_v40  ;;  %v14471_v23 = vld [vmem:[#allocation17 + $0x608] ss:$48 sps:$4 sm:$0xff]  }
0x10de   : > { %v5819_v9 = vpop.xlane.xlu1 %5818  ;;  %v5928_v20 = vadd.f32 %v18153_v51, %v5888_v15  ;;  %v5850_v26 = vmul.f32 %v18165_v42, %v18040_v11  ;;  %v14476_v15 = vld [vmem:[#allocation17 + $0x664] ss:$48 sps:$4 sm:$0xff]  }
0x10df   : > { %v5927_v14 = vadd.f32 %v18157_v25, %v5887_v56  ;;  %v5834_v30 = vadd.f32 1e-05, %v5826_v13  ;;  %v5827_v34 = vmul.f32 0.0026041667, %v5819_v9  ;;  %v5891_v40 = vmul.f32 %v18137_v24, %v5851_v60 }
0x10e0   : > { %v18177_v53 = vpop.eup %15402  ;;  %v18179_v37 = vpack.c.bf16 %v5928_v20, %v5925_v58  ;;  %v5890_v13 = vmul.f32 %v18143_v50, %v5850_v26  ;;  %v14477_v58 = vld [vmem:[#allocation17 + $0x668] ss:$48 sps:$4 sm:$0xff]   ;;  %v14482_v26 = vld [vmem:[#allocation17 + $0x6c4] ss:$48 sps:$4 sm:$0xff]  }
0x10e1   : > { %v18181_v33 = vpack.c.bf16 %v5927_v14, %v5924_v39  ;;  %15408 = vrsqrt.f32 %v5834_v30  ;;  %v5835_v46 = vadd.f32 1e-05, %v5827_v34  ;;  %v5854_v56 = vmul.f32 %v18177_v53, %v18058_v55  ;;  %v14474_v55 = vld [vmem:[#allocation17 + $0x660] ss:$48 sps:$4 sm:$0xff]   ;;  %v14485_v34 = vld [vmem:[#allocation17 + $0x6cc] ss:$48 sps:$4 sm:$0xff]  }
0x10e2   : > { %7784 = vmatprep.mubr.bf16.mxu1 %v18179_v37  ;;  %7930 = vmatprep.mubr.bf16.mxu0 %v18179_v37  ;;  %v5853_v20 = vmul.f32 %v18177_v53, %v18055_v44  ;;  %v5931_v9 = vadd.f32 %v18153_v51, %v5891_v40  ;;  %v14480_v40 = vld [vmem:[#allocation17 + $0x6c0] ss:$48 sps:$4 sm:$0xff]  }
0x10e3   : > { %15410 = vrsqrt.f32 %v5835_v46  ;;  %7785 = vmatmul.mubr.bf16.vlgmr.msra.gmra.mrb[104].mxu1 %v18181_v33  ;;  %7931 = vmatmul.mubr.bf16.vlgmr.msra.gmra.mrb[136].mxu0 %v18181_v33  ;;  %v5894_v30 = vmul.f32 %v18137_v24, %v5854_v56 }
0x10e4   : > { %v18191_v11 = vpop.eup %15404  ;;  %7826 = vmatpush1.bf16.msra.mxu1 %v14468_v49  ;;  %7972 = vmatpush1.bf16.msra.mxu0 %v14471_v23  ;;  %v5893_v60 = vmul.f32 %v18143_v50, %v5853_v20  ;;  %v5930_v49 = vadd.f32 %v18157_v25, %v5890_v13  ;;  %v14483_v20 = vld [vmem:[#allocation17 + $0x6c8] ss:$48 sps:$4 sm:$0xff]  }
0x10e5   : > { %v5857_v44 = vmul.f32 %v18191_v11, %v18073_v6  ;;  %7827 = vmatprep.subr.bf16.mxu1 %v14476_v15  ;;  %7973 = vmatprep.subr.bf16.mxu0 %v14479_v62  ;;  %v5934_v39 = vadd.f32 %v18153_v51, %v5894_v30  ;;  %v5856_v46 = vmul.f32 %v18191_v11, %v18070_v57  ;;  %v14488_v30 = vld [vmem:[#allocation17 + $0x724] ss:$48 sps:$4 sm:$0xff]  }
0x10e6   : > { %v18201_v14 = vpop.eup %15406  ;;  %v5933_v23 = vadd.f32 %v18157_v25, %v5893_v60  ;;  %v14491_v60 = vld [vmem:[#allocation17 + $0x72c] ss:$48 sps:$4 sm:$0xff]  }
0x10e7   : > { %v18207_v56 = vpack.c.bf16 %v5934_v39, %v5931_v9  ;;  %v5860_v62 = vmul.f32 %v18201_v14, %v18088_v22  ;;  %v5897_v6 = vmul.f32 %v18137_v24, %v5857_v44  ;;  %v5859_v15 = vmul.f32 %v18201_v14, %v18085_v5  ;;  %v14486_v9 = vld [vmem:[#allocation17 + $0x720] ss:$48 sps:$4 sm:$0xff]   ;;  %v14489_v39 = vld [vmem:[#allocation17 + $0x728] ss:$48 sps:$4 sm:$0xff]  }
0x10e8   : > { %7828 = vmatpush1.bf16.msra.mxu1 %v14474_v55  ;;  %7974 = vmatpush1.bf16.msra.mxu0 %v14477_v58  ;;  %v18216_v13 = vpack.c.bf16 %v5933_v23, %v5930_v49  ;;  %v5896_v58 = vmul.f32 %v18143_v50, %v5856_v46  ;;  %v14494_v23 = vld [vmem:[#allocation17 + $0x784] ss:$48 sps:$4 sm:$0xff]  }
0x10e9   : > { %7794 = vmatprep.mubr.bf16.mxu1 %v18207_v56  ;;  %7940 = vmatprep.mubr.bf16.mxu0 %v18207_v56  ;;  %v5900_v57 = vmul.f32 %v18137_v24, %v5860_v62  ;;  %v5899_v22 = vmul.f32 %v18143_v50, %v5859_v15  ;;  %v5937_v5 = vadd.f32 %v18153_v51, %v5897_v6  ;;  %v14497_v62 = vld [vmem:[#allocation17 + $0x78c] ss:$48 sps:$4 sm:$0xff]  }
0x10ea   : > { %7829 = vmatprep.subr.bf16.mxu1 %v14482_v26  ;;  %7975 = vmatprep.subr.bf16.mxu0 %v14485_v34 }
0x10eb   : > { %v18220_v44 = vpop.eup %15408  ;;  %7795 = vmatmul.mubr.bf16.gmra.mrb[108].mxu1 %v18216_v13  ;;  %7941 = vmatmul.mubr.bf16.gmra.mrb[140].mxu0 %v18216_v13  ;;  %v5940_v55 = vadd.f32 %v18153_v51, %v5900_v57  ;;  %v5939_v6 = vadd.f32 %v18157_v25, %v5899_v22  ;;  %v14492_v57 = vld [vmem:[#allocation17 + $0x780] ss:$48 sps:$4 sm:$0xff]   ;;  %v14503_v22 = vld [vmem:[#allocation17 + $0x7ec] ss:$48 sps:$4 sm:$0xff]  }
0x10ec   : > { %7830 = vmatpush1.bf16.msra.mxu1 %v14480_v40  ;;  %7976 = vmatpush1.bf16.msra.mxu0 %v14483_v20  ;;  %v5863_v26 = vmul.f32 %v18220_v44, %v18105_v59  ;;  %v5936_v59 = vadd.f32 %v18157_v25, %v5896_v58  ;;  %v5862_v20 = vmul.f32 %v18220_v44, %v18102_v45 }
0x10ed   : > { %v18229_v34 = vpop.eup %15410  ;;  %v18231_v49 = vpack.c.bf16 %v5940_v55, %v5937_v5  ;;  %7831 = vmatprep.subr.bf16.mxu1 %v14488_v30  ;;  %7977 = vmatprep.subr.bf16.mxu0 %v14491_v60  ;;  %v14495_v30 = vld [vmem:[#allocation17 + $0x788] ss:$48 sps:$4 sm:$0xff]  }
0x10ee   : > { %v5866_v46 = vmul.f32 %v18229_v34, %v18118_v43  ;;  %v5903_v15 = vmul.f32 %v18137_v24, %v5863_v26  ;;  %v5865_v40 = vmul.f32 %v18229_v34, %v18115_v12  ;;  %v18245_v60 = vpack.c.bf16 %v5939_v6, %v5936_v59  ;;  %v14500_v12 = vld [vmem:[#allocation17 + $0x7e4] ss:$48 sps:$4 sm:$0xff]   ;;  %v14515_v59 = vld [vmem:[#allocation17 + $0x8ac] ss:$48 sps:$4 sm:$0xff]  }
0x10ef   : > { %7804 = vmatprep.mubr.bf16.mxu1 %v18231_v49  ;;  %7950 = vmatprep.mubr.bf16.mxu0 %v18231_v49  ;;  %v5902_v45 = vmul.f32 %v18143_v50, %v5862_v20  ;;  %v14506_v26 = vld [vmem:[#allocation17 + $0x844] ss:$48 sps:$4 sm:$0xff]   ;;  %v5846_v6 = vmul.f32 %v18139_v31, %v18018_v41  ;;  %v14510_v31 = vld [vmem:[#allocation17 + $0x8a0] ss:$48 sps:$4 sm:$0xff]  }
0x10f0   : > { %7832 = vmatpush1.bf16.msra.mxu1 %v14486_v9  ;;  %7978 = vmatpush1.bf16.msra.mxu0 %v14489_v39  ;;  %v5906_v43 = vmul.f32 %v18137_v24, %v5866_v46  ;;  %v5905_v5 = vmul.f32 %v18143_v50, %v5865_v40  ;;  %v5943_v55 = vadd.f32 %v18153_v51, %v5903_v15  ;;  %v14498_v9 = vld [vmem:[#allocation17 + $0x7e0] ss:$48 sps:$4 sm:$0xff]   ;;  %v14501_v39 = vld [vmem:[#allocation17 + $0x7e8] ss:$48 sps:$4 sm:$0xff]  }
0x10f1   : > { %7833 = vmatprep.subr.bf16.mxu1 %v14494_v23  ;;  %7979 = vmatprep.subr.bf16.mxu0 %v14497_v62  ;;  %v14509_v23 = vld [vmem:[#allocation17 + $0x84c] ss:$48 sps:$4 sm:$0xff]   ;;  %v5942_v50 = vadd.f32 %v18157_v25, %v5902_v45  ;;  %v18265_v46 = vrot.slane %v18131_v52, %v19076_v21  ;;  %v14504_v15 = vld [vmem:[#allocation17 + $0x840] ss:$48 sps:$4 sm:$0xff]   ;;  %v14507_v40 = vld [vmem:[#allocation17 + $0x848] ss:$48 sps:$4 sm:$0xff]   ;;  %v18275_v52 = vrot.slane %v18133_v4, %v19076_v21 }
0x10f2   : > { %v5946_v58 = vadd.f32 %v18153_v51, %v5906_v43  ;;  %v5945_v62 = vadd.f32 %v18157_v25, %v5905_v5  ;;  %v5849_v51 = vmul.f32 %v18149_v8, %v18031_v38  ;;  %v14512_v8 = vld [vmem:[#allocation17 + $0x8a4] ss:$48 sps:$4 sm:$0xff]   ;;  %v14513_v25 = vld [vmem:[#allocation17 + $0x8a8] ss:$48 sps:$4 sm:$0xff]   ;;  %v14516_v5 = vld [vmem:[#allocation17 + $0x10] ss:$48 sps:$4 sm:$0xff]  }
0x10f3   : > { %7805 = vmatmul.mubr.bf16.gmra.mrb[112].mxu1 %v18245_v60  ;;  %7951 = vmatmul.mubr.bf16.gmra.mrb[144].mxu0 %v18245_v60  ;;  %v5886_v41 = vmul.f32 %v18265_v46, %v5846_v6  ;;  %v14524_v45 = vld [vmem:[#allocation17 + $0x74] ss:$48 sps:$4 sm:$0xff]   ;;  %v14528_v6 = vld [vmem:[#allocation17 + $0xd0] ss:$48 sps:$4 sm:$0xff]  }
0x10f4   : > { %7834 = vmatpush1.bf16.msra.mxu1 %v14492_v57  ;;  %7980 = vmatpush1.bf16.msra.mxu0 %v14495_v30  ;;  %v18253_v24 = vpack.c.bf16 %v5946_v58, %v5943_v55  ;;  %v18267_v38 = vpack.c.bf16 %v5945_v62, %v5942_v50  ;;  %v5889_v20 = vmul.f32 %v18265_v46, %v5849_v51  ;;  %v14518_v57 = vld [vmem:[#allocation17 + $0x14] ss:$48 sps:$4 sm:$0xff]   ;;  %v14521_v30 = vld [vmem:[#allocation17 + $0x1c] ss:$48 sps:$4 sm:$0xff]   ;;  %v14519_v55 = vld [vmem:[#allocation17 + $0x18] ss:$48 sps:$4 sm:$0xff]  }
0x10f5   : > { %7835 = vmatprep.subr.bf16.mxu1 %v14500_v12  ;;  %7981 = vmatprep.subr.bf16.mxu0 %v14503_v22  ;;  %v5855_v12 = vmul.f32 %v18177_v53, %v18061_v2  ;;  %v5926_v4 = vadd.f32 %v18275_v52, %v5886_v41  ;;  %v5852_v22 = vmul.f32 %v18165_v42, %v18046_v1  ;;  %v14522_v1 = vld [vmem:[#allocation17 + $0x70] ss:$48 sps:$4 sm:$0xff]   ;;  %v14525_v42 = vld [vmem:[#allocation17 + $0x78] ss:$48 sps:$4 sm:$0xff]   ;;  %v14545_v41 = vld [vmem:[#allocation17 + $0x19c] ss:$48 sps:$4 sm:$0xff]  }
0x10f6   : > { %7814 = vmatprep.mubr.bf16.mxu1 %v18253_v24  ;;  %7960 = vmatprep.mubr.bf16.mxu0 %v18253_v24  ;;  %v5929_v43 = vadd.f32 %v18275_v52, %v5889_v20  ;;  %v5861_v62 = vmul.f32 %v18201_v14, %v18091_v16  ;;  %v5858_v50 = vmul.f32 %v18191_v11, %v18076_v19  ;;  %v14534_v19 = vld [vmem:[#allocation17 + $0x130] ss:$48 sps:$4 sm:$0xff]   ;;  %v14537_v11 = vld [vmem:[#allocation17 + $0x138] ss:$48 sps:$4 sm:$0xff]   ;;  %v14542_v20 = vld [vmem:[#allocation17 + $0x194] ss:$48 sps:$4 sm:$0xff]  }
0x10f7   : > { %v5895_v53 = vmul.f32 %v18265_v46, %v5855_v12  ;;  %v5892_v2 = vmul.f32 %v18265_v46, %v5852_v22  ;;  %v14543_v12 = vld [vmem:[#allocation17 + $0x198] ss:$48 sps:$4 sm:$0xff]   ;;  %v14548_v22 = vld [vmem:[#allocation17 + $0x1f4] ss:$48 sps:$4 sm:$0xff]  }
0x10f8   : > { %7836 = vmatpush1.bf16.msra.mxu1 %v14498_v9  ;;  %7982 = vmatpush1.bf16.msra.mxu0 %v14501_v39  ;;  %v18285_v58 = vpack.c.bf16 %v5929_v43, %v5926_v4  ;;  %v14527_v9 = vld [vmem:[#allocation17 + $0x7c] ss:$48 sps:$4 sm:$0xff]   ;;  %v14530_v39 = vld [vmem:[#allocation17 + $0xd4] ss:$48 sps:$4 sm:$0xff]   ;;  %v5901_v16 = vmul.f32 %v18265_v46, %v5861_v62  ;;  %v5898_v14 = vmul.f32 %v18265_v46, %v5858_v50  ;;  %v14540_v43 = vld [vmem:[#allocation17 + $0x190] ss:$48 sps:$4 sm:$0xff]  }
0x10f9   : > { %7837 = vmatprep.subr.bf16.mxu1 %v14506_v26  ;;  %7983 = vmatprep.subr.bf16.mxu0 %v14509_v23  ;;  %v14533_v26 = vld [vmem:[#allocation17 + $0xdc] ss:$48 sps:$4 sm:$0xff]   ;;  %v5935_v23 = vadd.f32 %v18275_v52, %v5895_v53  ;;  %v5932_v51 = vadd.f32 %v18275_v52, %v5892_v2  ;;  %v14552_v2 = vld [vmem:[#allocation17 + $0x250] ss:$48 sps:$4 sm:$0xff]   ;;  %v14567_v50 = vld [vmem:[#allocation17 + $0x318] ss:$48 sps:$4 sm:$0xff]  }
0x10fa   : > { %v14569_v62 = vld [vmem:[#allocation17 + $0x31c] ss:$48 sps:$4 sm:$0xff]  }
0x10fb   : > { %7815 = vmatmul.mubr.bf16.gmra.mrb[116].mxu1 %v18267_v38  ;;  %7961 = vmatmul.mubr.bf16.gmra.mrb[148].mxu0 %v18267_v38 }
0x10fc   : > { %7838 = vmatpush1.bf16.msra.mxu1 %v14504_v15  ;;  %7984 = vmatpush1.bf16.msra.mxu0 %v14507_v40  ;;  %v14531_v15 = vld [vmem:[#allocation17 + $0xd8] ss:$48 sps:$4 sm:$0xff]   ;;  %v18299_v40 = vpack.c.bf16 %v5935_v23, %v5932_v51  ;;  %v14564_v51 = vld [vmem:[#allocation17 + $0x310] ss:$48 sps:$4 sm:$0xff]  }
0x10fd   : > { %7839 = vmatprep.subr.bf16.mxu1 %v14512_v8  ;;  %7985 = vmatprep.subr.bf16.mxu0 %v14515_v59  ;;  %v14536_v8 = vld [vmem:[#allocation17 + $0x134] ss:$48 sps:$4 sm:$0xff]   ;;  %v14539_v59 = vld [vmem:[#allocation17 + $0x13c] ss:$48 sps:$4 sm:$0xff]   ;;  %v14561_v23 = vld [vmem:[#allocation17 + $0x2b8] ss:$48 sps:$4 sm:$0xff]  }
0x10fe   : > { %7857 = vmatprep.mubr.bf16.mxu1 %v19073_v28  ;;  %8003 = vmatprep.mubr.bf16.mxu0 %v19073_v28 }
0x1100   : > { %7840 = vmatpush1.bf16.msra.mxu1 %v14510_v31  ;;  %7986 = vmatpush1.bf16.msra.mxu0 %v14513_v25  ;;  %v5941_v31 = vadd.f32 %v18275_v52, %v5901_v16  ;;  %v5867_v25 = vmul.f32 %v18229_v34, %v18121_v61  ;;  %v14578_v16 = vld [vmem:[#allocation17 + $0x3d4] ss:$48 sps:$4 sm:$0xff]  }
0x1101   : > { %8044 = vmatprep.subr.bf16.mxu1 %v14518_v57  ;;  %8190 = vmatprep.subr.bf16.mxu0 %v14521_v30  ;;  %v5938_v57 = vadd.f32 %v18275_v52, %v5898_v14  ;;  %v5864_v30 = vmul.f32 %v18220_v44, %v18108_v48  ;;  %v14546_v48 = vld [vmem:[#allocation17 + $0x1f0] ss:$48 sps:$4 sm:$0xff]   ;;  %v14549_v44 = vld [vmem:[#allocation17 + $0x1f8] ss:$48 sps:$4 sm:$0xff]   ;;  %v14581_v14 = vld [vmem:[#allocation17 + $0x3dc] ss:$48 sps:$4 sm:$0xff]  }
0x1102   : > { %v5907_v61 = vmul.f32 %v18265_v46, %v5867_v25  ;;  %v14585_v25 = vld [vmem:[#allocation17 + $0x438] ss:$48 sps:$4 sm:$0xff]  }
0x1103   : > { %7858 = vmatmul.mubr.bf16.vlgmr.msra.gmra.mrb[104].mxu1 %v18285_v58  ;;  %8004 = vmatmul.mubr.bf16.vlgmr.msra.gmra.mrb[136].mxu0 %v18285_v58  ;;  %v18313_v4 = vpack.c.bf16 %v5941_v31, %v5938_v57  ;;  %v5904_v34 = vmul.f32 %v18265_v46, %v5864_v30  ;;  %v14555_v46 = vld [vmem:[#allocation17 + $0x258] ss:$48 sps:$4 sm:$0xff]   ;;  %v14582_v31 = vld [vmem:[#allocation17 + $0x430] ss:$48 sps:$4 sm:$0xff]   ;;  %v14590_v57 = vld [vmem:[#allocation17 + $0x494] ss:$48 sps:$4 sm:$0xff]  }
0x1104   : > { %8045 = vmatpush1.bf16.msra.mxu1 %v14516_v5  ;;  %8191 = vmatpush1.bf16.msra.mxu0 %v14519_v55  ;;  %v14551_v5 = vld [vmem:[#allocation17 + $0x1fc] ss:$48 sps:$4 sm:$0xff]   ;;  %v14554_v55 = vld [vmem:[#allocation17 + $0x254] ss:$48 sps:$4 sm:$0xff]  }
0x1105   : > { %8046 = vmatprep.subr.bf16.mxu1 %v14524_v45  ;;  %8192 = vmatprep.subr.bf16.mxu0 %v14527_v9  ;;  %v14557_v45 = vld [vmem:[#allocation17 + $0x25c] ss:$48 sps:$4 sm:$0xff]   ;;  %v5947_v9 = vadd.f32 %v18275_v52, %v5907_v61  ;;  %v5944_v53 = vadd.f32 %v18275_v52, %v5904_v34  ;;  %v14566_v52 = vld [vmem:[#allocation17 + $0x314] ss:$48 sps:$4 sm:$0xff]   ;;  %v14594_v61 = vld [vmem:[#allocation17 + $0x4f0] ss:$48 sps:$4 sm:$0xff]  }
0x1106   : > { %7867 = vmatprep.mubr.bf16.mxu1 %v19073_v28  ;;  %8013 = vmatprep.mubr.bf16.mxu0 %v19073_v28  ;;  %v14593_v30 = vld [vmem:[#allocation17 + $0x49c] ss:$48 sps:$4 sm:$0xff]   ;;  %v14597_v34 = vld [vmem:[#allocation17 + $0x4f8] ss:$48 sps:$4 sm:$0xff]  }
0x1108   : > { %8047 = vmatpush1.bf16.msra.mxu1 %v14522_v1  ;;  %8193 = vmatpush1.bf16.msra.mxu0 %v14525_v42  ;;  %v18323_v1 = vpack.c.bf16 %v5947_v9, %v5944_v53  ;;  %v14560_v42 = vld [vmem:[#allocation17 + $0x2b4] ss:$48 sps:$4 sm:$0xff]   ;;  %v14611_v53 = vld [vmem:[#allocation17 + $0x5bc] ss:$48 sps:$4 sm:$0xff]  }
0x1109   : > { %8048 = vmatprep.subr.bf16.mxu1 %v14530_v39  ;;  %8194 = vmatprep.subr.bf16.mxu0 %v14533_v26  ;;  %v14563_v39 = vld [vmem:[#allocation17 + $0x2bc] ss:$48 sps:$4 sm:$0xff]   ;;  %v14558_v26 = vld [vmem:[#allocation17 + $0x2b0] ss:$48 sps:$4 sm:$0xff]   ;;  %v14608_v9 = vld [vmem:[#allocation17 + $0x5b4] ss:$48 sps:$4 sm:$0xff]  }
0x110b   : > { %7868 = vmatmul.mubr.bf16.gmra.mrb[108].mxu1 %v18299_v40  ;;  %8014 = vmatmul.mubr.bf16.gmra.mrb[140].mxu0 %v18299_v40 }
0x110c   : > { %8049 = vmatpush1.bf16.msra.mxu1 %v14528_v6  ;;  %8195 = vmatpush1.bf16.msra.mxu0 %v14531_v15  ;;  %v14572_v6 = vld [vmem:[#allocation17 + $0x374] ss:$48 sps:$4 sm:$0xff]   ;;  %v14575_v15 = vld [vmem:[#allocation17 + $0x37c] ss:$48 sps:$4 sm:$0xff]  }
0x110d   : > { %8050 = vmatprep.subr.bf16.mxu1 %v14536_v8  ;;  %8196 = vmatprep.subr.bf16.mxu0 %v14539_v59  ;;  %v14570_v8 = vld [vmem:[#allocation17 + $0x370] ss:$48 sps:$4 sm:$0xff]   ;;  %v14573_v59 = vld [vmem:[#allocation17 + $0x378] ss:$48 sps:$4 sm:$0xff]  }
0x110e   : > { %7877 = vmatprep.mubr.bf16.mxu1 %v19073_v28  ;;  %8023 = vmatprep.mubr.bf16.mxu0 %v19073_v28 }
0x1110   : > { %8051 = vmatpush1.bf16.msra.mxu1 %v14534_v19  ;;  %8197 = vmatpush1.bf16.msra.mxu0 %v14537_v11  ;;  %v14576_v19 = vld [vmem:[#allocation17 + $0x3d0] ss:$48 sps:$4 sm:$0xff]   ;;  %v14579_v11 = vld [vmem:[#allocation17 + $0x3d8] ss:$48 sps:$4 sm:$0xff]  }
0x1111   : > { %8052 = vmatprep.subr.bf16.mxu1 %v14542_v20  ;;  %8198 = vmatprep.subr.bf16.mxu0 %v14545_v41  ;;  %v14584_v20 = vld [vmem:[#allocation17 + $0x434] ss:$48 sps:$4 sm:$0xff]   ;;  %v14587_v41 = vld [vmem:[#allocation17 + $0x43c] ss:$48 sps:$4 sm:$0xff]  }
0x1113   : > { %7878 = vmatmul.mubr.bf16.gmra.mrb[112].mxu1 %v18313_v4  ;;  %8024 = vmatmul.mubr.bf16.gmra.mrb[144].mxu0 %v18313_v4 }
0x1114   : > { %8053 = vmatpush1.bf16.msra.mxu1 %v14540_v43  ;;  %8199 = vmatpush1.bf16.msra.mxu0 %v14543_v12  ;;  %v14588_v43 = vld [vmem:[#allocation17 + $0x490] ss:$48 sps:$4 sm:$0xff]   ;;  %v14591_v12 = vld [vmem:[#allocation17 + $0x498] ss:$48 sps:$4 sm:$0xff]  }
0x1115   : > { %8054 = vmatprep.subr.bf16.mxu1 %v14548_v22  ;;  %8200 = vmatprep.subr.bf16.mxu0 %v14551_v5  ;;  %v14596_v22 = vld [vmem:[#allocation17 + $0x4f4] ss:$48 sps:$4 sm:$0xff]   ;;  %v14599_v5 = vld [vmem:[#allocation17 + $0x4fc] ss:$48 sps:$4 sm:$0xff]  }
0x1116   : > { %7887 = vmatprep.mubr.bf16.mxu1 %v19073_v28  ;;  %8033 = vmatprep.mubr.bf16.mxu0 %v19073_v28 }
0x1118   : > { %8055 = vmatpush1.bf16.msra.mxu1 %v14546_v48  ;;  %8201 = vmatpush1.bf16.msra.mxu0 %v14549_v44  ;;  %v14602_v48 = vld [vmem:[#allocation17 + $0x554] ss:$48 sps:$4 sm:$0xff]   ;;  %v14605_v44 = vld [vmem:[#allocation17 + $0x55c] ss:$48 sps:$4 sm:$0xff]  }
0x1119   : > { %8056 = vmatprep.subr.bf16.mxu1 %v14554_v55  ;;  %8202 = vmatprep.subr.bf16.mxu0 %v14557_v45  ;;  %v14600_v55 = vld [vmem:[#allocation17 + $0x550] ss:$48 sps:$4 sm:$0xff]   ;;  %v14603_v45 = vld [vmem:[#allocation17 + $0x558] ss:$48 sps:$4 sm:$0xff]  }
0x111b   : > { %7888 = vmatmul.mubr.bf16.gmra.mrb[116].mxu1 %v18323_v1  ;;  %8034 = vmatmul.mubr.bf16.gmra.mrb[148].mxu0 %v18323_v1 }
0x111c   : > { %8057 = vmatpush1.bf16.msra.mxu1 %v14552_v2  ;;  %8203 = vmatpush1.bf16.msra.mxu0 %v14555_v46  ;;  %v14606_v2 = vld [vmem:[#allocation17 + $0x5b0] ss:$48 sps:$4 sm:$0xff]   ;;  %v14609_v46 = vld [vmem:[#allocation17 + $0x5b8] ss:$48 sps:$4 sm:$0xff]  }
0x111d   : > { %8076 = vmatprep.mubr.bf16.mxu1 %v18179_v37  ;;  %8222 = vmatprep.mubr.bf16.mxu0 %v18179_v37 }
0x111e   : > { %8058 = vmatprep.subr.bf16.mxu1 %v14560_v42  ;;  %8204 = vmatprep.subr.bf16.mxu0 %v14563_v39  ;;  %v14614_v42 = vld [vmem:[#allocation17 + $0x614] ss:$48 sps:$4 sm:$0xff]   ;;  %v14617_v39 = vld [vmem:[#allocation17 + $0x61c] ss:$48 sps:$4 sm:$0xff]  }
0x1120   : > { %8059 = vmatpush1.bf16.msra.mxu1 %v14558_v26  ;;  %8205 = vmatpush1.bf16.msra.mxu0 %v14561_v23  ;;  %v14612_v26 = vld [vmem:[#allocation17 + $0x610] ss:$48 sps:$4 sm:$0xff]   ;;  %v14615_v23 = vld [vmem:[#allocation17 + $0x618] ss:$48 sps:$4 sm:$0xff]  }
0x1121   : > { %8060 = vmatprep.subr.bf16.mxu1 %v14566_v52  ;;  %8206 = vmatprep.subr.bf16.mxu0 %v14569_v62  ;;  %v14620_v52 = vld [vmem:[#allocation17 + $0x674] ss:$48 sps:$4 sm:$0xff]   ;;  %v14623_v62 = vld [vmem:[#allocation17 + $0x67c] ss:$48 sps:$4 sm:$0xff]  }
0x1124   : > { %8061 = vmatpush1.bf16.msra.mxu1 %v14564_v51  ;;  %8207 = vmatpush1.bf16.msra.mxu0 %v14567_v50  ;;  %v14618_v51 = vld [vmem:[#allocation17 + $0x670] ss:$48 sps:$4 sm:$0xff]   ;;  %v14621_v50 = vld [vmem:[#allocation17 + $0x678] ss:$48 sps:$4 sm:$0xff]  }
0x1125   : > { %8062 = vmatprep.subr.bf16.mxu1 %v14572_v6  ;;  %8208 = vmatprep.subr.bf16.mxu0 %v14575_v15  ;;  %v14626_v6 = vld [vmem:[#allocation17 + $0x6d4] ss:$48 sps:$4 sm:$0xff]   ;;  %v14629_v15 = vld [vmem:[#allocation17 + $0x6dc] ss:$48 sps:$4 sm:$0xff]  }
0x1128   : > { %8063 = vmatpush1.bf16.msra.mxu1 %v14570_v8  ;;  %8209 = vmatpush1.bf16.msra.mxu0 %v14573_v59  ;;  %v14624_v8 = vld [vmem:[#allocation17 + $0x6d0] ss:$48 sps:$4 sm:$0xff]   ;;  %v14627_v59 = vld [vmem:[#allocation17 + $0x6d8] ss:$48 sps:$4 sm:$0xff]  }
0x1129   : > { %8064 = vmatprep.subr.bf16.mxu1 %v14578_v16  ;;  %8210 = vmatprep.subr.bf16.mxu0 %v14581_v14  ;;  %v14632_v16 = vld [vmem:[#allocation17 + $0x734] ss:$48 sps:$4 sm:$0xff]   ;;  %v14635_v14 = vld [vmem:[#allocation17 + $0x73c] ss:$48 sps:$4 sm:$0xff]  }
0x112c   : > { %8065 = vmatpush1.bf16.msra.mxu1 %v14576_v19  ;;  %8211 = vmatpush1.bf16.msra.mxu0 %v14579_v11  ;;  %v14630_v19 = vld [vmem:[#allocation17 + $0x730] ss:$48 sps:$4 sm:$0xff]   ;;  %v14633_v11 = vld [vmem:[#allocation17 + $0x738] ss:$48 sps:$4 sm:$0xff]  }
0x112d   : > { %8066 = vmatprep.subr.bf16.mxu1 %v14584_v20  ;;  %8212 = vmatprep.subr.bf16.mxu0 %v14587_v41  ;;  %v14638_v20 = vld [vmem:[#allocation17 + $0x794] ss:$48 sps:$4 sm:$0xff]   ;;  %v14641_v41 = vld [vmem:[#allocation17 + $0x79c] ss:$48 sps:$4 sm:$0xff]  }
0x1130   : > { %8067 = vmatpush1.bf16.msra.mxu1 %v14582_v31  ;;  %8213 = vmatpush1.bf16.msra.mxu0 %v14585_v25  ;;  %v14636_v31 = vld [vmem:[#allocation17 + $0x790] ss:$48 sps:$4 sm:$0xff]   ;;  %v14639_v25 = vld [vmem:[#allocation17 + $0x798] ss:$48 sps:$4 sm:$0xff]  }
0x1131   : > { %8068 = vmatprep.subr.bf16.mxu1 %v14590_v57  ;;  %8214 = vmatprep.subr.bf16.mxu0 %v14593_v30  ;;  %v14644_v57 = vld [vmem:[#allocation17 + $0x7f4] ss:$48 sps:$4 sm:$0xff]   ;;  %v14647_v30 = vld [vmem:[#allocation17 + $0x7fc] ss:$48 sps:$4 sm:$0xff]  }
0x1134   : > { %8069 = vmatpush1.bf16.msra.mxu1 %v14588_v43  ;;  %8215 = vmatpush1.bf16.msra.mxu0 %v14591_v12  ;;  %v14642_v43 = vld [vmem:[#allocation17 + $0x7f0] ss:$48 sps:$4 sm:$0xff]   ;;  %v14645_v12 = vld [vmem:[#allocation17 + $0x7f8] ss:$48 sps:$4 sm:$0xff]  }
0x1135   : > { %8070 = vmatprep.subr.bf16.mxu1 %v14596_v22  ;;  %8216 = vmatprep.subr.bf16.mxu0 %v14599_v5  ;;  %v14650_v22 = vld [vmem:[#allocation17 + $0x854] ss:$48 sps:$4 sm:$0xff]   ;;  %v14653_v5 = vld [vmem:[#allocation17 + $0x85c] ss:$48 sps:$4 sm:$0xff]  }
0x1138   : > { %8071 = vmatpush1.bf16.msra.mxu1 %v14594_v61  ;;  %8217 = vmatpush1.bf16.msra.mxu0 %v14597_v34  ;;  %v14648_v61 = vld [vmem:[#allocation17 + $0x850] ss:$48 sps:$4 sm:$0xff]   ;;  %v14651_v34 = vld [vmem:[#allocation17 + $0x858] ss:$48 sps:$4 sm:$0xff]  }
0x1139   : > { %8072 = vmatprep.subr.bf16.mxu1 %v14602_v48  ;;  %8218 = vmatprep.subr.bf16.mxu0 %v14605_v44  ;;  %v14656_v48 = vld [vmem:[#allocation17 + $0x8b4] ss:$48 sps:$4 sm:$0xff]   ;;  %v14659_v44 = vld [vmem:[#allocation17 + $0x8bc] ss:$48 sps:$4 sm:$0xff]  }
0x113c   : > { %8073 = vmatpush1.bf16.msra.mxu1 %v14600_v55  ;;  %8219 = vmatpush1.bf16.msra.mxu0 %v14603_v45  ;;  %v14654_v55 = vld [vmem:[#allocation17 + $0x8b0] ss:$48 sps:$4 sm:$0xff]   ;;  %v14657_v45 = vld [vmem:[#allocation17 + $0x8b8] ss:$48 sps:$4 sm:$0xff]  }
0x113d   : > { %8074 = vmatprep.subr.bf16.mxu1 %v14608_v9  ;;  %8220 = vmatprep.subr.bf16.mxu0 %v14611_v53  ;;  %v14662_v9 = vld [vmem:[#allocation17 + $0x24] ss:$48 sps:$4 sm:$0xff]   ;;  %v14665_v53 = vld [vmem:[#allocation17 + $0x2c] ss:$48 sps:$4 sm:$0xff]  }
0x1140   : > { %8075 = vmatpush1.bf16.msra.mxu1 %v14606_v2  ;;  %8221 = vmatpush1.bf16.msra.mxu0 %v14609_v46  ;;  %v14660_v2 = vld [vmem:[#allocation17 + $0x20] ss:$48 sps:$4 sm:$0xff]   ;;  %v14663_v46 = vld [vmem:[#allocation17 + $0x28] ss:$48 sps:$4 sm:$0xff]  }
0x1141   : > { %8117 = vmatprep.subr.bf16.mxu1 %v14614_v42  ;;  %8263 = vmatprep.subr.bf16.mxu0 %v14617_v39  ;;  %v14668_v42 = vld [vmem:[#allocation17 + $0x84] ss:$48 sps:$4 sm:$0xff]   ;;  %v14671_v39 = vld [vmem:[#allocation17 + $0x8c] ss:$48 sps:$4 sm:$0xff]  }
0x1143   : > { %8077 = vmatmul.mubr.bf16.vlgmr.msra.gmra.mrb[120].mxu1 %v18181_v33  ;;  %8223 = vmatmul.mubr.bf16.vlgmr.msra.gmra.mrb[152].mxu0 %v18181_v33 }
0x1144   : > { %8086 = vmatprep.mubr.bf16.mxu1 %v18207_v56  ;;  %8118 = vmatpush1.bf16.msra.mxu1 %v14612_v26  ;;  %v14666_v26 = vld [vmem:[#allocation17 + $0x80] ss:$48 sps:$4 sm:$0xff]  }
0x1145   : > { %8232 = vmatprep.mubr.bf16.mxu0 %v18207_v56  ;;  %8264 = vmatpush1.bf16.msra.mxu0 %v14615_v23  ;;  %v14669_v23 = vld [vmem:[#allocation17 + $0x88] ss:$48 sps:$4 sm:$0xff]  }
0x1146   : > { %8119 = vmatprep.subr.bf16.mxu1 %v14620_v52  ;;  %8265 = vmatprep.subr.bf16.mxu0 %v14623_v62  ;;  %v14674_v52 = vld [vmem:[#allocation17 + $0xe4] ss:$48 sps:$4 sm:$0xff]   ;;  %v14677_v62 = vld [vmem:[#allocation17 + $0xec] ss:$48 sps:$4 sm:$0xff]  }
0x1148   : > { %8120 = vmatpush1.bf16.msra.mxu1 %v14618_v51  ;;  %v14672_v51 = vld [vmem:[#allocation17 + $0xe0] ss:$48 sps:$4 sm:$0xff]  }
0x1149   : > { %8266 = vmatpush1.bf16.msra.mxu0 %v14621_v50  ;;  %8121 = vmatprep.subr.bf16.mxu1 %v14626_v6  ;;  %v14675_v50 = vld [vmem:[#allocation17 + $0xe8] ss:$48 sps:$4 sm:$0xff]   ;;  %v14680_v6 = vld [vmem:[#allocation17 + $0x144] ss:$48 sps:$4 sm:$0xff]  }
0x114a   : > { %8267 = vmatprep.subr.bf16.mxu0 %v14629_v15  ;;  %v14683_v15 = vld [vmem:[#allocation17 + $0x14c] ss:$48 sps:$4 sm:$0xff]  }
0x114b   : > { %8087 = vmatmul.mubr.bf16.gmra.mrb[124].mxu1 %v18216_v13  ;;  %8233 = vmatmul.mubr.bf16.gmra.mrb[156].mxu0 %v18216_v13 }
0x114c   : > { %8096 = vmatprep.mubr.bf16.mxu1 %v18231_v49  ;;  %8122 = vmatpush1.bf16.msra.mxu1 %v14624_v8  ;;  %v14678_v8 = vld [vmem:[#allocation17 + $0x140] ss:$48 sps:$4 sm:$0xff]  }
0x114d   : > { %8242 = vmatprep.mubr.bf16.mxu0 %v18231_v49  ;;  %8268 = vmatpush1.bf16.msra.mxu0 %v14627_v59  ;;  %v14681_v59 = vld [vmem:[#allocation17 + $0x148] ss:$48 sps:$4 sm:$0xff]  }
0x114e   : > { %8123 = vmatprep.subr.bf16.mxu1 %v14632_v16  ;;  %8269 = vmatprep.subr.bf16.mxu0 %v14635_v14  ;;  %v14686_v16 = vld [vmem:[#allocation17 + $0x1a4] ss:$48 sps:$4 sm:$0xff]   ;;  %v14689_v14 = vld [vmem:[#allocation17 + $0x1ac] ss:$48 sps:$4 sm:$0xff]  }
0x1150   : > { %8124 = vmatpush1.bf16.msra.mxu1 %v14630_v19  ;;  %v14684_v19 = vld [vmem:[#allocation17 + $0x1a0] ss:$48 sps:$4 sm:$0xff]  }
0x1151   : > { %8270 = vmatpush1.bf16.msra.mxu0 %v14633_v11  ;;  %8125 = vmatprep.subr.bf16.mxu1 %v14638_v20  ;;  %v14687_v11 = vld [vmem:[#allocation17 + $0x1a8] ss:$48 sps:$4 sm:$0xff]   ;;  %v14692_v20 = vld [vmem:[#allocation17 + $0x204] ss:$48 sps:$4 sm:$0xff]  }
0x1152   : > { %8271 = vmatprep.subr.bf16.mxu0 %v14641_v41  ;;  %v14695_v41 = vld [vmem:[#allocation17 + $0x20c] ss:$48 sps:$4 sm:$0xff]  }
0x1153   : > { %8097 = vmatmul.mubr.bf16.gmra.mrb[128].mxu1 %v18245_v60  ;;  %8243 = vmatmul.mubr.bf16.gmra.mrb[160].mxu0 %v18245_v60 }
0x1154   : > { %8106 = vmatprep.mubr.bf16.mxu1 %v18253_v24  ;;  %8126 = vmatpush1.bf16.msra.mxu1 %v14636_v31  ;;  %v14690_v31 = vld [vmem:[#allocation17 + $0x200] ss:$48 sps:$4 sm:$0xff]  }
0x1155   : > { %8252 = vmatprep.mubr.bf16.mxu0 %v18253_v24  ;;  %8272 = vmatpush1.bf16.msra.mxu0 %v14639_v25  ;;  %v14693_v25 = vld [vmem:[#allocation17 + $0x208] ss:$48 sps:$4 sm:$0xff]  }
0x1156   : > { %8127 = vmatprep.subr.bf16.mxu1 %v14644_v57  ;;  %8273 = vmatprep.subr.bf16.mxu0 %v14647_v30  ;;  %v14698_v57 = vld [vmem:[#allocation17 + $0x264] ss:$48 sps:$4 sm:$0xff]   ;;  %v14701_v30 = vld [vmem:[#allocation17 + $0x26c] ss:$48 sps:$4 sm:$0xff]  }
0x1158   : > { %8128 = vmatpush1.bf16.msra.mxu1 %v14642_v43  ;;  %v14696_v43 = vld [vmem:[#allocation17 + $0x260] ss:$48 sps:$4 sm:$0xff]  }
0x1159   : > { %8274 = vmatpush1.bf16.msra.mxu0 %v14645_v12  ;;  %8129 = vmatprep.subr.bf16.mxu1 %v14650_v22  ;;  %v14699_v12 = vld [vmem:[#allocation17 + $0x268] ss:$48 sps:$4 sm:$0xff]   ;;  %v14704_v22 = vld [vmem:[#allocation17 + $0x2c4] ss:$48 sps:$4 sm:$0xff]  }
0x115a   : > { %8275 = vmatprep.subr.bf16.mxu0 %v14653_v5  ;;  %v14707_v5 = vld [vmem:[#allocation17 + $0x2cc] ss:$48 sps:$4 sm:$0xff]  }
0x115b   : > { %8107 = vmatmul.mubr.bf16.gmra.mrb[132].mxu1 %v18267_v38  ;;  %8253 = vmatmul.mubr.bf16.gmra.mrb[164].mxu0 %v18267_v38 }
0x115c   : > { %8130 = vmatpush1.bf16.msra.mxu1 %v14648_v61  ;;  %8149 = vmatprep.mubr.bf16.mxu1 %v19073_v28  ;;  %v14702_v61 = vld [vmem:[#allocation17 + $0x2c0] ss:$48 sps:$4 sm:$0xff]  }
0x115d   : > { %8276 = vmatpush1.bf16.msra.mxu0 %v14651_v34  ;;  %8131 = vmatprep.subr.bf16.mxu1 %v14656_v48  ;;  %v14705_v34 = vld [vmem:[#allocation17 + $0x2c8] ss:$48 sps:$4 sm:$0xff]   ;;  %v14710_v48 = vld [vmem:[#allocation17 + $0x324] ss:$48 sps:$4 sm:$0xff]  }
0x115e   : > { %8277 = vmatprep.subr.bf16.mxu0 %v14659_v44  ;;  %8295 = vmatprep.mubr.bf16.mxu0 %v19073_v28  ;;  %v14713_v44 = vld [vmem:[#allocation17 + $0x32c] ss:$48 sps:$4 sm:$0xff]  }
0x1160   : > { %8132 = vmatpush1.bf16.msra.mxu1 %v14654_v55  ;;  %v14708_v55 = vld [vmem:[#allocation17 + $0x320] ss:$48 sps:$4 sm:$0xff]  }
0x1161   : > { %8278 = vmatpush1.bf16.msra.mxu0 %v14657_v45  ;;  %8336 = vmatprep.subr.bf16.mxu1 %v14662_v9  ;;  %v14711_v45 = vld [vmem:[#allocation17 + $0x328] ss:$48 sps:$4 sm:$0xff]   ;;  %v14716_v9 = vld [vmem:[#allocation17 + $0x384] ss:$48 sps:$4 sm:$0xff]  }
0x1162   : > { %8482 = vmatprep.subr.bf16.mxu0 %v14665_v53  ;;  %v14719_v53 = vld [vmem:[#allocation17 + $0x38c] ss:$48 sps:$4 sm:$0xff]  }
0x1163   : > { %8150 = vmatmul.mubr.bf16.vlgmr.msra.gmra.mrb[120].mxu1 %v18285_v58 }
0x1164   : > { %8296 = vmatmul.mubr.bf16.vlgmr.msra.gmra.mrb[152].mxu0 %v18285_v58  ;;  %8337 = vmatpush1.bf16.msra.mxu1 %v14660_v2  ;;  %v14714_v2 = vld [vmem:[#allocation17 + $0x380] ss:$48 sps:$4 sm:$0xff]  }
0x1165   : > { %8483 = vmatpush1.bf16.msra.mxu0 %v14663_v46  ;;  %8338 = vmatprep.subr.bf16.mxu1 %v14668_v42  ;;  %v14717_v46 = vld [vmem:[#allocation17 + $0x388] ss:$48 sps:$4 sm:$0xff]   ;;  %v14722_v42 = vld [vmem:[#allocation17 + $0x3e4] ss:$48 sps:$4 sm:$0xff]  }
0x1166   : > { %8484 = vmatprep.subr.bf16.mxu0 %v14671_v39  ;;  %8159 = vmatprep.mubr.bf16.mxu1 %v19073_v28  ;;  %v14725_v39 = vld [vmem:[#allocation17 + $0x3ec] ss:$48 sps:$4 sm:$0xff]  }
0x1167   : > { %8305 = vmatprep.mubr.bf16.mxu0 %v19073_v28 }
0x1168   : > { %8339 = vmatpush1.bf16.msra.mxu1 %v14666_v26  ;;  %v14723_v26 = vld [vmem:[#allocation17 + $0x3e8] ss:$48 sps:$4 sm:$0xff]  }
0x1169   : > { %8485 = vmatpush1.bf16.msra.mxu0 %v14669_v23  ;;  %8340 = vmatprep.subr.bf16.mxu1 %v14674_v52  ;;  %v14728_v23 = vld [vmem:[#allocation17 + $0x444] ss:$48 sps:$4 sm:$0xff]   ;;  %v14731_v52 = vld [vmem:[#allocation17 + $0x44c] ss:$48 sps:$4 sm:$0xff]  }
0x116a   : > { %8486 = vmatprep.subr.bf16.mxu0 %v14677_v62  ;;  %v14726_v62 = vld [vmem:[#allocation17 + $0x440] ss:$48 sps:$4 sm:$0xff]  }
0x116b   : > { %8160 = vmatmul.mubr.bf16.gmra.mrb[124].mxu1 %v18299_v40 }
0x116c   : > { %8306 = vmatmul.mubr.bf16.gmra.mrb[156].mxu0 %v18299_v40  ;;  %8341 = vmatpush1.bf16.msra.mxu1 %v14672_v51  ;;  %v14729_v51 = vld [vmem:[#allocation17 + $0x448] ss:$48 sps:$4 sm:$0xff]  }
0x116d   : > { %8487 = vmatpush1.bf16.msra.mxu0 %v14675_v50  ;;  %8342 = vmatprep.subr.bf16.mxu1 %v14680_v6  ;;  %v14734_v50 = vld [vmem:[#allocation17 + $0x4a4] ss:$48 sps:$4 sm:$0xff]   ;;  %v14737_v6 = vld [vmem:[#allocation17 + $0x4ac] ss:$48 sps:$4 sm:$0xff]  }
0x116e   : > { %8488 = vmatprep.subr.bf16.mxu0 %v14683_v15  ;;  %8169 = vmatprep.mubr.bf16.mxu1 %v19073_v28  ;;  %v14732_v15 = vld [vmem:[#allocation17 + $0x4a0] ss:$48 sps:$4 sm:$0xff]  }
0x116f   : > { %8315 = vmatprep.mubr.bf16.mxu0 %v19073_v28 }
0x1170   : > { %8343 = vmatpush1.bf16.msra.mxu1 %v14678_v8  ;;  %v14735_v8 = vld [vmem:[#allocation17 + $0x4a8] ss:$48 sps:$4 sm:$0xff]  }
0x1171   : > { %8489 = vmatpush1.bf16.msra.mxu0 %v14681_v59  ;;  %8344 = vmatprep.subr.bf16.mxu1 %v14686_v16  ;;  %v14740_v59 = vld [vmem:[#allocation17 + $0x504] ss:$48 sps:$4 sm:$0xff]   ;;  %v14743_v16 = vld [vmem:[#allocation17 + $0x50c] ss:$48 sps:$4 sm:$0xff]  }
0x1172   : > { %8490 = vmatprep.subr.bf16.mxu0 %v14689_v14  ;;  %v14738_v14 = vld [vmem:[#allocation17 + $0x500] ss:$48 sps:$4 sm:$0xff]  }
0x1173   : > { %8170 = vmatmul.mubr.bf16.gmra.mrb[128].mxu1 %v18313_v4 }
0x1174   : > { %8316 = vmatmul.mubr.bf16.gmra.mrb[160].mxu0 %v18313_v4  ;;  %8345 = vmatpush1.bf16.msra.mxu1 %v14684_v19  ;;  %v14741_v19 = vld [vmem:[#allocation17 + $0x508] ss:$48 sps:$4 sm:$0xff]  }
0x1175   : > { %8491 = vmatpush1.bf16.msra.mxu0 %v14687_v11  ;;  %8346 = vmatprep.subr.bf16.mxu1 %v14692_v20  ;;  %v14746_v11 = vld [vmem:[#allocation17 + $0x564] ss:$48 sps:$4 sm:$0xff]   ;;  %v14749_v20 = vld [vmem:[#allocation17 + $0x56c] ss:$48 sps:$4 sm:$0xff]  }
0x1176   : > { %8492 = vmatprep.subr.bf16.mxu0 %v14695_v41  ;;  %8179 = vmatprep.mubr.bf16.mxu1 %v19073_v28  ;;  %v14744_v41 = vld [vmem:[#allocation17 + $0x560] ss:$48 sps:$4 sm:$0xff]  }
0x1177   : > { %8325 = vmatprep.mubr.bf16.mxu0 %v19073_v28 }
0x1178   : > { %8347 = vmatpush1.bf16.msra.mxu1 %v14690_v31  ;;  %v14747_v31 = vld [vmem:[#allocation17 + $0x568] ss:$48 sps:$4 sm:$0xff]  }
0x1179   : > { %8493 = vmatpush1.bf16.msra.mxu0 %v14693_v25  ;;  %8348 = vmatprep.subr.bf16.mxu1 %v14698_v57  ;;  %v14752_v25 = vld [vmem:[#allocation17 + $0x5c4] ss:$48 sps:$4 sm:$0xff]   ;;  %v14755_v57 = vld [vmem:[#allocation17 + $0x5cc] ss:$48 sps:$4 sm:$0xff]  }
0x117a   : > { %8494 = vmatprep.subr.bf16.mxu0 %v14701_v30  ;;  %v14750_v30 = vld [vmem:[#allocation17 + $0x5c0] ss:$48 sps:$4 sm:$0xff]  }
0x117b   : > { %8180 = vmatmul.mubr.bf16.gmra.mrb[132].mxu1 %v18323_v1 }
0x117c   : > { %8326 = vmatmul.mubr.bf16.gmra.mrb[164].mxu0 %v18323_v1  ;;  %8349 = vmatpush1.bf16.msra.mxu1 %v14696_v43  ;;  %v14753_v43 = vld [vmem:[#allocation17 + $0x5c8] ss:$48 sps:$4 sm:$0xff]  }
0x117d   : > { %8368 = vmatprep.mubr.bf16.mxu1 %v18179_v37  ;;  %8495 = vmatpush1.bf16.msra.mxu0 %v14699_v12  ;;  %v14758_v12 = vld [vmem:[#allocation17 + $0x624] ss:$48 sps:$4 sm:$0xff]  }
0x117e   : > { %8514 = vmatprep.mubr.bf16.mxu0 %v18179_v37  ;;  %8350 = vmatprep.subr.bf16.mxu1 %v14704_v22  ;;  %v14720_v37 = vld [vmem:[#allocation17 + $0x3e0] ss:$48 sps:$4 sm:$0xff]   ;;  %v14761_v22 = vld [vmem:[#allocation17 + $0x62c] ss:$48 sps:$4 sm:$0xff]  }
0x117f   : > { %8496 = vmatprep.subr.bf16.mxu0 %v14707_v5  ;;  %v14756_v5 = vld [vmem:[#allocation17 + $0x620] ss:$48 sps:$4 sm:$0xff]  }
0x1180   : > { %8351 = vmatpush1.bf16.msra.mxu1 %v14702_v61  ;;  %v14759_v61 = vld [vmem:[#allocation17 + $0x628] ss:$48 sps:$4 sm:$0xff]  }
0x1181   : > { %8497 = vmatpush1.bf16.msra.mxu0 %v14705_v34  ;;  %8352 = vmatprep.subr.bf16.mxu1 %v14710_v48  ;;  %v14764_v34 = vld [vmem:[#allocation17 + $0x684] ss:$48 sps:$4 sm:$0xff]   ;;  %v14767_v48 = vld [vmem:[#allocation17 + $0x68c] ss:$48 sps:$4 sm:$0xff]  }
0x1182   : > { %8498 = vmatprep.subr.bf16.mxu0 %v14713_v44  ;;  %v14762_v44 = vld [vmem:[#allocation17 + $0x680] ss:$48 sps:$4 sm:$0xff]  }
0x1184   : > { %8353 = vmatpush1.bf16.msra.mxu1 %v14708_v55  ;;  %v14765_v55 = vld [vmem:[#allocation17 + $0x688] ss:$48 sps:$4 sm:$0xff]  }
0x1185   : > { %8499 = vmatpush1.bf16.msra.mxu0 %v14711_v45  ;;  %8354 = vmatprep.subr.bf16.mxu1 %v14716_v9  ;;  %v14770_v45 = vld [vmem:[#allocation17 + $0x6e4] ss:$48 sps:$4 sm:$0xff]   ;;  %v14773_v9 = vld [vmem:[#allocation17 + $0x6ec] ss:$48 sps:$4 sm:$0xff]  }
0x1186   : > { %8500 = vmatprep.subr.bf16.mxu0 %v14719_v53  ;;  %v14768_v53 = vld [vmem:[#allocation17 + $0x6e0] ss:$48 sps:$4 sm:$0xff]  }
0x1188   : > { %8355 = vmatpush1.bf16.msra.mxu1 %v14714_v2  ;;  %v14771_v2 = vld [vmem:[#allocation17 + $0x6e8] ss:$48 sps:$4 sm:$0xff]  }
0x1189   : > { %8501 = vmatpush1.bf16.msra.mxu0 %v14717_v46  ;;  %8356 = vmatprep.subr.bf16.mxu1 %v14722_v42  ;;  %v14776_v46 = vld [vmem:[#allocation17 + $0x744] ss:$48 sps:$4 sm:$0xff]   ;;  %v14777_v42 = vld [vmem:[#allocation17 + $0x748] ss:$48 sps:$4 sm:$0xff]  }
0x118a   : > { %8502 = vmatprep.subr.bf16.mxu0 %v14725_v39  ;;  %v14782_v39 = vld [vmem:[#allocation17 + $0x7a4] ss:$48 sps:$4 sm:$0xff]  }
0x118c   : > { %8357 = vmatpush1.bf16.msra.mxu1 %v14720_v37  ;;  %v14785_v37 = vld [vmem:[#allocation17 + $0x7ac] ss:$48 sps:$4 sm:$0xff]  }
0x118d   : > { %8503 = vmatpush1.bf16.msra.mxu0 %v14723_v26  ;;  %8358 = vmatprep.subr.bf16.mxu1 %v14728_v23  ;;  %v14780_v26 = vld [vmem:[#allocation17 + $0x7a0] ss:$48 sps:$4 sm:$0xff]   ;;  %v14783_v23 = vld [vmem:[#allocation17 + $0x7a8] ss:$48 sps:$4 sm:$0xff]  }
0x118e   : > { %8504 = vmatprep.subr.bf16.mxu0 %v14731_v52  ;;  %v14788_v52 = vld [vmem:[#allocation17 + $0x804] ss:$48 sps:$4 sm:$0xff]  }
0x1190   : > { %8359 = vmatpush1.bf16.msra.mxu1 %v14726_v62  ;;  %v14789_v62 = vld [vmem:[#allocation17 + $0x808] ss:$48 sps:$4 sm:$0xff]  }
0x1191   : > { %8505 = vmatpush1.bf16.msra.mxu0 %v14729_v51  ;;  %8360 = vmatprep.subr.bf16.mxu1 %v14734_v50  ;;  %v14794_v51 = vld [vmem:[#allocation17 + $0x864] ss:$48 sps:$4 sm:$0xff]   ;;  %v14797_v50 = vld [vmem:[#allocation17 + $0x86c] ss:$48 sps:$4 sm:$0xff]  }
0x1192   : > { %8506 = vmatprep.subr.bf16.mxu0 %v14737_v6  ;;  %v14792_v6 = vld [vmem:[#allocation17 + $0x860] ss:$48 sps:$4 sm:$0xff]  }
0x1194   : > { %8361 = vmatpush1.bf16.msra.mxu1 %v14732_v15  ;;  %v14795_v15 = vld [vmem:[#allocation17 + $0x868] ss:$48 sps:$4 sm:$0xff]  }
0x1195   : > { %8507 = vmatpush1.bf16.msra.mxu0 %v14735_v8  ;;  %8362 = vmatprep.subr.bf16.mxu1 %v14740_v59  ;;  %v14800_v8 = vld [vmem:[#allocation17 + $0x8c4] ss:$48 sps:$4 sm:$0xff]   ;;  %v14801_v59 = vld [vmem:[#allocation17 + $0x8c8] ss:$48 sps:$4 sm:$0xff]  }
0x1196   : > { %8508 = vmatprep.subr.bf16.mxu0 %v14743_v16  ;;  %v14806_v16 = vld [vmem:[#allocation20 + $0x4] ss:$12 sps:$4 sm:$0xff]  }
0x1198   : > { %8363 = vmatpush1.bf16.msra.mxu1 %v14738_v14  ;;  %v14807_v14 = vld [vmem:[#allocation20 + $0xc8] ss:$12 sps:$4 sm:$0xff]  }
0x1199   : > { %8509 = vmatpush1.bf16.msra.mxu0 %v14741_v19  ;;  %8364 = vmatprep.subr.bf16.mxu1 %v14746_v11  ;;  %v14804_v19 = vld [vmem:[#allocation20] ss:$12 sps:$4 sm:$0xff]   ;;  %v14808_v11 = vld [vmem:[#allocation20 + $0x8] ss:$12 sps:$4 sm:$0xff]  }
0x119a   : > { %8510 = vmatprep.subr.bf16.mxu0 %v14749_v20  ;;  %v14811_v20 = vld [vmem:[#allocation20 + $0x1c] ss:$12 sps:$4 sm:$0xff]  }
0x119c   : > { %8365 = vmatpush1.bf16.msra.mxu1 %v14744_v41  ;;  %v14809_v41 = vld [vmem:[#allocation20 + $0x18] ss:$12 sps:$4 sm:$0xff]  }
0x119d   : > { %8511 = vmatpush1.bf16.msra.mxu0 %v14747_v31  ;;  %8366 = vmatprep.subr.bf16.mxu1 %v14752_v25  ;;  %v14813_v31 = vld [vmem:[#allocation20 + $0x20] ss:$12 sps:$4 sm:$0xff]  }
0x119e   : > { %8512 = vmatprep.subr.bf16.mxu0 %v14755_v57  ;;  %v14816_v25 = vld [vmem:[#allocation20 + $0x34] ss:$12 sps:$4 sm:$0xff]   ;;  %v14817_v57 = vld [vmem:[#allocation20 + $0xf8] ss:$12 sps:$4 sm:$0xff]  }
0x11a0   : > { %8367 = vmatpush1.bf16.msra.mxu1 %v14750_v30  ;;  %v14814_v30 = vld [vmem:[#allocation20 + $0x30] ss:$12 sps:$4 sm:$0xff]  }
0x11a1   : > { %8513 = vmatpush1.bf16.msra.mxu0 %v14753_v43  ;;  %8409 = vmatprep.subr.bf16.mxu1 %v14758_v12  ;;  %v14818_v43 = vld [vmem:[#allocation20 + $0x38] ss:$12 sps:$4 sm:$0xff]  }
0x11a2   : > { %8555 = vmatprep.subr.bf16.mxu0 %v14761_v22  ;;  %v14821_v12 = vld [vmem:[#allocation20 + $0x4c] ss:$12 sps:$4 sm:$0xff]   ;;  %v14819_v22 = vld [vmem:[#allocation20 + $0x48] ss:$12 sps:$4 sm:$0xff]  }
0x11a3   : > { %8369 = vmatmul.mubr.bf16.vlgmr.msra.gmra.mrb[136].mxu1 %v18181_v33 }
0x11a4   : > { %8515 = vmatmul.mubr.bf16.vlgmr.msra.gmra.mrb[168].mxu0 %v18181_v33  ;;  %8378 = vmatprep.mubr.bf16.mxu1 %v18207_v56  ;;  %v14779_v33 = vld [vmem:[#allocation17 + $0x74c] ss:$48 sps:$4 sm:$0xff]  }
0x11a5   : > { %8410 = vmatpush1.bf16.msra.mxu1 %v14756_v5  ;;  %8524 = vmatprep.mubr.bf16.mxu0 %v18207_v56  ;;  %v14774_v56 = vld [vmem:[#allocation17 + $0x740] ss:$48 sps:$4 sm:$0xff]   ;;  %v14823_v5 = vld [vmem:[#allocation20 + $0x50] ss:$12 sps:$4 sm:$0xff]  }
0x11a6   : > { %8556 = vmatpush1.bf16.msra.mxu0 %v14759_v61  ;;  %8411 = vmatprep.subr.bf16.mxu1 %v14764_v34  ;;  %v14826_v61 = vld [vmem:[#allocation20 + $0x64] ss:$12 sps:$4 sm:$0xff]   ;;  %v14827_v34 = vld [vmem:[#allocation20 + $0x128] ss:$12 sps:$4 sm:$0xff]  }
0x11a7   : > { %8557 = vmatprep.subr.bf16.mxu0 %v14767_v48  ;;  %v18385_v48 = vld [vmem:[#allocation18] sm:$0xff] }
0x11a9   : > { %8412 = vmatpush1.bf16.msra.mxu1 %v14762_v44  ;;  %v19089_v44 = vld [vmem:[#allocation33_spill] sm:$0xff] }
0x11aa   : > { %8558 = vmatpush1.bf16.msra.mxu0 %v14765_v55  ;;  %8413 = vmatprep.subr.bf16.mxu1 %v14770_v45  ;;  %v6266_v55 = vsub.s32 3, %v19089_v44  ;;  %v14824_v45 = vld [vmem:[#allocation20 + $0x60] ss:$12 sps:$4 sm:$0xff]  }
0x11ab   : > { %8379 = vmatmul.mubr.bf16.gmra.mrb[140].mxu1 %v18216_v13  ;;  %8559 = vmatprep.subr.bf16.mxu0 %v14773_v9  ;;  %v14831_v9 = vld [vmem:[#allocation20 + $0x7c] ss:$12 sps:$4 sm:$0xff]  }
0x11ac   : > { %8525 = vmatmul.mubr.bf16.gmra.mrb[172].mxu0 %v18216_v13  ;;  %8388 = vmatprep.mubr.bf16.mxu1 %v18231_v49  ;;  %v14791_v13 = vld [vmem:[#allocation17 + $0x80c] ss:$48 sps:$4 sm:$0xff]  }
0x11ad   : > { %8414 = vmatpush1.bf16.msra.mxu1 %v14768_v53  ;;  %8534 = vmatprep.mubr.bf16.mxu0 %v18231_v49  ;;  %v14786_v49 = vld [vmem:[#allocation17 + $0x800] ss:$48 sps:$4 sm:$0xff]   ;;  %v18390_v53 = vrot.slane %v18385_v48, %v19074_v32 }
0x11ae   : > { %8560 = vmatpush1.bf16.msra.mxu0 %v14771_v2  ;;  %8415 = vmatprep.subr.bf16.mxu1 %v14776_v46  ;;  %v18394_v2 = vrot.slane %v18385_v48, %v19076_v21  ;;  %v14832_v46 = vld [vmem:[#allocation20 + $0x140] ss:$12 sps:$4 sm:$0xff]  }
0x11af   : > { %8561 = vmatprep.subr.bf16.mxu0 %v14779_v33  ;;  %v18399_v33 = vrot.slane %v18385_v48, %v19075_v47 }
0x11b1   : > { %8416 = vmatpush1.bf16.msra.mxu1 %v14774_v56  ;;  %v18404_v56 = vrot.slane %v18385_v48, %v6266_v55 }
0x11b2   : > { %8562 = vmatpush1.bf16.msra.mxu0 %v14777_v42  ;;  %8417 = vmatprep.subr.bf16.mxu1 %v14782_v39  ;;  %v14829_v42 = vld [vmem:[#allocation20 + $0x78] ss:$12 sps:$4 sm:$0xff]  }
0x11b3   : > { %8389 = vmatmul.mubr.bf16.gmra.mrb[144].mxu1 %v18245_v60  ;;  %8563 = vmatprep.subr.bf16.mxu0 %v14785_v37 }
0x11b4   : > { %8535 = vmatmul.mubr.bf16.gmra.mrb[176].mxu0 %v18245_v60  ;;  %8398 = vmatprep.mubr.bf16.mxu1 %v18253_v24  ;;  %v14803_v60 = vld [vmem:[#allocation17 + $0x8cc] ss:$48 sps:$4 sm:$0xff]  }
0x11b5   : > { %8418 = vmatpush1.bf16.msra.mxu1 %v14780_v26  ;;  %8544 = vmatprep.mubr.bf16.mxu0 %v18253_v24  ;;  %v14798_v24 = vld [vmem:[#allocation17 + $0x8c0] ss:$48 sps:$4 sm:$0xff]   ;;  %v14833_v26 = vld [vmem:[#allocation20 + $0x80] ss:$12 sps:$4 sm:$0xff]  }
0x11b6   : > { %8564 = vmatpush1.bf16.msra.mxu0 %v14783_v23  ;;  %8419 = vmatprep.subr.bf16.mxu1 %v14788_v52  ;;  %v14836_v23 = vld [vmem:[#allocation20 + $0x94] ss:$12 sps:$4 sm:$0xff]  }
0x11b7   : > { %8565 = vmatprep.subr.bf16.mxu0 %v14791_v13 }
0x11b9   : > { %8420 = vmatpush1.bf16.msra.mxu1 %v14786_v49 }
0x11ba   : > { %8566 = vmatpush1.bf16.msra.mxu0 %v14789_v62  ;;  %8421 = vmatprep.subr.bf16.mxu1 %v14794_v51  ;;  %v14837_v51 = vld [vmem:[#allocation20 + $0x158] ss:$12 sps:$4 sm:$0xff]  }
0x11bb   : > { %8399 = vmatmul.mubr.bf16.gmra.mrb[148].mxu1 %v18267_v38  ;;  %8567 = vmatprep.subr.bf16.mxu0 %v14797_v50 }
0x11bc   : > { %8545 = vmatmul.mubr.bf16.gmra.mrb[180].mxu0 %v18267_v38  ;;  %8441 = vmatprep.mubr.bf16.mxu1 %v19073_v28  ;;  %v14812_v38 = vld [vmem:[#allocation20 + $0xe0] ss:$12 sps:$4 sm:$0xff]  }
0x11bd   : > { %8422 = vmatpush1.bf16.msra.mxu1 %v14792_v6  ;;  %8587 = vmatprep.mubr.bf16.mxu0 %v19073_v28 }
0x11be   : > { %8568 = vmatpush1.bf16.msra.mxu0 %v14795_v15  ;;  %8423 = vmatprep.subr.bf16.mxu1 %v14800_v8 }
0x11bf   : > { %8569 = vmatprep.subr.bf16.mxu0 %v14803_v60 }
0x11c1   : > { %8424 = vmatpush1.bf16.msra.mxu1 %v14798_v24 }
0x11c2   : > { %8570 = vmatpush1.bf16.msra.mxu0 %v14801_v59  ;;  %10709 = vmatprep.subr.bf16.mxu1 %v14806_v16  ;;  %v14834_v16 = vld [vmem:[#allocation20 + $0x90] ss:$12 sps:$4 sm:$0xff]  }
0x11c3   : > { %12919 = vmatprep.subr.bf16.mxu0 %v14807_v14 }
0x11c4   : > { %8442 = vmatmul.mubr.bf16.vlgmr.msra.gmra.mrb[136].mxu1 %v18285_v58 }
0x11c5   : > { %8588 = vmatmul.mubr.bf16.vlgmr.msra.gmra.mrb[168].mxu0 %v18285_v58  ;;  %10710 = vmatpush1.bf16.msra.mxu1 %v14804_v19  ;;  %v14822_v58 = vld [vmem:[#allocation20 + $0x110] ss:$12 sps:$4 sm:$0xff]  }
0x11c6   : > { %12920 = vmatpush3.bf16.msra.mxu0 %v14808_v11  ;;  %10711 = vmatprep.subr.bf16.mxu1 %v14811_v20  ;;  %v14838_v11 = vld [vmem:[#allocation20 + $0x98] ss:$12 sps:$4 sm:$0xff]  }
0x11c7   : > { %12921 = vmatprep.subr.bf16.mxu0 %v14812_v38  ;;  %8451 = vmatprep.mubr.bf16.mxu1 %v19073_v28  ;;  %v14841_v20 = vld [vmem:[#allocation20 + $0xac] ss:$12 sps:$4 sm:$0xff]  }
0x11c8   : > { %8597 = vmatprep.mubr.bf16.mxu0 %v19073_v28 }
0x11c9   : > { %10712 = vmatpush1.bf16.msra.mxu1 %v14809_v41 }
0x11ca   : > { %12922 = vmatpush3.bf16.msra.mxu0 %v14813_v31  ;;  %10713 = vmatprep.subr.bf16.mxu1 %v14816_v25  ;;  %v14842_v25 = vld [vmem:[#allocation20 + $0x170] ss:$12 sps:$4 sm:$0xff]  }
0x11cb   : > { %12923 = vmatprep.subr.bf16.mxu0 %v14817_v57 }
0x11cc   : > { %8452 = vmatmul.mubr.bf16.gmra.mrb[140].mxu1 %v18299_v40 }
0x11cd   : > { %8598 = vmatmul.mubr.bf16.gmra.mrb[172].mxu0 %v18299_v40  ;;  %10714 = vmatpush1.bf16.msra.mxu1 %v14814_v30  ;;  %v14828_v40 = vld [vmem:[#allocation20 + $0x68] ss:$12 sps:$4 sm:$0xff]  }
0x11ce   : > { %12924 = vmatpush3.bf16.msra.mxu0 %v14818_v43  ;;  %10715 = vmatprep.subr.bf16.mxu1 %v14821_v12 }
0x11cf   : > { %12925 = vmatprep.subr.bf16.mxu0 %v14822_v58  ;;  %8461 = vmatprep.mubr.bf16.mxu1 %v19073_v28 }
0x11d0   : > { %8607 = vmatprep.mubr.bf16.mxu0 %v19073_v28 }
0x11d1   : > { %10716 = vmatpush1.bf16.msra.mxu1 %v14819_v22 }
0x11d2   : > { %12926 = vmatpush3.bf16.msra.mxu0 %v14823_v5  ;;  %10717 = vmatprep.subr.bf16.mxu1 %v14826_v61  ;;  %v14839_v5 = vld [vmem:[#allocation20 + $0xa8] ss:$12 sps:$4 sm:$0xff]  }
0x11d3   : > { %12927 = vmatprep.subr.bf16.mxu0 %v14827_v34 }
0x11d4   : > { %8462 = vmatmul.mubr.bf16.gmra.mrb[144].mxu1 %v18313_v4 }
0x11d5   : > { %8608 = vmatmul.mubr.bf16.gmra.mrb[176].mxu0 %v18313_v4  ;;  %10718 = vmatpush1.bf16.msra.mxu1 %v14824_v45 }
0x11d6   : > { %12928 = vmatpush3.bf16.msra.mxu0 %v14828_v40  ;;  %v7859_v39 = vpop.f32.mrb[104].mxu1  ;;  %v8005_v37 = vpop.f32.mrb[136].mxu0  ;;  %10719 = vmatprep.subr.bf16.mxu1 %v14831_v9  ;;  %v14843_v9 = vld [vmem:[#allocation20 + $0xb0] ss:$12 sps:$4 sm:$0xff]  }
0x11d7   : > { %v13415_v52 = vadd.f32 %v7859_v39, %v18390_v53  ;;  %v13431_v13 = vadd.f32 %v8005_v37, %v18394_v2  ;;  %12929 = vmatprep.subr.bf16.mxu0 %v14832_v46  ;;  %v7861_v49 = vpop.f32.mrb[105].mxu1  ;;  %v8007_v62 = vpop.f32.mrb[137].mxu0  ;;  %8471 = vmatprep.mubr.bf16.mxu1 %v19073_v28  ;;  %v14846_v46 = vld [vmem:[#allocation20 + $0xc4] ss:$12 sps:$4 sm:$0xff]  }
0x11d8   : > { %v13416_v4 = vadd.f32 %v7861_v49, %v18399_v33  ;;  %v13432_v50 = vadd.f32 %v8007_v62, %v18404_v56  ;;  %v7863_v6 = vpop.f32.mrb[106].mxu1  ;;  %v8009_v15 = vpop.f32.mrb[138].mxu0  ;;  %8617 = vmatprep.mubr.bf16.mxu0 %v19073_v28 }
0x11d9   : > { %10720 = vmatpush1.bf16.msra.mxu1 %v14829_v42  ;;  %v13417_v8 = vadd.f32 %v7863_v6, %v18390_v53  ;;  %v13433_v60 = vadd.f32 %v8009_v15, %v18394_v2  ;;  %v7865_v24 = vpop.f32.mrb[107].mxu1  ;;  %v8011_v59 = vpop.f32.mrb[139].mxu0  ;;  %v8628_v38 = vmax.f32 %v13415_v52, 0.0  ;;  %v8630_v41 = vmax.f32 %v13431_v13, 0.0  ;;  %v14844_v6 = vld [vmem:[#allocation20 + $0xc0] ss:$12 sps:$4 sm:$0xff]  }
0x11da   : > { %12930 = vmatpush3.bf16.msra.mxu0 %v14833_v26  ;;  %v13418_v14 = vadd.f32 %v7865_v24, %v18399_v33  ;;  %v13434_v19 = vadd.f32 %v8011_v59, %v18404_v56  ;;  %10721 = vmatprep.subr.bf16.mxu1 %v14836_v23  ;;  %v8629_v57 = vmax.f32 %v13416_v4, 0.0  ;;  %v8631_v30 = vmax.f32 %v13432_v50, 0.0  ;;  %v14847_v23 = vld [vmem:[#allocation20 + $0x248] ss:$12 sps:$4 sm:$0xff]  }
0x11db   : > { %v8640_v31 = vmax.f32 %v13417_v8, 0.0  ;;  %v8642_v28 = vmax.f32 %v13433_v60, 0.0  ;;  %12931 = vmatprep.subr.bf16.mxu0 %v14837_v51  ;;  %v14848_v60 = vld [vmem:[#allocation20 + $0x188] ss:$12 sps:$4 sm:$0xff]  }
0x11dc   : > { %v8641_v43 = vmax.f32 %v13418_v14, 0.0  ;;  %v8643_v12 = vmax.f32 %v13434_v19, 0.0  ;;  %8472 = vmatmul.mubr.bf16.gmra.mrb[148].mxu1 %v18323_v1  ;;  %v14851_v24 = vld [vmem:[#allocation20 + $0xdc] ss:$12 sps:$4 sm:$0xff]  }
0x11dd   : > { %v18418_v58 = vpack.c.bf16 %v8640_v31, %v8628_v38  ;;  %v18420_v22 = vpack.c.bf16 %v8642_v28, %v8630_v41  ;;  %8618 = vmatmul.mubr.bf16.gmra.mrb[180].mxu0 %v18323_v1  ;;  %10722 = vmatpush1.bf16.msra.mxu1 %v14834_v16 }
0x11de   : > { %v8725_v61 = vpack.c.bf16 %v8641_v43, %v8629_v57  ;;  %v18423_v34 = vpack.c.bf16 %v8643_v12, %v8631_v30  ;;  %12932 = vmatpush3.bf16.msra.mxu0 %v14838_v11  ;;  %v7869_v45 = vpop.f32.mrb[108].mxu1  ;;  %v8015_v40 = vpop.f32.mrb[140].mxu0  ;;  %10723 = vmatprep.subr.bf16.mxu1 %v14841_v20  ;;  %v14852_v11 = vld [vmem:[#allocation20 + $0x260] ss:$12 sps:$4 sm:$0xff]   ;;  %v14849_v57 = vld [vmem:[#allocation20 + $0xd8] ss:$12 sps:$4 sm:$0xff]  }
0x11df   : > { %v13419_v42 = vadd.f32 %v7869_v45, %v18390_v53  ;;  %v13435_v39 = vadd.f32 %v8015_v40, %v18394_v2  ;;  %12933 = vmatprep.subr.bf16.mxu0 %v14842_v25  ;;  %v7871_v37 = vpop.f32.mrb[109].mxu1  ;;  %v8017_v26 = vpop.f32.mrb[141].mxu0  ;;  %v14856_v45 = vld [vmem:[#allocation20 + $0xf4] ss:$12 sps:$4 sm:$0xff]  }
0x11e0   : > { %v13420_v1 = vadd.f32 %v7871_v37, %v18399_v33  ;;  %v13436_v52 = vadd.f32 %v8017_v26, %v18404_v56  ;;  %v7873_v13 = vpop.f32.mrb[110].mxu1  ;;  %v8019_v49 = vpop.f32.mrb[142].mxu0  ;;  %10741 = vmatprep.mubr.bf16.mxu1 %v8725_v61  ;;  %11179 = vmatprep.mubr.bf16.mxu0 %v8725_v61  ;;  %v14853_v61 = vld [vmem:[#allocation20 + $0x1a0] ss:$12 sps:$4 sm:$0xff]  }
0x11e1   : > { %10724 = vmatpush1.bf16.msra.mxu1 %v14839_v5  ;;  %v13421_v62 = vadd.f32 %v7873_v13, %v18390_v53  ;;  %v13437_v51 = vadd.f32 %v8019_v49, %v18394_v2  ;;  %v7875_v4 = vpop.f32.mrb[111].mxu1  ;;  %v8021_v50 = vpop.f32.mrb[143].mxu0  ;;  %v8652_v59 = vmax.f32 %v13419_v42, 0.0  ;;  %v8654_v16 = vmax.f32 %v13435_v39, 0.0  ;;  %v14857_v39 = vld [vmem:[#allocation20 + $0x278] ss:$12 sps:$4 sm:$0xff]  }
0x11e2   : > { %12934 = vmatpush3.bf16.msra.mxu0 %v14843_v9  ;;  %v13422_v15 = vadd.f32 %v7875_v4, %v18399_v33  ;;  %v13438_v8 = vadd.f32 %v8021_v50, %v18404_v56  ;;  %10725 = vmatprep.subr.bf16.mxu1 %v14846_v46  ;;  %v8653_v20 = vmax.f32 %v13420_v1, 0.0  ;;  %v8655_v38 = vmax.f32 %v13436_v52, 0.0 }
0x11e3   : > { %v8664_v14 = vmax.f32 %v13421_v62, 0.0  ;;  %v8666_v19 = vmax.f32 %v13437_v51, 0.0  ;;  %12959 = vmatprep.subr.bf16.mxu0 %v14847_v23  ;;  %v14854_v51 = vld [vmem:[#allocation20 + $0xf0] ss:$12 sps:$4 sm:$0xff]  }
0x11e4   : > { %v8665_v41 = vmax.f32 %v13422_v15, 0.0  ;;  %v8667_v31 = vmax.f32 %v13438_v8, 0.0  ;;  %v14861_v15 = vld [vmem:[#allocation20 + $0x10c] ss:$12 sps:$4 sm:$0xff]  }
0x11e5   : > { %v18433_v28 = vpack.c.bf16 %v8664_v14, %v8652_v59  ;;  %v18435_v25 = vpack.c.bf16 %v8666_v19, %v8654_v16  ;;  %11180 = vmatmul.mubr.bf16.vlgmr.msra.gmra.mrb[184].mxu0 %v18418_v58  ;;  %10726 = vmatpush1.bf16.msra.mxu1 %v14844_v6  ;;  %v14858_v6 = vld [vmem:[#allocation20 + $0x1b8] ss:$12 sps:$4 sm:$0xff]   ;;  %v14862_v16 = vld [vmem:[#allocation20 + $0x290] ss:$12 sps:$4 sm:$0xff]  }
0x11e6   : > { %v18438_v30 = vpack.c.bf16 %v8665_v41, %v8653_v20  ;;  %v18440_v43 = vpack.c.bf16 %v8667_v31, %v8655_v38  ;;  %12960 = vmatpush3.bf16.msra.mxu0 %v14848_v60  ;;  %v7879_v12 = vpop.f32.mrb[112].mxu1  ;;  %v8025_v5 = vpop.f32.mrb[144].mxu0  ;;  %10727 = vmatprep.subr.bf16.mxu1 %v14851_v24  ;;  %v14859_v31 = vld [vmem:[#allocation20 + $0x108] ss:$12 sps:$4 sm:$0xff]  }
0x11e7   : > { %v13423_v40 = vadd.f32 %v7879_v12, %v18390_v53  ;;  %v13439_v9 = vadd.f32 %v8025_v5, %v18394_v2  ;;  %12961 = vmatprep.subr.bf16.mxu0 %v14852_v11  ;;  %v7881_v46 = vpop.f32.mrb[113].mxu1  ;;  %v8027_v42 = vpop.f32.mrb[145].mxu0 }
0x11e8   : > { %v13424_v37 = vadd.f32 %v7881_v46, %v18399_v33  ;;  %v13440_v26 = vadd.f32 %v8027_v42, %v18404_v56  ;;  %v7883_v23 = vpop.f32.mrb[114].mxu1  ;;  %v8029_v1 = vpop.f32.mrb[146].mxu0  ;;  %11187 = vmatprep.mubr.bf16.mxu0 %v18438_v30 }
0x11e9   : > { %10728 = vmatpush1.bf16.msra.mxu1 %v14849_v57  ;;  %v13425_v52 = vadd.f32 %v7883_v23, %v18390_v53  ;;  %v13441_v13 = vadd.f32 %v8029_v1, %v18394_v2  ;;  %v7885_v49 = vpop.f32.mrb[115].mxu1  ;;  %v8031_v62 = vpop.f32.mrb[147].mxu0  ;;  %v8676_v8 = vmax.f32 %v13423_v40, 0.0  ;;  %v8678_v60 = vmax.f32 %v13439_v9, 0.0  ;;  %v14866_v40 = vld [vmem:[#allocation20 + $0x124] ss:$12 sps:$4 sm:$0xff]  }
0x11ea   : > { %12962 = vmatpush3.bf16.msra.mxu0 %v14853_v61  ;;  %v13426_v4 = vadd.f32 %v7885_v49, %v18399_v33  ;;  %v13442_v50 = vadd.f32 %v8031_v62, %v18404_v56  ;;  %10729 = vmatprep.subr.bf16.mxu1 %v14856_v45  ;;  %v8677_v14 = vmax.f32 %v13424_v37, 0.0  ;;  %v8679_v19 = vmax.f32 %v13440_v26, 0.0  ;;  %v14863_v45 = vld [vmem:[#allocation20 + $0x1d0] ss:$12 sps:$4 sm:$0xff]   ;;  %v14867_v37 = vld [vmem:[#allocation20 + $0x2a8] ss:$12 sps:$4 sm:$0xff]  }
0x11eb   : > { %v8688_v24 = vmax.f32 %v13425_v52, 0.0  ;;  %v8690_v59 = vmax.f32 %v13441_v13, 0.0  ;;  %12963 = vmatprep.subr.bf16.mxu0 %v14857_v39 }
0x11ec   : > { %v8689_v11 = vmax.f32 %v13426_v4, 0.0  ;;  %v8691_v20 = vmax.f32 %v13442_v50, 0.0  ;;  %v14864_v4 = vld [vmem:[#allocation20 + $0x120] ss:$12 sps:$4 sm:$0xff]  }
0x11ed   : > { %v18451_v38 = vpack.c.bf16 %v8688_v24, %v8676_v8  ;;  %v18453_v41 = vpack.c.bf16 %v8690_v59, %v8678_v60  ;;  %11188 = vmatmul.mubr.bf16.gmra.mrb[188].mxu0 %v18433_v28  ;;  %10730 = vmatpush1.bf16.msra.mxu1 %v14854_v51  ;;  %v14871_v8 = vld [vmem:[#allocation20 + $0x13c] ss:$12 sps:$4 sm:$0xff]  }
0x11ee   : > { %v18456_v57 = vpack.c.bf16 %v8689_v11, %v8677_v14  ;;  %v18458_v12 = vpack.c.bf16 %v8691_v20, %v8679_v19  ;;  %12964 = vmatpush3.bf16.msra.mxu0 %v14858_v6  ;;  %v7889_v5 = vpop.f32.mrb[116].mxu1  ;;  %v8035_v61 = vpop.f32.mrb[148].mxu0  ;;  %10731 = vmatprep.subr.bf16.mxu1 %v14861_v15  ;;  %v14868_v15 = vld [vmem:[#allocation20 + $0x1e8] ss:$12 sps:$4 sm:$0xff]   ;;  %v14872_v14 = vld [vmem:[#allocation20 + $0x2c0] ss:$12 sps:$4 sm:$0xff]  }
0x11ef   : > { %v13427_v9 = vadd.f32 %v7889_v5, %v18390_v53  ;;  %v13443_v46 = vadd.f32 %v8035_v61, %v18394_v2  ;;  %12965 = vmatprep.subr.bf16.mxu0 %v14862_v16  ;;  %v7891_v42 = vpop.f32.mrb[117].mxu1  ;;  %v8037_v39 = vpop.f32.mrb[149].mxu0  ;;  %v14873_v61 = vld [vmem:[#allocation20 + $0x200] ss:$12 sps:$4 sm:$0xff]  }
0x11f0   : > { %v13428_v26 = vadd.f32 %v7891_v42, %v18399_v33  ;;  %v13444_v23 = vadd.f32 %v8037_v39, %v18404_v56  ;;  %v7893_v1 = vpop.f32.mrb[118].mxu1  ;;  %v8039_v52 = vpop.f32.mrb[150].mxu0  ;;  %11195 = vmatprep.mubr.bf16.mxu0 %v18456_v57  ;;  %v14881_v42 = vld [vmem:[#allocation20 + $0x16c] ss:$12 sps:$4 sm:$0xff]   ;;  %v14882_v39 = vld [vmem:[#allocation20 + $0x2f0] ss:$12 sps:$4 sm:$0xff]  }
0x11f1   : > { %10732 = vmatpush1.bf16.msra.mxu1 %v14859_v31  ;;  %v13429_v13 = vadd.f32 %v7893_v1, %v18390_v53  ;;  %v13445_v49 = vadd.f32 %v8039_v52, %v18394_v2  ;;  %v7895_v62 = vpop.f32.mrb[119].mxu1  ;;  %v8041_v51 = vpop.f32.mrb[151].mxu0  ;;  %v8700_v60 = vmax.f32 %v13427_v9, 0.0  ;;  %v8702_v24 = vmax.f32 %v13443_v46, 0.0  ;;  %v14874_v9 = vld [vmem:[#allocation20 + $0x150] ss:$12 sps:$4 sm:$0xff]  }
0x11f2   : > { %12966 = vmatpush3.bf16.msra.mxu0 %v14863_v45  ;;  %v13430_v50 = vadd.f32 %v7895_v62, %v18399_v33  ;;  %v13446_v6 = vadd.f32 %v8041_v51, %v18404_v56  ;;  %10733 = vmatprep.subr.bf16.mxu1 %v14866_v40  ;;  %v8701_v53 = vmax.f32 %v13428_v26, 0.0  ;;  %v8703_v19 = vmax.f32 %v13444_v23, 0.0  ;;  %v14869_v33 = vld [vmem:[#allocation20 + $0x138] ss:$12 sps:$4 sm:$0xff]   ;;  %v14876_v45 = vld [vmem:[#allocation20 + $0x154] ss:$12 sps:$4 sm:$0xff]  }
0x11f3   : > { %v8712_v59 = vmax.f32 %v13429_v13, 0.0  ;;  %v8714_v16 = vmax.f32 %v13445_v49, 0.0  ;;  %12967 = vmatprep.subr.bf16.mxu0 %v14867_v37  ;;  %v14877_v40 = vld [vmem:[#allocation20 + $0x2d8] ss:$12 sps:$4 sm:$0xff]   ;;  %v14879_v37 = vld [vmem:[#allocation20 + $0x168] ss:$12 sps:$4 sm:$0xff]  }
0x11f4   : > { %v8713_v2 = vmax.f32 %v13430_v50, 0.0  ;;  %v8715_v11 = vmax.f32 %v13446_v6, 0.0  ;;  %v14878_v46 = vld [vmem:[#allocation20 + $0x218] ss:$12 sps:$4 sm:$0xff]   ;;  %v14883_v26 = vld [vmem:[#allocation20 + $0x230] ss:$12 sps:$4 sm:$0xff]  }
0x11f5   : > { %v18469_v20 = vpack.c.bf16 %v8712_v59, %v8700_v60  ;;  %v18471_v31 = vpack.c.bf16 %v8714_v16, %v8702_v24  ;;  %11196 = vmatmul.mubr.bf16.gmra.mrb[192].mxu0 %v18451_v38  ;;  %10734 = vmatpush1.bf16.msra.mxu1 %v14864_v4  ;;  %v14886_v23 = vld [vmem:[#allocation20 + $0x184] ss:$12 sps:$4 sm:$0xff]   ;;  %v14908_v1 = vld [vmem:[#allocation20 + $0x3c8] ss:$12 sps:$4 sm:$0xff]   ;;  %v14884_v52 = vld [vmem:[#allocation20 + $0x180] ss:$12 sps:$4 sm:$0xff]  }
0x11f6   : > { %v18474_v56 = vpack.c.bf16 %v8713_v2, %v8701_v53  ;;  %v18476_v5 = vpack.c.bf16 %v8715_v11, %v8703_v19  ;;  %12968 = vmatpush3.bf16.msra.mxu0 %v14868_v15  ;;  %10735 = vmatprep.subr.bf16.mxu1 %v14871_v8  ;;  %v14889_v13 = vld [vmem:[#allocation20 + $0x19c] ss:$12 sps:$4 sm:$0xff]   ;;  %v14913_v62 = vld [vmem:[#allocation20 + $0x3e0] ss:$12 sps:$4 sm:$0xff]   ;;  %v14887_v51 = vld [vmem:[#allocation20 + $0x198] ss:$12 sps:$4 sm:$0xff]  }
0x11f7   : > { %12969 = vmatprep.subr.bf16.mxu0 %v14872_v14  ;;  %v14909_v49 = vld [vmem:[#allocation20 + $0x308] ss:$12 sps:$4 sm:$0xff]   ;;  %v14914_v50 = vld [vmem:[#allocation20 + $0x320] ss:$12 sps:$4 sm:$0xff]   ;;  %v14918_v6 = vld [vmem:[#allocation20 + $0x3f8] ss:$12 sps:$4 sm:$0xff]  }
0x11f8   : > { %11203 = vmatprep.mubr.bf16.mxu0 %v18474_v56  ;;  %v14892_v4 = vld [vmem:[#allocation20 + $0x1b4] ss:$12 sps:$4 sm:$0xff]   ;;  %v14890_v15 = vld [vmem:[#allocation20 + $0x1b0] ss:$12 sps:$4 sm:$0xff]   ;;  %v14895_v8 = vld [vmem:[#allocation20 + $0x1cc] ss:$12 sps:$4 sm:$0xff]  }
0x11f9   : > { %10736 = vmatpush1.bf16.msra.mxu1 %v14869_v33  ;;  %v14893_v60 = vld [vmem:[#allocation20 + $0x1c8] ss:$12 sps:$4 sm:$0xff]   ;;  %v14898_v24 = vld [vmem:[#allocation20 + $0x1e4] ss:$12 sps:$4 sm:$0xff]   ;;  %v14896_v14 = vld [vmem:[#allocation20 + $0x1e0] ss:$12 sps:$4 sm:$0xff]  }
0x11fa   : > { %12970 = vmatpush3.bf16.msra.mxu0 %v14873_v61  ;;  %10737 = vmatprep.subr.bf16.mxu1 %v14876_v45  ;;  %v14924_v59 = vld [vmem:[#allocation20 + $0x350] ss:$12 sps:$4 sm:$0xff]   ;;  %v14928_v16 = vld [vmem:[#allocation20 + $0x428] ss:$12 sps:$4 sm:$0xff]   ;;  %v14899_v19 = vld [vmem:[#allocation20 + $0x1f8] ss:$12 sps:$4 sm:$0xff]  }
0x11fb   : > { %12971 = vmatprep.subr.bf16.mxu0 %v14877_v40  ;;  %v14929_v53 = vld [vmem:[#allocation20 + $0x368] ss:$12 sps:$4 sm:$0xff]   ;;  %v14934_v11 = vld [vmem:[#allocation20 + $0x380] ss:$12 sps:$4 sm:$0xff]   ;;  %v14938_v33 = vld [vmem:[#allocation20 + $0x458] ss:$12 sps:$4 sm:$0xff]  }
0x11fc   : > { %v14904_v2 = vld [vmem:[#allocation20 + $0x214] ss:$12 sps:$4 sm:$0xff]   ;;  %v14902_v61 = vld [vmem:[#allocation20 + $0x210] ss:$12 sps:$4 sm:$0xff]   ;;  %v14939_v45 = vld [vmem:[#allocation20 + $0x398] ss:$12 sps:$4 sm:$0xff]  }
0x11fd   : > { %11204 = vmatmul.mubr.bf16.gmra.mrb[196].mxu0 %v18469_v20  ;;  %10738 = vmatpush1.bf16.msra.mxu1 %v14874_v9  ;;  %v14905_v40 = vld [vmem:[#allocation20 + $0x228] ss:$12 sps:$4 sm:$0xff]   ;;  %v14912_v9 = vld [vmem:[#allocation20 + $0x244] ss:$12 sps:$4 sm:$0xff]  }
0x11fe   : > { %12972 = vmatpush3.bf16.msra.mxu0 %v14878_v46  ;;  %11244 = vmatprep.mubr.bf16.mxu0 %v18423_v34  ;;  %v14944_v46 = vld [vmem:[#allocation20 + $0x3b0] ss:$12 sps:$4 sm:$0xff]  }
0x11ff   : > { %10739 = vmatprep.subr.bf16.mxu1 %v14881_v42  ;;  %12973 = vmatprep.subr.bf16.mxu0 %v14882_v39  ;;  %v14948_v42 = vld [vmem:[#allocation20 + $0x548] ss:$12 sps:$4 sm:$0xff]   ;;  %v14910_v39 = vld [vmem:[#allocation20 + $0x240] ss:$12 sps:$4 sm:$0xff]  }
0x1201   : > { %10740 = vmatpush1.bf16.msra.mxu1 %v14879_v37  ;;  %v14917_v37 = vld [vmem:[#allocation20 + $0x25c] ss:$12 sps:$4 sm:$0xff]  }
0x1202   : > { %12974 = vmatpush3.bf16.msra.mxu0 %v14883_v26  ;;  %10782 = vmatprep.subr.bf16.mxu1 %v14886_v23  ;;  %v14922_v26 = vld [vmem:[#allocation20 + $0x274] ss:$12 sps:$4 sm:$0xff]   ;;  %v14927_v23 = vld [vmem:[#allocation20 + $0x28c] ss:$12 sps:$4 sm:$0xff]  }
0x1203   : > { %12999 = vmatprep.subr.bf16.mxu0 %v14908_v1  ;;  %v14925_v1 = vld [vmem:[#allocation20 + $0x288] ss:$12 sps:$4 sm:$0xff]  }
0x1204   : > { %10742 = vmatmul.mubr.bf16.vlgmr.msra.gmra.mrb[152].mxu1 %v18418_v58  ;;  %v14919_v58 = vld [vmem:[#allocation20 + $0x338] ss:$12 sps:$4 sm:$0xff]  }
0x1205   : > { %11245 = vmatmul.mubr.bf16.vlgmr.msra.gmra.mrb[200].mxu0 %v18420_v22  ;;  %10751 = vmatprep.mubr.bf16.mxu1 %v18438_v30  ;;  %v14923_v30 = vld [vmem:[#allocation20 + $0x410] ss:$12 sps:$4 sm:$0xff]  }
0x1206   : > { %10783 = vmatpush1.bf16.msra.mxu1 %v14884_v52  ;;  %11252 = vmatprep.mubr.bf16.mxu0 %v18440_v43  ;;  %v14932_v52 = vld [vmem:[#allocation20 + $0x2a4] ss:$12 sps:$4 sm:$0xff]  }
0x1207   : > { %10784 = vmatprep.subr.bf16.mxu1 %v14889_v13  ;;  %13000 = vmatpush3.bf16.msra.mxu0 %v14909_v49  ;;  %v6270_v13 = vsub.s32 4, %v19089_v44  ;;  %v6278_v49 = vsub.s32 6, %v19089_v44 }
0x1208   : > { %13001 = vmatprep.subr.bf16.mxu0 %v14913_v62  ;;  %v6274_v62 = vsub.s32 5, %v19089_v44 }
0x120a   : > { %10785 = vmatpush1.bf16.msra.mxu1 %v14887_v51  ;;  %v6282_v51 = vsub.s32 7, %v19089_v44 }
0x120b   : > { %10786 = vmatprep.subr.bf16.mxu1 %v14892_v4  ;;  %13002 = vmatpush3.bf16.msra.mxu0 %v14914_v50  ;;  %v14930_v4 = vld [vmem:[#allocation20 + $0x2a0] ss:$12 sps:$4 sm:$0xff]   ;;  %v18501_v50 = vrot.slane %v18385_v48, %v6270_v13 }
0x120c   : > { %10752 = vmatmul.mubr.bf16.gmra.mrb[156].mxu1 %v18433_v28  ;;  %13003 = vmatprep.subr.bf16.mxu0 %v14918_v6  ;;  %v14901_v28 = vld [vmem:[#allocation20 + $0x1fc] ss:$12 sps:$4 sm:$0xff]  }
0x120d   : > { %11253 = vmatmul.mubr.bf16.gmra.mrb[204].mxu0 %v18435_v25  ;;  %10761 = vmatprep.mubr.bf16.mxu1 %v18456_v57  ;;  %v14933_v57 = vld [vmem:[#allocation20 + $0x440] ss:$12 sps:$4 sm:$0xff]   ;;  %v14937_v6 = vld [vmem:[#allocation20 + $0x2bc] ss:$12 sps:$4 sm:$0xff]  }
0x120e   : > { %10787 = vmatpush1.bf16.msra.mxu1 %v14890_v15  ;;  %11260 = vmatprep.mubr.bf16.mxu0 %v18458_v12  ;;  %v18504_v15 = vrot.slane %v18385_v48, %v6278_v49 }
0x120f   : > { %10788 = vmatprep.subr.bf16.mxu1 %v14895_v8  ;;  %13004 = vmatpush3.bf16.msra.mxu0 %v14919_v58  ;;  %v18507_v8 = vrot.slane %v18385_v48, %v6274_v62  ;;  %v18510_v58 = vrot.slane %v18385_v48, %v6282_v51  ;;  %v14945_v62 = vld [vmem:[#allocation20 + $0x2e8] ss:$12 sps:$4 sm:$0xff]  }
0x1210   : > { %13005 = vmatprep.subr.bf16.mxu0 %v14923_v30  ;;  %v14949_v51 = vld [vmem:[#allocation20 + $0x488] ss:$12 sps:$4 sm:$0xff]  }
0x1212   : > { %10789 = vmatpush1.bf16.msra.mxu1 %v14893_v60  ;;  %v14935_v60 = vld [vmem:[#allocation20 + $0x2b8] ss:$12 sps:$4 sm:$0xff]  }
0x1213   : > { %10790 = vmatprep.subr.bf16.mxu1 %v14898_v24  ;;  %13006 = vmatpush3.bf16.msra.mxu0 %v14924_v59 }
0x1214   : > { %10762 = vmatmul.mubr.bf16.gmra.mrb[160].mxu1 %v18451_v38  ;;  %13007 = vmatprep.subr.bf16.mxu0 %v14928_v16  ;;  %v14907_v38 = vld [vmem:[#allocation20 + $0x22c] ss:$12 sps:$4 sm:$0xff]  }
0x1215   : > { %11261 = vmatmul.mubr.bf16.gmra.mrb[208].mxu0 %v18453_v41  ;;  %10771 = vmatprep.mubr.bf16.mxu1 %v18474_v56  ;;  %v14943_v56 = vld [vmem:[#allocation20 + $0x470] ss:$12 sps:$4 sm:$0xff]  }
0x1216   : > { %10791 = vmatpush1.bf16.msra.mxu1 %v14896_v14  ;;  %11268 = vmatprep.mubr.bf16.mxu0 %v18476_v5  ;;  %v14942_v14 = vld [vmem:[#allocation20 + $0x2d4] ss:$12 sps:$4 sm:$0xff]  }
0x1217   : > { %10792 = vmatprep.subr.bf16.mxu1 %v14901_v28  ;;  %13008 = vmatpush3.bf16.msra.mxu0 %v14929_v53 }
0x1218   : > { %13009 = vmatprep.subr.bf16.mxu0 %v14933_v57 }
0x121a   : > { %10793 = vmatpush1.bf16.msra.mxu1 %v14899_v19 }
0x121b   : > { %10794 = vmatprep.subr.bf16.mxu1 %v14904_v2  ;;  %13010 = vmatpush3.bf16.msra.mxu0 %v14934_v11 }
0x121c   : > { %10772 = vmatmul.mubr.bf16.gmra.mrb[164].mxu1 %v18469_v20  ;;  %13011 = vmatprep.subr.bf16.mxu0 %v14938_v33  ;;  %v14915_v20 = vld [vmem:[#allocation20 + $0x258] ss:$12 sps:$4 sm:$0xff]  }
0x121d   : > { %11269 = vmatmul.mubr.bf16.gmra.mrb[212].mxu0 %v18471_v31  ;;  %10814 = vmatprep.mubr.bf16.mxu1 %v18423_v34  ;;  %v14920_v34 = vld [vmem:[#allocation20 + $0x270] ss:$12 sps:$4 sm:$0xff]  }
0x121e   : > { %10795 = vmatpush1.bf16.msra.mxu1 %v14902_v61 }
0x121f   : > { %10796 = vmatprep.subr.bf16.mxu1 %v14907_v38  ;;  %13012 = vmatpush3.bf16.msra.mxu0 %v14939_v45 }
0x1220   : > { %13013 = vmatprep.subr.bf16.mxu0 %v14943_v56  ;;  %v14940_v56 = vld [vmem:[#allocation20 + $0x2d0] ss:$12 sps:$4 sm:$0xff]  }
0x1222   : > { %10797 = vmatpush1.bf16.msra.mxu1 %v14905_v40 }
0x1223   : > { %10798 = vmatprep.subr.bf16.mxu1 %v14912_v9  ;;  %13014 = vmatpush3.bf16.msra.mxu0 %v14944_v46 }
0x1224   : > { %13039 = vmatprep.subr.bf16.mxu0 %v14948_v42  ;;  %v14947_v42 = vld [vmem:[#allocation20 + $0x2ec] ss:$12 sps:$4 sm:$0xff]  }
0x1226   : > { %10799 = vmatpush1.bf16.msra.mxu1 %v14910_v39 }
0x1227   : > { %10800 = vmatprep.subr.bf16.mxu1 %v14917_v37 }
0x122a   : > { %10801 = vmatpush1.bf16.msra.mxu1 %v14915_v20 }
0x122b   : > { %10802 = vmatprep.subr.bf16.mxu1 %v14922_v26 }
0x122e   : > { %10803 = vmatpush1.bf16.msra.mxu1 %v14920_v34 }
0x122f   : > { %10804 = vmatprep.subr.bf16.mxu1 %v14927_v23 }
0x1232   : > { %10805 = vmatpush1.bf16.msra.mxu1 %v14925_v1 }
0x1233   : > { %10806 = vmatprep.subr.bf16.mxu1 %v14932_v52 }
0x1236   : > { %10807 = vmatpush1.bf16.msra.mxu1 %v14930_v4  ;;  %v8151_v30 = vpop.f32.mrb[120].mxu1 }
0x1237   : > { %v13447_v24 = vadd.f32 %v8151_v30, %v18501_v50  ;;  %v8297_v59 = vpop.f32.mrb[152].mxu0  ;;  %v8153_v16 = vpop.f32.mrb[121].mxu1  ;;  %10808 = vmatprep.subr.bf16.mxu1 %v14937_v6 }
0x1238   : > { %v13463_v28 = vadd.f32 %v8297_v59, %v18504_v15  ;;  %v13448_v53 = vadd.f32 %v8153_v16, %v18507_v8  ;;  %v8299_v57 = vpop.f32.mrb[153].mxu0  ;;  %v8155_v19 = vpop.f32.mrb[122].mxu1  ;;  %v14953_v59 = vld [vmem:[#allocation20 + $0x560] ss:$12 sps:$4 sm:$0xff]  }
0x1239   : > { %v13464_v2 = vadd.f32 %v8299_v57, %v18510_v58  ;;  %v13449_v48 = vadd.f32 %v8155_v19, %v18501_v50  ;;  %v8301_v11 = vpop.f32.mrb[154].mxu0  ;;  %v8157_v33 = vpop.f32.mrb[123].mxu1  ;;  %v8632_v40 = vmax.f32 %v13447_v24, 0.0  ;;  %v14952_v24 = vld [vmem:[#allocation20 + $0x304] ss:$12 sps:$4 sm:$0xff]  }
0x123a   : > { %v13465_v61 = vadd.f32 %v8301_v11, %v18504_v15  ;;  %10809 = vmatpush1.bf16.msra.mxu1 %v14935_v60  ;;  %v13450_v38 = vadd.f32 %v8157_v33, %v18507_v8  ;;  %v8303_v45 = vpop.f32.mrb[155].mxu0  ;;  %v8634_v39 = vmax.f32 %v13463_v28, 0.0  ;;  %v8633_v37 = vmax.f32 %v13448_v53, 0.0 }
0x123b   : > { %v8644_v9 = vmax.f32 %v13449_v48, 0.0  ;;  %v13466_v46 = vadd.f32 %v8303_v45, %v18510_v58  ;;  %10810 = vmatprep.subr.bf16.mxu1 %v14942_v14  ;;  %v8635_v34 = vmax.f32 %v13464_v2, 0.0 }
0x123c   : > { %v8646_v20 = vmax.f32 %v13465_v61, 0.0  ;;  %v8645_v26 = vmax.f32 %v13450_v38, 0.0  ;;  %v14950_v38 = vld [vmem:[#allocation20 + $0x300] ss:$12 sps:$4 sm:$0xff]  }
0x123d   : > { %v18520_v23 = vpack.c.bf16 %v8644_v9, %v8632_v40  ;;  %v8647_v1 = vmax.f32 %v13466_v46, 0.0  ;;  %v14954_v9 = vld [vmem:[#allocation20 + $0x4a0] ss:$12 sps:$4 sm:$0xff]   ;;  %v14957_v46 = vld [vmem:[#allocation20 + $0x31c] ss:$12 sps:$4 sm:$0xff]  }
0x123e   : > { %v18522_v52 = vpack.c.bf16 %v8646_v20, %v8634_v39  ;;  %v18524_v13 = vpack.c.bf16 %v8645_v26, %v8633_v37  ;;  %10811 = vmatpush1.bf16.msra.mxu1 %v14940_v56  ;;  %v8161_v49 = vpop.f32.mrb[124].mxu1  ;;  %v14958_v26 = vld [vmem:[#allocation20 + $0x578] ss:$12 sps:$4 sm:$0xff]  }
0x123f   : > { %v18526_v4 = vpack.c.bf16 %v8647_v1, %v8635_v34  ;;  %v13451_v6 = vadd.f32 %v8161_v49, %v18501_v50  ;;  %v8307_v30 = vpop.f32.mrb[156].mxu0  ;;  %v8163_v60 = vpop.f32.mrb[125].mxu1  ;;  %10812 = vmatprep.subr.bf16.mxu1 %v14947_v42 }
0x1240   : > { %v13467_v16 = vadd.f32 %v8307_v30, %v18504_v15  ;;  %v13452_v14 = vadd.f32 %v8163_v60, %v18507_v8  ;;  %v8309_v28 = vpop.f32.mrb[157].mxu0  ;;  %v8165_v53 = vpop.f32.mrb[126].mxu1  ;;  %11309 = vmatprep.mubr.bf16.mxu0 %v18524_v13  ;;  %v14955_v30 = vld [vmem:[#allocation20 + $0x318] ss:$12 sps:$4 sm:$0xff]  }
0x1241   : > { %v13468_v57 = vadd.f32 %v8309_v28, %v18510_v58  ;;  %v13453_v19 = vadd.f32 %v8165_v53, %v18501_v50  ;;  %v8311_v2 = vpop.f32.mrb[158].mxu0  ;;  %v8167_v48 = vpop.f32.mrb[127].mxu1  ;;  %11310 = vmatmul.mubr.bf16.vlgmr.msra.gmra.mrb[216].mxu0 %v18520_v23  ;;  %v8656_v45 = vmax.f32 %v13451_v6, 0.0  ;;  %v14962_v28 = vld [vmem:[#allocation20 + $0x334] ss:$12 sps:$4 sm:$0xff]  }
0x1242   : > { %v13469_v11 = vadd.f32 %v8311_v2, %v18504_v15  ;;  %10813 = vmatpush1.bf16.msra.mxu1 %v14945_v62  ;;  %v13454_v33 = vadd.f32 %v8167_v48, %v18507_v8  ;;  %v8313_v61 = vpop.f32.mrb[159].mxu0  ;;  %13040 = vmatpush3.bf16.msra.mxu0 %v14949_v51  ;;  %v8658_v42 = vmax.f32 %v13467_v16, 0.0  ;;  %v8657_v39 = vmax.f32 %v13452_v14, 0.0  ;;  %v14959_v14 = vld [vmem:[#allocation20 + $0x4b8] ss:$12 sps:$4 sm:$0xff]  }
0x1243   : > { %v8668_v56 = vmax.f32 %v13453_v19, 0.0  ;;  %v13470_v40 = vadd.f32 %v8313_v61, %v18510_v58  ;;  %10855 = vmatprep.subr.bf16.mxu1 %v14952_v24  ;;  %13041 = vmatprep.subr.bf16.mxu0 %v14953_v59  ;;  %v8659_v34 = vmax.f32 %v13468_v57, 0.0 }
0x1244   : > { %v8670_v37 = vmax.f32 %v13469_v11, 0.0  ;;  %v8669_v20 = vmax.f32 %v13454_v33, 0.0 }
0x1245   : > { %v18538_v1 = vpack.c.bf16 %v8668_v56, %v8656_v45  ;;  %v8671_v49 = vmax.f32 %v13470_v40, 0.0  ;;  %10815 = vmatmul.mubr.bf16.vlgmr.msra.gmra.mrb[152].mxu1 %v18420_v22  ;;  %v14960_v56 = vld [vmem:[#allocation20 + $0x330] ss:$12 sps:$4 sm:$0xff]  }
0x1246   : > { %v18541_v62 = vpack.c.bf16 %v8670_v37, %v8658_v42  ;;  %v18543_v51 = vpack.c.bf16 %v8669_v20, %v8657_v39  ;;  %10824 = vmatprep.mubr.bf16.mxu1 %v18440_v43  ;;  %10856 = vmatpush1.bf16.msra.mxu1 %v14950_v38  ;;  %v8171_v6 = vpop.f32.mrb[128].mxu1  ;;  %v14963_v43 = vld [vmem:[#allocation20 + $0x590] ss:$12 sps:$4 sm:$0xff]   ;;  %v14967_v39 = vld [vmem:[#allocation20 + $0x34c] ss:$12 sps:$4 sm:$0xff]  }
0x1247   : > { %v18546_v60 = vpack.c.bf16 %v8671_v49, %v8659_v34  ;;  %v13455_v24 = vadd.f32 %v8171_v6, %v18501_v50  ;;  %v8317_v59 = vpop.f32.mrb[160].mxu0  ;;  %13042 = vmatpush3.bf16.msra.mxu0 %v14954_v9  ;;  %v8173_v16 = vpop.f32.mrb[129].mxu1  ;;  %10857 = vmatprep.subr.bf16.mxu1 %v14957_v46  ;;  %v14964_v42 = vld [vmem:[#allocation20 + $0x4d0] ss:$12 sps:$4 sm:$0xff]   ;;  %v14968_v49 = vld [vmem:[#allocation20 + $0x5a8] ss:$12 sps:$4 sm:$0xff]  }
0x1248   : > { %v13471_v22 = vadd.f32 %v8317_v59, %v18504_v15  ;;  %v13456_v53 = vadd.f32 %v8173_v16, %v18507_v8  ;;  %v8319_v57 = vpop.f32.mrb[161].mxu0  ;;  %v8175_v19 = vpop.f32.mrb[130].mxu1  ;;  %11317 = vmatprep.mubr.bf16.mxu0 %v18543_v51  ;;  %13043 = vmatprep.subr.bf16.mxu0 %v14958_v26 }
0x1249   : > { %v13472_v2 = vadd.f32 %v8319_v57, %v18510_v58  ;;  %v13457_v48 = vadd.f32 %v8175_v19, %v18501_v50  ;;  %v8321_v11 = vpop.f32.mrb[162].mxu0  ;;  %v8177_v33 = vpop.f32.mrb[131].mxu1  ;;  %11318 = vmatmul.mubr.bf16.gmra.mrb[220].mxu0 %v18538_v1  ;;  %v8680_v40 = vmax.f32 %v13455_v24, 0.0 }
0x124a   : > { %v13473_v61 = vadd.f32 %v8321_v11, %v18504_v15  ;;  %10858 = vmatpush1.bf16.msra.mxu1 %v14955_v30  ;;  %v13458_v38 = vadd.f32 %v8177_v33, %v18507_v8  ;;  %v8323_v45 = vpop.f32.mrb[163].mxu0  ;;  %v8682_v37 = vmax.f32 %v13471_v22, 0.0  ;;  %v8681_v20 = vmax.f32 %v13456_v53, 0.0 }
0x124b   : > { %v8692_v9 = vmax.f32 %v13457_v48, 0.0  ;;  %v13474_v46 = vadd.f32 %v8323_v45, %v18510_v58  ;;  %13044 = vmatpush3.bf16.msra.mxu0 %v14959_v14  ;;  %10859 = vmatprep.subr.bf16.mxu1 %v14962_v28  ;;  %v8683_v6 = vmax.f32 %v13472_v2, 0.0  ;;  %v14965_v28 = vld [vmem:[#allocation20 + $0x348] ss:$12 sps:$4 sm:$0xff]   ;;  %v14972_v2 = vld [vmem:[#allocation20 + $0x364] ss:$12 sps:$4 sm:$0xff]  }
0x124c   : > { %v8694_v26 = vmax.f32 %v13473_v61, 0.0  ;;  %v8693_v34 = vmax.f32 %v13458_v38, 0.0  ;;  %13045 = vmatprep.subr.bf16.mxu0 %v14963_v43  ;;  %v14969_v43 = vld [vmem:[#allocation20 + $0x4e8] ss:$12 sps:$4 sm:$0xff]  }
0x124d   : > { %v18558_v30 = vpack.c.bf16 %v8692_v9, %v8680_v40  ;;  %v8695_v59 = vmax.f32 %v13474_v46, 0.0  ;;  %10825 = vmatmul.mubr.bf16.gmra.mrb[156].mxu1 %v18435_v25 }
0x124e   : > { %v18561_v24 = vpack.c.bf16 %v8694_v26, %v8682_v37  ;;  %v18563_v16 = vpack.c.bf16 %v8693_v34, %v8681_v20  ;;  %10834 = vmatprep.mubr.bf16.mxu1 %v18458_v12  ;;  %10860 = vmatpush1.bf16.msra.mxu1 %v14960_v56  ;;  %v8181_v14 = vpop.f32.mrb[132].mxu1  ;;  %v14973_v12 = vld [vmem:[#allocation20 + $0x5c0] ss:$12 sps:$4 sm:$0xff]   ;;  %v14977_v34 = vld [vmem:[#allocation20 + $0x37c] ss:$12 sps:$4 sm:$0xff]  }
0x124f   : > { %v18566_v22 = vpack.c.bf16 %v8695_v59, %v8683_v6  ;;  %v13459_v53 = vadd.f32 %v8181_v14, %v18501_v50  ;;  %v8327_v57 = vpop.f32.mrb[164].mxu0  ;;  %13046 = vmatpush3.bf16.msra.mxu0 %v14964_v42  ;;  %v8183_v19 = vpop.f32.mrb[133].mxu1  ;;  %10861 = vmatprep.subr.bf16.mxu1 %v14967_v39  ;;  %v14970_v42 = vld [vmem:[#allocation20 + $0x360] ss:$12 sps:$4 sm:$0xff]   ;;  %v14978_v14 = vld [vmem:[#allocation20 + $0x5d8] ss:$12 sps:$4 sm:$0xff]  }
0x1250   : > { %v13475_v25 = vadd.f32 %v8327_v57, %v18504_v15  ;;  %v13460_v48 = vadd.f32 %v8183_v19, %v18507_v8  ;;  %v8329_v11 = vpop.f32.mrb[165].mxu0  ;;  %v8185_v33 = vpop.f32.mrb[134].mxu1  ;;  %11325 = vmatprep.mubr.bf16.mxu0 %v18563_v16  ;;  %13047 = vmatprep.subr.bf16.mxu0 %v14968_v49  ;;  %v14974_v26 = vld [vmem:[#allocation20 + $0x500] ss:$12 sps:$4 sm:$0xff]  }
0x1251   : > { %v13476_v61 = vadd.f32 %v8329_v11, %v18510_v58  ;;  %v13461_v38 = vadd.f32 %v8185_v33, %v18501_v50  ;;  %v8331_v45 = vpop.f32.mrb[166].mxu0  ;;  %v8187_v56 = vpop.f32.mrb[135].mxu1  ;;  %11326 = vmatmul.mubr.bf16.gmra.mrb[224].mxu0 %v18558_v30  ;;  %v8704_v39 = vmax.f32 %v13459_v53, 0.0  ;;  %v15012_v11 = vld [vmem:[#allocation20 + $0x6c8] ss:$12 sps:$4 sm:$0xff]  }
0x1252   : > { %v13477_v40 = vadd.f32 %v8331_v45, %v18504_v15  ;;  %10862 = vmatpush1.bf16.msra.mxu1 %v14965_v28  ;;  %v13462_v9 = vadd.f32 %v8187_v56, %v18507_v8  ;;  %v8333_v46 = vpop.f32.mrb[167].mxu0  ;;  %v8706_v50 = vmax.f32 %v13475_v25, 0.0  ;;  %v8705_v49 = vmax.f32 %v13460_v48, 0.0  ;;  %v14983_v25 = vld [vmem:[#allocation20 + $0x5f0] ss:$12 sps:$4 sm:$0xff]  }
0x1253   : > { %v8716_v37 = vmax.f32 %v13461_v38, 0.0  ;;  %v13478_v20 = vadd.f32 %v8333_v46, %v18510_v58  ;;  %13048 = vmatpush3.bf16.msra.mxu0 %v14969_v43  ;;  %10863 = vmatprep.subr.bf16.mxu1 %v14972_v2  ;;  %v8707_v15 = vmax.f32 %v13476_v61, 0.0  ;;  %v14975_v58 = vld [vmem:[#allocation20 + $0x378] ss:$12 sps:$4 sm:$0xff]   ;;  %v14982_v2 = vld [vmem:[#allocation20 + $0x394] ss:$12 sps:$4 sm:$0xff]  }
0x1254   : > { %v8718_v6 = vmax.f32 %v13477_v40, 0.0  ;;  %v8717_v59 = vmax.f32 %v13462_v9, 0.0  ;;  %13049 = vmatprep.subr.bf16.mxu0 %v14973_v12  ;;  %v14979_v43 = vld [vmem:[#allocation20 + $0x518] ss:$12 sps:$4 sm:$0xff]   ;;  %v14985_v33 = vld [vmem:[#allocation20 + $0x3a8] ss:$12 sps:$4 sm:$0xff]  }
0x1255   : > { %v18578_v28 = vpack.c.bf16 %v8716_v37, %v8704_v39  ;;  %v8719_v8 = vmax.f32 %v13478_v20, 0.0  ;;  %10835 = vmatmul.mubr.bf16.gmra.mrb[160].mxu1 %v18453_v41  ;;  %v14980_v41 = vld [vmem:[#allocation20 + $0x390] ss:$12 sps:$4 sm:$0xff]   ;;  %v14987_v48 = vld [vmem:[#allocation20 + $0x3ac] ss:$12 sps:$4 sm:$0xff]  }
0x1256   : > { %v18581_v53 = vpack.c.bf16 %v8718_v6, %v8706_v50  ;;  %v18583_v57 = vpack.c.bf16 %v8717_v59, %v8705_v49  ;;  %10844 = vmatprep.mubr.bf16.mxu1 %v18476_v5  ;;  %10864 = vmatpush1.bf16.msra.mxu1 %v14970_v42  ;;  %v14984_v5 = vld [vmem:[#allocation20 + $0x530] ss:$12 sps:$4 sm:$0xff]   ;;  %v15013_v61 = vld [vmem:[#allocation20 + $0x608] ss:$12 sps:$4 sm:$0xff]   ;;  %v15017_v38 = vld [vmem:[#allocation20 + $0x6e0] ss:$12 sps:$4 sm:$0xff]  }
0x1257   : > { %v18586_v19 = vpack.c.bf16 %v8719_v8, %v8707_v15  ;;  %13050 = vmatpush3.bf16.msra.mxu0 %v14974_v26  ;;  %10865 = vmatprep.subr.bf16.mxu1 %v14977_v34  ;;  %v14990_v12 = vld [vmem:[#allocation20 + $0x3c4] ss:$12 sps:$4 sm:$0xff]   ;;  %v14988_v45 = vld [vmem:[#allocation20 + $0x3c0] ss:$12 sps:$4 sm:$0xff]   ;;  %v14993_v56 = vld [vmem:[#allocation20 + $0x3dc] ss:$12 sps:$4 sm:$0xff]  }
0x1258   : > { %11333 = vmatprep.mubr.bf16.mxu0 %v18583_v57  ;;  %13051 = vmatprep.subr.bf16.mxu0 %v14978_v14  ;;  %v15022_v40 = vld [vmem:[#allocation20 + $0x6f8] ss:$12 sps:$4 sm:$0xff]   ;;  %v14996_v9 = vld [vmem:[#allocation20 + $0x3f4] ss:$12 sps:$4 sm:$0xff]   ;;  %v15027_v42 = vld [vmem:[#allocation20 + $0x710] ss:$12 sps:$4 sm:$0xff]  }
0x1259   : > { %11334 = vmatmul.mubr.bf16.gmra.mrb[228].mxu0 %v18578_v28  ;;  %v15023_v46 = vld [vmem:[#allocation20 + $0x638] ss:$12 sps:$4 sm:$0xff]   ;;  %v14994_v39 = vld [vmem:[#allocation20 + $0x3f0] ss:$12 sps:$4 sm:$0xff]   ;;  %v15032_v26 = vld [vmem:[#allocation20 + $0x728] ss:$12 sps:$4 sm:$0xff]  }
0x125a   : > { %10866 = vmatpush1.bf16.msra.mxu1 %v14975_v58  ;;  %11374 = vmatprep.mubr.bf16.mxu0 %v18526_v4  ;;  %v14999_v37 = vld [vmem:[#allocation20 + $0x40c] ss:$12 sps:$4 sm:$0xff]   ;;  %v15028_v20 = vld [vmem:[#allocation20 + $0x650] ss:$12 sps:$4 sm:$0xff]   ;;  %v14997_v34 = vld [vmem:[#allocation20 + $0x408] ss:$12 sps:$4 sm:$0xff]  }
0x125b   : > { %13052 = vmatpush3.bf16.msra.mxu0 %v14979_v43  ;;  %10867 = vmatprep.subr.bf16.mxu1 %v14982_v2  ;;  %v15002_v50 = vld [vmem:[#allocation20 + $0x424] ss:$12 sps:$4 sm:$0xff]   ;;  %v15033_v49 = vld [vmem:[#allocation20 + $0x668] ss:$12 sps:$4 sm:$0xff]   ;;  %v15037_v6 = vld [vmem:[#allocation20 + $0x740] ss:$12 sps:$4 sm:$0xff]  }
0x125c   : > { %13053 = vmatprep.subr.bf16.mxu0 %v14983_v25  ;;  %v15000_v59 = vld [vmem:[#allocation20 + $0x420] ss:$12 sps:$4 sm:$0xff]   ;;  %v15005_v14 = vld [vmem:[#allocation20 + $0x43c] ss:$12 sps:$4 sm:$0xff]   ;;  %v15042_v8 = vld [vmem:[#allocation20 + $0x758] ss:$12 sps:$4 sm:$0xff]  }
0x125d   : > { %10845 = vmatmul.mubr.bf16.gmra.mrb[164].mxu1 %v18471_v31  ;;  %v15018_v31 = vld [vmem:[#allocation20 + $0x620] ss:$12 sps:$4 sm:$0xff]   ;;  %v15003_v58 = vld [vmem:[#allocation20 + $0x438] ss:$12 sps:$4 sm:$0xff]   ;;  %v15047_v25 = vld [vmem:[#allocation20 + $0x770] ss:$12 sps:$4 sm:$0xff]  }
0x125e   : > { %10868 = vmatpush1.bf16.msra.mxu1 %v14980_v41  ;;  %10887 = vmatprep.mubr.bf16.mxu1 %v18524_v13  ;;  %v14991_v13 = vld [vmem:[#allocation20 + $0x3d8] ss:$12 sps:$4 sm:$0xff]   ;;  %v15038_v15 = vld [vmem:[#allocation20 + $0x680] ss:$12 sps:$4 sm:$0xff]   ;;  %v15006_v41 = vld [vmem:[#allocation20 + $0x450] ss:$12 sps:$4 sm:$0xff]  }
0x125f   : > { %13054 = vmatpush3.bf16.msra.mxu0 %v14984_v5  ;;  %10869 = vmatprep.subr.bf16.mxu1 %v14987_v48  ;;  %v15008_v43 = vld [vmem:[#allocation20 + $0x454] ss:$12 sps:$4 sm:$0xff]   ;;  %v15043_v2 = vld [vmem:[#allocation20 + $0x698] ss:$12 sps:$4 sm:$0xff]   ;;  %v15048_v48 = vld [vmem:[#allocation20 + $0x6b0] ss:$12 sps:$4 sm:$0xff]  }
0x1260   : > { %13079 = vmatprep.subr.bf16.mxu0 %v15012_v11  ;;  %v15011_v5 = vld [vmem:[#allocation20 + $0x46c] ss:$12 sps:$4 sm:$0xff]   ;;  %v15052_v11 = vld [vmem:[#allocation20 + $0x848] ss:$12 sps:$4 sm:$0xff]  }
0x1262   : > { %10870 = vmatpush1.bf16.msra.mxu1 %v14985_v33  ;;  %11375 = vmatmul.mubr.bf16.vlgmr.msra.gmra.mrb[232].mxu0 %v18522_v52  ;;  %v15009_v33 = vld [vmem:[#allocation20 + $0x468] ss:$12 sps:$4 sm:$0xff]  }
0x1263   : > { %11382 = vmatprep.mubr.bf16.mxu0 %v18546_v60  ;;  %10871 = vmatprep.subr.bf16.mxu1 %v14990_v12  ;;  %v15016_v12 = vld [vmem:[#allocation20 + $0x484] ss:$12 sps:$4 sm:$0xff]  }
0x1264   : > { %13080 = vmatpush3.bf16.msra.mxu0 %v15013_v61  ;;  %v15014_v61 = vld [vmem:[#allocation20 + $0x480] ss:$12 sps:$4 sm:$0xff]  }
0x1265   : > { %13081 = vmatprep.subr.bf16.mxu0 %v15017_v38  ;;  %v15021_v38 = vld [vmem:[#allocation20 + $0x49c] ss:$12 sps:$4 sm:$0xff]  }
0x1266   : > { %10872 = vmatpush1.bf16.msra.mxu1 %v14988_v45  ;;  %v15019_v45 = vld [vmem:[#allocation20 + $0x498] ss:$12 sps:$4 sm:$0xff]  }
0x1267   : > { %10873 = vmatprep.subr.bf16.mxu1 %v14993_v56  ;;  %v15026_v56 = vld [vmem:[#allocation20 + $0x4b4] ss:$12 sps:$4 sm:$0xff]  }
0x1268   : > { %13082 = vmatpush3.bf16.msra.mxu0 %v15018_v31  ;;  %v15024_v31 = vld [vmem:[#allocation20 + $0x4b0] ss:$12 sps:$4 sm:$0xff]  }
0x1269   : > { %13083 = vmatprep.subr.bf16.mxu0 %v15022_v40  ;;  %v15031_v40 = vld [vmem:[#allocation20 + $0x4cc] ss:$12 sps:$4 sm:$0xff]  }
0x126a   : > { %10874 = vmatpush1.bf16.msra.mxu1 %v14991_v13  ;;  %11383 = vmatmul.mubr.bf16.gmra.mrb[236].mxu0 %v18541_v62  ;;  %v15029_v13 = vld [vmem:[#allocation20 + $0x4c8] ss:$12 sps:$4 sm:$0xff]  }
0x126b   : > { %11390 = vmatprep.mubr.bf16.mxu0 %v18566_v22  ;;  %10875 = vmatprep.subr.bf16.mxu1 %v14996_v9  ;;  %v15036_v9 = vld [vmem:[#allocation20 + $0x4e4] ss:$12 sps:$4 sm:$0xff]  }
0x126c   : > { %13084 = vmatpush3.bf16.msra.mxu0 %v15023_v46  ;;  %v6249_v46 = vld [vmem:[#allocation18 + $0x8] sm:$0xf] }
0x126d   : > { %13085 = vmatprep.subr.bf16.mxu0 %v15027_v42  ;;  %v18605_v42 = vrot.slane %v6249_v46, %v19074_v32 }
0x126e   : > { %10876 = vmatpush1.bf16.msra.mxu1 %v14994_v39  ;;  %v18609_v39 = vrot.slane %v6249_v46, %v19076_v21 }
0x126f   : > { %10877 = vmatprep.subr.bf16.mxu1 %v14999_v37  ;;  %v15039_v37 = vld [vmem:[#allocation20 + $0x4f8] ss:$12 sps:$4 sm:$0xff]  }
0x1270   : > { %13086 = vmatpush3.bf16.msra.mxu0 %v15028_v20 }
0x1271   : > { %13087 = vmatprep.subr.bf16.mxu0 %v15032_v26  ;;  %v15046_v26 = vld [vmem:[#allocation20 + $0x514] ss:$12 sps:$4 sm:$0xff]  }
0x1272   : > { %10878 = vmatpush1.bf16.msra.mxu1 %v14997_v34  ;;  %11391 = vmatmul.mubr.bf16.gmra.mrb[240].mxu0 %v18561_v24 }
0x1273   : > { %11398 = vmatprep.mubr.bf16.mxu0 %v18586_v19  ;;  %10879 = vmatprep.subr.bf16.mxu1 %v15002_v50 }
0x1274   : > { %13088 = vmatpush3.bf16.msra.mxu0 %v15033_v49 }
0x1275   : > { %13089 = vmatprep.subr.bf16.mxu0 %v15037_v6 }
0x1276   : > { %10880 = vmatpush1.bf16.msra.mxu1 %v15000_v59 }
0x1277   : > { %10881 = vmatprep.subr.bf16.mxu1 %v15005_v14 }
0x1278   : > { %13090 = vmatpush3.bf16.msra.mxu0 %v15038_v15 }
0x1279   : > { %13091 = vmatprep.subr.bf16.mxu0 %v15042_v8  ;;  %v15044_v8 = vld [vmem:[#allocation20 + $0x510] ss:$12 sps:$4 sm:$0xff]  }
0x127a   : > { %10882 = vmatpush1.bf16.msra.mxu1 %v15003_v58  ;;  %11399 = vmatmul.mubr.bf16.gmra.mrb[244].mxu0 %v18581_v53 }
0x127b   : > { %10883 = vmatprep.subr.bf16.mxu1 %v15008_v43 }
0x127c   : > { %13092 = vmatpush3.bf16.msra.mxu0 %v15043_v2 }
0x127d   : > { %13093 = vmatprep.subr.bf16.mxu0 %v15047_v25  ;;  %v15051_v25 = vld [vmem:[#allocation20 + $0x52c] ss:$12 sps:$4 sm:$0xff]  }
0x127e   : > { %10884 = vmatpush1.bf16.msra.mxu1 %v15006_v41 }
0x127f   : > { %10885 = vmatprep.subr.bf16.mxu1 %v15011_v5 }
0x1280   : > { %13094 = vmatpush3.bf16.msra.mxu0 %v15048_v48 }
0x1281   : > { %13119 = vmatprep.subr.bf16.mxu0 %v15052_v11 }
0x1282   : > { %10886 = vmatpush1.bf16.msra.mxu1 %v15009_v33 }
0x1283   : > { %10928 = vmatprep.subr.bf16.mxu1 %v15016_v12 }
0x1285   : > { %10888 = vmatmul.mubr.bf16.vlgmr.msra.gmra.mrb[152].mxu1 %v18520_v23  ;;  %v15034_v23 = vld [vmem:[#allocation20 + $0x4e0] ss:$12 sps:$4 sm:$0xff]  }
0x1286   : > { %10897 = vmatprep.mubr.bf16.mxu1 %v18543_v51  ;;  %10929 = vmatpush1.bf16.msra.mxu1 %v15014_v61  ;;  %v15041_v51 = vld [vmem:[#allocation20 + $0x4fc] ss:$12 sps:$4 sm:$0xff]  }
0x1287   : > { %10930 = vmatprep.subr.bf16.mxu1 %v15021_v38 }
0x128a   : > { %10931 = vmatpush1.bf16.msra.mxu1 %v15019_v45 }
0x128b   : > { %10932 = vmatprep.subr.bf16.mxu1 %v15026_v56 }
0x128d   : > { %10898 = vmatmul.mubr.bf16.gmra.mrb[156].mxu1 %v18538_v1  ;;  %v18612_v1 = vrot.slane %v6249_v46, %v19075_v47 }
0x128e   : > { %10907 = vmatprep.mubr.bf16.mxu1 %v18563_v16  ;;  %10933 = vmatpush1.bf16.msra.mxu1 %v15024_v31  ;;  %v18617_v16 = vrot.slane %v6249_v46, %v6266_v55  ;;  %v15049_v31 = vld [vmem:[#allocation20 + $0x528] ss:$12 sps:$4 sm:$0xff]  }
0x128f   : > { %10934 = vmatprep.subr.bf16.mxu1 %v15031_v40  ;;  %v15053_v46 = vld [vmem:[#allocation20 + $0x788] ss:$12 sps:$4 sm:$0xff]  }
0x1292   : > { %10935 = vmatpush1.bf16.msra.mxu1 %v15029_v13 }
0x1293   : > { %10936 = vmatprep.subr.bf16.mxu1 %v15036_v9 }
0x1295   : > { %10908 = vmatmul.mubr.bf16.gmra.mrb[160].mxu1 %v18558_v30 }
0x1296   : > { %10917 = vmatprep.mubr.bf16.mxu1 %v18583_v57  ;;  %10937 = vmatpush1.bf16.msra.mxu1 %v15034_v23  ;;  %v15056_v23 = vld [vmem:[#allocation20 + $0x544] ss:$12 sps:$4 sm:$0xff]  }
0x1297   : > { %v8443_v20 = vpop.f32.mrb[136].mxu1  ;;  %10938 = vmatprep.subr.bf16.mxu1 %v15041_v51 }
0x1298   : > { %v13479_v34 = vadd.f32 %v8443_v20, %v18605_v42  ;;  %v8589_v30 = vpop.f32.mrb[168].mxu0  ;;  %v8445_v50 = vpop.f32.mrb[137].mxu1 }
0x1299   : > { %v13495_v49 = vadd.f32 %v8589_v30, %v18609_v39  ;;  %v13480_v6 = vadd.f32 %v8445_v50, %v18612_v1  ;;  %v8591_v59 = vpop.f32.mrb[169].mxu0  ;;  %v8447_v14 = vpop.f32.mrb[138].mxu1 }
0x129a   : > { %v13496_v57 = vadd.f32 %v8591_v59, %v18617_v16  ;;  %v13481_v44 = vadd.f32 %v8447_v14, %v18605_v42  ;;  %v8593_v55 = vpop.f32.mrb[170].mxu0  ;;  %10939 = vmatpush1.bf16.msra.mxu1 %v15039_v37  ;;  %v8449_v15 = vpop.f32.mrb[139].mxu1  ;;  %v8636_v41 = vmax.f32 %v13479_v34, 0.0 }
0x129b   : > { %v13497_v58 = vadd.f32 %v8593_v55, %v18609_v39  ;;  %v13482_v43 = vadd.f32 %v8449_v15, %v18612_v1  ;;  %v8595_v2 = vpop.f32.mrb[171].mxu0  ;;  %10940 = vmatprep.subr.bf16.mxu1 %v15046_v26  ;;  %v8638_v11 = vmax.f32 %v13495_v49, 0.0  ;;  %v8637_v33 = vmax.f32 %v13480_v6, 0.0  ;;  %v15057_v26 = vld [vmem:[#allocation20 + $0x860] ss:$12 sps:$4 sm:$0xff]  }
0x129c   : > { %v8648_v5 = vmax.f32 %v13481_v44, 0.0  ;;  %v13498_v48 = vadd.f32 %v8595_v2, %v18617_v16  ;;  %v8639_v38 = vmax.f32 %v13496_v57, 0.0  ;;  %v15054_v57 = vld [vmem:[#allocation20 + $0x540] ss:$12 sps:$4 sm:$0xff]  }
0x129d   : > { %v8650_v12 = vmax.f32 %v13497_v58, 0.0  ;;  %v8649_v61 = vmax.f32 %v13482_v43, 0.0  ;;  %10918 = vmatmul.mubr.bf16.gmra.mrb[164].mxu1 %v18578_v28  ;;  %v15061_v58 = vld [vmem:[#allocation20 + $0x55c] ss:$12 sps:$4 sm:$0xff]  }
0x129e   : > { %v18628_v45 = vpack.c.bf16 %v8648_v5, %v8636_v41  ;;  %v8651_v56 = vmax.f32 %v13498_v48, 0.0  ;;  %10941 = vmatpush1.bf16.msra.mxu1 %v15044_v8  ;;  %10960 = vmatprep.mubr.bf16.mxu1 %v18526_v4  ;;  %v15058_v8 = vld [vmem:[#allocation20 + $0x7a0] ss:$12 sps:$4 sm:$0xff]   ;;  %v15062_v41 = vld [vmem:[#allocation20 + $0x878] ss:$12 sps:$4 sm:$0xff]  }
0x129f   : > { %v18631_v40 = vpack.c.bf16 %v8650_v12, %v8638_v11  ;;  %v18633_v13 = vpack.c.bf16 %v8649_v61, %v8637_v33  ;;  %v8453_v9 = vpop.f32.mrb[140].mxu1  ;;  %10942 = vmatprep.subr.bf16.mxu1 %v15051_v25 }
0x12a0   : > { %v18635_v51 = vpack.c.bf16 %v8651_v56, %v8639_v38  ;;  %v13483_v28 = vadd.f32 %v8453_v9, %v18605_v42  ;;  %v8599_v37 = vpop.f32.mrb[172].mxu0  ;;  %v8455_v20 = vpop.f32.mrb[141].mxu1  ;;  %v15059_v56 = vld [vmem:[#allocation20 + $0x558] ss:$12 sps:$4 sm:$0xff]  }
0x12a1   : > { %v13499_v34 = vadd.f32 %v8599_v37, %v18609_v39  ;;  %v13484_v4 = vadd.f32 %v8455_v20, %v18612_v1  ;;  %v8601_v30 = vpop.f32.mrb[173].mxu0  ;;  %v8457_v50 = vpop.f32.mrb[142].mxu1  ;;  %11439 = vmatprep.mubr.bf16.mxu0 %v18633_v13 }
0x12a2   : > { %v13500_v49 = vadd.f32 %v8601_v30, %v18617_v16  ;;  %v13485_v6 = vadd.f32 %v8457_v50, %v18605_v42  ;;  %v8603_v59 = vpop.f32.mrb[174].mxu0  ;;  %10943 = vmatpush1.bf16.msra.mxu1 %v15049_v31  ;;  %v8459_v14 = vpop.f32.mrb[143].mxu1  ;;  %11440 = vmatmul.mubr.bf16.vlgmr.msra.gmra.mrb[248].mxu0 %v18628_v45  ;;  %v8660_v43 = vmax.f32 %v13483_v28, 0.0  ;;  %v15066_v28 = vld [vmem:[#allocation20 + $0x574] ss:$12 sps:$4 sm:$0xff]  }
0x12a3   : > { %v13501_v44 = vadd.f32 %v8603_v59, %v18609_v39  ;;  %v13486_v55 = vadd.f32 %v8459_v14, %v18612_v1  ;;  %v8605_v15 = vpop.f32.mrb[175].mxu0  ;;  %13120 = vmatpush3.bf16.msra.mxu0 %v15053_v46  ;;  %10944 = vmatprep.subr.bf16.mxu1 %v15056_v23  ;;  %v8662_v5 = vmax.f32 %v13499_v34, 0.0  ;;  %v8661_v48 = vmax.f32 %v13484_v4, 0.0  ;;  %v15063_v23 = vld [vmem:[#allocation20 + $0x7b8] ss:$12 sps:$4 sm:$0xff]  }
0x12a4   : > { %v8672_v2 = vmax.f32 %v13485_v6, 0.0  ;;  %v13502_v25 = vadd.f32 %v8605_v15, %v18617_v16  ;;  %13121 = vmatprep.subr.bf16.mxu0 %v15057_v26  ;;  %v8663_v12 = vmax.f32 %v13500_v49, 0.0  ;;  %v15067_v4 = vld [vmem:[#allocation20 + $0x890] ss:$12 sps:$4 sm:$0xff]  }
0x12a5   : > { %v8674_v11 = vmax.f32 %v13501_v44, 0.0  ;;  %v8673_v33 = vmax.f32 %v13486_v55, 0.0  ;;  %v15064_v55 = vld [vmem:[#allocation20 + $0x570] ss:$12 sps:$4 sm:$0xff]  }
0x12a6   : > { %v18647_v61 = vpack.c.bf16 %v8672_v2, %v8660_v43  ;;  %v8675_v38 = vmax.f32 %v13502_v25, 0.0  ;;  %10945 = vmatpush1.bf16.msra.mxu1 %v15054_v57  ;;  %v15068_v43 = vld [vmem:[#allocation20 + $0x7d0] ss:$12 sps:$4 sm:$0xff]   ;;  %v15071_v2 = vld [vmem:[#allocation20 + $0x58c] ss:$12 sps:$4 sm:$0xff]  }
0x12a7   : > { %v18649_v31 = vpack.c.bf16 %v8674_v11, %v8662_v5  ;;  %v18651_v9 = vpack.c.bf16 %v8673_v33, %v8661_v48  ;;  %v8463_v46 = vpop.f32.mrb[144].mxu1  ;;  %13122 = vmatpush3.bf16.msra.mxu0 %v15058_v8  ;;  %10946 = vmatprep.subr.bf16.mxu1 %v15061_v58  ;;  %v15072_v48 = vld [vmem:[#allocation20 + $0x8a8] ss:$12 sps:$4 sm:$0xff]  }
0x12a8   : > { %v18653_v37 = vpack.c.bf16 %v8675_v38, %v8663_v12  ;;  %v13487_v20 = vadd.f32 %v8463_v46, %v18605_v42  ;;  %v8609_v26 = vpop.f32.mrb[176].mxu0  ;;  %v8465_v34 = vpop.f32.mrb[145].mxu1  ;;  %13123 = vmatprep.subr.bf16.mxu0 %v15062_v41 }
0x12a9   : > { %v13503_v30 = vadd.f32 %v8609_v26, %v18609_v39  ;;  %v13488_v50 = vadd.f32 %v8465_v34, %v18612_v1  ;;  %v8611_v49 = vpop.f32.mrb[177].mxu0  ;;  %v8467_v6 = vpop.f32.mrb[146].mxu1  ;;  %11447 = vmatprep.mubr.bf16.mxu0 %v18651_v9  ;;  %v15069_v34 = vld [vmem:[#allocation20 + $0x588] ss:$12 sps:$4 sm:$0xff]  }
0x12aa   : > { %v13504_v59 = vadd.f32 %v8611_v49, %v18617_v16  ;;  %v13489_v14 = vadd.f32 %v8467_v6, %v18605_v42  ;;  %v8613_v57 = vpop.f32.mrb[178].mxu0  ;;  %10947 = vmatpush1.bf16.msra.mxu1 %v15059_v56  ;;  %v8469_v44 = vpop.f32.mrb[147].mxu1  ;;  %11448 = vmatmul.mubr.bf16.gmra.mrb[252].mxu0 %v18647_v61  ;;  %v8684_v25 = vmax.f32 %v13487_v20, 0.0  ;;  %v15073_v49 = vld [vmem:[#allocation20 + $0x7e8] ss:$12 sps:$4 sm:$0xff]  }
0x12ab   : > { %v13505_v15 = vadd.f32 %v8613_v57, %v18609_v39  ;;  %v13490_v8 = vadd.f32 %v8469_v44, %v18612_v1  ;;  %v8615_v58 = vpop.f32.mrb[179].mxu0  ;;  %13124 = vmatpush3.bf16.msra.mxu0 %v15063_v23  ;;  %10948 = vmatprep.subr.bf16.mxu1 %v15066_v28  ;;  %v8686_v11 = vmax.f32 %v13503_v30, 0.0  ;;  %v8685_v33 = vmax.f32 %v13488_v50, 0.0 }
0x12ac   : > { %v8696_v41 = vmax.f32 %v13489_v14, 0.0  ;;  %v13506_v5 = vadd.f32 %v8615_v58, %v18617_v16  ;;  %13125 = vmatprep.subr.bf16.mxu0 %v15067_v4  ;;  %v8687_v56 = vmax.f32 %v13504_v59, 0.0  ;;  %v15076_v4 = vld [vmem:[#allocation20 + $0x5a4] ss:$12 sps:$4 sm:$0xff]   ;;  %v15077_v14 = vld [vmem:[#allocation20 + $0x8c0] ss:$12 sps:$4 sm:$0xff]  }
0x12ad   : > { %v8698_v12 = vmax.f32 %v13505_v15, 0.0  ;;  %v8697_v38 = vmax.f32 %v13490_v8, 0.0 }
0x12ae   : > { %v18665_v46 = vpack.c.bf16 %v8696_v41, %v8684_v25  ;;  %v8699_v26 = vmax.f32 %v13506_v5, 0.0  ;;  %10949 = vmatpush1.bf16.msra.mxu1 %v15064_v55  ;;  %v15074_v25 = vld [vmem:[#allocation20 + $0x5a0] ss:$12 sps:$4 sm:$0xff]  }
0x12af   : > { %v18667_v23 = vpack.c.bf16 %v8698_v12, %v8686_v11  ;;  %v18669_v28 = vpack.c.bf16 %v8697_v38, %v8685_v33  ;;  %v8473_v20 = vpop.f32.mrb[148].mxu1  ;;  %13126 = vmatpush3.bf16.msra.mxu0 %v15068_v43  ;;  %10950 = vmatprep.subr.bf16.mxu1 %v15071_v2  ;;  %v15078_v11 = vld [vmem:[#allocation20 + $0x800] ss:$12 sps:$4 sm:$0xff]   ;;  %v15081_v33 = vld [vmem:[#allocation20 + $0x5bc] ss:$12 sps:$4 sm:$0xff]  }
0x12b0   : > { %v18671_v6 = vpack.c.bf16 %v8699_v26, %v8687_v56  ;;  %v13491_v30 = vadd.f32 %v8473_v20, %v18605_v42  ;;  %v8619_v50 = vpop.f32.mrb[180].mxu0  ;;  %v8475_v59 = vpop.f32.mrb[149].mxu1  ;;  %13127 = vmatprep.subr.bf16.mxu0 %v15072_v48 }
0x12b1   : > { %v13507_v57 = vadd.f32 %v8619_v50, %v18609_v39  ;;  %v13492_v44 = vadd.f32 %v8475_v59, %v18612_v1  ;;  %v8621_v55 = vpop.f32.mrb[181].mxu0  ;;  %v8477_v15 = vpop.f32.mrb[150].mxu1  ;;  %11455 = vmatprep.mubr.bf16.mxu0 %v18669_v28 }
0x12b2   : > { %v13508_v8 = vadd.f32 %v8621_v55, %v18617_v16  ;;  %v13493_v58 = vadd.f32 %v8477_v15, %v18605_v42  ;;  %v8623_v43 = vpop.f32.mrb[182].mxu0  ;;  %10951 = vmatpush1.bf16.msra.mxu1 %v15069_v34  ;;  %v8479_v2 = vpop.f32.mrb[151].mxu1  ;;  %11456 = vmatmul.mubr.bf16.gmra.mrb[0].mxu0 %v18665_v46  ;;  %v8708_v12 = vmax.f32 %v13491_v30, 0.0  ;;  %v15082_v42 = vld [vmem:[#allocation20 + $0x8d8] ss:$12 sps:$4 sm:$0xff]  }
0x12b3   : > { %v13509_v41 = vadd.f32 %v8623_v43, %v18609_v39  ;;  %v13494_v5 = vadd.f32 %v8479_v2, %v18612_v1  ;;  %v8625_v48 = vpop.f32.mrb[183].mxu0  ;;  %13128 = vmatpush3.bf16.msra.mxu0 %v15073_v49  ;;  %10952 = vmatprep.subr.bf16.mxu1 %v15076_v4  ;;  %v8710_v26 = vmax.f32 %v13507_v57, 0.0  ;;  %v8709_v34 = vmax.f32 %v13492_v44, 0.0  ;;  %v15079_v1 = vld [vmem:[#allocation20 + $0x5b8] ss:$12 sps:$4 sm:$0xff]  }
0x12b4   : > { %v8720_v38 = vmax.f32 %v13493_v58, 0.0  ;;  %v13510_v56 = vadd.f32 %v8625_v48, %v18617_v16  ;;  %13129 = vmatprep.subr.bf16.mxu0 %v15077_v14  ;;  %v8711_v59 = vmax.f32 %v13508_v8, 0.0  ;;  %v15083_v30 = vld [vmem:[#allocation20 + $0x818] ss:$12 sps:$4 sm:$0xff]   ;;  %v15086_v57 = vld [vmem:[#allocation20 + $0x5d4] ss:$12 sps:$4 sm:$0xff]  }
0x12b5   : > { %v8722_v20 = vmax.f32 %v13509_v41, 0.0  ;;  %v8721_v50 = vmax.f32 %v13494_v5, 0.0  ;;  %v15087_v44 = vld [vmem:[#allocation20 + $0x8f0] ss:$12 sps:$4 sm:$0xff]   ;;  %v15091_v41 = vld [vmem:[#allocation20 + $0x5ec] ss:$12 sps:$4 sm:$0xff]  }
0x12b6   : > { %v18683_v55 = vpack.c.bf16 %v8720_v38, %v8708_v12  ;;  %v8723_v39 = vmax.f32 %v13510_v56, 0.0  ;;  %10953 = vmatpush1.bf16.msra.mxu1 %v15074_v25  ;;  %v15084_v43 = vld [vmem:[#allocation20 + $0x5d0] ss:$12 sps:$4 sm:$0xff]   ;;  %v15089_v48 = vld [vmem:[#allocation20 + $0x5e8] ss:$12 sps:$4 sm:$0xff]  }
0x12b7   : > { %v18685_v49 = vpack.c.bf16 %v8722_v20, %v8710_v26  ;;  %v18687_v4 = vpack.c.bf16 %v8721_v50, %v8709_v34  ;;  %13130 = vmatpush3.bf16.msra.mxu0 %v15078_v11  ;;  %10954 = vmatprep.subr.bf16.mxu1 %v15081_v33  ;;  %v15088_v25 = vld [vmem:[#allocation20 + $0x830] ss:$12 sps:$4 sm:$0xff]   ;;  %v15095_v50 = vld [vmem:[#allocation20 + $0x618] ss:$12 sps:$4 sm:$0xff]  }
0x12b8   : > { %v18689_v16 = vpack.c.bf16 %v8723_v39, %v8711_v59  ;;  %v12935_v14 = vpop.f32.mrb[184].mxu0  ;;  %13131 = vmatprep.subr.bf16.mxu0 %v15082_v42  ;;  %v15094_v11 = vld [vmem:[#allocation20 + $0x604] ss:$12 sps:$4 sm:$0xff]   ;;  %v15092_v42 = vld [vmem:[#allocation20 + $0x600] ss:$12 sps:$4 sm:$0xff]  }
0x12b9   : > { %v12936_v15 = vpop.f32.mrb[185].mxu0  ;;  %11463 = vmatprep.mubr.bf16.mxu0 %v18687_v4  ;;  %v15097_v34 = vld [vmem:[#allocation20 + $0x61c] ss:$12 sps:$4 sm:$0xff]   ;;  %v15100_v59 = vld [vmem:[#allocation20 + $0x634] ss:$12 sps:$4 sm:$0xff]  }
0x12ba   : > { %v18692_v8 = vadd.f32 %v12936_v15, %v12935_v14  ;;  %10955 = vmatpush1.bf16.msra.mxu1 %v15079_v1  ;;  %v12938_v58 = vpop.f32.mrb[186].mxu0  ;;  %11464 = vmatmul.mubr.bf16.gmra.mrb[4].mxu0 %v18683_v55 }
0x12bb   : > { %v12939_v2 = vpop.f32.mrb[187].mxu0  ;;  %13132 = vmatpush3.bf16.msra.mxu0 %v15083_v30  ;;  %11504 = vmatprep.mubr.bf16.mxu0 %v18635_v51 }
0x12bc   : > { %v18696_v5 = vadd.f32 %v12939_v2, %v12938_v58  ;;  %10956 = vmatprep.subr.bf16.mxu1 %v15086_v57  ;;  %13133 = vmatprep.subr.bf16.mxu0 %v15087_v44  ;;  %v15098_v57 = vld [vmem:[#allocation20 + $0x630] ss:$12 sps:$4 sm:$0xff]  }
0x12bd   : > { %v15106_v58 = vld [vmem:[#allocation20 + $0x664] ss:$12 sps:$4 sm:$0xff]  }
0x12be   : > { %10957 = vmatpush1.bf16.msra.mxu1 %v15084_v43 }
0x12bf   : > { %13134 = vmatpush3.bf16.msra.mxu0 %v15088_v25  ;;  %10958 = vmatprep.subr.bf16.mxu1 %v15091_v41 }
0x12c0   : > { %v12941_v33 = vpop.f32.mrb[188].mxu0 }
0x12c1   : > { %v12942_v12 = vpop.f32.mrb[189].mxu0 }
0x12c2   : > { %v18698_v38 = vadd.f32 %v12942_v12, %v12941_v33  ;;  %10959 = vmatpush1.bf16.msra.mxu1 %v15089_v48  ;;  %v12944_v56 = vpop.f32.mrb[190].mxu0  ;;  %11505 = vmatmul.mubr.bf16.vlgmr.msra.gmra.mrb[8].mxu0 %v18631_v40  ;;  %v15104_v48 = vld [vmem:[#allocation20 + $0x660] ss:$12 sps:$4 sm:$0xff]  }
0x12c3   : > { %v12945_v26 = vpop.f32.mrb[191].mxu0  ;;  %11512 = vmatprep.mubr.bf16.mxu0 %v18653_v37  ;;  %11001 = vmatprep.subr.bf16.mxu1 %v15094_v11  ;;  %v18717_v11 = vld [vmem:[#allocation21] sm:$0x7] }
0x12c4   : > { %v18702_v20 = vadd.f32 %v12945_v26, %v12944_v56  ;;  %v18725_v12 = vrot.slane %v18717_v11, %v19076_v21  ;;  %v15107_v56 = vld [vmem:[#allocation20 + $0x678] ss:$12 sps:$4 sm:$0xff]  }
0x12c5   : > { %10961 = vmatmul.mubr.bf16.vlgmr.msra.gmra.mrb[152].mxu1 %v18522_v52  ;;  %v15103_v52 = vld [vmem:[#allocation20 + $0x64c] ss:$12 sps:$4 sm:$0xff]  }
0x12c6   : > { %10970 = vmatprep.mubr.bf16.mxu1 %v18546_v60  ;;  %11002 = vmatpush1.bf16.msra.mxu1 %v15092_v42  ;;  %v15101_v60 = vld [vmem:[#allocation20 + $0x648] ss:$12 sps:$4 sm:$0xff]   ;;  %v15115_v21 = vld [vmem:[#allocation20 + $0x6ac] ss:$12 sps:$4 sm:$0xff]  }
0x12c7   : > { %11003 = vmatprep.subr.bf16.mxu1 %v15097_v34  ;;  %v15112_v42 = vld [vmem:[#allocation20 + $0x694] ss:$12 sps:$4 sm:$0xff]  }
0x12c8   : > { %v12947_v39 = vpop.f32.mrb[192].mxu0 }
0x12c9   : > { %v12948_v1 = vpop.f32.mrb[193].mxu0 }
0x12ca   : > { %v18706_v30 = vadd.f32 %v12948_v1, %v12947_v39  ;;  %11004 = vmatpush1.bf16.msra.mxu1 %v15095_v50  ;;  %v12950_v14 = vpop.f32.mrb[194].mxu0  ;;  %11513 = vmatmul.mubr.bf16.gmra.mrb[12].mxu0 %v18649_v31  ;;  %v11182_v50 = vadd.f32 %v18692_v8, %v18725_v12  ;;  %v15113_v8 = vld [vmem:[#allocation20 + $0x6a8] ss:$12 sps:$4 sm:$0xff]  }
0x12cb   : > { %v12951_v44 = vpop.f32.mrb[195].mxu0  ;;  %11520 = vmatprep.mubr.bf16.mxu0 %v18671_v6  ;;  %11005 = vmatprep.subr.bf16.mxu1 %v15100_v59 }
0x12cc   : > { %v18710_v15 = vadd.f32 %v12951_v44, %v12950_v14 }
0x12cd   : > { %10971 = vmatmul.mubr.bf16.gmra.mrb[156].mxu1 %v18541_v62  ;;  %v15109_v62 = vld [vmem:[#allocation20 + $0x67c] ss:$12 sps:$4 sm:$0xff]  }
0x12ce   : > { %10980 = vmatprep.mubr.bf16.mxu1 %v18566_v22  ;;  %11006 = vmatpush1.bf16.msra.mxu1 %v15098_v57 }
0x12cf   : > { %11007 = vmatprep.subr.bf16.mxu1 %v15103_v52  ;;  %v15118_v52 = vld [vmem:[#allocation20 + $0x6c4] ss:$12 sps:$4 sm:$0xff]  }
0x12d0   : > { %v12953_v43 = vpop.f32.mrb[196].mxu0 }
0x12d1   : > { %v12954_v2 = vpop.f32.mrb[197].mxu0 }
0x12d2   : > { %v18714_v25 = vadd.f32 %v12954_v2, %v12953_v43  ;;  %11008 = vmatpush1.bf16.msra.mxu1 %v15101_v60  ;;  %v12956_v41 = vpop.f32.mrb[198].mxu0  ;;  %11521 = vmatmul.mubr.bf16.gmra.mrb[16].mxu0 %v18667_v23  ;;  %v11190_v43 = vadd.f32 %v18698_v38, %v18725_v12 }
0x12d3   : > { %v12957_v33 = vpop.f32.mrb[199].mxu0  ;;  %11528 = vmatprep.mubr.bf16.mxu0 %v18689_v16  ;;  %11009 = vmatprep.subr.bf16.mxu1 %v15106_v58 }
0x12d4   : > { %v18720_v22 = vadd.f32 %v12957_v33, %v12956_v41  ;;  %v15116_v41 = vld [vmem:[#allocation20 + $0x6c0] ss:$12 sps:$4 sm:$0xff]   ;;  %v11193_v33 = vadd.f32 %v18702_v20, %v18725_v12 }
0x12d5   : > { %10981 = vmatmul.mubr.bf16.gmra.mrb[160].mxu1 %v18561_v24  ;;  %v15110_v24 = vld [vmem:[#allocation20 + $0x690] ss:$12 sps:$4 sm:$0xff]   ;;  %v15127_v20 = vld [vmem:[#allocation20 + $0x70c] ss:$12 sps:$4 sm:$0xff]  }
0x12d6   : > { %10990 = vmatprep.mubr.bf16.mxu1 %v18586_v19  ;;  %11010 = vmatpush1.bf16.msra.mxu1 %v15104_v48  ;;  %v11185_v19 = vadd.f32 %v18696_v5, %v18725_v12 }
0x12d7   : > { %11011 = vmatprep.subr.bf16.mxu1 %v15109_v62 }
0x12d8   : > { %v12975_v26 = vpop.f32.mrb[200].mxu0 }
0x12d9   : > { %v12976_v34 = vpop.f32.mrb[201].mxu0 }
0x12da   : > { %v12977_v59 = vadd.f32 %v12976_v34, %v12975_v26  ;;  %11012 = vmatpush1.bf16.msra.mxu1 %v15107_v56  ;;  %v12978_v39 = vpop.f32.mrb[202].mxu0  ;;  %11529 = vmatmul.mubr.bf16.gmra.mrb[20].mxu0 %v18685_v49  ;;  %v15124_v26 = vld [vmem:[#allocation20 + $0x6f4] ss:$12 sps:$4 sm:$0xff]  }
0x12db   : > { %v12979_v1 = vpop.f32.mrb[203].mxu0  ;;  %11013 = vmatprep.subr.bf16.mxu1 %v15112_v42  ;;  %v15119_v42 = vld [vmem:[#allocation20 + $0x6d8] ss:$12 sps:$4 sm:$0xff]  }
0x12dc   : > { %v18733_v14 = vadd.f32 %v12977_v59, %v11182_v50  ;;  %v12980_v57 = vadd.f32 %v12979_v1, %v12978_v39  ;;  %v11198_v50 = vadd.f32 %v18706_v30, %v18725_v12 }
0x12dd   : > { %10991 = vmatmul.mubr.bf16.gmra.mrb[164].mxu1 %v18581_v53  ;;  %v15121_v53 = vld [vmem:[#allocation20 + $0x6dc] ss:$12 sps:$4 sm:$0xff]  }
0x12de   : > { %v18736_v44 = vadd.f32 %v12980_v57, %v11185_v19  ;;  %11014 = vmatpush1.bf16.msra.mxu1 %v15110_v24  ;;  %11033 = vmatprep.mubr.bf16.mxu1 %v18633_v13  ;;  %v15122_v24 = vld [vmem:[#allocation20 + $0x6f0] ss:$12 sps:$4 sm:$0xff]  }
0x12df   : > { %11015 = vmatprep.subr.bf16.mxu1 %v15115_v21  ;;  %v11201_v21 = vadd.f32 %v18710_v15, %v18725_v12  ;;  %v15133_v15 = vld [vmem:[#allocation20 + $0x73c] ss:$12 sps:$4 sm:$0xff]  }
0x12e0   : > { %v12981_v60 = vpop.f32.mrb[204].mxu0 }
0x12e1   : > { %v12982_v58 = vpop.f32.mrb[205].mxu0 }
0x12e2   : > { %v12983_v2 = vadd.f32 %v12982_v58, %v12981_v60  ;;  %11016 = vmatpush1.bf16.msra.mxu1 %v15113_v8  ;;  %v12984_v5 = vpop.f32.mrb[206].mxu0  ;;  %v15130_v60 = vld [vmem:[#allocation20 + $0x724] ss:$12 sps:$4 sm:$0xff]  }
0x12e3   : > { %v12985_v48 = vpop.f32.mrb[207].mxu0  ;;  %11017 = vmatprep.subr.bf16.mxu1 %v15118_v52  ;;  %v15125_v52 = vld [vmem:[#allocation20 + $0x708] ss:$12 sps:$4 sm:$0xff]  }
0x12e4   : > { %v18743_v62 = vadd.f32 %v12983_v2, %v11190_v43  ;;  %v12986_v13 = vadd.f32 %v12985_v48, %v12984_v5  ;;  %v11206_v43 = vadd.f32 %v18714_v25, %v18725_v12  ;;  %v15134_v25 = vld [vmem:[#allocation20 + $0x750] ss:$12 sps:$4 sm:$0xff]  }
0x12e6   : > { %v18745_v56 = vadd.f32 %v12986_v13, %v11193_v33  ;;  %11018 = vmatpush1.bf16.msra.mxu1 %v15116_v41  ;;  %v15128_v41 = vld [vmem:[#allocation20 + $0x720] ss:$12 sps:$4 sm:$0xff]  }
0x12e7   : > { %11019 = vmatprep.subr.bf16.mxu1 %v15121_v53  ;;  %v11209_v53 = vadd.f32 %v18720_v22, %v18725_v12  ;;  %v15145_v22 = vld [vmem:[#allocation20 + $0x79c] ss:$12 sps:$4 sm:$0xff]   ;;  %v15143_v12 = vld [vmem:[#allocation20 + $0x798] ss:$12 sps:$4 sm:$0xff]  }
0x12e8   : > { %v12987_v38 = vpop.f32.mrb[208].mxu0 }
0x12e9   : > { %v12988_v34 = vpop.f32.mrb[209].mxu0 }
0x12ea   : > { %v12989_v59 = vadd.f32 %v12988_v34, %v12987_v38  ;;  %11020 = vmatpush1.bf16.msra.mxu1 %v15119_v42  ;;  %v12990_v39 = vpop.f32.mrb[210].mxu0  ;;  %v15136_v38 = vld [vmem:[#allocation20 + $0x754] ss:$12 sps:$4 sm:$0xff]   ;;  %v15139_v34 = vld [vmem:[#allocation20 + $0x76c] ss:$12 sps:$4 sm:$0xff]  }
0x12eb   : > { %v12991_v1 = vpop.f32.mrb[211].mxu0  ;;  %11021 = vmatprep.subr.bf16.mxu1 %v15124_v26  ;;  %v15131_v26 = vld [vmem:[#allocation20 + $0x738] ss:$12 sps:$4 sm:$0xff]  }
0x12ec   : > { %v18751_v19 = vadd.f32 %v12989_v59, %v11198_v50  ;;  %v12992_v57 = vadd.f32 %v12991_v1, %v12990_v39  ;;  %v15137_v50 = vld [vmem:[#allocation20 + $0x768] ss:$12 sps:$4 sm:$0xff]   ;;  %v15142_v59 = vld [vmem:[#allocation20 + $0x784] ss:$12 sps:$4 sm:$0xff]   ;;  %v15140_v39 = vld [vmem:[#allocation20 + $0x780] ss:$12 sps:$4 sm:$0xff]  }
0x12ed   : > { %v15146_v1 = vld [vmem:[#allocation20 + $0x7b0] ss:$12 sps:$4 sm:$0xff]  }
0x12ee   : > { %v18753_v8 = vadd.f32 %v12992_v57, %v11201_v21  ;;  %11022 = vmatpush1.bf16.msra.mxu1 %v15122_v24  ;;  %v15148_v24 = vld [vmem:[#allocation20 + $0x7b4] ss:$12 sps:$4 sm:$0xff]   ;;  %v15154_v57 = vld [vmem:[#allocation20 + $0x7e4] ss:$12 sps:$4 sm:$0xff]  }
0x12ef   : > { %11023 = vmatprep.subr.bf16.mxu1 %v15127_v20  ;;  %v15151_v20 = vld [vmem:[#allocation20 + $0x7cc] ss:$12 sps:$4 sm:$0xff]   ;;  %v15149_v21 = vld [vmem:[#allocation20 + $0x7c8] ss:$12 sps:$4 sm:$0xff]  }
0x12f0   : > { %v12993_v30 = vpop.f32.mrb[212].mxu0 }
0x12f1   : > { %v12994_v58 = vpop.f32.mrb[213].mxu0 }
0x12f2   : > { %v12995_v2 = vadd.f32 %v12994_v58, %v12993_v30  ;;  %11024 = vmatpush1.bf16.msra.mxu1 %v15125_v52  ;;  %v12996_v5 = vpop.f32.mrb[214].mxu0 }
0x12f3   : > { %v12997_v48 = vpop.f32.mrb[215].mxu0  ;;  %11025 = vmatprep.subr.bf16.mxu1 %v15130_v60 }
0x12f4   : > { %v18759_v33 = vadd.f32 %v12995_v2, %v11206_v43  ;;  %v12998_v13 = vadd.f32 %v12997_v48, %v12996_v5  ;;  %v15160_v43 = vld [vmem:[#allocation20 + $0x814] ss:$12 sps:$4 sm:$0xff]   ;;  %v15158_v48 = vld [vmem:[#allocation20 + $0x810] ss:$12 sps:$4 sm:$0xff]  }
0x12f6   : > { %v18761_v42 = vadd.f32 %v12998_v13, %v11209_v53  ;;  %11026 = vmatpush1.bf16.msra.mxu1 %v15128_v41 }
0x12f7   : > { %11027 = vmatprep.subr.bf16.mxu1 %v15133_v15 }
0x12fa   : > { %11028 = vmatpush1.bf16.msra.mxu1 %v15131_v26  ;;  %v15161_v26 = vld [vmem:[#allocation20 + $0x828] ss:$12 sps:$4 sm:$0xff]  }
0x12fb   : > { %11029 = vmatprep.subr.bf16.mxu1 %v15136_v38  ;;  %v15166_v38 = vld [vmem:[#allocation20 + $0x844] ss:$12 sps:$4 sm:$0xff]  }
0x12fe   : > { %11030 = vmatpush1.bf16.msra.mxu1 %v15134_v25 }
0x12ff   : > { %11031 = vmatprep.subr.bf16.mxu1 %v15139_v34 }
0x1302   : > { %11032 = vmatpush1.bf16.msra.mxu1 %v15137_v50  ;;  %v15164_v50 = vld [vmem:[#allocation20 + $0x840] ss:$12 sps:$4 sm:$0xff]  }
0x1303   : > { %11074 = vmatprep.subr.bf16.mxu1 %v15142_v59 }
0x1305   : > { %11034 = vmatmul.mubr.bf16.vlgmr.msra.gmra.mrb[152].mxu1 %v18628_v45  ;;  %v15152_v45 = vld [vmem:[#allocation20 + $0x7e0] ss:$12 sps:$4 sm:$0xff]  }
0x1306   : > { %11043 = vmatprep.mubr.bf16.mxu1 %v18651_v9  ;;  %11075 = vmatpush1.bf16.msra.mxu1 %v15140_v39  ;;  %v15157_v9 = vld [vmem:[#allocation20 + $0x7fc] ss:$12 sps:$4 sm:$0xff]  }
0x1307   : > { %11076 = vmatprep.subr.bf16.mxu1 %v15145_v22 }
0x130a   : > { %11077 = vmatpush1.bf16.msra.mxu1 %v15143_v12  ;;  %v15167_v12 = vld [vmem:[#allocation20 + $0x858] ss:$12 sps:$4 sm:$0xff]  }
0x130b   : > { %11078 = vmatprep.subr.bf16.mxu1 %v15148_v24 }
0x130d   : > { %11044 = vmatmul.mubr.bf16.gmra.mrb[156].mxu1 %v18647_v61  ;;  %v15155_v61 = vld [vmem:[#allocation20 + $0x7f8] ss:$12 sps:$4 sm:$0xff]  }
0x130e   : > { %11053 = vmatprep.mubr.bf16.mxu1 %v18669_v28  ;;  %11079 = vmatpush1.bf16.msra.mxu1 %v15146_v1  ;;  %v15172_v1 = vld [vmem:[#allocation20 + $0x874] ss:$12 sps:$4 sm:$0xff]  }
0x130f   : > { %11080 = vmatprep.subr.bf16.mxu1 %v15151_v20 }
0x1312   : > { %11081 = vmatpush1.bf16.msra.mxu1 %v15149_v21 }
0x1313   : > { %11082 = vmatprep.subr.bf16.mxu1 %v15154_v57  ;;  %v15175_v57 = vld [vmem:[#allocation20 + $0x88c] ss:$12 sps:$4 sm:$0xff]  }
0x1314   : > { %v13015_v52 = vpop.f32.mrb[216].mxu0 }
0x1315   : > { %11054 = vmatmul.mubr.bf16.gmra.mrb[160].mxu1 %v18665_v46  ;;  %v13016_v60 = vpop.f32.mrb[217].mxu0  ;;  %v15163_v46 = vld [vmem:[#allocation20 + $0x82c] ss:$12 sps:$4 sm:$0xff]  }
0x1316   : > { %11063 = vmatprep.mubr.bf16.mxu1 %v18687_v4  ;;  %11083 = vmatpush1.bf16.msra.mxu1 %v15152_v45  ;;  %v13017_v30 = vadd.f32 %v13016_v60, %v13015_v52  ;;  %v13018_v58 = vpop.f32.mrb[218].mxu0 }
0x1317   : > { %11084 = vmatprep.subr.bf16.mxu1 %v15157_v9  ;;  %v13019_v28 = vpop.f32.mrb[219].mxu0 }
0x1318   : > { %v18770_v2 = vadd.f32 %v13017_v30, %v18733_v14  ;;  %v13020_v5 = vadd.f32 %v13019_v28, %v13018_v58  ;;  %v15173_v30 = vld [vmem:[#allocation20 + $0x888] ss:$12 sps:$4 sm:$0xff]  }
0x131a   : > { %v18773_v41 = vadd.f32 %v13020_v5, %v18736_v44  ;;  %11085 = vmatpush1.bf16.msra.mxu1 %v15155_v61  ;;  %v15178_v61 = vld [vmem:[#allocation20 + $0x8a4] ss:$12 sps:$4 sm:$0xff]   ;;  %v15181_v5 = vld [vmem:[#allocation20 + $0x8bc] ss:$12 sps:$4 sm:$0xff]  }
0x131b   : > { %11086 = vmatprep.subr.bf16.mxu1 %v15160_v43 }
0x131c   : > { %v13021_v15 = vpop.f32.mrb[220].mxu0 }
0x131d   : > { %11064 = vmatmul.mubr.bf16.gmra.mrb[164].mxu1 %v18683_v55  ;;  %v13022_v4 = vpop.f32.mrb[221].mxu0  ;;  %v15169_v55 = vld [vmem:[#allocation20 + $0x85c] ss:$12 sps:$4 sm:$0xff]  }
0x131e   : > { %11087 = vmatpush1.bf16.msra.mxu1 %v15158_v48  ;;  %11106 = vmatprep.mubr.bf16.mxu1 %v18635_v51  ;;  %v13023_v53 = vadd.f32 %v13022_v4, %v13021_v15  ;;  %v13024_v13 = vpop.f32.mrb[222].mxu0  ;;  %v15179_v15 = vld [vmem:[#allocation20 + $0x8b8] ss:$12 sps:$4 sm:$0xff]  }
0x131f   : > { %11088 = vmatprep.subr.bf16.mxu1 %v15163_v46  ;;  %v13025_v14 = vpop.f32.mrb[223].mxu0 }
0x1320   : > { %v18778_v44 = vadd.f32 %v13023_v53, %v18743_v62  ;;  %v13026_v25 = vadd.f32 %v13025_v14, %v13024_v13  ;;  %v15184_v13 = vld [vmem:[#allocation20 + $0x8d4] ss:$12 sps:$4 sm:$0xff]  }
0x1322   : > { %v18781_v34 = vadd.f32 %v13026_v25, %v18745_v56  ;;  %11089 = vmatpush1.bf16.msra.mxu1 %v15161_v26  ;;  %v15170_v56 = vld [vmem:[#allocation20 + $0x870] ss:$12 sps:$4 sm:$0xff]   ;;  %v15187_v25 = vld [vmem:[#allocation20 + $0x8ec] ss:$12 sps:$4 sm:$0xff]  }
0x1323   : > { %11090 = vmatprep.subr.bf16.mxu1 %v15166_v38 }
0x1324   : > { %v13027_v59 = vpop.f32.mrb[224].mxu0 }
0x1325   : > { %v13028_v39 = vpop.f32.mrb[225].mxu0 }
0x1326   : > { %11091 = vmatpush1.bf16.msra.mxu1 %v15164_v50  ;;  %v13029_v51 = vadd.f32 %v13028_v39, %v13027_v59  ;;  %v13030_v22 = vpop.f32.mrb[226].mxu0  ;;  %v15185_v59 = vld [vmem:[#allocation20 + $0x8e8] ss:$12 sps:$4 sm:$0xff]  }
0x1327   : > { %11092 = vmatprep.subr.bf16.mxu1 %v15169_v55  ;;  %v13031_v24 = vpop.f32.mrb[227].mxu0 }
0x1328   : > { %v11328_v62 = vadd.f32 %v13029_v51, %v18751_v19  ;;  %v13032_v20 = vadd.f32 %v13031_v24, %v13030_v22 }
0x132a   : > { %v11331_v21 = vadd.f32 %v13032_v20, %v18753_v8  ;;  %11093 = vmatpush1.bf16.msra.mxu1 %v15167_v12  ;;  %v15176_v8 = vld [vmem:[#allocation20 + $0x8a0] ss:$12 sps:$4 sm:$0xff]  }
0x132b   : > { %11094 = vmatprep.subr.bf16.mxu1 %v15172_v1 }
0x132c   : > { %v13033_v45 = vpop.f32.mrb[228].mxu0 }
0x132d   : > { %v13034_v9 = vpop.f32.mrb[229].mxu0 }
0x132e   : > { %11095 = vmatpush1.bf16.msra.mxu1 %v15170_v56  ;;  %v13035_v52 = vadd.f32 %v13034_v9, %v13033_v45  ;;  %v13036_v60 = vpop.f32.mrb[230].mxu0 }
0x132f   : > { %11096 = vmatprep.subr.bf16.mxu1 %v15175_v57  ;;  %v13037_v58 = vpop.f32.mrb[231].mxu0 }
0x1330   : > { %v11336_v28 = vadd.f32 %v13035_v52, %v18759_v33  ;;  %v13038_v43 = vadd.f32 %v13037_v58, %v13036_v60  ;;  %v15182_v33 = vld [vmem:[#allocation20 + $0x8d0] ss:$12 sps:$4 sm:$0xff]  }
0x1332   : > { %v11339_v19 = vadd.f32 %v13038_v43, %v18761_v42  ;;  %11097 = vmatpush1.bf16.msra.mxu1 %v15173_v30 }
0x1333   : > { %11098 = vmatprep.subr.bf16.mxu1 %v15178_v61 }
0x1335   : > { %v13055_v48 = vpop.f32.mrb[232].mxu0 }
0x1336   : > { %11099 = vmatpush1.bf16.msra.mxu1 %v15176_v8  ;;  %v13056_v46 = vpop.f32.mrb[233].mxu0 }
0x1337   : > { %v13057_v4 = vadd.f32 %v13056_v46, %v13055_v48  ;;  %v13058_v53 = vpop.f32.mrb[234].mxu0  ;;  %11100 = vmatprep.subr.bf16.mxu1 %v15181_v5 }
0x1338   : > { %v13059_v26 = vpop.f32.mrb[235].mxu0 }
0x1339   : > { %v11377_v14 = vadd.f32 %v13057_v4, %v18770_v2  ;;  %v13060_v38 = vadd.f32 %v13059_v26, %v13058_v53 }
0x133a   : > { %11101 = vmatpush1.bf16.msra.mxu1 %v15179_v15 }
0x133b   : > { %v11380_v42 = vadd.f32 %v13060_v38, %v18773_v41  ;;  %11102 = vmatprep.subr.bf16.mxu1 %v15184_v13 }
0x133d   : > { %v13061_v50 = vpop.f32.mrb[236].mxu0 }
0x133e   : > { %11103 = vmatpush1.bf16.msra.mxu1 %v15182_v33  ;;  %v13062_v55 = vpop.f32.mrb[237].mxu0 }
0x133f   : > { %v13063_v39 = vadd.f32 %v13062_v55, %v13061_v50  ;;  %v13064_v51 = vpop.f32.mrb[238].mxu0  ;;  %11104 = vmatprep.subr.bf16.mxu1 %v15187_v25 }
0x1340   : > { %v13065_v22 = vpop.f32.mrb[239].mxu0 }
0x1341   : > { %v11385_v12 = vadd.f32 %v13063_v39, %v18778_v44  ;;  %v13066_v24 = vadd.f32 %v13065_v22, %v13064_v51 }
0x1342   : > { %11105 = vmatpush1.bf16.msra.mxu1 %v15185_v59 }
0x1343   : > { %v11388_v2 = vadd.f32 %v13066_v24, %v18781_v34 }
0x1345   : > { %11107 = vmatmul.mubr.bf16.vlgmr.msra.gmra.mrb[152].mxu1 %v18631_v40  ;;  %v13067_v1 = vpop.f32.mrb[240].mxu0 }
0x1346   : > { %11116 = vmatprep.mubr.bf16.mxu1 %v18653_v37  ;;  %v13068_v41 = vpop.f32.mrb[241].mxu0 }
0x1347   : > { %v13069_v20 = vadd.f32 %v13068_v41, %v13067_v1  ;;  %v13070_v56 = vpop.f32.mrb[242].mxu0 }
0x1348   : > { %v13071_v57 = vpop.f32.mrb[243].mxu0 }
0x1349   : > { %v11393_v45 = vadd.f32 %v13069_v20, %v11328_v62  ;;  %v13072_v9 = vadd.f32 %v13071_v57, %v13070_v56 }
0x134b   : > { %v11396_v52 = vadd.f32 %v13072_v9, %v11331_v21 }
0x134d   : > { %11117 = vmatmul.mubr.bf16.gmra.mrb[156].mxu1 %v18649_v31  ;;  %v13073_v60 = vpop.f32.mrb[244].mxu0 }
0x134e   : > { %11126 = vmatprep.mubr.bf16.mxu1 %v18671_v6  ;;  %v13074_v44 = vpop.f32.mrb[245].mxu0 }
0x134f   : > { %v13075_v30 = vadd.f32 %v13074_v44, %v13073_v60  ;;  %v13076_v34 = vpop.f32.mrb[246].mxu0 }
0x1350   : > { %v13077_v58 = vpop.f32.mrb[247].mxu0 }
0x1351   : > { %v11401_v40 = vadd.f32 %v13075_v30, %v11336_v28  ;;  %v13078_v61 = vadd.f32 %v13077_v58, %v13076_v34 }
0x1353   : > { %v11404_v43 = vadd.f32 %v13078_v61, %v11339_v19 }
0x1355   : > { %11127 = vmatmul.mubr.bf16.gmra.mrb[160].mxu1 %v18667_v23 }
0x1356   : > { %11136 = vmatprep.mubr.bf16.mxu1 %v18689_v16 }
0x135d   : > { %11137 = vmatmul.mubr.bf16.gmra.mrb[164].mxu1 %v18685_v49 }
0x1375   : > { %v13095_v37 = vpop.f32.mrb[248].mxu0 }
0x1376   : > { %v13096_v62 = vpop.f32.mrb[249].mxu0 }
0x1377   : > { %v13097_v21 = vadd.f32 %v13096_v62, %v13095_v37  ;;  %v13098_v31 = vpop.f32.mrb[250].mxu0 }
0x1378   : > { %v13099_v8 = vpop.f32.mrb[251].mxu0 }
0x1379   : > { %v11442_v5 = vadd.f32 %v13097_v21, %v11377_v14  ;;  %v13100_v6 = vadd.f32 %v13099_v8, %v13098_v31 }
0x137b   : > { %v11445_v48 = vadd.f32 %v13100_v6, %v11380_v42 }
0x137d   : > { %v13101_v46 = vpop.f32.mrb[252].mxu0 }
0x137e   : > { %v13102_v15 = vpop.f32.mrb[253].mxu0 }
0x137f   : > { %v13103_v4 = vadd.f32 %v13102_v15, %v13101_v46  ;;  %v13104_v28 = vpop.f32.mrb[254].mxu0 }
0x1380   : > { %v13105_v53 = vpop.f32.mrb[255].mxu0 }
0x1381   : > { %v11450_v19 = vadd.f32 %v13103_v4, %v11385_v12  ;;  %v13106_v13 = vadd.f32 %v13105_v53, %v13104_v28 }
0x1383   : > { %v11453_v23 = vadd.f32 %v13106_v13, %v11388_v2 }
0x1385   : > { %v13107_v26 = vpop.f32.mrb[0].mxu0 }
0x1386   : > { %v13108_v16 = vpop.f32.mrb[1].mxu0 }
0x1387   : > { %v13109_v38 = vadd.f32 %v13108_v16, %v13107_v26  ;;  %v13110_v49 = vpop.f32.mrb[2].mxu0 }
0x1388   : > { %v13111_v33 = vpop.f32.mrb[3].mxu0 }
0x1389   : > { %v11458_v25 = vadd.f32 %v13109_v38, %v11393_v45  ;;  %v13112_v50 = vadd.f32 %v13111_v33, %v13110_v49  ;;  %v9165_v38 = vrot.slane %v18717_v11, %v19075_v47 }
0x138b   : > { %v11461_v55 = vadd.f32 %v13112_v50, %v11396_v52 }
0x138d   : > { %v13113_v59 = vpop.f32.mrb[4].mxu0 }
0x138e   : > { %v13114_v14 = vpop.f32.mrb[5].mxu0 }
0x138f   : > { %v13115_v42 = vadd.f32 %v13114_v14, %v13113_v59  ;;  %v13116_v39 = vpop.f32.mrb[6].mxu0 }
0x1390   : > { %v13117_v51 = vpop.f32.mrb[7].mxu0 }
0x1391   : > { %v11466_v22 = vadd.f32 %v13115_v42, %v11401_v40  ;;  %v13118_v24 = vadd.f32 %v13117_v51, %v13116_v39 }
0x1393   : > { %v11469_v1 = vadd.f32 %v13118_v24, %v11404_v43  ;;  %v19090_v24 = vld [vmem:[#allocation55_spill] sm:$0xff] }
0x1395   : > { %v13135_v12 = vpop.f32.mrb[8].mxu0 }
0x1396   : > { %v13136_v41 = vpop.f32.mrb[9].mxu0 }
0x1397   : > { %v13137_v2 = vadd.f32 %v13136_v41, %v13135_v12  ;;  %v13138_v20 = vpop.f32.mrb[10].mxu0  ;;  %v19091_v41 = vld [vmem:[#allocation38_spill] sm:$0xff] }
0x1398   : > { %v13139_v56 = vpop.f32.mrb[11].mxu0 }
0x1399   : > { %v11507_v57 = vadd.f32 %v13137_v2, %v11442_v5  ;;  %v13140_v9 = vadd.f32 %v13139_v56, %v13138_v20  ;;  %v19092_v20 = vld [vmem:[#allocation56_spill] sm:$0xff]  ;;  %v19093_v56 = vld [vmem:[#allocation37_spill] sm:$0xff] }
0x139b   : > { %v11539_v45 = vadd.f32 %v11507_v57, %v17908_v54  ;;  %v11510_v60 = vadd.f32 %v13140_v9, %v11445_v48 }
0x139d   : > { %11563 = vst [vmem:[%s18801_s5 + $0x10] sm:$0xff] %v11539_v45  ;;  %v11542_v52 = vadd.f32 %v11510_v60, %v17921_v7  ;;  %v13141_v44 = vpop.f32.mrb[12].mxu0 }
0x139e   : > { %v13142_v30 = vpop.f32.mrb[13].mxu0 }
0x139f   : > { %11566 = vst [vmem:[%s18801_s5 + $0x28] sm:$0xff] %v11542_v52  ;;  %v13143_v34 = vadd.f32 %v13142_v30, %v13141_v44  ;;  %v13144_v58 = vpop.f32.mrb[14].mxu0  ;;  %v19094_v30 = vld [vmem:[#allocation49_spill] sm:$0xff] }
0x13a0   : > { %v13145_v40 = vpop.f32.mrb[15].mxu0 }
0x13a1   : > { %v11515_v61 = vadd.f32 %v13143_v34, %v11450_v19  ;;  %v13146_v54 = vadd.f32 %v13145_v40, %v13144_v58 }
0x13a3   : > { %v11545_v43 = vadd.f32 %v11515_v61, %v17929_v10  ;;  %v11518_v37 = vadd.f32 %v13146_v54, %v11453_v23  ;;  %v19095_v61 = vld [vmem:[#allocation54_spill] sm:$0xff] }
0x13a5   : > { %11569 = vst [vmem:[%s18801_s5 + $0x40] sm:$0xff] %v11545_v43  ;;  %v11548_v62 = vadd.f32 %v11518_v37, %v17949_v18  ;;  %v13147_v21 = vpop.f32.mrb[16].mxu0  ;;  %v19096_v37 = vld [vmem:[#allocation69_spill] sm:$0xff] }
0x13a6   : > { %v13148_v31 = vpop.f32.mrb[17].mxu0 }
0x13a7   : > { %11572 = vst [vmem:[%s18801_s5 + $0x58] sm:$0xff] %v11548_v62  ;;  %v13149_v7 = vadd.f32 %v13148_v31, %v13147_v21  ;;  %v13150_v8 = vpop.f32.mrb[18].mxu0  ;;  %v19097_v21 = vld [vmem:[#allocation53_spill] sm:$0xff] }
0x13a8   : > { %v13151_v5 = vpop.f32.mrb[19].mxu0 }
0x13a9   : > { %v11523_v6 = vadd.f32 %v13149_v7, %v11458_v25  ;;  %v13152_v48 = vadd.f32 %v13151_v5, %v13150_v8 }
0x13ab   : > { %v11551_v46 = vadd.f32 %v11523_v6, %v17967_v35  ;;  %v11526_v15 = vadd.f32 %v13152_v48, %v11461_v55 }
0x13ad   : > { %11575 = vst [vmem:[%s18801_s5 + $0x70] sm:$0xff] %v11551_v46  ;;  %v11554_v10 = vadd.f32 %v11526_v15, %v17975_v17  ;;  %v13153_v4 = vpop.f32.mrb[20].mxu0  ;;  %v9161_v17 = vrot.slane %v18717_v11, %v19074_v32  ;;  %v19098_v46 = vld [vmem:[#allocation60_spill] sm:$0xff] }
0x13ae   : > { %v13154_v28 = vpop.f32.mrb[21].mxu0 }
0x13af   : > { %11578 = vst [vmem:[%s18801_s5 + $0x88] sm:$0xff] %v11554_v10  ;;  %v13155_v18 = vadd.f32 %v13154_v28, %v13153_v4  ;;  %v13156_v53 = vpop.f32.mrb[22].mxu0  ;;  %v19099_v28 = vld [vmem:[#allocation42_spill] sm:$0xff] }
0x13b0   : > { %v13157_v19 = vpop.f32.mrb[23].mxu0 }
0x13b1   : > { %v11531_v13 = vadd.f32 %v13155_v18, %v11466_v22  ;;  %v13158_v23 = vadd.f32 %v13157_v19, %v13156_v53  ;;  %v19100_v19 = vld [vmem:[#allocation59_spill] sm:$0xff] }
0x13b3   : > { %v11557_v26 = vadd.f32 %v11531_v13, %v17997_v27  ;;  %v11534_v16 = vadd.f32 %v13158_v23, %v11469_v1  ;;  %v19102_v23 = vld [vmem:[#allocation41_spill] sm:$0xff] }
0x13b5   : > { %11581 = vst [vmem:[%s18801_s5 + $0xa0] sm:$0xff] %v11557_v26  ;;  %v11560_v35 = vadd.f32 %v11534_v16, %v18005_v0 }
0x13b7   : > { %11584 = vst [vmem:[%s18801_s5 + $0xb8] sm:$0xff] %v11560_v35 }
0x1418   : > { %v11108_v49 = vpop.f32.mrb[152].mxu1 }
0x1419   : > { %v13511_v33 = vadd.f32 %v11108_v49, %v9161_v17  ;;  %v11110_v25 = vpop.f32.mrb[153].mxu1 }
0x141a   : > { %v13512_v50 = vadd.f32 %v11110_v25, %v9165_v38  ;;  %v11112_v27 = vpop.f32.mrb[154].mxu1 }
0x141b   : > { %v11537_v55 = vadd.f32 %v13511_v33, %v17888_v29  ;;  %v13513_v59 = vadd.f32 %v11112_v27, %v9161_v17  ;;  %v11114_v14 = vpop.f32.mrb[155].mxu1 }
0x141c   : > { %v11538_v0 = vadd.f32 %v13512_v50, %v17891_v63  ;;  %v13514_v42 = vadd.f32 %v11114_v14, %v9165_v38 }
0x141d   : > { %11561 = vst [vmem:[%s18801_s5] sm:$0xff] %v11537_v55  ;;  %v11540_v32 = vadd.f32 %v13513_v59, %v17898_v3 }
0x141e   : > { %11562 = vst [vmem:[%s18801_s5 + $0x8] sm:$0xff] %v11538_v0  ;;  %v11541_v47 = vadd.f32 %v13514_v42, %v17901_v36 }
0x141f   : > { %11564 = vst [vmem:[%s18801_s5 + $0x18] sm:$0xff] %v11540_v32 }
0x1420   : > { %11565 = vst [vmem:[%s18801_s5 + $0x20] sm:$0xff] %v11541_v47  ;;  %v11118_v11 = vpop.f32.mrb[156].mxu1 }
0x1421   : > { %v13515_v39 = vadd.f32 %v11118_v11, %v9161_v17  ;;  %v11120_v29 = vpop.f32.mrb[157].mxu1 }
0x1422   : > { %v13516_v51 = vadd.f32 %v11120_v29, %v9165_v38  ;;  %v11122_v22 = vpop.f32.mrb[158].mxu1 }
0x1423   : > { %v11543_v63 = vadd.f32 %v13515_v39, %v19090_v24  ;;  %v13517_v1 = vadd.f32 %v11122_v22, %v9161_v17  ;;  %v11124_v12 = vpop.f32.mrb[159].mxu1 }
0x1424   : > { %v11544_v2 = vadd.f32 %v13516_v51, %v19091_v41  ;;  %v13518_v3 = vadd.f32 %v11124_v12, %v9165_v38 }
0x1425   : > { %11567 = vst [vmem:[%s18801_s5 + $0x30] sm:$0xff] %v11543_v63  ;;  %v11546_v36 = vadd.f32 %v13517_v1, %v19092_v20 }
0x1426   : > { %11568 = vst [vmem:[%s18801_s5 + $0x38] sm:$0xff] %v11544_v2  ;;  %v11547_v57 = vadd.f32 %v13518_v3, %v19093_v56 }
0x1427   : > { %11570 = vst [vmem:[%s18801_s5 + $0x48] sm:$0xff] %v11546_v36 }
0x1428   : > { %11571 = vst [vmem:[%s18801_s5 + $0x50] sm:$0xff] %v11547_v57  ;;  %v11128_v9 = vpop.f32.mrb[160].mxu1 }
0x1429   : > { %v13519_v45 = vadd.f32 %v11128_v9, %v9161_v17  ;;  %v11130_v60 = vpop.f32.mrb[161].mxu1 }
0x142a   : > { %v13520_v52 = vadd.f32 %v11130_v60, %v9165_v38  ;;  %v11132_v44 = vpop.f32.mrb[162].mxu1 }
0x142b   : > { %v11549_v34 = vadd.f32 %v13519_v45, %v19094_v30  ;;  %v13521_v58 = vadd.f32 %v11132_v44, %v9161_v17  ;;  %v11134_v40 = vpop.f32.mrb[163].mxu1 }
0x142c   : > { %v11550_v54 = vadd.f32 %v13520_v52, %v19095_v61  ;;  %v13522_v43 = vadd.f32 %v11134_v40, %v9165_v38 }
0x142d   : > { %11573 = vst [vmem:[%s18801_s5 + $0x60] sm:$0xff] %v11549_v34  ;;  %v11552_v62 = vadd.f32 %v13521_v58, %v19096_v37 }
0x142e   : > { %11574 = vst [vmem:[%s18801_s5 + $0x68] sm:$0xff] %v11550_v54  ;;  %v11553_v31 = vadd.f32 %v13522_v43, %v19097_v21 }
0x142f   : > { %11576 = vst [vmem:[%s18801_s5 + $0x78] sm:$0xff] %v11552_v62 }
0x1430   : > { %11577 = vst [vmem:[%s18801_s5 + $0x80] sm:$0xff] %v11553_v31  ;;  %v11138_v7 = vpop.f32.mrb[164].mxu1 }
0x1431   : > { %v13523_v8 = vadd.f32 %v11138_v7, %v9161_v17  ;;  %v11140_v5 = vpop.f32.mrb[165].mxu1 }
0x1432   : > { %v13524_v6 = vadd.f32 %v11140_v5, %v9165_v38  ;;  %v11142_v48 = vpop.f32.mrb[166].mxu1 }
0x1433   : > { %v11555_v15 = vadd.f32 %v13523_v8, %v19098_v46  ;;  %v13525_v10 = vadd.f32 %v11142_v48, %v9161_v17  ;;  %v11144_v4 = vpop.f32.mrb[167].mxu1 }
0x1434   : > { %v11556_v18 = vadd.f32 %v13524_v6, %v19099_v28  ;;  %v13526_v53 = vadd.f32 %v11144_v4, %v9165_v38 }
0x1435   : > { %11579 = vst [vmem:[%s18801_s5 + $0x90] sm:$0xff] %v11555_v15  ;;  %v11558_v13 = vadd.f32 %v13525_v10, %v19100_v19 }
0x1436   : > { %11580 = vst [vmem:[%s18801_s5 + $0x98] sm:$0xff] %v11556_v18  ;;  %v11559_v26 = vadd.f32 %v13526_v53, %v19102_v23 }
0x1437   : > { %11582 = vst [vmem:[%s18801_s5 + $0xa8] sm:$0xff] %v11558_v13 }
0x1438   : > { %11583 = vst [vmem:[%s18801_s5 + $0xb0] sm:$0xff] %v11559_v26 }
0x1439   : > { %15805 = shalt.err (!%p15802_p9)
}
0x143a   : > { %s15806_s14 = scalar_lea.hbm %s18855_s27, 3072  ;;  %s15810_s19 = scalar_lea.hbm %s19101_s26, 6144 }
0x143b   : > { %p15807_p7 = scmp.ne.s32.totalorder %s18855_s27, %s15806_s14  ;;  %p15811_p13 = scmp.lt.u32.totalorder %s18855_s27, %s19101_s26 }
0x143c   : > { %p15812_p1 = scmp.lt.u32.totalorder %s15810_s19, %s15806_s14  ;;  %p15814_p2 = scmp.lt.u32.totalorder %s15806_s14, %s18855_s27 }
0x143d   : > { %p15808_p10 = pnand %p15807_p7, %p19103_p8 }
0x143e   : > { %p15813_p3 = por %p15812_p1, %p15811_p13 }
0x143f   : > { %p15809_p4 = pneg %p15808_p10 }
0x1440   : > { %p15815_p6 = por %p15814_p2, %p15813_p3 }
0x1442   : > { %p15816_p11 = pnand %p15815_p6, %p15809_p4 }
0x1444   : > { %15819 = shalt.err (!%p15816_p11)
}
0x1445   : > { %s15907_s16 = smov 384   ;;  %s15908_s30 = smov 24  }
0x1446   : > { %13841 = dma.vmem_to_hbm [thread:$0]  (%p19103_p8), %s18859_s29, 3072, %s18855_s27, %s11586_s25, %s15907_s16, %s15907_s16, %s15908_s30  }
0x1447 PF: > { %s11614_s15 = sand.u32 1, %s15870_s21   ;;  %p19104_p12 = scmp.ne.s32.totalorder %s18969_s2, 0 }
0x1448   : > { %p19105_p0 = scmp.ge.s32.totalorder %s15882_s24, 2  ;;  %s11615_s18 = scalar_lea.sflag [#allocation5], %s11614_s15 }
0x144a   : > { %p13882_p5 = pnand %p19105_p0, %p19104_p12 }
0x144c   : > { %15865 = dma.done.wait (!%p13882_p5), %s11615_s18, 3072  }
0x144d   : > { %15867 = vsyncadd (!%p13882_p5), %s11615_s18, 4294964224  ;;  %p31_p9 = scmp.ge.s32.totalorder %s16248_s13, 4   ;;  %s19106_s21 = smov %s15874_s22 }
0x144e   : > { %s19107_s22 = smov %s15878_s23  ;;  %s19108_s23 = smov %s16260_s20 }
0x144f   : > { %s19109_s24 = smov %s16248_s13  ;;  %33 = sbr.rel (!%p31_p9) target bundleno = 17 (0x11), region = 157 }
0x1456   :  { %11620 = vsyncpa [#allocation4], 1 }
0x1457   :  { %11622 = vsyncpa [#allocation4 + $0x1], 1 }
0x1458   :  { %11623 = vsyncpa [#allocation7], 1 }
0x1459   :  { %11624 = vsyncpa [#allocation10], 1 }
0x145a   :  { %11625 = vsyncpa [#allocation13], 1 }
0x145b   :  { %11626 = vsyncpa [#allocation16], 1 }
0x145c   :  { %11627 = vsyncpa [#allocation19], 1 }
0x145d   :  { %11628 = vsyncpa [#allocation22], 1 }
0x145e   :  { %11629 = vsyncpa [#allocation5], 1 }
0x145f   :  { %11631 = vsyncpa [#allocation5 + $0x1], 1 }

</bundles_post_ra>
